<compile_context>
chip_gen: v7x
topology: tpu7x:2x2x1
jax: 0.10.0
libtpu: 0.0.40
codegen_flags: <defaults>
</compile_context>

<pallas_src>
import jax
import jax.numpy as jnp
import numpy as np
from jax import lax
from jax.experimental import pallas as pl
from jax.experimental.pallas import tpu as pltpu

EPS = 1e-5
LANE = 128  # pad output channels to this => lane-dense vregs & unmasked stores


def _bn_relu(z, g, be):
    """Training-mode BatchNorm (biased batch stats over N,H,W) + ReLU, fused."""
    m = jnp.mean(z, axis=0, keepdims=True)
    m = jnp.mean(m, axis=1, keepdims=True)
    m = jnp.mean(m, axis=2, keepdims=True)          # (1,1,1,C)
    d = z - m
    v = jnp.mean(d * d, axis=0, keepdims=True)
    v = jnp.mean(v, axis=1, keepdims=True)
    v = jnp.mean(v, axis=2, keepdims=True)          # biased variance
    scale = g * lax.rsqrt(v + EPS)                  # rsqrt sits on the EUP slot
    shift = be - m * scale
    return jnp.maximum(z * scale + shift, 0.0)


def _downblock_kernel(xcols_ref, w1_ref, g1_ref, be1_ref,
                      w2_ref, g2_ref, be2_ref,
                      y_ref, pool_ref, hmax_ref):
    n, ho2, wo2, cpad = y_ref.shape
    ho1, wo1 = ho2 + 2, wo2 + 2
    wo1p = xcols_ref.shape[0] // (n * ho1)          # sublane-padded conv1 width

    # ---- Conv1: one MXU matmul over the wrapper-built im2col LHS ----------
    # (M1, K1) x (K1, Cpad) -> (M1, Cpad), bf16 operands, f32 accumulation.
    z1 = jnp.dot(xcols_ref[...], w1_ref[...],
                 preferred_element_type=jnp.float32)
    # Aligned split (wo1p % 8 == 0), then drop the zero-padded width columns
    # so they do not pollute the BatchNorm statistics.
    z1 = z1.reshape(n, ho1, wo1p, cpad)[:, :, :wo1, :]
    y1 = _bn_relu(z1, g1_ref[...], be1_ref[...])    # (n, ho1, wo1, cpad)

    # ---- Conv2: in-kernel im2col (K = 9*Cpad) -> one MXU matmul -----------
    taps = [y1[:, dy:dy + ho2, dx:dx + wo2, :]
            for dy in range(3) for dx in range(3)]
    patches = jnp.concatenate(taps, axis=-1)        # lane-aligned concat (128-multiples)
    lhs = patches.reshape(n * ho2 * wo2, 9 * cpad)  # aligned flatten (wo2 % 8 == 0)
    lhs = lhs.astype(jnp.bfloat16)                  # single cast for this conv
    z2 = jnp.dot(lhs, w2_ref[...], preferred_element_type=jnp.float32)
    y2 = _bn_relu(z2.reshape(n, ho2, wo2, cpad), g2_ref[...], be2_ref[...])

    # Bulk, lane-dense store of the pre-pool activation.
    y_ref[...] = y2.astype(y_ref.dtype)

    # ---- 2x2 / stride-2 max pool ------------------------------------------
    hp, wp = ho2 // 2, wo2 // 2
    # (1) pool along H: split a leading dim (layout no-op), one bulk store.
    y2r = y2.reshape(n, hp, 2, wo2, cpad)
    hmax_ref[...] = jnp.maximum(y2r[:, :, 0], y2r[:, :, 1])
    # (2) pool along W: stride-2 sublane reads + one bulk unmasked store.
    left = hmax_ref[:, :, pl.ds(0, wp, stride=2), :]
    right = hmax_ref[:, :, pl.ds(1, wp, stride=2), :]
    pool_ref[...] = jnp.maximum(left, right).astype(pool_ref.dtype)


def downblock_forward(x_nchw, params):
    """x_nchw: (N, Cin, H, W) float32. Returns (y, pooled) in NCHW."""
    w1, b1, g1, be1, w2, b2, g2, be2 = params
    # b1/b2 are intentionally unused: BN's mean subtraction cancels a
    # per-channel pre-BN constant exactly (verified against the reference).
    del b1, b2

    x = jnp.transpose(x_nchw, (0, 2, 3, 1)).astype(jnp.float32)   # NHWC
    n, h, w, cin = x.shape
    cout = w1.shape[-1]
    cpad = -(-cout // LANE) * LANE
    ho1, wo1 = h - 2, w - 2
    ho2, wo2 = h - 4, w - 4
    hp, wp = ho2 // 2, wo2 // 2
    assert ho2 % 2 == 0 and wo2 % 2 == 0, "max-pool needs an even conv2 output"
    # The in-kernel im2col flatten for conv2 relies on a sublane-aligned width.
    # TODO(synk): support arbitrary widths (in-kernel sublane padding or a row
    # grid) for general UNet input sizes.
    assert wo2 % 8 == 0, "demo wrapper requires (W - 4) to be a multiple of 8"

    wo1p = -(-wo1 // 8) * 8                 # conv1 width padded to sublane multiple
    k1 = 9 * cin
    k1p = -(-k1 // LANE) * LANE             # conv1 K padded to a lane-dense 128

    # conv1 im2col LHS (wrapper-side layout plumbing on the smallest tensor).
    taps = [x[:, dy:dy + ho1, dx:dx + wo1, :]
            for dy in range(3) for dx in range(3)]
    xcols = jnp.concatenate(taps, axis=-1)                          # (n,ho1,wo1,9*cin)
    xcols = jnp.pad(xcols, ((0, 0), (0, 0), (0, wo1p - wo1), (0, k1p - k1)))
    xcols = xcols.reshape(n * ho1 * wo1p, k1p).astype(jnp.bfloat16)  # (M1, K1p)

    # Weights as 2-D (K, Cpad) bf16 matrices, tap-major K, zero-padded.
    w1k = jnp.pad(w1.reshape(k1, cout),
                  ((0, k1p - k1), (0, cpad - cout))).astype(jnp.bfloat16)
    w2k = jnp.pad(w2, ((0, 0), (0, 0), (0, cpad - w2.shape[2]), (0, 0)))
    w2k = jnp.pad(w2k.reshape(9 * cpad, cout),
                  ((0, 0), (0, cpad - cout))).astype(jnp.bfloat16)   # (9*cpad, cpad)

    def vec(a):
        # ZERO-pad gamma/beta: zero gamma => scale==0 on padded channels.
        return jnp.pad(a.reshape(1, -1).astype(jnp.float32),
                       ((0, 0), (0, cpad - a.shape[0])))

    vmem = pl.BlockSpec(memory_space=pltpu.MemorySpace.VMEM)
    y_p, pool_p = pl.pallas_call(
        _downblock_kernel,
        out_shape=(jax.ShapeDtypeStruct((n, ho2, wo2, cpad), jnp.float32),
                   jax.ShapeDtypeStruct((n, hp, wp, cpad), jnp.float32)),
        in_specs=[vmem] * 7,
        out_specs=(vmem, vmem),
        scratch_shapes=[pltpu.VMEM((n, hp, wo2, cpad), jnp.float32)],
        # 32 MiB scoped VMEM is safe on every generation (v7x has 64 MiB
        # physical); plenty for these whole-tensor-resident demo shapes.
        compiler_params=pltpu.CompilerParams(vmem_limit_bytes=32 * 1024 * 1024),
    )(xcols, w1k, vec(g1), vec(be1), w2k, vec(g2), vec(be2))

    # Strip channel padding, back to NCHW to match PyTorch's convention.
    # (Outputs kept f32 to match the nn.Module; emit bf16 here if the consumer
    # allows to halve HBM writeback.)
    y = jnp.transpose(y_p[..., :cout], (0, 3, 1, 2))
    pool = jnp.transpose(pool_p[..., :cout], (0, 3, 1, 2))
    return y, pool


def downblock_reference(x_nchw, params):
    """Pure-JAX f32 reference (XLA conv / reduce_window) for validation."""
    w1, b1, g1, be1, w2, b2, g2, be2 = params
    x = jnp.transpose(x_nchw, (0, 2, 3, 1)).astype(jnp.float32)

    def conv(z, wt, b):
        return jax.lax.conv_general_dilated(
            z, wt, (1, 1), 'VALID',
            dimension_numbers=('NHWC', 'HWIO', 'NHWC')) + b

    def bn_relu(z, g, be):
        m = jnp.mean(z, axis=(0, 1, 2), keepdims=True)
        v = jnp.mean((z - m) ** 2, axis=(0, 1, 2), keepdims=True)
        return jnp.maximum((z - m) / jnp.sqrt(v + EPS) * g + be, 0.0)

    y = bn_relu(conv(x, w1, b1), g1, be1)
    y = bn_relu(conv(y, w2, b2), g2, be2)
    p = jax.lax.reduce_window(y, -jnp.inf, jax.lax.max,
                              (1, 2, 2, 1), (1, 2, 2, 1), 'VALID')
    return jnp.transpose(y, (0, 3, 1, 2)), jnp.transpose(p, (0, 3, 1, 2))


if __name__ == "__main__":
    # W - 4 must be a multiple of 8 for the in-kernel aligned im2col flatten.
    N, CIN, COUT, H, W = 2, 4, 8, 20, 20

    key = jax.random.PRNGKey(0)
    kx, k1, k2, k3, k4, k5, k6, k7, k8 = jax.random.split(key, 9)

    x_nchw = jax.random.normal(kx, (N, CIN, H, W), jnp.float32)

    # Deterministic synthetic parameters (weights stored HWIO for NHWC conv).
    w1 = jax.random.normal(k1, (3, 3, CIN, COUT), jnp.float32) * 0.3
    b1 = jax.random.normal(k2, (COUT,), jnp.float32) * 0.1
    g1 = 1.0 + 0.1 * jax.random.normal(k3, (COUT,), jnp.float32)
    be1 = 0.1 * jax.random.normal(k4, (COUT,), jnp.float32)
    w2 = jax.random.normal(k5, (3, 3, COUT, COUT), jnp.float32) * 0.2
    b2 = jax.random.normal(k6, (COUT,), jnp.float32) * 0.1
    g2 = 1.0 + 0.1 * jax.random.normal(k7, (COUT,), jnp.float32)
    be2 = 0.1 * jax.random.normal(k8, (COUT,), jnp.float32)

    params = (w1, b1, g1, be1, w2, b2, g2, be2)

    y, pooled = downblock_forward(x_nchw, params)
    jax.block_until_ready((y, pooled))

    y_ref, p_ref = downblock_reference(x_nchw, params)
    jax.block_until_ready((y_ref, p_ref))

    assert y.shape == (N, COUT, H - 4, W - 4)
    assert pooled.shape == (N, COUT, (H - 4) // 2, (W - 4) // 2)
    # bf16 matmul operands with f32 accumulation => compare with bf16-level slack
    np.testing.assert_allclose(np.asarray(y), np.asarray(y_ref),
                               rtol=2e-2, atol=2e-2)
    np.testing.assert_allclose(np.asarray(pooled), np.asarray(p_ref),
                               rtol=2e-2, atol=2e-2)

    print("KERNEL_OK")
</pallas_src>

<mosaic_0001>
module attributes {stable_mosaic.version = 11 : i64} {
  func.func @_downblock_kernel(%arg0: memref<864x128xbf16, #tpu.memory_space<vmem>>, %arg1: memref<128x128xbf16, #tpu.memory_space<vmem>>, %arg2: memref<1x128xf32, #tpu.memory_space<vmem>>, %arg3: memref<1x128xf32, #tpu.memory_space<vmem>>, %arg4: memref<1152x128xbf16, #tpu.memory_space<vmem>>, %arg5: memref<1x128xf32, #tpu.memory_space<vmem>>, %arg6: memref<1x128xf32, #tpu.memory_space<vmem>>, %arg7: memref<2x16x16x128xf32, #tpu.memory_space<vmem>>, %arg8: memref<2x8x8x128xf32, #tpu.memory_space<vmem>>, %arg9: memref<2x8x16x128xf32, #tpu.memory_space<vmem>>) attributes {dimension_semantics = [], scalar_prefetch = 0 : i64, scratch_operands = 1 : i64, tpu.core_type = #tpu.core_type<tc>} {
    %c0 = arith.constant 0 : index
    %c0_0 = arith.constant 0 : index
    %0 = vector.load %arg0[%c0, %c0_0] : memref<864x128xbf16, #tpu.memory_space<vmem>>, vector<864x128xbf16>
    %c0_1 = arith.constant 0 : index
    %c0_2 = arith.constant 0 : index
    %1 = vector.load %arg1[%c0_1, %c0_2] : memref<128x128xbf16, #tpu.memory_space<vmem>>, vector<128x128xbf16>
    %cst = arith.constant dense<0.000000e+00> : vector<864x128xf32>
    %2 = tpu.matmul %0, %1, %cst {dimension_numbers = #tpu.dot_dimension_numbers<[1], [0], [0], [1], [0, 0, 1, 1], [], []>} : vector<864x128xbf16>, vector<128x128xbf16>, vector<864x128xf32> -> vector<864x128xf32>
    %3 = vector.shape_cast %2 : vector<864x128xf32> to vector<2x18x24x128xf32>
    %4 = vector.extract_strided_slice %3 {offsets = [0, 0, 0, 0], sizes = [2, 18, 18, 128], strides = [1, 1, 1, 1]} : vector<2x18x24x128xf32> to vector<2x18x18x128xf32>
    %c0_3 = arith.constant 0 : index
    %c0_4 = arith.constant 0 : index
    %5 = vector.load %arg2[%c0_3, %c0_4] : memref<1x128xf32, #tpu.memory_space<vmem>>, vector<1x128xf32>
    %c0_5 = arith.constant 0 : index
    %c0_6 = arith.constant 0 : index
    %6 = vector.load %arg3[%c0_5, %c0_6] : memref<1x128xf32, #tpu.memory_space<vmem>>, vector<1x128xf32>
    %cst_7 = arith.constant dense<0.000000e+00> : vector<18x18x128xf32>
    %7 = vector.multi_reduction <add>, %4, %cst_7 [0] : vector<2x18x18x128xf32> to vector<18x18x128xf32>
    %8 = vector.shape_cast %7 : vector<18x18x128xf32> to vector<1x18x18x128xf32>
    %cst_8 = arith.constant 2.000000e+00 : f32
    %9 = vector.broadcast %cst_8 : f32 to vector<1x18x18x128xf32>
    %10 = arith.divf %8, %9 : vector<1x18x18x128xf32>
    %cst_9 = arith.constant dense<0.000000e+00> : vector<1x18x128xf32>
    %11 = vector.multi_reduction <add>, %10, %cst_9 [1] : vector<1x18x18x128xf32> to vector<1x18x128xf32>
    %12 = vector.shape_cast %11 : vector<1x18x128xf32> to vector<1x1x18x128xf32>
    %cst_10 = arith.constant 1.800000e+01 : f32
    %13 = vector.broadcast %cst_10 : f32 to vector<1x1x18x128xf32>
    %14 = arith.divf %12, %13 : vector<1x1x18x128xf32>
    %cst_11 = arith.constant dense<0.000000e+00> : vector<1x1x128xf32>
    %15 = vector.multi_reduction <add>, %14, %cst_11 [2] : vector<1x1x18x128xf32> to vector<1x1x128xf32>
    %16 = vector.shape_cast %15 : vector<1x1x128xf32> to vector<1x1x1x128xf32>
    %cst_12 = arith.constant 1.800000e+01 : f32
    %17 = vector.broadcast %cst_12 : f32 to vector<1x1x1x128xf32>
    %18 = arith.divf %16, %17 : vector<1x1x1x128xf32>
    %19 = vector.broadcast %18 : vector<1x1x1x128xf32> to vector<2x18x18x128xf32>
    %20 = arith.subf %4, %19 : vector<2x18x18x128xf32>
    %21 = arith.mulf %20, %20 : vector<2x18x18x128xf32>
    %cst_13 = arith.constant dense<0.000000e+00> : vector<18x18x128xf32>
    %22 = vector.multi_reduction <add>, %21, %cst_13 [0] : vector<2x18x18x128xf32> to vector<18x18x128xf32>
    %23 = vector.shape_cast %22 : vector<18x18x128xf32> to vector<1x18x18x128xf32>
    %cst_14 = arith.constant 2.000000e+00 : f32
    %24 = vector.broadcast %cst_14 : f32 to vector<1x18x18x128xf32>
    %25 = arith.divf %23, %24 : vector<1x18x18x128xf32>
    %cst_15 = arith.constant dense<0.000000e+00> : vector<1x18x128xf32>
    %26 = vector.multi_reduction <add>, %25, %cst_15 [1] : vector<1x18x18x128xf32> to vector<1x18x128xf32>
    %27 = vector.shape_cast %26 : vector<1x18x128xf32> to vector<1x1x18x128xf32>
    %cst_16 = arith.constant 1.800000e+01 : f32
    %28 = vector.broadcast %cst_16 : f32 to vector<1x1x18x128xf32>
    %29 = arith.divf %27, %28 : vector<1x1x18x128xf32>
    %cst_17 = arith.constant dense<0.000000e+00> : vector<1x1x128xf32>
    %30 = vector.multi_reduction <add>, %29, %cst_17 [2] : vector<1x1x18x128xf32> to vector<1x1x128xf32>
    %31 = vector.shape_cast %30 : vector<1x1x128xf32> to vector<1x1x1x128xf32>
    %cst_18 = arith.constant 1.800000e+01 : f32
    %32 = vector.broadcast %cst_18 : f32 to vector<1x1x1x128xf32>
    %33 = arith.divf %31, %32 : vector<1x1x1x128xf32>
    %cst_19 = arith.constant 9.99999974E-6 : f32
    %34 = vector.broadcast %cst_19 : f32 to vector<1x1x1x128xf32>
    %35 = arith.addf %33, %34 : vector<1x1x1x128xf32>
    %36 = math.rsqrt %35 : vector<1x1x1x128xf32>
    %37 = vector.shape_cast %5 : vector<1x128xf32> to vector<1x1x1x128xf32>
    %38 = arith.mulf %37, %36 : vector<1x1x1x128xf32>
    %39 = arith.mulf %18, %38 : vector<1x1x1x128xf32>
    %40 = vector.shape_cast %6 : vector<1x128xf32> to vector<1x1x1x128xf32>
    %41 = arith.subf %40, %39 : vector<1x1x1x128xf32>
    %42 = vector.broadcast %38 : vector<1x1x1x128xf32> to vector<2x18x18x128xf32>
    %43 = arith.mulf %4, %42 : vector<2x18x18x128xf32>
    %44 = vector.broadcast %41 : vector<1x1x1x128xf32> to vector<2x18x18x128xf32>
    %45 = arith.addf %43, %44 : vector<2x18x18x128xf32>
    %cst_20 = arith.constant 0.000000e+00 : f32
    %46 = vector.broadcast %cst_20 : f32 to vector<2x18x18x128xf32>
    %47 = arith.maximumf %45, %46 : vector<2x18x18x128xf32>
    %48 = vector.extract_strided_slice %47 {offsets = [0, 0, 0, 0], sizes = [2, 16, 16, 128], strides = [1, 1, 1, 1]} : vector<2x18x18x128xf32> to vector<2x16x16x128xf32>
    %49 = vector.extract_strided_slice %47 {offsets = [0, 0, 1, 0], sizes = [2, 16, 16, 128], strides = [1, 1, 1, 1]} : vector<2x18x18x128xf32> to vector<2x16x16x128xf32>
    %50 = vector.extract_strided_slice %47 {offsets = [0, 0, 2, 0], sizes = [2, 16, 16, 128], strides = [1, 1, 1, 1]} : vector<2x18x18x128xf32> to vector<2x16x16x128xf32>
    %51 = vector.extract_strided_slice %47 {offsets = [0, 1, 0, 0], sizes = [2, 16, 16, 128], strides = [1, 1, 1, 1]} : vector<2x18x18x128xf32> to vector<2x16x16x128xf32>
    %52 = vector.extract_strided_slice %47 {offsets = [0, 1, 1, 0], sizes = [2, 16, 16, 128], strides = [1, 1, 1, 1]} : vector<2x18x18x128xf32> to vector<2x16x16x128xf32>
    %53 = vector.extract_strided_slice %47 {offsets = [0, 1, 2, 0], sizes = [2, 16, 16, 128], strides = [1, 1, 1, 1]} : vector<2x18x18x128xf32> to vector<2x16x16x128xf32>
    %54 = vector.extract_strided_slice %47 {offsets = [0, 2, 0, 0], sizes = [2, 16, 16, 128], strides = [1, 1, 1, 1]} : vector<2x18x18x128xf32> to vector<2x16x16x128xf32>
    %55 = vector.extract_strided_slice %47 {offsets = [0, 2, 1, 0], sizes = [2, 16, 16, 128], strides = [1, 1, 1, 1]} : vector<2x18x18x128xf32> to vector<2x16x16x128xf32>
    %56 = vector.extract_strided_slice %47 {offsets = [0, 2, 2, 0], sizes = [2, 16, 16, 128], strides = [1, 1, 1, 1]} : vector<2x18x18x128xf32> to vector<2x16x16x128xf32>
    %57 = tpu.concatenate %48, %49, %50, %51, %52, %53, %54, %55, %56 in 3 : vector<2x16x16x128xf32>, vector<2x16x16x128xf32>, vector<2x16x16x128xf32>, vector<2x16x16x128xf32>, vector<2x16x16x128xf32>, vector<2x16x16x128xf32>, vector<2x16x16x128xf32>, vector<2x16x16x128xf32>, vector<2x16x16x128xf32> -> vector<2x16x16x1152xf32>
    %58 = vector.shape_cast %57 : vector<2x16x16x1152xf32> to vector<512x1152xf32>
    %59 = arith.truncf %58 : vector<512x1152xf32> to vector<512x1152xbf16>
    %c0_21 = arith.constant 0 : index
    %c0_22 = arith.constant 0 : index
    %60 = vector.load %arg4[%c0_21, %c0_22] : memref<1152x128xbf16, #tpu.memory_space<vmem>>, vector<1152x128xbf16>
    %cst_23 = arith.constant dense<0.000000e+00> : vector<512x128xf32>
    %61 = tpu.matmul %59, %60, %cst_23 {dimension_numbers = #tpu.dot_dimension_numbers<[1], [0], [0], [1], [0, 0, 1, 1], [], []>} : vector<512x1152xbf16>, vector<1152x128xbf16>, vector<512x128xf32> -> vector<512x128xf32>
    %62 = vector.shape_cast %61 : vector<512x128xf32> to vector<2x16x16x128xf32>
    %c0_24 = arith.constant 0 : index
    %c0_25 = arith.constant 0 : index
    %63 = vector.load %arg5[%c0_24, %c0_25] : memref<1x128xf32, #tpu.memory_space<vmem>>, vector<1x128xf32>
    %c0_26 = arith.constant 0 : index
    %c0_27 = arith.constant 0 : index
    %64 = vector.load %arg6[%c0_26, %c0_27] : memref<1x128xf32, #tpu.memory_space<vmem>>, vector<1x128xf32>
    %cst_28 = arith.constant dense<0.000000e+00> : vector<16x16x128xf32>
    %65 = vector.multi_reduction <add>, %62, %cst_28 [0] : vector<2x16x16x128xf32> to vector<16x16x128xf32>
    %66 = vector.shape_cast %65 : vector<16x16x128xf32> to vector<1x16x16x128xf32>
    %cst_29 = arith.constant 2.000000e+00 : f32
    %67 = vector.broadcast %cst_29 : f32 to vector<1x16x16x128xf32>
    %68 = arith.divf %66, %67 : vector<1x16x16x128xf32>
    %cst_30 = arith.constant dense<0.000000e+00> : vector<1x16x128xf32>
    %69 = vector.multi_reduction <add>, %68, %cst_30 [1] : vector<1x16x16x128xf32> to vector<1x16x128xf32>
    %70 = vector.shape_cast %69 : vector<1x16x128xf32> to vector<1x1x16x128xf32>
    %cst_31 = arith.constant 1.600000e+01 : f32
    %71 = vector.broadcast %cst_31 : f32 to vector<1x1x16x128xf32>
    %72 = arith.divf %70, %71 : vector<1x1x16x128xf32>
    %cst_32 = arith.constant dense<0.000000e+00> : vector<1x1x128xf32>
    %73 = vector.multi_reduction <add>, %72, %cst_32 [2] : vector<1x1x16x128xf32> to vector<1x1x128xf32>
    %74 = vector.shape_cast %73 : vector<1x1x128xf32> to vector<1x1x1x128xf32>
    %cst_33 = arith.constant 1.600000e+01 : f32
    %75 = vector.broadcast %cst_33 : f32 to vector<1x1x1x128xf32>
    %76 = arith.divf %74, %75 : vector<1x1x1x128xf32>
    %77 = vector.broadcast %76 : vector<1x1x1x128xf32> to vector<2x16x16x128xf32>
    %78 = arith.subf %62, %77 : vector<2x16x16x128xf32>
    %79 = arith.mulf %78, %78 : vector<2x16x16x128xf32>
    %cst_34 = arith.constant dense<0.000000e+00> : vector<16x16x128xf32>
    %80 = vector.multi_reduction <add>, %79, %cst_34 [0] : vector<2x16x16x128xf32> to vector<16x16x128xf32>
    %81 = vector.shape_cast %80 : vector<16x16x128xf32> to vector<1x16x16x128xf32>
    %cst_35 = arith.constant 2.000000e+00 : f32
    %82 = vector.broadcast %cst_35 : f32 to vector<1x16x16x128xf32>
    %83 = arith.divf %81, %82 : vector<1x16x16x128xf32>
    %cst_36 = arith.constant dense<0.000000e+00> : vector<1x16x128xf32>
    %84 = vector.multi_reduction <add>, %83, %cst_36 [1] : vector<1x16x16x128xf32> to vector<1x16x128xf32>
    %85 = vector.shape_cast %84 : vector<1x16x128xf32> to vector<1x1x16x128xf32>
    %cst_37 = arith.constant 1.600000e+01 : f32
    %86 = vector.broadcast %cst_37 : f32 to vector<1x1x16x128xf32>
    %87 = arith.divf %85, %86 : vector<1x1x16x128xf32>
    %cst_38 = arith.constant dense<0.000000e+00> : vector<1x1x128xf32>
    %88 = vector.multi_reduction <add>, %87, %cst_38 [2] : vector<1x1x16x128xf32> to vector<1x1x128xf32>
    %89 = vector.shape_cast %88 : vector<1x1x128xf32> to vector<1x1x1x128xf32>
    %cst_39 = arith.constant 1.600000e+01 : f32
    %90 = vector.broadcast %cst_39 : f32 to vector<1x1x1x128xf32>
    %91 = arith.divf %89, %90 : vector<1x1x1x128xf32>
    %cst_40 = arith.constant 9.99999974E-6 : f32
    %92 = vector.broadcast %cst_40 : f32 to vector<1x1x1x128xf32>
    %93 = arith.addf %91, %92 : vector<1x1x1x128xf32>
    %94 = math.rsqrt %93 : vector<1x1x1x128xf32>
    %95 = vector.shape_cast %63 : vector<1x128xf32> to vector<1x1x1x128xf32>
    %96 = arith.mulf %95, %94 : vector<1x1x1x128xf32>
    %97 = arith.mulf %76, %96 : vector<1x1x1x128xf32>
    %98 = vector.shape_cast %64 : vector<1x128xf32> to vector<1x1x1x128xf32>
    %99 = arith.subf %98, %97 : vector<1x1x1x128xf32>
    %100 = vector.broadcast %96 : vector<1x1x1x128xf32> to vector<2x16x16x128xf32>
    %101 = arith.mulf %62, %100 : vector<2x16x16x128xf32>
    %102 = vector.broadcast %99 : vector<1x1x1x128xf32> to vector<2x16x16x128xf32>
    %103 = arith.addf %101, %102 : vector<2x16x16x128xf32>
    %cst_41 = arith.constant 0.000000e+00 : f32
    %104 = vector.broadcast %cst_41 : f32 to vector<2x16x16x128xf32>
    %105 = arith.maximumf %103, %104 : vector<2x16x16x128xf32>
    %c0_42 = arith.constant 0 : index
    %c0_43 = arith.constant 0 : index
    %c0_44 = arith.constant 0 : index
    %c0_45 = arith.constant 0 : index
    %106 = vector.load %arg7[%c0_42, %c0_43, %c0_44, %c0_45] : memref<2x16x16x128xf32, #tpu.memory_space<vmem>>, vector<2x16x16x128xf32>
    tpu.vector_store %arg7[%c0_42, %c0_43, %c0_44, %c0_45], %105 {strides = array<i32>} : memref<2x16x16x128xf32, #tpu.memory_space<vmem>>, vector<2x16x16x128xf32>,
    %107 = vector.shape_cast %105 : vector<2x16x16x128xf32> to vector<2x8x2x16x128xf32>
    %108 = vector.extract_strided_slice %107 {offsets = [0, 0, 0, 0, 0], sizes = [2, 8, 1, 16, 128], strides = [1, 1, 1, 1, 1]} : vector<2x8x2x16x128xf32> to vector<2x8x1x16x128xf32>
    %109 = vector.shape_cast %108 : vector<2x8x1x16x128xf32> to vector<2x8x16x128xf32>
    %110 = vector.extract_strided_slice %107 {offsets = [0, 0, 1, 0, 0], sizes = [2, 8, 1, 16, 128], strides = [1, 1, 1, 1, 1]} : vector<2x8x2x16x128xf32> to vector<2x8x1x16x128xf32>
    %111 = vector.shape_cast %110 : vector<2x8x1x16x128xf32> to vector<2x8x16x128xf32>
    %112 = arith.maximumf %109, %111 : vector<2x8x16x128xf32>
    %c0_46 = arith.constant 0 : index
    %c0_47 = arith.constant 0 : index
    %c0_48 = arith.constant 0 : index
    %c0_49 = arith.constant 0 : index
    %113 = vector.load %arg9[%c0_46, %c0_47, %c0_48, %c0_49] : memref<2x8x16x128xf32, #tpu.memory_space<vmem>>, vector<2x8x16x128xf32>
    tpu.vector_store %arg9[%c0_46, %c0_47, %c0_48, %c0_49], %112 {strides = array<i32>} : memref<2x8x16x128xf32, #tpu.memory_space<vmem>>, vector<2x8x16x128xf32>,
    %c0_50 = arith.constant 0 : index
    %c0_51 = arith.constant 0 : index
    %c0_52 = arith.constant 0 : index
    %c0_53 = arith.constant 0 : index
    %114 = tpu.strided_load %arg9[%c0_50, %c0_51, %c0_52, %c0_53] {strides = array<i32: 1, 1, 2, 1>} : memref<2x8x16x128xf32, #tpu.memory_space<vmem>>, vector<2x8x8x128xf32>
    %c0_54 = arith.constant 0 : index
    %c0_55 = arith.constant 0 : index
    %c1 = arith.constant 1 : index
    %c0_56 = arith.constant 0 : index
    %115 = tpu.strided_load %arg9[%c0_54, %c0_55, %c1, %c0_56] {strides = array<i32: 1, 1, 2, 1>} : memref<2x8x16x128xf32, #tpu.memory_space<vmem>>, vector<2x8x8x128xf32>
    %116 = arith.maximumf %114, %115 : vector<2x8x8x128xf32>
    %c0_57 = arith.constant 0 : index
    %c0_58 = arith.constant 0 : index
    %c0_59 = arith.constant 0 : index
    %c0_60 = arith.constant 0 : index
    %117 = vector.load %arg8[%c0_57, %c0_58, %c0_59, %c0_60] : memref<2x8x8x128xf32, #tpu.memory_space<vmem>>, vector<2x8x8x128xf32>
    tpu.vector_store %arg8[%c0_57, %c0_58, %c0_59, %c0_60], %116 {strides = array<i32>} : memref<2x8x8x128xf32, #tpu.memory_space<vmem>>, vector<2x8x8x128xf32>,
    return
  }
}

</mosaic_0001>

<bundles_post_ra>
// kernel: tpu_custom_call.1
= control target key start
LH: loop header
LB: loop body
LE: loop exit
PB: predicated region body
PF: predicated region fallthrough
CT: control target
= control target key end

     0   :  { %14 = vsyncpa [#allocation4], 0  ;;  %s12379_s0 = inlined_call_operand.hbm [shape: bf16[864,128], index: 0, kind: input, shape index: {}]   ;;  %s12380_s1 = inlined_call_operand.hbm [shape: bf16[128,128], index: 1, kind: input, shape index: {}]   ;;  %s12381_s2 = inlined_call_operand.vmem [shape: f32[1,128], index: 2, kind: input, shape index: {}]   ;;  %s12382_s3 = inlined_call_operand.vmem [shape: f32[1,128], index: 3, kind: input, shape index: {}]   ;;  %s12383_s4 = inlined_call_operand.hbm [shape: bf16[1152,128], index: 4, kind: input, shape index: {}]   ;;  %s12384_s5 = inlined_call_operand.vmem [shape: f32[1,128], index: 5, kind: input, shape index: {}]   ;;  %s12385_s6 = inlined_call_operand.vmem [shape: f32[1,128], index: 6, kind: input, shape index: {}]   ;;  %s12386_s7 = inlined_call_operand.hbm [shape: f32[2,16,16,128], index: 7, kind: output, shape index: {0}]   ;;  %s12387_s8 = inlined_call_operand.hbm [shape: f32[2,8,8,128], index: 8, kind: output, shape index: {1}]  }
   0x1   :  { %15 = vsyncpa [#allocation7], 0 }
   0x2   :  { %16 = vsyncpa [#allocation5], 0 }
   0x3   :  { %17 = vsyncpa [#allocation11], 0  ;;  %s6669_s27 = smov [#allocation6]   ;;  %s6670_s29 = smov [#allocation3]  }
   0x4   :  { %s35_s28 = sshll.u32 %s6669_s27, 4  ;;  %s23_s30 = sshll.u32 %s6670_s29, 4  ;;  %s36_s28 = int_to_ptr.vmem [resolvable:$true] %s35_s28  ;;  %s6724_s30 = int_to_ptr.vmem [resolvable:$true] %s23_s30 }
   0x5   :  { %s6551_s11 = scalar_lea.hbm %s12380_s1, 1024 }
   0x6   :  { %p6552_p0 = scmp.ne.s32.totalorder %s12380_s1, %s6551_s11  ;;  %p6555_p1 = scmp.lt.u32.totalorder %s6551_s11, %s12380_s1 }
   0x8   :  { %p6557_p2 = pnand %p6555_p1, %p6552_p0 }
   0xa   :  { %6560 = shalt.err (!%p6557_p2)
}
   0xb   :  { %s6561_s16 = scalar_lea.vmem %s36_s28, 1024  ;;  %p6566_p4 = scmp.lt.s32.totalorder %s36_s28, %s36_s28 }
   0xc   :  { %p6562_p3 = scmp.ne.s32.totalorder %s36_s28, %s6561_s16  ;;  %p6567_p5 = scmp.lt.s32.totalorder %s6561_s16, %s6561_s16 }
   0xe   :  { %p6568_p6 = por %p6567_p5, %p6566_p4 }
  0x10   :  { %p6569_p7 = pnand %p6568_p6, %p6562_p3 }
  0x12   :  { %6572 = shalt.err (!%p6569_p7)
}
  0x13   :  { %s6671_s17 = smov 64   ;;  %s6672_s18 = smov 4  }
  0x14   :  { %41 = dma.hbm_to_vmem [thread:$0]  %s12380_s1, 1024, %s36_s28, [#allocation7], %s6671_s17, %s6671_s17, %s6672_s18  }
  0x15   :  { %s6573_s23 = scalar_lea.hbm %s12379_s0, 6912 }
  0x16   :  { %p6574_p8 = scmp.ne.s32.totalorder %s12379_s0, %s6573_s23  ;;  %p6577_p9 = scmp.lt.u32.totalorder %s6573_s23, %s12379_s0 }
  0x18   :  { %p6579_p10 = pnand %p6577_p9, %p6574_p8 }
  0x1a   :  { %6582 = shalt.err (!%p6579_p10)
}
  0x1b   :  { %s6583_s29 = scalar_lea.vmem %s6724_s30, 6912  ;;  %p6588_p12 = scmp.lt.s32.totalorder %s6724_s30, %s6724_s30 }
  0x1c   :  { %p6584_p11 = scmp.ne.s32.totalorder %s6724_s30, %s6583_s29  ;;  %p6589_p13 = scmp.lt.s32.totalorder %s6583_s29, %s6583_s29 }
  0x1e   :  { %p6590_p0 = por %p6589_p13, %p6588_p12 }
  0x20   :  { %p6591_p1 = pnand %p6590_p0, %p6584_p11 }
  0x22   :  { %6594 = shalt.err (!%p6591_p1)
}
  0x23   :  { %29 = dma.hbm_to_vmem [thread:$0]  %s12379_s0, 6912, %s6724_s30, [#allocation4], %s6671_s17, %s6671_s17, %s6672_s18  }
  0x24   :  { %s6673_s9 = smov [#allocation8]   ;;  %s6595_s13 = scalar_lea.hbm %s12383_s4, 9216 }
  0x25   :  { %s51_s10 = sshll.u32 %s6673_s9, 4  ;;  %p6596_p2 = scmp.ne.s32.totalorder %s12383_s4, %s6595_s13  ;;  %s52_s10 = int_to_ptr.vmem [resolvable:$true] %s51_s10 }
  0x26   :  { %p6599_p3 = scmp.lt.u32.totalorder %s6595_s13, %s12383_s4 }
  0x28   :  { %p6601_p4 = pnand %p6599_p3, %p6596_p2 }
  0x2a   :  { %6604 = shalt.err (!%p6601_p4)
}
  0x2b   :  { %s6605_s20 = scalar_lea.vmem %s52_s10, 9216  ;;  %p6610_p6 = scmp.lt.s32.totalorder %s52_s10, %s52_s10 }
  0x2c   :  { %p6606_p5 = scmp.ne.s32.totalorder %s52_s10, %s6605_s20  ;;  %p6611_p7 = scmp.lt.s32.totalorder %s6605_s20, %s6605_s20 }
  0x2e   :  { %p6612_p8 = por %p6611_p7, %p6610_p6 }
  0x30   :  { %p6613_p9 = pnand %p6612_p8, %p6606_p5 }
  0x32   :  { %6616 = shalt.err (!%p6613_p9)
}
  0x33   :  { %57 = dma.hbm_to_vmem [thread:$0]  %s12383_s4, 9216, %s52_s10, [#allocation7], %s6671_s17, %s6671_s17, %s6672_s18  }
  0x34   :  { %6661 = dma.done.wait [#allocation4], 6912  }
  0x35   :  { %6662 = vsyncadd [#allocation4], 4294960384 }
  0x36   :  { %6663 = dma.done.wait [#allocation7], 10240  }
  0x37   :  { %6664 = vsyncadd [#allocation7], 4294957056  ;;  %v6397_v0 = vld [vmem:[#allocation6] sm:$0xff]   ;;  %v6398_v1 = vld [vmem:[#allocation6 + $0x8] sm:$0xff]   ;;  %vm1037_vm0 = vcmask 1041408   ;;  %vm2143_vm1 = vcmask 1046528  }
  0x38   :  { %5831 = vmatprep.subr.bf16.mxu0 %v6397_v0  ;;  %v6399_v2 = vld [vmem:[#allocation6 + $0x10] sm:$0xff]   ;;  %v6400_v3 = vld [vmem:[#allocation6 + $0x18] sm:$0xff]   ;;  %v6401_v5 = vld [vmem:[#allocation6 + $0x20] sm:$0xff]   ;;  %vm2368_vm2 = vcmask 1045504  }
  0x39   :  { %5832 = vmatpush3.bf16.msra.mxu0 %v6397_v0  ;;  %v6405_v4 = vld [vmem:[#allocation3] sm:$0xff]   ;;  %v6402_v6 = vld [vmem:[#allocation6 + $0x28] sm:$0xff]   ;;  %v6404_v8 = vld [vmem:[#allocation6 + $0x38] sm:$0xff]  }
  0x3a   :  { %5833 = vmatprep.subr.bf16.mxu0 %v6398_v1  ;;  %5847 = vmatprep.mubr.bf16.mxu0 %v6405_v4  ;;  %v6403_v7 = vld [vmem:[#allocation6 + $0x30] sm:$0xff]   ;;  %v6406_v9 = vld [vmem:[#allocation3 + $0x8] sm:$0xff]   ;;  %v6407_v10 = vld [vmem:[#allocation3 + $0x10] sm:$0xff]  }
  0x3b   :  { %v6408_v11 = vld [vmem:[#allocation3 + $0x18] sm:$0xff]   ;;  %v6409_v12 = vld [vmem:[#allocation3 + $0x20] sm:$0xff]   ;;  %v6410_v13 = vld [vmem:[#allocation3 + $0x28] sm:$0xff]  }
  0x3c   :  { %v6411_v14 = vld [vmem:[#allocation3 + $0x30] sm:$0xff]   ;;  %v6412_v15 = vld [vmem:[#allocation3 + $0x38] sm:$0xff]   ;;  %v6413_v16 = vld [vmem:[#allocation3 + $0x40] sm:$0xff]  }
  0x3d   :  { %5834 = vmatpush3.bf16.msra.mxu0 %v6398_v1  ;;  %v6414_v17 = vld [vmem:[#allocation3 + $0x48] sm:$0xff]   ;;  %v6415_v18 = vld [vmem:[#allocation3 + $0x50] sm:$0xff]   ;;  %v6416_v19 = vld [vmem:[#allocation3 + $0x58] sm:$0xff]  }
  0x3e   :  { %5835 = vmatprep.subr.bf16.mxu0 %v6399_v2  ;;  %v6417_v20 = vld [vmem:[#allocation3 + $0x60] sm:$0xff]   ;;  %v6418_v21 = vld [vmem:[#allocation3 + $0x68] sm:$0xff]   ;;  %v6419_v22 = vld [vmem:[#allocation3 + $0x70] sm:$0xff]  }
  0x3f   :  { %v6420_v23 = vld [vmem:[#allocation3 + $0x78] sm:$0xff]   ;;  %v6421_v24 = vld [vmem:[#allocation3 + $0x80] sm:$0xff]   ;;  %v6422_v25 = vld [vmem:[#allocation3 + $0x88] sm:$0xff]  }
  0x40   :  { %v6423_v26 = vld [vmem:[#allocation3 + $0x90] sm:$0xff]   ;;  %v6424_v27 = vld [vmem:[#allocation3 + $0x98] sm:$0xff]   ;;  %v6425_v28 = vld [vmem:[#allocation3 + $0xa0] sm:$0xff]  }
  0x41   :  { %5836 = vmatpush3.bf16.msra.mxu0 %v6399_v2  ;;  %v6426_v29 = vld [vmem:[#allocation3 + $0xa8] sm:$0xff]   ;;  %v6427_v30 = vld [vmem:[#allocation3 + $0xb0] sm:$0xff]   ;;  %v6428_v31 = vld [vmem:[#allocation3 + $0xb8] sm:$0xff]  }
  0x42   :  { %5837 = vmatprep.subr.bf16.mxu0 %v6400_v3  ;;  %v6429_v32 = vld [vmem:[#allocation3 + $0xc0] sm:$0xff]   ;;  %v6430_v33 = vld [vmem:[#allocation3 + $0xc8] sm:$0xff]   ;;  %v6431_v34 = vld [vmem:[#allocation3 + $0xd0] sm:$0xff]  }
  0x43   :  { %v6432_v35 = vld [vmem:[#allocation3 + $0xd8] sm:$0xff]   ;;  %v6433_v36 = vld [vmem:[#allocation3 + $0xe0] sm:$0xff]   ;;  %v6434_v37 = vld [vmem:[#allocation3 + $0xe8] sm:$0xff]  }
  0x44   :  { %v6435_v38 = vld [vmem:[#allocation3 + $0xf0] sm:$0xff]   ;;  %v6436_v39 = vld [vmem:[#allocation3 + $0xf8] sm:$0xff]   ;;  %v6437_v40 = vld [vmem:[#allocation3 + $0x100] sm:$0xff]  }
  0x45   :  { %5838 = vmatpush3.bf16.msra.mxu0 %v6400_v3  ;;  %v6438_v41 = vld [vmem:[#allocation3 + $0x108] sm:$0xff]   ;;  %v6439_v42 = vld [vmem:[#allocation3 + $0x110] sm:$0xff]   ;;  %v6440_v43 = vld [vmem:[#allocation3 + $0x118] sm:$0xff]  }
  0x46   :  { %5839 = vmatprep.subr.bf16.mxu0 %v6401_v5  ;;  %v6441_v44 = vld [vmem:[#allocation3 + $0x120] sm:$0xff]   ;;  %v6442_v45 = vld [vmem:[#allocation3 + $0x128] sm:$0xff]   ;;  %v6443_v46 = vld [vmem:[#allocation3 + $0x130] sm:$0xff]  }
  0x47   :  { %v6444_v47 = vld [vmem:[#allocation3 + $0x138] sm:$0xff]   ;;  %v6445_v48 = vld [vmem:[#allocation3 + $0x140] sm:$0xff]   ;;  %v6446_v49 = vld [vmem:[#allocation3 + $0x148] sm:$0xff]  }
  0x48   :  { %v6447_v50 = vld [vmem:[#allocation3 + $0x150] sm:$0xff]   ;;  %v6448_v51 = vld [vmem:[#allocation3 + $0x158] sm:$0xff]   ;;  %v6449_v52 = vld [vmem:[#allocation3 + $0x160] sm:$0xff]  }
  0x49   :  { %5840 = vmatpush3.bf16.msra.mxu0 %v6401_v5  ;;  %v6450_v53 = vld [vmem:[#allocation3 + $0x168] sm:$0xff]   ;;  %v6451_v54 = vld [vmem:[#allocation3 + $0x170] sm:$0xff]   ;;  %v6452_v55 = vld [vmem:[#allocation3 + $0x178] sm:$0xff]  }
  0x4a   :  { %5841 = vmatprep.subr.bf16.mxu0 %v6402_v6  ;;  %v6453_v56 = vld [vmem:[#allocation3 + $0x180] sm:$0xff]   ;;  %v6454_v57 = vld [vmem:[#allocation3 + $0x188] sm:$0xff]   ;;  %v6455_v58 = vld [vmem:[#allocation3 + $0x190] sm:$0xff]  }
  0x4b   :  { %v6456_v59 = vld [vmem:[#allocation3 + $0x198] sm:$0xff]   ;;  %v6457_v60 = vld [vmem:[#allocation3 + $0x1a0] sm:$0xff]   ;;  %v6458_v61 = vld [vmem:[#allocation3 + $0x1a8] sm:$0xff]  }
  0x4d   :  { %5842 = vmatpush3.bf16.msra.mxu0 %v6402_v6 }
  0x4e   :  { %5843 = vmatprep.subr.bf16.mxu0 %v6403_v7 }
  0x51   :  { %5844 = vmatpush3.bf16.msra.mxu0 %v6403_v7 }
  0x52   :  { %5845 = vmatprep.subr.bf16.mxu0 %v6404_v8 }
  0x55   :  { %5846 = vmatpush3.bf16.msra.mxu0 %v6404_v8 }
  0x58   :  { %5848 = vmatmul.mubr.bf16.vlgmr.msra.gmra.mrb[0].mxu0 %v6406_v9 }
  0x59   :  { %5851 = vmatprep.mubr.bf16.mxu0 %v6407_v10 }
  0x60   :  { %5852 = vmatmul.mubr.bf16.gmra.mrb[4].mxu0 %v6408_v11 }
  0x61   :  { %5855 = vmatprep.mubr.bf16.mxu0 %v6409_v12 }
  0x68   :  { %5856 = vmatmul.mubr.bf16.gmra.mrb[8].mxu0 %v6410_v13 }
  0x69   :  { %5859 = vmatprep.mubr.bf16.mxu0 %v6411_v14 }
  0x70   :  { %5860 = vmatmul.mubr.bf16.gmra.mrb[12].mxu0 %v6412_v15 }
  0x71   :  { %5863 = vmatprep.mubr.bf16.mxu0 %v6413_v16 }
  0x78   :  { %5864 = vmatmul.mubr.bf16.gmra.mrb[16].mxu0 %v6414_v17 }
  0x79   :  { %5867 = vmatprep.mubr.bf16.mxu0 %v6415_v18 }
  0x80   :  { %5868 = vmatmul.mubr.bf16.gmra.mrb[20].mxu0 %v6416_v19 }
  0x81   :  { %5871 = vmatprep.mubr.bf16.mxu0 %v6417_v20 }
  0x88   :  { %5872 = vmatmul.mubr.bf16.gmra.mrb[24].mxu0 %v6418_v21 }
  0x89   :  { %5875 = vmatprep.mubr.bf16.mxu0 %v6419_v22 }
  0x90   :  { %5876 = vmatmul.mubr.bf16.gmra.mrb[28].mxu0 %v6420_v23 }
  0x91   :  { %5879 = vmatprep.mubr.bf16.mxu0 %v6421_v24 }
  0x98   :  { %5880 = vmatmul.mubr.bf16.gmra.mrb[32].mxu0 %v6422_v25 }
  0x99   :  { %5883 = vmatprep.mubr.bf16.mxu0 %v6423_v26 }
  0xa0   :  { %5884 = vmatmul.mubr.bf16.gmra.mrb[36].mxu0 %v6424_v27 }
  0xa1   :  { %5887 = vmatprep.mubr.bf16.mxu0 %v6425_v28 }
  0xa8   :  { %5888 = vmatmul.mubr.bf16.gmra.mrb[40].mxu0 %v6426_v29 }
  0xa9   :  { %5891 = vmatprep.mubr.bf16.mxu0 %v6427_v30 }
  0xb0   :  { %5892 = vmatmul.mubr.bf16.gmra.mrb[44].mxu0 %v6428_v31 }
  0xb1   :  { %5895 = vmatprep.mubr.bf16.mxu0 %v6429_v32 }
  0xb8   :  { %5896 = vmatmul.mubr.bf16.gmra.mrb[48].mxu0 %v6430_v33 }
  0xb9   :  { %5899 = vmatprep.mubr.bf16.mxu0 %v6431_v34 }
  0xc0   :  { %5900 = vmatmul.mubr.bf16.gmra.mrb[52].mxu0 %v6432_v35 }
  0xc1   :  { %5903 = vmatprep.mubr.bf16.mxu0 %v6433_v36 }
  0xc8   :  { %5904 = vmatmul.mubr.bf16.gmra.mrb[56].mxu0 %v6434_v37 }
  0xc9   :  { %5907 = vmatprep.mubr.bf16.mxu0 %v6435_v38 }
  0xd0   :  { %5908 = vmatmul.mubr.bf16.gmra.mrb[60].mxu0 %v6436_v39 }
  0xd1   :  { %5911 = vmatprep.mubr.bf16.mxu0 %v6437_v40 }
  0xd8   :  { %5912 = vmatmul.mubr.bf16.gmra.mrb[64].mxu0 %v6438_v41 }
  0xd9   :  { %5915 = vmatprep.mubr.bf16.mxu0 %v6439_v42 }
  0xe0   :  { %5916 = vmatmul.mubr.bf16.gmra.mrb[68].mxu0 %v6440_v43 }
  0xe1   :  { %5919 = vmatprep.mubr.bf16.mxu0 %v6441_v44 }
  0xe8   :  { %5920 = vmatmul.mubr.bf16.gmra.mrb[72].mxu0 %v6442_v45 }
  0xe9   :  { %5923 = vmatprep.mubr.bf16.mxu0 %v6443_v46 }
  0xf0   :  { %5924 = vmatmul.mubr.bf16.gmra.mrb[76].mxu0 %v6444_v47 }
  0xf1   :  { %5927 = vmatprep.mubr.bf16.mxu0 %v6445_v48 }
  0xf8   :  { %5928 = vmatmul.mubr.bf16.gmra.mrb[80].mxu0 %v6446_v49 }
  0xf9   :  { %5931 = vmatprep.mubr.bf16.mxu0 %v6447_v50 }
 0x100   :  { %5932 = vmatmul.mubr.bf16.gmra.mrb[84].mxu0 %v6448_v51 }
 0x101   :  { %5935 = vmatprep.mubr.bf16.mxu0 %v6449_v52 }
 0x108   :  { %5936 = vmatmul.mubr.bf16.gmra.mrb[88].mxu0 %v6450_v53 }
 0x109   :  { %5939 = vmatprep.mubr.bf16.mxu0 %v6451_v54 }
 0x110   :  { %5940 = vmatmul.mubr.bf16.gmra.mrb[92].mxu0 %v6452_v55 }
 0x111   :  { %5943 = vmatprep.mubr.bf16.mxu0 %v6453_v56 }
 0x118   :  { %5944 = vmatmul.mubr.bf16.gmra.mrb[96].mxu0 %v6454_v57 }
 0x119   :  { %5947 = vmatprep.mubr.bf16.mxu0 %v6455_v58 }
 0x120   :  { %5948 = vmatmul.mubr.bf16.gmra.mrb[100].mxu0 %v6456_v59 }
 0x121   :  { %5951 = vmatprep.mubr.bf16.mxu0 %v6457_v60 }
 0x128   :  { %5952 = vmatmul.mubr.bf16.gmra.mrb[104].mxu0 %v6458_v61 }
 0x12b   :  { %v6776_v62 = vpop.f32.mrb[0].mxu0 }
 0x12c   :  { %12900 = vst [vmem:[#allocation16_spill] sm:$0xff] %v6776_v62  ;;  %v6778_v63 = vpop.f32.mrb[1].mxu0  ;;  %v1038_v59 = vsel %vm1037_vm0, %v6776_v62, 0.0 }
 0x12d   :  { %12901 = vst [vmem:[#allocation17_spill] sm:$0xff] %v6778_v63  ;;  %v6780_v0 = vpop.f32.mrb[2].mxu0 }
 0x12e   :  { %12902 = vst [vmem:[#allocation18_spill] sm:$0xff] %v6780_v0  ;;  %v6782_v1 = vpop.f32.mrb[3].mxu0 }
 0x12f   :  { %12903 = vst [vmem:[#allocation19_spill] sm:$0xff] %v6782_v1 }
 0x133   :  { %v6784_v2 = vpop.f32.mrb[4].mxu0 }
 0x134   :  { %12904 = vst [vmem:[#allocation20_spill] sm:$0xff] %v6784_v2  ;;  %v6786_v3 = vpop.f32.mrb[5].mxu0 }
 0x135   :  { %12905 = vst [vmem:[#allocation21_spill] sm:$0xff] %v6786_v3  ;;  %v6788_v4 = vpop.f32.mrb[6].mxu0 }
 0x136   :  { %12906 = vst [vmem:[#allocation22_spill] sm:$0xff] %v6788_v4  ;;  %v6790_v5 = vpop.f32.mrb[7].mxu0 }
 0x137   :  { %12907 = vst [vmem:[#allocation23_spill] sm:$0xff] %v6790_v5 }
 0x13b   :  { %v6792_v6 = vpop.f32.mrb[8].mxu0 }
 0x13c   :  { %12908 = vst [vmem:[#allocation24_spill] sm:$0xff] %v6792_v6  ;;  %v6794_v7 = vpop.f32.mrb[9].mxu0 }
 0x13d   :  { %12909 = vst [vmem:[#allocation25_spill] sm:$0xff] %v6794_v7  ;;  %v6796_v8 = vpop.f32.mrb[10].mxu0 }
 0x13e   :  { %12910 = vst [vmem:[#allocation26_spill] sm:$0xff] %v6796_v8  ;;  %v6798_v9 = vpop.f32.mrb[11].mxu0 }
 0x13f   :  { %12911 = vst [vmem:[#allocation27_spill] sm:$0xff] %v6798_v9 }
 0x143   :  { %v6800_v10 = vpop.f32.mrb[12].mxu0 }
 0x144   :  { %12912 = vst [vmem:[#allocation28_spill] sm:$0xff] %v6800_v10  ;;  %v6802_v11 = vpop.f32.mrb[13].mxu0 }
 0x145   :  { %12913 = vst [vmem:[#allocation29_spill] sm:$0xff] %v6802_v11  ;;  %v6804_v12 = vpop.f32.mrb[14].mxu0 }
 0x146   :  { %12914 = vst [vmem:[#allocation30_spill] sm:$0xff] %v6804_v12  ;;  %v6806_v13 = vpop.f32.mrb[15].mxu0 }
 0x147   :  { %12915 = vst [vmem:[#allocation31_spill] sm:$0xff] %v6806_v13 }
 0x14b   :  { %v6808_v14 = vpop.f32.mrb[16].mxu0 }
 0x14c   :  { %12916 = vst [vmem:[#allocation32_spill] sm:$0xff] %v6808_v14  ;;  %v6810_v15 = vpop.f32.mrb[17].mxu0 }
 0x14d   :  { %12917 = vst [vmem:[#allocation33_spill] sm:$0xff] %v6810_v15  ;;  %v6812_v16 = vpop.f32.mrb[18].mxu0 }
 0x14e   :  { %12918 = vst [vmem:[#allocation34_spill] sm:$0xff] %v6812_v16  ;;  %v6814_v17 = vpop.f32.mrb[19].mxu0 }
 0x14f   :  { %12919 = vst [vmem:[#allocation35_spill] sm:$0xff] %v6814_v17 }
 0x153   :  { %v6816_v18 = vpop.f32.mrb[20].mxu0 }
 0x154   :  { %12920 = vst [vmem:[#allocation36_spill] sm:$0xff] %v6816_v18  ;;  %v6818_v19 = vpop.f32.mrb[21].mxu0 }
 0x155   :  { %12921 = vst [vmem:[#allocation37_spill] sm:$0xff] %v6818_v19  ;;  %v6820_v20 = vpop.f32.mrb[22].mxu0 }
 0x156   :  { %12922 = vst [vmem:[#allocation38_spill] sm:$0xff] %v6820_v20  ;;  %v6822_v21 = vpop.f32.mrb[23].mxu0 }
 0x157   :  { %12923 = vst [vmem:[#allocation39_spill] sm:$0xff] %v6822_v21 }
 0x15b   :  { %v6824_v22 = vpop.f32.mrb[24].mxu0 }
 0x15c   :  { %12924 = vst [vmem:[#allocation40_spill] sm:$0xff] %v6824_v22  ;;  %v6826_v23 = vpop.f32.mrb[25].mxu0 }
 0x15d   :  { %12925 = vst [vmem:[#allocation41_spill] sm:$0xff] %v6826_v23  ;;  %v6828_v24 = vpop.f32.mrb[26].mxu0 }
 0x15e   :  { %12926 = vst [vmem:[#allocation42_spill] sm:$0xff] %v6828_v24  ;;  %v6830_v25 = vpop.f32.mrb[27].mxu0 }
 0x15f   :  { %12927 = vst [vmem:[#allocation43_spill] sm:$0xff] %v6830_v25 }
 0x163   :  { %v6832_v26 = vpop.f32.mrb[28].mxu0 }
 0x164   :  { %12928 = vst [vmem:[#allocation44_spill] sm:$0xff] %v6832_v26  ;;  %v6834_v27 = vpop.f32.mrb[29].mxu0 }
 0x165   :  { %12929 = vst [vmem:[#allocation45_spill] sm:$0xff] %v6834_v27  ;;  %v6836_v28 = vpop.f32.mrb[30].mxu0 }
 0x166   :  { %12930 = vst [vmem:[#allocation46_spill] sm:$0xff] %v6836_v28  ;;  %v6838_v29 = vpop.f32.mrb[31].mxu0 }
 0x167   :  { %12931 = vst [vmem:[#allocation47_spill] sm:$0xff] %v6838_v29 }
 0x16b   :  { %v6840_v30 = vpop.f32.mrb[32].mxu0 }
 0x16c   :  { %12932 = vst [vmem:[#allocation48_spill] sm:$0xff] %v6840_v30  ;;  %v6842_v31 = vpop.f32.mrb[33].mxu0 }
 0x16d   :  { %12933 = vst [vmem:[#allocation49_spill] sm:$0xff] %v6842_v31  ;;  %v6844_v32 = vpop.f32.mrb[34].mxu0 }
 0x16e   :  { %12934 = vst [vmem:[#allocation50_spill] sm:$0xff] %v6844_v32  ;;  %v6846_v33 = vpop.f32.mrb[35].mxu0 }
 0x16f   :  { %12935 = vst [vmem:[#allocation51_spill] sm:$0xff] %v6846_v33 }
 0x173   :  { %v6848_v34 = vpop.f32.mrb[36].mxu0 }
 0x174   :  { %12936 = vst [vmem:[#allocation52_spill] sm:$0xff] %v6848_v34  ;;  %v6850_v35 = vpop.f32.mrb[37].mxu0 }
 0x175   :  { %12937 = vst [vmem:[#allocation53_spill] sm:$0xff] %v6850_v35  ;;  %v6852_v36 = vpop.f32.mrb[38].mxu0 }
 0x176   :  { %12938 = vst [vmem:[#allocation54_spill] sm:$0xff] %v6852_v36  ;;  %v6854_v37 = vpop.f32.mrb[39].mxu0 }
 0x177   :  { %12939 = vst [vmem:[#allocation55_spill] sm:$0xff] %v6854_v37 }
 0x17b   :  { %v6856_v38 = vpop.f32.mrb[40].mxu0 }
 0x17c   :  { %12940 = vst [vmem:[#allocation56_spill] sm:$0xff] %v6856_v38  ;;  %v6858_v39 = vpop.f32.mrb[41].mxu0 }
 0x17d   :  { %12941 = vst [vmem:[#allocation57_spill] sm:$0xff] %v6858_v39  ;;  %v6860_v40 = vpop.f32.mrb[42].mxu0 }
 0x17e   :  { %12942 = vst [vmem:[#allocation58_spill] sm:$0xff] %v6860_v40  ;;  %v6862_v41 = vpop.f32.mrb[43].mxu0 }
 0x17f   :  { %12943 = vst [vmem:[#allocation59_spill] sm:$0xff] %v6862_v41 }
 0x183   :  { %v6864_v42 = vpop.f32.mrb[44].mxu0 }
 0x184   :  { %12944 = vst [vmem:[#allocation60_spill] sm:$0xff] %v6864_v42  ;;  %v6866_v43 = vpop.f32.mrb[45].mxu0 }
 0x185   :  { %12945 = vst [vmem:[#allocation61_spill] sm:$0xff] %v6866_v43  ;;  %v6868_v44 = vpop.f32.mrb[46].mxu0 }
 0x186   :  { %12946 = vst [vmem:[#allocation62_spill] sm:$0xff] %v6868_v44  ;;  %v6870_v45 = vpop.f32.mrb[47].mxu0 }
 0x187   :  { %12947 = vst [vmem:[#allocation63_spill] sm:$0xff] %v6870_v45 }
 0x18b   :  { %v6872_v46 = vpop.f32.mrb[48].mxu0 }
 0x18c   :  { %12948 = vst [vmem:[#allocation64_spill] sm:$0xff] %v6872_v46  ;;  %v6874_v47 = vpop.f32.mrb[49].mxu0 }
 0x18d   :  { %12949 = vst [vmem:[#allocation65_spill] sm:$0xff] %v6874_v47  ;;  %v6876_v48 = vpop.f32.mrb[50].mxu0 }
 0x18e   :  { %12950 = vst [vmem:[#allocation66_spill] sm:$0xff] %v6876_v48  ;;  %v6878_v49 = vpop.f32.mrb[51].mxu0 }
 0x18f   :  { %12951 = vst [vmem:[#allocation67_spill] sm:$0xff] %v6878_v49 }
 0x193   :  { %v6880_v50 = vpop.f32.mrb[52].mxu0 }
 0x194   :  { %12952 = vst [vmem:[#allocation68_spill] sm:$0xff] %v6880_v50  ;;  %v1035_v51 = vadd.f32 %v6880_v50, %v6778_v63  ;;  %v6884_v52 = vpop.f32.mrb[53].mxu0 }
 0x195   :  { %12953 = vst [vmem:[#allocation69_spill] sm:$0xff] %v6884_v52  ;;  %v6886_v53 = vpop.f32.mrb[54].mxu0 }
 0x196   :  { %12954 = vst [vmem:[#allocation70_spill] sm:$0xff] %v6886_v53  ;;  %v1036_v54 = vadd.f32 %v6886_v53, %v6782_v1  ;;  %v6890_v55 = vpop.f32.mrb[55].mxu0  ;;  %v1043_v53 = vsel %vm1037_vm0, %v6790_v5, 0.0 }
 0x197   :  { %12955 = vst [vmem:[#allocation71_spill] sm:$0xff] %v6890_v55 }
 0x198   :  { %v1128_v50 = vmul.f32 0.5, %v1036_v54 }
 0x19b   :  { %v6892_v56 = vpop.f32.mrb[56].mxu0 }
 0x19c   :  { %12956 = vst [vmem:[#allocation72_spill] sm:$0xff] %v6892_v56  ;;  %v1042_v57 = vadd.f32 %v6892_v56, %v6786_v3  ;;  %v6896_v58 = vpop.f32.mrb[57].mxu0 }
 0x19d   :  { %12957 = vst [vmem:[#allocation73_spill] sm:$0xff] %v6896_v58  ;;  %v1039_v60 = vsel %vm1037_vm0, %v6896_v58, 0.0  ;;  %v6902_v61 = vpop.f32.mrb[58].mxu0  ;;  %v1127_v58 = vmul.f32 0.5, %v1035_v51 }
 0x19e   :  { %12958 = vst [vmem:[#allocation74_spill] sm:$0xff] %v6902_v61  ;;  %v1131_v1 = vmul.f32 0.5, %v1042_v57  ;;  %v1040_v63 = vadd.f32 %v1039_v60, %v1038_v59  ;;  %v1044_v48 = vsel %vm1037_vm0, %v6902_v61, 0.0  ;;  %v6908_v56 = vpop.f32.mrb[59].mxu0  ;;  %v1048_v61 = vsel %vm1037_vm0, %v6794_v7, 0.0 }
 0x19f   :  { %12959 = vst [vmem:[#allocation75_spill] sm:$0xff] %v6908_v56  ;;  %v1045_v3 = vadd.f32 %v1044_v48, %v1043_v53  ;;  %v1041_v62 = vadd.f32 %v6780_v0, %v6908_v56 }
 0x1a0   :  { %v1198_v55 = vadd.f32 %v1131_v1, %v1128_v50  ;;  %v1129_v46 = vmul.f32 0.5, %v1040_v63 }
 0x1a1   :  { %v1132_v52 = vmul.f32 0.5, %v1045_v3  ;;  %v1130_v44 = vmul.f32 0.5, %v1041_v62 }
 0x1a2   :  { %v1215_v49 = vsel %vm1037_vm0, %v1129_v46, 0.0 }
 0x1a3   :  { %v1216_v54 = vsel %vm1037_vm0, %v1132_v52, 0.0  ;;  %v1181_v57 = vadd.f32 %v1130_v44, %v1127_v58  ;;  %v6914_v59 = vpop.f32.mrb[60].mxu0 }
 0x1a4   :  { %12960 = vst [vmem:[#allocation76_spill] sm:$0xff] %v6914_v59  ;;  %v1217_v60 = vadd.f32 %v1216_v54, %v1215_v49  ;;  %v1049_v48 = vsel %vm1037_vm0, %v6914_v59, 0.0  ;;  %v6920_v53 = vpop.f32.mrb[61].mxu0 }
 0x1a5   :  { %12961 = vst [vmem:[#allocation77_spill] sm:$0xff] %v6920_v53  ;;  %v1050_v63 = vadd.f32 %v1049_v48, %v1048_v61  ;;  %v1046_v62 = vadd.f32 %v6784_v2, %v6920_v53  ;;  %v6924_v1 = vpop.f32.mrb[62].mxu0 }
 0x1a6   :  { %12962 = vst [vmem:[#allocation78_spill] sm:$0xff] %v6924_v1  ;;  %v1051_v3 = vadd.f32 %v6924_v1, %v6798_v9  ;;  %v6928_v44 = vpop.f32.mrb[63].mxu0 }
 0x1a7   :  { %12963 = vst [vmem:[#allocation79_spill] sm:$0xff] %v6928_v44  ;;  %v1135_v46 = vmul.f32 0.5, %v1050_v63  ;;  %v1133_v49 = vmul.f32 0.5, %v1046_v62  ;;  %v1047_v50 = vadd.f32 %v6788_v4, %v6928_v44 }
 0x1a8   :  { %v1136_v51 = vmul.f32 0.5, %v1051_v3 }
 0x1a9   :  { %v1218_v52 = vsel %vm1037_vm0, %v1135_v46, 0.0  ;;  %v1182_v58 = vadd.f32 %v1181_v57, %v1133_v49  ;;  %v1134_v61 = vmul.f32 0.5, %v1047_v50 }
 0x1aa   :  { %v1219_v54 = vadd.f32 %v1218_v52, %v1217_v60 }
 0x1ab   :  { %v1183_v48 = vadd.f32 %v1182_v58, %v1136_v51  ;;  %v1199_v59 = vadd.f32 %v1198_v55, %v1134_v61  ;;  %v6933_v53 = vpop.f32.mrb[64].mxu0  ;;  %v1053_v55 = vsel %vm1037_vm0, %v6796_v8, 0.0 }
 0x1ac   :  { %12964 = vst [vmem:[#allocation80_spill] sm:$0xff] %v6933_v53  ;;  %v1056_v1 = vadd.f32 %v6933_v53, %v6802_v11  ;;  %v6937_v56 = vpop.f32.mrb[65].mxu0 }
 0x1ad   :  { %12965 = vst [vmem:[#allocation81_spill] sm:$0xff] %v6937_v56  ;;  %v1052_v63 = vadd.f32 %v6792_v6, %v6937_v56  ;;  %v6941_v62 = vpop.f32.mrb[66].mxu0 }
 0x1ae   :  { %12966 = vst [vmem:[#allocation82_spill] sm:$0xff] %v6941_v62  ;;  %v1139_v3 = vmul.f32 0.5, %v1056_v1  ;;  %v1057_v57 = vadd.f32 %v6941_v62, %v6806_v13  ;;  %v6945_v46 = vpop.f32.mrb[67].mxu0  ;;  %v1058_v13 = vsel %vm1037_vm0, %v6800_v10, 0.0 }
 0x1af   :  { %12967 = vst [vmem:[#allocation83_spill] sm:$0xff] %v6945_v46  ;;  %v1137_v60 = vmul.f32 0.5, %v1052_v63  ;;  %v1054_v49 = vsel %vm1037_vm0, %v6945_v46, 0.0  ;;  %v1078_v46 = vsel %vm1037_vm0, %v6824_v22, 0.0 }
 0x1b0   :  { %v1184_v50 = vadd.f32 %v1183_v48, %v1139_v3  ;;  %v1140_v51 = vmul.f32 0.5, %v1057_v57  ;;  %v1055_v52 = vadd.f32 %v1054_v49, %v1053_v55 }
 0x1b1   :  { %v1200_v58 = vadd.f32 %v1199_v59, %v1137_v60  ;;  %v1063_v60 = vsel %vm1037_vm0, %v6814_v17, 0.0 }
 0x1b2   :  { %v1138_v61 = vmul.f32 0.5, %v1055_v52 }
 0x1b3   :  { %v1201_v53 = vadd.f32 %v1200_v58, %v1140_v51  ;;  %v6951_v56 = vpop.f32.mrb[68].mxu0 }
 0x1b4   :  { %12968 = vst [vmem:[#allocation84_spill] sm:$0xff] %v6951_v56  ;;  %v1220_v1 = vsel %vm1037_vm0, %v1138_v61, 0.0  ;;  %v1062_v62 = vadd.f32 %v6951_v56, %v6810_v15  ;;  %v6956_v63 = vpop.f32.mrb[69].mxu0 }
 0x1b5   :  { %12969 = vst [vmem:[#allocation85_spill] sm:$0xff] %v6956_v63  ;;  %v1221_v44 = vadd.f32 %v1220_v1, %v1219_v54  ;;  %v1059_v48 = vsel %vm1037_vm0, %v6956_v63, 0.0  ;;  %v6962_v3 = vpop.f32.mrb[70].mxu0 }
 0x1b6   :  { %12970 = vst [vmem:[#allocation86_spill] sm:$0xff] %v6962_v3  ;;  %v1143_v59 = vmul.f32 0.5, %v1062_v62  ;;  %v1060_v57 = vadd.f32 %v1059_v48, %v1058_v13  ;;  %v1064_v55 = vsel %vm1037_vm0, %v6962_v3, 0.0  ;;  %v6968_v49 = vpop.f32.mrb[71].mxu0  ;;  %v1068_v3 = vsel %vm1037_vm0, %v6818_v19, 0.0 }
 0x1b7   :  { %12971 = vst [vmem:[#allocation87_spill] sm:$0xff] %v6968_v49  ;;  %v1065_v51 = vadd.f32 %v1064_v55, %v1063_v60  ;;  %v1061_v54 = vadd.f32 %v6804_v12, %v6968_v49 }
 0x1b8   :  { %v1202_v52 = vadd.f32 %v1201_v53, %v1143_v59  ;;  %v1141_v58 = vmul.f32 0.5, %v1060_v57 }
 0x1b9   :  { %v1144_v61 = vmul.f32 0.5, %v1065_v51  ;;  %v1142_v1 = vmul.f32 0.5, %v1061_v54 }
 0x1ba   :  { %v1222_v56 = vsel %vm1037_vm0, %v1141_v58, 0.0 }
 0x1bb   :  { %v1223_v62 = vadd.f32 %v1222_v56, %v1221_v44  ;;  %v1224_v13 = vsel %vm1037_vm0, %v1144_v61, 0.0  ;;  %v1185_v48 = vadd.f32 %v1184_v50, %v1142_v1  ;;  %v6974_v63 = vpop.f32.mrb[72].mxu0 }
 0x1bc   :  { %12972 = vst [vmem:[#allocation88_spill] sm:$0xff] %v6974_v63  ;;  %v1069_v60 = vsel %vm1037_vm0, %v6974_v63, 0.0  ;;  %v6980_v55 = vpop.f32.mrb[73].mxu0 }
 0x1bd   :  { %12973 = vst [vmem:[#allocation89_spill] sm:$0xff] %v6980_v55  ;;  %v1225_v53 = vadd.f32 %v1224_v13, %v1223_v62  ;;  %v1070_v59 = vadd.f32 %v1069_v60, %v1068_v3  ;;  %v1066_v57 = vadd.f32 %v6808_v14, %v6980_v55  ;;  %v6984_v51 = vpop.f32.mrb[74].mxu0 }
 0x1be   :  { %12974 = vst [vmem:[#allocation90_spill] sm:$0xff] %v6984_v51  ;;  %v1071_v56 = vadd.f32 %v6984_v51, %v6822_v21  ;;  %v6988_v44 = vpop.f32.mrb[75].mxu0 }
 0x1bf   :  { %12975 = vst [vmem:[#allocation91_spill] sm:$0xff] %v6988_v44  ;;  %v1147_v50 = vmul.f32 0.5, %v1070_v59  ;;  %v1145_v54 = vmul.f32 0.5, %v1066_v57  ;;  %v1067_v58 = vadd.f32 %v6812_v16, %v6988_v44 }
 0x1c0   :  { %v1148_v61 = vmul.f32 0.5, %v1071_v56 }
 0x1c1   :  { %v1226_v1 = vsel %vm1037_vm0, %v1147_v50, 0.0  ;;  %v1186_v62 = vadd.f32 %v1185_v48, %v1145_v54  ;;  %v1146_v3 = vmul.f32 0.5, %v1067_v58 }
 0x1c2   :  { %v1227_v13 = vadd.f32 %v1226_v1, %v1225_v53 }
 0x1c3   :  { %v1187_v60 = vadd.f32 %v1186_v62, %v1148_v61  ;;  %v1203_v63 = vadd.f32 %v1202_v52, %v1146_v3  ;;  %v6993_v55 = vpop.f32.mrb[76].mxu0  ;;  %v1073_v52 = vsel %vm1037_vm0, %v6820_v20, 0.0 }
 0x1c4   :  { %12976 = vst [vmem:[#allocation92_spill] sm:$0xff] %v6993_v55  ;;  %v1076_v51 = vadd.f32 %v6993_v55, %v6826_v23  ;;  %v6997_v49 = vpop.f32.mrb[77].mxu0 }
 0x1c5   :  { %12977 = vst [vmem:[#allocation93_spill] sm:$0xff] %v6997_v49  ;;  %v1072_v59 = vadd.f32 %v6816_v18, %v6997_v49  ;;  %v7001_v57 = vpop.f32.mrb[78].mxu0 }
 0x1c6   :  { %12978 = vst [vmem:[#allocation94_spill] sm:$0xff] %v7001_v57  ;;  %v1151_v56 = vmul.f32 0.5, %v1076_v51  ;;  %v1077_v48 = vadd.f32 %v7001_v57, %v6830_v25  ;;  %v7005_v50 = vpop.f32.mrb[79].mxu0 }
 0x1c7   :  { %12979 = vst [vmem:[#allocation95_spill] sm:$0xff] %v7005_v50  ;;  %v1149_v53 = vmul.f32 0.5, %v1072_v59  ;;  %v1074_v54 = vsel %vm1037_vm0, %v7005_v50, 0.0  ;;  %v1098_v50 = vsel %vm1037_vm0, %v6848_v34, 0.0 }
 0x1c8   :  { %v1188_v58 = vadd.f32 %v1187_v60, %v1151_v56  ;;  %v1152_v61 = vmul.f32 0.5, %v1077_v48  ;;  %v1075_v1 = vadd.f32 %v1074_v54, %v1073_v52 }
 0x1c9   :  { %v1204_v62 = vadd.f32 %v1203_v63, %v1149_v53  ;;  %v1083_v53 = vsel %vm1037_vm0, %v6838_v29, 0.0 }
 0x1ca   :  { %v1150_v3 = vmul.f32 0.5, %v1075_v1 }
 0x1cb   :  { %v1205_v55 = vadd.f32 %v1204_v62, %v1152_v61  ;;  %v7011_v49 = vpop.f32.mrb[80].mxu0 }
 0x1cc   :  { %12980 = vst [vmem:[#allocation96_spill] sm:$0xff] %v7011_v49  ;;  %v1228_v51 = vsel %vm1037_vm0, %v1150_v3, 0.0  ;;  %v1082_v57 = vadd.f32 %v7011_v49, %v6834_v27  ;;  %v7016_v59 = vpop.f32.mrb[81].mxu0 }
 0x1cd   :  { %12981 = vst [vmem:[#allocation97_spill] sm:$0xff] %v7016_v59  ;;  %v1229_v44 = vadd.f32 %v1228_v51, %v1227_v13  ;;  %v1079_v60 = vsel %vm1037_vm0, %v7016_v59, 0.0  ;;  %v7022_v56 = vpop.f32.mrb[82].mxu0 }
 0x1ce   :  { %12982 = vst [vmem:[#allocation98_spill] sm:$0xff] %v7022_v56  ;;  %v1155_v63 = vmul.f32 0.5, %v1082_v57  ;;  %v1080_v48 = vadd.f32 %v1079_v60, %v1078_v46  ;;  %v1084_v52 = vsel %vm1037_vm0, %v7022_v56, 0.0  ;;  %v7028_v54 = vpop.f32.mrb[83].mxu0  ;;  %v1088_v56 = vsel %vm1037_vm0, %v6842_v31, 0.0 }
 0x1cf   :  { %12983 = vst [vmem:[#allocation99_spill] sm:$0xff] %v7028_v54  ;;  %v1085_v61 = vadd.f32 %v1084_v52, %v1083_v53  ;;  %v1081_v13 = vadd.f32 %v6828_v24, %v7028_v54 }
 0x1d0   :  { %v1206_v1 = vadd.f32 %v1205_v55, %v1155_v63  ;;  %v1153_v62 = vmul.f32 0.5, %v1080_v48 }
 0x1d1   :  { %v1156_v3 = vmul.f32 0.5, %v1085_v61  ;;  %v1154_v51 = vmul.f32 0.5, %v1081_v13 }
 0x1d2   :  { %v1230_v49 = vsel %vm1037_vm0, %v1153_v62, 0.0 }
 0x1d3   :  { %v1231_v57 = vadd.f32 %v1230_v49, %v1229_v44  ;;  %v1232_v46 = vsel %vm1037_vm0, %v1156_v3, 0.0  ;;  %v1189_v60 = vadd.f32 %v1188_v58, %v1154_v51  ;;  %v7034_v59 = vpop.f32.mrb[84].mxu0 }
 0x1d4   :  { %12984 = vst [vmem:[#allocation100_spill] sm:$0xff] %v7034_v59  ;;  %v1089_v53 = vsel %vm1037_vm0, %v7034_v59, 0.0  ;;  %v7040_v52 = vpop.f32.mrb[85].mxu0 }
 0x1d5   :  { %12985 = vst [vmem:[#allocation101_spill] sm:$0xff] %v7040_v52  ;;  %v1233_v55 = vadd.f32 %v1232_v46, %v1231_v57  ;;  %v1090_v63 = vadd.f32 %v1089_v53, %v1088_v56  ;;  %v1086_v48 = vadd.f32 %v6832_v26, %v7040_v52  ;;  %v7044_v61 = vpop.f32.mrb[86].mxu0 }
 0x1d6   :  { %12986 = vst [vmem:[#allocation102_spill] sm:$0xff] %v7044_v61  ;;  %v1091_v49 = vadd.f32 %v7044_v61, %v6846_v33  ;;  %v7048_v44 = vpop.f32.mrb[87].mxu0 }
 0x1d7   :  { %12987 = vst [vmem:[#allocation103_spill] sm:$0xff] %v7048_v44  ;;  %v1159_v58 = vmul.f32 0.5, %v1090_v63  ;;  %v1157_v13 = vmul.f32 0.5, %v1086_v48  ;;  %v1087_v62 = vadd.f32 %v6836_v28, %v7048_v44 }
 0x1d8   :  { %v1160_v3 = vmul.f32 0.5, %v1091_v49 }
 0x1d9   :  { %v1234_v51 = vsel %vm1037_vm0, %v1159_v58, 0.0  ;;  %v1190_v57 = vadd.f32 %v1189_v60, %v1157_v13  ;;  %v1158_v56 = vmul.f32 0.5, %v1087_v62 }
 0x1da   :  { %v1235_v46 = vadd.f32 %v1234_v51, %v1233_v55 }
 0x1db   :  { %v1191_v53 = vadd.f32 %v1190_v57, %v1160_v3  ;;  %v1207_v59 = vadd.f32 %v1206_v1, %v1158_v56  ;;  %v7053_v52 = vpop.f32.mrb[88].mxu0  ;;  %v1093_v1 = vsel %vm1037_vm0, %v6844_v32, 0.0 }
 0x1dc   :  { %12988 = vst [vmem:[#allocation104_spill] sm:$0xff] %v7053_v52  ;;  %v1096_v61 = vadd.f32 %v7053_v52, %v6850_v35  ;;  %v7057_v54 = vpop.f32.mrb[89].mxu0 }
 0x1dd   :  { %12989 = vst [vmem:[#allocation105_spill] sm:$0xff] %v7057_v54  ;;  %v1092_v63 = vadd.f32 %v6840_v30, %v7057_v54  ;;  %v7061_v48 = vpop.f32.mrb[90].mxu0 }
 0x1de   :  { %12990 = vst [vmem:[#allocation106_spill] sm:$0xff] %v7061_v48  ;;  %v1163_v49 = vmul.f32 0.5, %v1096_v61  ;;  %v1097_v60 = vadd.f32 %v7061_v48, %v6854_v37  ;;  %v7065_v58 = vpop.f32.mrb[91].mxu0 }
 0x1df   :  { %12991 = vst [vmem:[#allocation107_spill] sm:$0xff] %v7065_v58  ;;  %v1161_v55 = vmul.f32 0.5, %v1092_v63  ;;  %v1094_v13 = vsel %vm1037_vm0, %v7065_v58, 0.0 }
 0x1e0   :  { %v1192_v62 = vadd.f32 %v1191_v53, %v1163_v49  ;;  %v1164_v3 = vmul.f32 0.5, %v1097_v60  ;;  %v1095_v51 = vadd.f32 %v1094_v13, %v1093_v1 }
 0x1e1   :  { %v1208_v57 = vadd.f32 %v1207_v59, %v1161_v55  ;;  %v1103_v55 = vsel %vm1037_vm0, %v6862_v41, 0.0 }
 0x1e2   :  { %v1162_v56 = vmul.f32 0.5, %v1095_v51 }
 0x1e3   :  { %v1209_v52 = vadd.f32 %v1208_v57, %v1164_v3  ;;  %v7071_v54 = vpop.f32.mrb[92].mxu0 }
 0x1e4   :  { %12992 = vst [vmem:[#allocation108_spill] sm:$0xff] %v7071_v54  ;;  %v1236_v61 = vsel %vm1037_vm0, %v1162_v56, 0.0  ;;  %v1102_v48 = vadd.f32 %v7071_v54, %v6858_v39  ;;  %v7076_v63 = vpop.f32.mrb[93].mxu0 }
 0x1e5   :  { %12993 = vst [vmem:[#allocation109_spill] sm:$0xff] %v7076_v63  ;;  %v1237_v44 = vadd.f32 %v1236_v61, %v1235_v46  ;;  %v1099_v53 = vsel %vm1037_vm0, %v7076_v63, 0.0  ;;  %v7082_v49 = vpop.f32.mrb[94].mxu0 }
 0x1e6   :  { %12994 = vst [vmem:[#allocation110_spill] sm:$0xff] %v7082_v49  ;;  %v1167_v59 = vmul.f32 0.5, %v1102_v48  ;;  %v1100_v60 = vadd.f32 %v1099_v53, %v1098_v50  ;;  %v1104_v1 = vsel %vm1037_vm0, %v7082_v49, 0.0  ;;  %v7088_v13 = vpop.f32.mrb[95].mxu0  ;;  %v1108_v49 = vsel %vm1037_vm0, %v6866_v43, 0.0 }
 0x1e7   :  { %12995 = vst [vmem:[#allocation111_spill] sm:$0xff] %v7088_v13  ;;  %v1105_v3 = vadd.f32 %v1104_v1, %v1103_v55  ;;  %v1101_v46 = vadd.f32 %v6852_v36, %v7088_v13 }
 0x1e8   :  { %v1210_v51 = vadd.f32 %v1209_v52, %v1167_v59  ;;  %v1165_v57 = vmul.f32 0.5, %v1100_v60 }
 0x1e9   :  { %v1168_v56 = vmul.f32 0.5, %v1105_v3  ;;  %v1166_v61 = vmul.f32 0.5, %v1101_v46 }
 0x1ea   :  { %v1238_v54 = vsel %vm1037_vm0, %v1165_v57, 0.0 }
 0x1eb   :  { %v1239_v48 = vadd.f32 %v1238_v54, %v1237_v44  ;;  %v1240_v50 = vsel %vm1037_vm0, %v1168_v56, 0.0  ;;  %v1193_v53 = vadd.f32 %v1192_v62, %v1166_v61  ;;  %v7094_v63 = vpop.f32.mrb[96].mxu0 }
 0x1ec   :  { %12996 = vst [vmem:[#allocation112_spill] sm:$0xff] %v7094_v63  ;;  %v1109_v55 = vsel %vm1037_vm0, %v7094_v63, 0.0  ;;  %v7100_v1 = vpop.f32.mrb[97].mxu0 }
 0x1ed   :  { %12997 = vst [vmem:[#allocation113_spill] sm:$0xff] %v7100_v1  ;;  %v1241_v52 = vadd.f32 %v1240_v50, %v1239_v48  ;;  %v1110_v59 = vadd.f32 %v1109_v55, %v1108_v49  ;;  %v1106_v60 = vadd.f32 %v6856_v38, %v7100_v1  ;;  %v7104_v3 = vpop.f32.mrb[98].mxu0 }
 0x1ee   :  { %12998 = vst [vmem:[#allocation114_spill] sm:$0xff] %v7104_v3  ;;  %v1111_v54 = vadd.f32 %v7104_v3, %v6870_v45  ;;  %v7108_v44 = vpop.f32.mrb[99].mxu0 }
 0x1ef   :  { %12999 = vst [vmem:[#allocation115_spill] sm:$0xff] %v7108_v44  ;;  %v1171_v62 = vmul.f32 0.5, %v1110_v59  ;;  %v1169_v46 = vmul.f32 0.5, %v1106_v60  ;;  %v1107_v57 = vadd.f32 %v6860_v40, %v7108_v44  ;;  %v13003_v44 = vld [vmem:[#allocation67_spill] sm:$0xff] }
 0x1f0   :  { %v1172_v56 = vmul.f32 0.5, %v1111_v54 }
 0x1f1   :  { %v1242_v61 = vsel %vm1037_vm0, %v1171_v62, 0.0  ;;  %v1194_v48 = vadd.f32 %v1193_v53, %v1169_v46  ;;  %v1170_v49 = vmul.f32 0.5, %v1107_v57 }
 0x1f2   :  { %v1243_v50 = vadd.f32 %v1242_v61, %v1241_v52  ;;  %v13005_v52 = vld [vmem:[#allocation62_spill] sm:$0xff] }
 0x1f3   :  { %v1195_v55 = vadd.f32 %v1194_v48, %v1172_v56  ;;  %v1211_v63 = vadd.f32 %v1210_v51, %v1170_v49  ;;  %v7113_v1 = vpop.f32.mrb[100].mxu0  ;;  %v1113_v51 = vsel %vm1037_vm0, %v13005_v52, 0.0  ;;  %v13009_v52 = vld [vmem:[#allocation64_spill] sm:$0xff] }
 0x1f4   :  { %13000 = vst [vmem:[#allocation116_spill] sm:$0xff] %v7113_v1  ;;  %v1116_v3 = vadd.f32 %v7113_v1, %v6874_v47  ;;  %v7117_v13 = vpop.f32.mrb[101].mxu0 }
 0x1f5   :  { %13001 = vst [vmem:[#allocation117_spill] sm:$0xff] %v7117_v13  ;;  %v1112_v59 = vadd.f32 %v6864_v42, %v7117_v13  ;;  %v7121_v60 = vpop.f32.mrb[102].mxu0 }
 0x1f6   :  { %13002 = vst [vmem:[#allocation118_spill] sm:$0xff] %v7121_v60  ;;  %v1175_v54 = vmul.f32 0.5, %v1116_v3  ;;  %v1117_v53 = vadd.f32 %v7121_v60, %v13003_v44  ;;  %v7125_v62 = vpop.f32.mrb[103].mxu0  ;;  %v13007_v60 = vld [vmem:[#allocation69_spill] sm:$0xff] }
 0x1f7   :  { %13004 = vst [vmem:[#allocation119_spill] sm:$0xff] %v7125_v62  ;;  %v1173_v46 = vmul.f32 0.5, %v1112_v59  ;;  %v1114_v57 = vsel %vm1037_vm0, %v7125_v62, 0.0  ;;  %v1118_v59 = vsel %vm1037_vm0, %v13009_v52, 0.0 }
 0x1f8   :  { %v1196_v56 = vadd.f32 %v1195_v55, %v1175_v54  ;;  %v1176_v61 = vmul.f32 0.5, %v1117_v53  ;;  %v1115_v48 = vadd.f32 %v1114_v57, %v1113_v51 }
 0x1f9   :  { %v1212_v49 = vadd.f32 %v1211_v63, %v1173_v46  ;;  %v13011_v63 = vld [vmem:[#allocation71_spill] sm:$0xff] }
 0x1fa   :  { %v1174_v1 = vmul.f32 0.5, %v1115_v48  ;;  %v1123_v53 = vsel %vm1037_vm0, %v13011_v63, 0.0  ;;  %v13013_v48 = vld [vmem:[#allocation66_spill] sm:$0xff] }
 0x1fb   :  { %v1213_v13 = vadd.f32 %v1212_v49, %v1176_v61  ;;  %v7131_v58 = vpop.f32.mrb[104].mxu0 }
 0x1fc   :  { %13006 = vst [vmem:[#allocation120_spill] sm:$0xff] %v7131_v58  ;;  %v1244_v3 = vsel %vm1037_vm0, %v1174_v1, 0.0  ;;  %v1122_v44 = vadd.f32 %v7131_v58, %v13007_v60  ;;  %v7136_v47 = vpop.f32.mrb[105].mxu0 }
 0x1fd   :  { %13008 = vst [vmem:[#allocation121_spill] sm:$0xff] %v7136_v47  ;;  %v1245_v42 = vadd.f32 %v1244_v3, %v1243_v50  ;;  %v1119_v55 = vsel %vm1037_vm0, %v7136_v47, 0.0  ;;  %v7142_v54 = vpop.f32.mrb[106].mxu0 }
 0x1fe   :  { %13010 = vst [vmem:[#allocation122_spill] sm:$0xff] %v7142_v54  ;;  %v1179_v51 = vmul.f32 0.5, %v1122_v44  ;;  %v1120_v46 = vadd.f32 %v1119_v55, %v1118_v59  ;;  %v1124_v1 = vsel %vm1037_vm0, %v7142_v54, 0.0  ;;  %v7148_v57 = vpop.f32.mrb[107].mxu0 }
 0x1ff   :  { %13012 = vst [vmem:[#allocation123_spill] sm:$0xff] %v7148_v57  ;;  %v1125_v61 = vadd.f32 %v1124_v1, %v1123_v53  ;;  %v1121_v49 = vadd.f32 %v13013_v48, %v7148_v57 }
 0x200   :  { %v1214_v50 = vadd.f32 %v1213_v13, %v1179_v51  ;;  %v1177_v3 = vmul.f32 0.5, %v1120_v46 }
 0x201   :  { %v1180_v58 = vmul.f32 0.5, %v1125_v61  ;;  %v1178_v47 = vmul.f32 0.5, %v1121_v49 }
 0x202   :  { %v1246_v62 = vsel %vm1037_vm0, %v1177_v3, 0.0  ;;  %v1252_v59 = vmul.f32 0.055555556, %v1214_v50 }
 0x203   :  { %v1247_v60 = vadd.f32 %v1246_v62, %v1245_v42  ;;  %v1248_v63 = vsel %vm1037_vm0, %v1180_v58, 0.0  ;;  %v1197_v44 = vadd.f32 %v1196_v56, %v1178_v47  ;;  %v13015_v42 = vld [vmem:[#allocation17_spill] sm:$0xff]  ;;  %v13016_v47 = vld [vmem:[#allocation19_spill] sm:$0xff]  ;;  %v13017_v62 = vld [vmem:[#allocation16_spill] sm:$0xff] }
 0x205   :  { %v1249_v55 = vadd.f32 %v1248_v63, %v1247_v60  ;;  %v1251_v52 = vmul.f32 0.055555556, %v1197_v44 }
 0x207   :  { %v1253_v54 = vmul.f32 0.055555556, %v1249_v55  ;;  %v1254_v45 = vadd.f32 %v1252_v59, %v1251_v52 }
 0x209   :  { %v1255_v53 = vsel %vm1037_vm0, %v1253_v54, 0.0 }
 0x20a   :  { %v1256_v1 = vadd.f32 %v1255_v53, %v1254_v45  ;;  %v13018_v45 = vld [vmem:[#allocation21_spill] sm:$0xff]  ;;  %v13019_v53 = vld [vmem:[#allocation31_spill] sm:$0xff] }
 0x20c   :  { %v1257_v43 = vrot.slane %v1256_v1, 4 }
 0x20e   :  { %v1258_v57 = vadd.f32 %v1257_v43, %v1256_v1 }
 0x210   :  { %v1259_v13 = vrot.slane %v1258_v57, 2 }
 0x212   :  { %v1260_v51 = vadd.f32 %v1259_v13, %v1258_v57 }
 0x214   :  { %v1261_v46 = vrot.slane %v1260_v51, 1 }
 0x216   :  { %v1262_v61 = vadd.f32 %v1261_v46, %v1260_v51 }
 0x218   :  { %v7155_v49 = vmul.f32 0.055555556, %v1262_v61 }
 0x21a   :  { %13014 = vst [vmem:[#allocation124_spill] sm:$0xff] %v7155_v49  ;;  %v7159_v58 = vsub.f32 %v13015_v42, %v7155_v49  ;;  %v7163_v60 = vsub.f32 %v13016_v47, %v7155_v49  ;;  %v7167_v52 = vsub.f32 %v13017_v62, %v7155_v49  ;;  %v7171_v43 = vsub.f32 %v6780_v0, %v7155_v49  ;;  %v13031_v0 = vld [vmem:[#allocation68_spill] sm:$0xff]  ;;  %v13033_v62 = vld [vmem:[#allocation70_spill] sm:$0xff]  ;;  %v13035_v47 = vld [vmem:[#allocation73_spill] sm:$0xff] }
 0x21b   :  { %v7175_v56 = vsub.f32 %v13018_v45, %v7155_v49  ;;  %v7179_v54 = vsub.f32 %v6790_v5, %v7155_v49  ;;  %v7183_v63 = vsub.f32 %v6784_v2, %v7155_v49  ;;  %v7187_v57 = vsub.f32 %v6788_v4, %v7155_v49  ;;  %v13025_v4 = vld [vmem:[#allocation67_spill] sm:$0xff]  ;;  %v13026_v2 = vld [vmem:[#allocation64_spill] sm:$0xff]  ;;  %v13027_v5 = vld [vmem:[#allocation69_spill] sm:$0xff] }
 0x21c   :  { %v7191_v50 = vsub.f32 %v6794_v7, %v7155_v49  ;;  %v7195_v3 = vsub.f32 %v6798_v9, %v7155_v49  ;;  %v7199_v44 = vsub.f32 %v6792_v6, %v7155_v49  ;;  %v7203_v59 = vsub.f32 %v6796_v8, %v7155_v49  ;;  %v13021_v8 = vld [vmem:[#allocation63_spill] sm:$0xff]  ;;  %v13022_v6 = vld [vmem:[#allocation60_spill] sm:$0xff]  ;;  %v13023_v9 = vld [vmem:[#allocation62_spill] sm:$0xff] }
 0x21d   :  { %v7207_v55 = vsub.f32 %v6802_v11, %v7155_v49  ;;  %v7211_v1 = vsub.f32 %v13019_v53, %v7155_v49  ;;  %v7215_v13 = vsub.f32 %v6800_v10, %v7155_v49  ;;  %v7219_v51 = vsub.f32 %v6804_v12, %v7155_v49  ;;  %v13020_v11 = vld [vmem:[#allocation61_spill] sm:$0xff]  ;;  %v13029_v45 = vld [vmem:[#allocation71_spill] sm:$0xff] }
 0x21e   :  { %v7223_v46 = vsub.f32 %v6810_v15, %v7155_v49  ;;  %v7227_v61 = vsub.f32 %v6814_v17, %v7155_v49  ;;  %v7231_v53 = vsub.f32 %v6808_v14, %v7155_v49  ;;  %v7235_v10 = vsub.f32 %v6812_v16, %v7155_v49  ;;  %v13024_v7 = vld [vmem:[#allocation65_spill] sm:$0xff]  ;;  %v13037_v42 = vld [vmem:[#allocation75_spill] sm:$0xff] }
 0x21f   :  { %v7239_v12 = vsub.f32 %v6818_v19, %v7155_v49  ;;  %v7243_v15 = vsub.f32 %v6822_v21, %v7155_v49  ;;  %v7247_v17 = vsub.f32 %v6816_v18, %v7155_v49  ;;  %v7251_v14 = vsub.f32 %v6820_v20, %v7155_v49 }
 0x220   :  { %v7255_v16 = vsub.f32 %v6826_v23, %v7155_v49  ;;  %v7259_v19 = vsub.f32 %v6830_v25, %v7155_v49  ;;  %v7263_v21 = vsub.f32 %v6824_v22, %v7155_v49  ;;  %v7267_v18 = vsub.f32 %v6828_v24, %v7155_v49 }
 0x221   :  { %v7271_v20 = vsub.f32 %v6834_v27, %v7155_v49  ;;  %v7275_v23 = vsub.f32 %v6838_v29, %v7155_v49  ;;  %v7279_v25 = vsub.f32 %v6832_v26, %v7155_v49  ;;  %v7283_v22 = vsub.f32 %v6836_v28, %v7155_v49 }
 0x222   :  { %v7287_v24 = vsub.f32 %v6842_v31, %v7155_v49  ;;  %v7291_v27 = vsub.f32 %v6846_v33, %v7155_v49  ;;  %v7295_v29 = vsub.f32 %v6840_v30, %v7155_v49  ;;  %v7299_v26 = vsub.f32 %v6844_v32, %v7155_v49 }
 0x223   :  { %v7303_v28 = vsub.f32 %v6850_v35, %v7155_v49  ;;  %v7307_v31 = vsub.f32 %v6854_v37, %v7155_v49  ;;  %v7311_v33 = vsub.f32 %v6848_v34, %v7155_v49  ;;  %v7315_v30 = vsub.f32 %v6852_v36, %v7155_v49 }
 0x224   :  { %v7319_v32 = vsub.f32 %v6858_v39, %v7155_v49  ;;  %v7323_v35 = vsub.f32 %v6862_v41, %v7155_v49  ;;  %v7327_v37 = vsub.f32 %v6856_v38, %v7155_v49  ;;  %v7331_v34 = vsub.f32 %v6860_v40, %v7155_v49 }
 0x225   :  { %v7335_v36 = vsub.f32 %v13020_v11, %v7155_v49  ;;  %v7339_v39 = vsub.f32 %v13021_v8, %v7155_v49  ;;  %v7343_v41 = vsub.f32 %v13022_v6, %v7155_v49  ;;  %v7347_v38 = vsub.f32 %v13023_v9, %v7155_v49 }
 0x226   :  { %v7351_v40 = vsub.f32 %v13024_v7, %v7155_v49  ;;  %v7355_v11 = vsub.f32 %v13025_v4, %v7155_v49  ;;  %v7359_v8 = vsub.f32 %v13026_v2, %v7155_v49  ;;  %v7363_v6 = vsub.f32 %v13013_v48, %v7155_v49 }
 0x227   :  { %v7367_v9 = vsub.f32 %v13027_v5, %v7155_v49  ;;  %v7371_v7 = vsub.f32 %v13029_v45, %v7155_v49  ;;  %v7375_v4 = vsub.f32 %v13031_v0, %v7155_v49  ;;  %v7379_v2 = vsub.f32 %v13033_v62, %v7155_v49 }
 0x228   :  { %v7383_v48 = vsub.f32 %v13035_v47, %v7155_v49  ;;  %v7387_v5 = vsub.f32 %v13037_v42, %v7155_v49 }
 0x229   :  { %13028 = vst [vmem:[#allocation125_spill] sm:$0xff] %v7367_v9  ;;  %13030 = vst [vmem:[#allocation126_spill] sm:$0xff] %v7371_v7  ;;  %v13039_v9 = vld [vmem:[#allocation72_spill] sm:$0xff]  ;;  %v13041_v7 = vld [vmem:[#allocation74_spill] sm:$0xff] }
 0x22a   :  { %13032 = vst [vmem:[#allocation127_spill] sm:$0xff] %v7375_v4  ;;  %13034 = vst [vmem:[#allocation128_spill] sm:$0xff] %v7379_v2  ;;  %v7391_v45 = vsub.f32 %v13039_v9, %v7155_v49  ;;  %v7395_v0 = vsub.f32 %v13041_v7, %v7155_v49  ;;  %v13043_v4 = vld [vmem:[#allocation77_spill] sm:$0xff]  ;;  %v13045_v2 = vld [vmem:[#allocation79_spill] sm:$0xff] }
 0x22b   :  { %13036 = vst [vmem:[#allocation129_spill] sm:$0xff] %v7383_v48  ;;  %13038 = vst [vmem:[#allocation130_spill] sm:$0xff] %v7387_v5  ;;  %v7399_v62 = vsub.f32 %v13043_v4, %v7155_v49  ;;  %v7403_v47 = vsub.f32 %v13045_v2, %v7155_v49  ;;  %v13047_v48 = vld [vmem:[#allocation76_spill] sm:$0xff]  ;;  %v13049_v5 = vld [vmem:[#allocation78_spill] sm:$0xff] }
 0x22c   :  { %13040 = vst [vmem:[#allocation131_spill] sm:$0xff] %v7391_v45  ;;  %13042 = vst [vmem:[#allocation132_spill] sm:$0xff] %v7395_v0  ;;  %v7407_v42 = vsub.f32 %v13047_v48, %v7155_v49  ;;  %v7411_v9 = vsub.f32 %v13049_v5, %v7155_v49  ;;  %v13051_v45 = vld [vmem:[#allocation81_spill] sm:$0xff]  ;;  %v13053_v0 = vld [vmem:[#allocation83_spill] sm:$0xff] }
 0x22d   :  { %13044 = vst [vmem:[#allocation133_spill] sm:$0xff] %v7399_v62  ;;  %13046 = vst [vmem:[#allocation134_spill] sm:$0xff] %v7403_v47  ;;  %v7415_v7 = vsub.f32 %v13051_v45, %v7155_v49  ;;  %v7419_v4 = vsub.f32 %v13053_v0, %v7155_v49  ;;  %v13055_v62 = vld [vmem:[#allocation80_spill] sm:$0xff]  ;;  %v13057_v47 = vld [vmem:[#allocation82_spill] sm:$0xff] }
 0x22e   :  { %13048 = vst [vmem:[#allocation135_spill] sm:$0xff] %v7407_v42  ;;  %13050 = vst [vmem:[#allocation136_spill] sm:$0xff] %v7411_v9  ;;  %v7423_v2 = vsub.f32 %v13055_v62, %v7155_v49  ;;  %v7427_v48 = vsub.f32 %v13057_v47, %v7155_v49  ;;  %v13059_v42 = vld [vmem:[#allocation85_spill] sm:$0xff]  ;;  %v13061_v9 = vld [vmem:[#allocation87_spill] sm:$0xff] }
 0x22f   :  { %13052 = vst [vmem:[#allocation137_spill] sm:$0xff] %v7415_v7  ;;  %13054 = vst [vmem:[#allocation138_spill] sm:$0xff] %v7419_v4  ;;  %v7431_v5 = vsub.f32 %v13059_v42, %v7155_v49  ;;  %v7435_v45 = vsub.f32 %v13061_v9, %v7155_v49  ;;  %v13063_v7 = vld [vmem:[#allocation84_spill] sm:$0xff]  ;;  %v13065_v4 = vld [vmem:[#allocation86_spill] sm:$0xff] }
 0x230   :  { %13056 = vst [vmem:[#allocation139_spill] sm:$0xff] %v7423_v2  ;;  %13058 = vst [vmem:[#allocation140_spill] sm:$0xff] %v7427_v48  ;;  %v7439_v0 = vsub.f32 %v13063_v7, %v7155_v49  ;;  %v7443_v62 = vsub.f32 %v13065_v4, %v7155_v49  ;;  %v13067_v2 = vld [vmem:[#allocation89_spill] sm:$0xff]  ;;  %v13069_v48 = vld [vmem:[#allocation91_spill] sm:$0xff] }
 0x231   :  { %13060 = vst [vmem:[#allocation141_spill] sm:$0xff] %v7431_v5  ;;  %13062 = vst [vmem:[#allocation142_spill] sm:$0xff] %v7435_v45  ;;  %v7447_v47 = vsub.f32 %v13067_v2, %v7155_v49  ;;  %v7451_v42 = vsub.f32 %v13069_v48, %v7155_v49  ;;  %v13071_v5 = vld [vmem:[#allocation88_spill] sm:$0xff]  ;;  %v13073_v45 = vld [vmem:[#allocation90_spill] sm:$0xff] }
 0x232   :  { %13064 = vst [vmem:[#allocation143_spill] sm:$0xff] %v7439_v0  ;;  %13066 = vst [vmem:[#allocation144_spill] sm:$0xff] %v7443_v62  ;;  %v7455_v9 = vsub.f32 %v13071_v5, %v7155_v49  ;;  %v7459_v7 = vsub.f32 %v13073_v45, %v7155_v49  ;;  %v13075_v0 = vld [vmem:[#allocation93_spill] sm:$0xff]  ;;  %v13077_v62 = vld [vmem:[#allocation95_spill] sm:$0xff] }
 0x233   :  { %13068 = vst [vmem:[#allocation145_spill] sm:$0xff] %v7447_v47  ;;  %13070 = vst [vmem:[#allocation146_spill] sm:$0xff] %v7451_v42  ;;  %v7463_v4 = vsub.f32 %v13075_v0, %v7155_v49  ;;  %v7467_v2 = vsub.f32 %v13077_v62, %v7155_v49  ;;  %v13079_v47 = vld [vmem:[#allocation92_spill] sm:$0xff]  ;;  %v13081_v42 = vld [vmem:[#allocation94_spill] sm:$0xff] }
 0x234   :  { %13072 = vst [vmem:[#allocation147_spill] sm:$0xff] %v7455_v9  ;;  %13074 = vst [vmem:[#allocation148_spill] sm:$0xff] %v7459_v7  ;;  %v7471_v48 = vsub.f32 %v13079_v47, %v7155_v49  ;;  %v7475_v5 = vsub.f32 %v13081_v42, %v7155_v49  ;;  %v13083_v9 = vld [vmem:[#allocation97_spill] sm:$0xff]  ;;  %v13085_v7 = vld [vmem:[#allocation99_spill] sm:$0xff] }
 0x235   :  { %13076 = vst [vmem:[#allocation149_spill] sm:$0xff] %v7463_v4  ;;  %13078 = vst [vmem:[#allocation150_spill] sm:$0xff] %v7467_v2  ;;  %v7479_v45 = vsub.f32 %v13083_v9, %v7155_v49  ;;  %v7483_v0 = vsub.f32 %v13085_v7, %v7155_v49  ;;  %v13087_v4 = vld [vmem:[#allocation96_spill] sm:$0xff]  ;;  %v13089_v2 = vld [vmem:[#allocation98_spill] sm:$0xff] }
 0x236   :  { %13080 = vst [vmem:[#allocation151_spill] sm:$0xff] %v7471_v48  ;;  %13082 = vst [vmem:[#allocation152_spill] sm:$0xff] %v7475_v5  ;;  %v7487_v62 = vsub.f32 %v13087_v4, %v7155_v49  ;;  %v7491_v47 = vsub.f32 %v13089_v2, %v7155_v49  ;;  %v13091_v48 = vld [vmem:[#allocation101_spill] sm:$0xff]  ;;  %v13093_v5 = vld [vmem:[#allocation103_spill] sm:$0xff] }
 0x237   :  { %13084 = vst [vmem:[#allocation153_spill] sm:$0xff] %v7479_v45  ;;  %13086 = vst [vmem:[#allocation154_spill] sm:$0xff] %v7483_v0  ;;  %v7495_v42 = vsub.f32 %v13091_v48, %v7155_v49  ;;  %v7499_v9 = vsub.f32 %v13093_v5, %v7155_v49  ;;  %v13095_v45 = vld [vmem:[#allocation100_spill] sm:$0xff]  ;;  %v13097_v0 = vld [vmem:[#allocation102_spill] sm:$0xff] }
 0x238   :  { %13088 = vst [vmem:[#allocation155_spill] sm:$0xff] %v7487_v62  ;;  %13090 = vst [vmem:[#allocation156_spill] sm:$0xff] %v7491_v47  ;;  %v7503_v7 = vsub.f32 %v13095_v45, %v7155_v49  ;;  %v7507_v4 = vsub.f32 %v13097_v0, %v7155_v49  ;;  %v13099_v62 = vld [vmem:[#allocation105_spill] sm:$0xff]  ;;  %v13101_v47 = vld [vmem:[#allocation107_spill] sm:$0xff] }
 0x239   :  { %13092 = vst [vmem:[#allocation157_spill] sm:$0xff] %v7495_v42  ;;  %13094 = vst [vmem:[#allocation158_spill] sm:$0xff] %v7499_v9  ;;  %v7511_v2 = vsub.f32 %v13099_v62, %v7155_v49  ;;  %v7515_v48 = vsub.f32 %v13101_v47, %v7155_v49  ;;  %v13103_v42 = vld [vmem:[#allocation104_spill] sm:$0xff]  ;;  %v13105_v9 = vld [vmem:[#allocation106_spill] sm:$0xff] }
 0x23a   :  { %13096 = vst [vmem:[#allocation159_spill] sm:$0xff] %v7503_v7  ;;  %13098 = vst [vmem:[#allocation160_spill] sm:$0xff] %v7507_v4  ;;  %v7519_v5 = vsub.f32 %v13103_v42, %v7155_v49  ;;  %v7523_v45 = vsub.f32 %v13105_v9, %v7155_v49  ;;  %v13107_v7 = vld [vmem:[#allocation109_spill] sm:$0xff]  ;;  %v13109_v4 = vld [vmem:[#allocation111_spill] sm:$0xff] }
 0x23b   :  { %13100 = vst [vmem:[#allocation161_spill] sm:$0xff] %v7511_v2  ;;  %13102 = vst [vmem:[#allocation162_spill] sm:$0xff] %v7515_v48  ;;  %v7527_v0 = vsub.f32 %v13107_v7, %v7155_v49  ;;  %v7531_v62 = vsub.f32 %v13109_v4, %v7155_v49  ;;  %v13111_v2 = vld [vmem:[#allocation108_spill] sm:$0xff]  ;;  %v13113_v48 = vld [vmem:[#allocation110_spill] sm:$0xff] }
 0x23c   :  { %13104 = vst [vmem:[#allocation163_spill] sm:$0xff] %v7519_v5  ;;  %13106 = vst [vmem:[#allocation164_spill] sm:$0xff] %v7523_v45  ;;  %v7535_v47 = vsub.f32 %v13111_v2, %v7155_v49  ;;  %v7539_v42 = vsub.f32 %v13113_v48, %v7155_v49  ;;  %v13115_v5 = vld [vmem:[#allocation113_spill] sm:$0xff]  ;;  %v13117_v45 = vld [vmem:[#allocation115_spill] sm:$0xff] }
 0x23d   :  { %13108 = vst [vmem:[#allocation165_spill] sm:$0xff] %v7527_v0  ;;  %13110 = vst [vmem:[#allocation166_spill] sm:$0xff] %v7531_v62  ;;  %v7543_v9 = vsub.f32 %v13115_v5, %v7155_v49  ;;  %v7547_v7 = vsub.f32 %v13117_v45, %v7155_v49  ;;  %v13119_v0 = vld [vmem:[#allocation112_spill] sm:$0xff]  ;;  %v13121_v62 = vld [vmem:[#allocation114_spill] sm:$0xff] }
 0x23e   :  { %13112 = vst [vmem:[#allocation167_spill] sm:$0xff] %v7535_v47  ;;  %13114 = vst [vmem:[#allocation168_spill] sm:$0xff] %v7539_v42  ;;  %v7551_v4 = vsub.f32 %v13119_v0, %v7155_v49  ;;  %v7555_v2 = vsub.f32 %v13121_v62, %v7155_v49  ;;  %v13123_v47 = vld [vmem:[#allocation117_spill] sm:$0xff]  ;;  %v13125_v42 = vld [vmem:[#allocation119_spill] sm:$0xff] }
 0x23f   :  { %13116 = vst [vmem:[#allocation169_spill] sm:$0xff] %v7543_v9  ;;  %13118 = vst [vmem:[#allocation170_spill] sm:$0xff] %v7547_v7  ;;  %v7559_v48 = vsub.f32 %v13123_v47, %v7155_v49  ;;  %v7563_v5 = vsub.f32 %v13125_v42, %v7155_v49  ;;  %v13127_v9 = vld [vmem:[#allocation116_spill] sm:$0xff]  ;;  %v13128_v7 = vld [vmem:[#allocation118_spill] sm:$0xff] }
 0x240   :  { %13120 = vst [vmem:[#allocation171_spill] sm:$0xff] %v7551_v4  ;;  %13122 = vst [vmem:[#allocation172_spill] sm:$0xff] %v7555_v2  ;;  %v7567_v45 = vsub.f32 %v13127_v9, %v7155_v49  ;;  %v7571_v0 = vsub.f32 %v13128_v7, %v7155_v49  ;;  %v13129_v4 = vld [vmem:[#allocation121_spill] sm:$0xff]  ;;  %v13130_v2 = vld [vmem:[#allocation123_spill] sm:$0xff]  ;;  %v7591_v7 = vmul.f32 %v7159_v58, %v7159_v58 }
 0x241   :  { %13124 = vst [vmem:[#allocation173_spill] sm:$0xff] %v7559_v48  ;;  %13126 = vst [vmem:[#allocation174_spill] sm:$0xff] %v7563_v5  ;;  %v7575_v62 = vsub.f32 %v13129_v4, %v7155_v49  ;;  %v7579_v47 = vsub.f32 %v13130_v2, %v7155_v49  ;;  %v13131_v48 = vld [vmem:[#allocation120_spill] sm:$0xff]  ;;  %v13132_v5 = vld [vmem:[#allocation122_spill] sm:$0xff]  ;;  %v7595_v4 = vmul.f32 %v7163_v60, %v7163_v60 }
 0x242   :  { %v7583_v42 = vsub.f32 %v13131_v48, %v7155_v49  ;;  %v7587_v9 = vsub.f32 %v13132_v5, %v7155_v49  ;;  %v7599_v2 = vmul.f32 %v7167_v52, %v7167_v52  ;;  %v7603_v48 = vmul.f32 %v7171_v43, %v7171_v43  ;;  %v13161_v5 = vld [vmem:[#allocation125_spill] sm:$0xff] }
 0x243   :  { %v7607_v49 = vmul.f32 %v7175_v56, %v7175_v56  ;;  %v7611_v58 = vmul.f32 %v7179_v54, %v7179_v54  ;;  %v7615_v60 = vmul.f32 %v7183_v63, %v7183_v63  ;;  %v7619_v52 = vmul.f32 %v7187_v57, %v7187_v57 }
 0x244   :  { %v7623_v43 = vmul.f32 %v7191_v50, %v7191_v50  ;;  %v7627_v56 = vmul.f32 %v7195_v3, %v7195_v3  ;;  %v7631_v54 = vmul.f32 %v7199_v44, %v7199_v44  ;;  %v7635_v63 = vmul.f32 %v7203_v59, %v7203_v59 }
 0x245   :  { %v7639_v57 = vmul.f32 %v7207_v55, %v7207_v55  ;;  %v7643_v50 = vmul.f32 %v7211_v1, %v7211_v1  ;;  %v7647_v3 = vmul.f32 %v7215_v13, %v7215_v13  ;;  %v7651_v44 = vmul.f32 %v7219_v51, %v7219_v51 }
 0x246   :  { %v7655_v59 = vmul.f32 %v7223_v46, %v7223_v46  ;;  %v7659_v55 = vmul.f32 %v7227_v61, %v7227_v61  ;;  %v7663_v1 = vmul.f32 %v7231_v53, %v7231_v53  ;;  %v7667_v13 = vmul.f32 %v7235_v10, %v7235_v10 }
 0x247   :  { %v7671_v51 = vmul.f32 %v7239_v12, %v7239_v12  ;;  %v7675_v46 = vmul.f32 %v7243_v15, %v7243_v15  ;;  %v7679_v61 = vmul.f32 %v7247_v17, %v7247_v17  ;;  %v7683_v53 = vmul.f32 %v7251_v14, %v7251_v14 }
 0x248   :  { %v7687_v10 = vmul.f32 %v7255_v16, %v7255_v16  ;;  %v7691_v12 = vmul.f32 %v7259_v19, %v7259_v19  ;;  %v7695_v15 = vmul.f32 %v7263_v21, %v7263_v21  ;;  %v7699_v17 = vmul.f32 %v7267_v18, %v7267_v18 }
 0x249   :  { %v7703_v14 = vmul.f32 %v7271_v20, %v7271_v20  ;;  %v7707_v16 = vmul.f32 %v7275_v23, %v7275_v23  ;;  %v7711_v19 = vmul.f32 %v7279_v25, %v7279_v25  ;;  %v7715_v21 = vmul.f32 %v7283_v22, %v7283_v22 }
 0x24a   :  { %13133 = vst [vmem:[#allocation175_spill] sm:$0xff] %v7687_v10  ;;  %13134 = vst [vmem:[#allocation176_spill] sm:$0xff] %v7691_v12  ;;  %v7719_v18 = vmul.f32 %v7287_v24, %v7287_v24  ;;  %v7723_v20 = vmul.f32 %v7291_v27, %v7291_v27  ;;  %v7727_v23 = vmul.f32 %v7295_v29, %v7295_v29  ;;  %v13196_v12 = vld [vmem:[#allocation154_spill] sm:$0xff]  ;;  %v13198_v10 = vld [vmem:[#allocation155_spill] sm:$0xff] }
 0x24b   :  { %13135 = vst [vmem:[#allocation177_spill] sm:$0xff] %v7695_v15  ;;  %13136 = vst [vmem:[#allocation178_spill] sm:$0xff] %v7699_v17  ;;  %v7731_v25 = vmul.f32 %v7299_v26, %v7299_v26  ;;  %v7735_v22 = vmul.f32 %v7303_v28, %v7303_v28  ;;  %v7739_v24 = vmul.f32 %v7307_v31, %v7307_v31  ;;  %v13192_v17 = vld [vmem:[#allocation152_spill] sm:$0xff]  ;;  %v13194_v15 = vld [vmem:[#allocation153_spill] sm:$0xff] }
 0x24c   :  { %13137 = vst [vmem:[#allocation179_spill] sm:$0xff] %v7703_v14  ;;  %13138 = vst [vmem:[#allocation180_spill] sm:$0xff] %v7707_v16  ;;  %v7743_v27 = vmul.f32 %v7311_v33, %v7311_v33  ;;  %v7747_v29 = vmul.f32 %v7315_v30, %v7315_v30  ;;  %v7751_v26 = vmul.f32 %v7319_v32, %v7319_v32  ;;  %v13188_v16 = vld [vmem:[#allocation150_spill] sm:$0xff]  ;;  %v13190_v14 = vld [vmem:[#allocation151_spill] sm:$0xff] }
 0x24d   :  { %13139 = vst [vmem:[#allocation181_spill] sm:$0xff] %v7711_v19  ;;  %13140 = vst [vmem:[#allocation182_spill] sm:$0xff] %v7715_v21  ;;  %v7755_v28 = vmul.f32 %v7323_v35, %v7323_v35  ;;  %v7759_v31 = vmul.f32 %v7327_v37, %v7327_v37  ;;  %v7763_v33 = vmul.f32 %v7331_v34, %v7331_v34  ;;  %v13186_v21 = vld [vmem:[#allocation148_spill] sm:$0xff]  ;;  %v13187_v19 = vld [vmem:[#allocation149_spill] sm:$0xff] }
 0x24e   :  { %13141 = vst [vmem:[#allocation183_spill] sm:$0xff] %v7719_v18  ;;  %13142 = vst [vmem:[#allocation184_spill] sm:$0xff] %v7723_v20  ;;  %v7767_v30 = vmul.f32 %v7335_v36, %v7335_v36  ;;  %v7771_v32 = vmul.f32 %v7339_v39, %v7339_v39  ;;  %v7775_v35 = vmul.f32 %v7343_v41, %v7343_v41  ;;  %v13185_v18 = vld [vmem:[#allocation147_spill] sm:$0xff] }
 0x24f   :  { %13143 = vst [vmem:[#allocation185_spill] sm:$0xff] %v7727_v23  ;;  %13144 = vst [vmem:[#allocation186_spill] sm:$0xff] %v7731_v25  ;;  %v7779_v37 = vmul.f32 %v7347_v38, %v7347_v38  ;;  %v7783_v34 = vmul.f32 %v7351_v40, %v7351_v40  ;;  %v7787_v36 = vmul.f32 %v7355_v11, %v7355_v11  ;;  %v13182_v23 = vld [vmem:[#allocation144_spill] sm:$0xff] }
 0x250   :  { %13145 = vst [vmem:[#allocation187_spill] sm:$0xff] %v7735_v22  ;;  %13146 = vst [vmem:[#allocation188_spill] sm:$0xff] %v7739_v24  ;;  %v7791_v39 = vmul.f32 %v7359_v8, %v7359_v8  ;;  %v7795_v41 = vmul.f32 %v7363_v6, %v7363_v6  ;;  %v7799_v38 = vmul.f32 %v13161_v5, %v13161_v5  ;;  %v13167_v8 = vld [vmem:[#allocation129_spill] sm:$0xff]  ;;  %v13178_v24 = vld [vmem:[#allocation140_spill] sm:$0xff] }
 0x251   :  { %13147 = vst [vmem:[#allocation189_spill] sm:$0xff] %v7743_v27  ;;  %13148 = vst [vmem:[#allocation190_spill] sm:$0xff] %v7747_v29  ;;  %v13176_v29 = vld [vmem:[#allocation138_spill] sm:$0xff]  ;;  %v13177_v27 = vld [vmem:[#allocation139_spill] sm:$0xff] }
 0x252   :  { %13149 = vst [vmem:[#allocation191_spill] sm:$0xff] %v7751_v26  ;;  %13150 = vst [vmem:[#allocation192_spill] sm:$0xff] %v7755_v28  ;;  %v13174_v28 = vld [vmem:[#allocation136_spill] sm:$0xff]  ;;  %v13175_v26 = vld [vmem:[#allocation137_spill] sm:$0xff] }
 0x253   :  { %13151 = vst [vmem:[#allocation193_spill] sm:$0xff] %v7759_v31  ;;  %13152 = vst [vmem:[#allocation194_spill] sm:$0xff] %v7763_v33  ;;  %v13172_v33 = vld [vmem:[#allocation134_spill] sm:$0xff]  ;;  %v13173_v31 = vld [vmem:[#allocation135_spill] sm:$0xff] }
 0x254   :  { %13153 = vst [vmem:[#allocation195_spill] sm:$0xff] %v7767_v30  ;;  %13154 = vst [vmem:[#allocation196_spill] sm:$0xff] %v7771_v32  ;;  %v13168_v32 = vld [vmem:[#allocation130_spill] sm:$0xff]  ;;  %v13179_v22 = vld [vmem:[#allocation141_spill] sm:$0xff] }
 0x255   :  { %13155 = vst [vmem:[#allocation197_spill] sm:$0xff] %v7775_v35  ;;  %13156 = vst [vmem:[#allocation198_spill] sm:$0xff] %v7779_v37  ;;  %v13163_v37 = vld [vmem:[#allocation126_spill] sm:$0xff]  ;;  %v1429_v6 = vmul.f32 %v13168_v32, %v13168_v32  ;;  %v1436_v32 = vmul.f32 %v13175_v26, %v13175_v26 }
 0x256   :  { %13157 = vst [vmem:[#allocation199_spill] sm:$0xff] %v7783_v34  ;;  %13158 = vst [vmem:[#allocation200_spill] sm:$0xff] %v7787_v36  ;;  %v7803_v40 = vmul.f32 %v13163_v37, %v13163_v37  ;;  %v13165_v34 = vld [vmem:[#allocation127_spill] sm:$0xff]  ;;  %v13166_v36 = vld [vmem:[#allocation128_spill] sm:$0xff] }
 0x257   :  { %13159 = vst [vmem:[#allocation201_spill] sm:$0xff] %v7791_v39  ;;  %13160 = vst [vmem:[#allocation202_spill] sm:$0xff] %v7795_v41  ;;  %v1426_v11 = vmul.f32 %v13165_v34, %v13165_v34  ;;  %v1427_v35 = vmul.f32 %v13166_v36, %v13166_v36  ;;  %v1428_v39 = vmul.f32 %v13167_v8, %v13167_v8  ;;  %v13169_v41 = vld [vmem:[#allocation131_spill] sm:$0xff]  ;;  %v13171_v37 = vld [vmem:[#allocation133_spill] sm:$0xff] }
 0x258   :  { %13162 = vst [vmem:[#allocation125_spill] sm:$0xff] %v7799_v38  ;;  %13164 = vst [vmem:[#allocation126_spill] sm:$0xff] %v7803_v40  ;;  %v1430_v5 = vmul.f32 %v13169_v41, %v13169_v41  ;;  %v13170_v38 = vld [vmem:[#allocation132_spill] sm:$0xff]  ;;  %v1432_v40 = vmul.f32 %v13171_v37, %v13171_v37  ;;  %v1433_v34 = vmul.f32 %v13172_v33, %v13172_v33 }
 0x259   :  { %v1431_v30 = vmul.f32 %v13170_v38, %v13170_v38  ;;  %v1434_v36 = vmul.f32 %v13173_v31, %v13173_v31  ;;  %v1435_v8 = vmul.f32 %v13174_v28, %v13174_v28  ;;  %v1437_v41 = vmul.f32 %v13176_v29, %v13176_v29  ;;  %v13180_v31 = vld [vmem:[#allocation142_spill] sm:$0xff]  ;;  %v13181_v28 = vld [vmem:[#allocation143_spill] sm:$0xff] }
 0x25a   :  { %v1438_v38 = vmul.f32 %v13177_v27, %v13177_v27  ;;  %v1439_v37 = vmul.f32 %v13178_v24, %v13178_v24  ;;  %v7835_v33 = vmul.f32 %v13179_v22, %v13179_v22  ;;  %v7839_v25 = vmul.f32 %v13180_v31, %v13180_v31  ;;  %v13183_v27 = vld [vmem:[#allocation145_spill] sm:$0xff]  ;;  %v13184_v24 = vld [vmem:[#allocation146_spill] sm:$0xff] }
 0x25b   :  { %v7843_v26 = vmul.f32 %v13181_v28, %v13181_v28  ;;  %v7847_v29 = vmul.f32 %v13182_v23, %v13182_v23  ;;  %v7851_v20 = vmul.f32 %v13183_v27, %v13183_v27  ;;  %v7855_v22 = vmul.f32 %v13184_v24, %v13184_v24 }
 0x25c   :  { %v7859_v31 = vmul.f32 %v13185_v18, %v13185_v18  ;;  %v7863_v28 = vmul.f32 %v13186_v21, %v13186_v21  ;;  %v7867_v23 = vmul.f32 %v13187_v19, %v13187_v19  ;;  %v7871_v27 = vmul.f32 %v13188_v16, %v13188_v16 }
 0x25d   :  { %v7875_v24 = vmul.f32 %v13190_v14, %v13190_v14  ;;  %v7879_v18 = vmul.f32 %v13192_v17, %v13192_v17  ;;  %v7883_v21 = vmul.f32 %v13194_v15, %v13194_v15  ;;  %v7887_v19 = vmul.f32 %v13196_v12, %v13196_v12 }
 0x25e   :  { %13189 = vst [vmem:[#allocation127_spill] sm:$0xff] %v7871_v27  ;;  %v7891_v16 = vmul.f32 %v13198_v10, %v13198_v10  ;;  %v13200_v27 = vld [vmem:[#allocation156_spill] sm:$0xff] }
 0x25f   :  { %13191 = vst [vmem:[#allocation128_spill] sm:$0xff] %v7875_v24  ;;  %13193 = vst [vmem:[#allocation129_spill] sm:$0xff] %v7879_v18  ;;  %v7895_v14 = vmul.f32 %v13200_v27, %v13200_v27  ;;  %v13202_v24 = vld [vmem:[#allocation157_spill] sm:$0xff]  ;;  %v13204_v18 = vld [vmem:[#allocation158_spill] sm:$0xff] }
 0x260   :  { %13195 = vst [vmem:[#allocation130_spill] sm:$0xff] %v7883_v21  ;;  %13197 = vst [vmem:[#allocation131_spill] sm:$0xff] %v7887_v19  ;;  %v7899_v17 = vmul.f32 %v13202_v24, %v13202_v24  ;;  %v7903_v15 = vmul.f32 %v13204_v18, %v13204_v18  ;;  %v13206_v21 = vld [vmem:[#allocation159_spill] sm:$0xff]  ;;  %v13208_v19 = vld [vmem:[#allocation160_spill] sm:$0xff] }
 0x261   :  { %13199 = vst [vmem:[#allocation132_spill] sm:$0xff] %v7891_v16  ;;  %13201 = vst [vmem:[#allocation133_spill] sm:$0xff] %v7895_v14  ;;  %v7907_v12 = vmul.f32 %v13206_v21, %v13206_v21  ;;  %v7911_v10 = vmul.f32 %v13208_v19, %v13208_v19  ;;  %v13210_v16 = vld [vmem:[#allocation161_spill] sm:$0xff]  ;;  %v13212_v14 = vld [vmem:[#allocation162_spill] sm:$0xff] }
 0x262   :  { %13203 = vst [vmem:[#allocation134_spill] sm:$0xff] %v7899_v17  ;;  %13205 = vst [vmem:[#allocation135_spill] sm:$0xff] %v7903_v15  ;;  %v7915_v27 = vmul.f32 %v13210_v16, %v13210_v16  ;;  %v7919_v24 = vmul.f32 %v13212_v14, %v13212_v14  ;;  %v13214_v17 = vld [vmem:[#allocation163_spill] sm:$0xff]  ;;  %v13216_v15 = vld [vmem:[#allocation164_spill] sm:$0xff] }
 0x263   :  { %13207 = vst [vmem:[#allocation136_spill] sm:$0xff] %v7907_v12  ;;  %13209 = vst [vmem:[#allocation137_spill] sm:$0xff] %v7911_v10  ;;  %v7923_v18 = vmul.f32 %v13214_v17, %v13214_v17  ;;  %v7927_v21 = vmul.f32 %v13216_v15, %v13216_v15  ;;  %v13218_v12 = vld [vmem:[#allocation165_spill] sm:$0xff]  ;;  %v13220_v10 = vld [vmem:[#allocation166_spill] sm:$0xff] }
 0x264   :  { %13211 = vst [vmem:[#allocation138_spill] sm:$0xff] %v7915_v27  ;;  %13213 = vst [vmem:[#allocation139_spill] sm:$0xff] %v7919_v24  ;;  %v7931_v19 = vmul.f32 %v13218_v12, %v13218_v12  ;;  %v7935_v16 = vmul.f32 %v13220_v10, %v13220_v10  ;;  %v13222_v27 = vld [vmem:[#allocation167_spill] sm:$0xff]  ;;  %v13224_v24 = vld [vmem:[#allocation168_spill] sm:$0xff] }
 0x265   :  { %13215 = vst [vmem:[#allocation140_spill] sm:$0xff] %v7923_v18  ;;  %13217 = vst [vmem:[#allocation141_spill] sm:$0xff] %v7927_v21  ;;  %v7939_v14 = vmul.f32 %v13222_v27, %v13222_v27  ;;  %v7943_v17 = vmul.f32 %v13224_v24, %v13224_v24  ;;  %v13226_v18 = vld [vmem:[#allocation169_spill] sm:$0xff]  ;;  %v13227_v21 = vld [vmem:[#allocation170_spill] sm:$0xff] }
 0x266   :  { %13219 = vst [vmem:[#allocation142_spill] sm:$0xff] %v7931_v19  ;;  %13221 = vst [vmem:[#allocation143_spill] sm:$0xff] %v7935_v16  ;;  %v7947_v15 = vmul.f32 %v13226_v18, %v13226_v18  ;;  %v7951_v12 = vmul.f32 %v13227_v21, %v13227_v21  ;;  %v13228_v19 = vld [vmem:[#allocation171_spill] sm:$0xff]  ;;  %v13229_v16 = vld [vmem:[#allocation172_spill] sm:$0xff]  ;;  %v7971_v21 = vmul.f32 %v7567_v45, %v7567_v45 }
 0x267   :  { %13223 = vst [vmem:[#allocation144_spill] sm:$0xff] %v7939_v14  ;;  %13225 = vst [vmem:[#allocation145_spill] sm:$0xff] %v7943_v17  ;;  %v7955_v10 = vmul.f32 %v13228_v19, %v13228_v19  ;;  %v7959_v27 = vmul.f32 %v13229_v16, %v13229_v16  ;;  %v13230_v14 = vld [vmem:[#allocation173_spill] sm:$0xff]  ;;  %v13231_v17 = vld [vmem:[#allocation174_spill] sm:$0xff]  ;;  %v7975_v19 = vmul.f32 %v7571_v0, %v7571_v0 }
 0x268   :  { %v7963_v24 = vmul.f32 %v13230_v14, %v13230_v14  ;;  %v7967_v18 = vmul.f32 %v13231_v17, %v13231_v17  ;;  %13232 = vst [vmem:[#allocation146_spill] sm:$0xff] %v7971_v21  ;;  %v7979_v16 = vmul.f32 %v7575_v62, %v7575_v62  ;;  %v7983_v14 = vmul.f32 %v7579_v47, %v7579_v47 }
 0x269   :  { %v7987_v17 = vmul.f32 %v7583_v42, %v7583_v42  ;;  %v7991_v45 = vmul.f32 %v7587_v9, %v7587_v9  ;;  %v7994_v21 = vadd.f32 %v1426_v11, %v7591_v7  ;;  %v7997_v0 = vadd.f32 %v1427_v35, %v7595_v4 }
 0x26a   :  { %13233 = vst [vmem:[#allocation147_spill] sm:$0xff] %v7983_v14  ;;  %v1482_v62 = vsel %vm1037_vm0, %v7599_v2, 0.0  ;;  %v1483_v47 = vsel %vm1037_vm0, %v1428_v39, 0.0  ;;  %v8005_v42 = vadd.f32 %v1429_v6, %v7603_v48  ;;  %v1487_v7 = vsel %vm1037_vm0, %v7611_v58, 0.0 }
 0x26b   :  { %13234 = vst [vmem:[#allocation148_spill] sm:$0xff] %v7987_v17  ;;  %v8002_v14 = vadd.f32 %v1483_v47, %v1482_v62  ;;  %v8008_v17 = vadd.f32 %v1430_v5, %v7607_v49  ;;  %v1488_v9 = vsel %vm1037_vm0, %v1431_v30, 0.0  ;;  %v8014_v4 = vadd.f32 %v1432_v40, %v7615_v60  ;;  %v13244_v62 = vld [vmem:[#allocation179_spill] sm:$0xff]  ;;  %v13245_v47 = vld [vmem:[#allocation132_spill] sm:$0xff] }
 0x26c   :  { %v8017_v2 = vadd.f32 %v1433_v34, %v7619_v52  ;;  %v1492_v35 = vsel %vm1037_vm0, %v7623_v43, 0.0  ;;  %v8021_v39 = vadd.f32 %v1488_v9, %v1487_v7  ;;  %v1493_v48 = vsel %vm1037_vm0, %v1434_v36, 0.0  ;;  %v13235_v36 = vld [vmem:[#allocation127_spill] sm:$0xff]  ;;  %v13246_v9 = vld [vmem:[#allocation180_spill] sm:$0xff] }
 0x26d   :  { %v8025_v49 = vadd.f32 %v1435_v8, %v7627_v56  ;;  %v8028_v58 = vadd.f32 %v1436_v32, %v7631_v54  ;;  %v8030_v30 = vadd.f32 %v1493_v48, %v1492_v35  ;;  %v1497_v60 = vsel %vm1037_vm0, %v7635_v63, 0.0  ;;  %v13236_v8 = vld [vmem:[#allocation175_spill] sm:$0xff]  ;;  %v13237_v32 = vld [vmem:[#allocation128_spill] sm:$0xff]  ;;  %v13247_v48 = vld [vmem:[#allocation133_spill] sm:$0xff] }
 0x26e   :  { %v1498_v52 = vsel %vm1037_vm0, %v1437_v41, 0.0  ;;  %v8036_v40 = vadd.f32 %v1438_v38, %v7639_v57  ;;  %v8041_v11 = vadd.f32 %v1439_v37, %v7643_v50  ;;  %v1502_v56 = vsel %vm1037_vm0, %v7647_v3, 0.0  ;;  %v13239_v37 = vld [vmem:[#allocation129_spill] sm:$0xff] }
 0x26f   :  { %v8038_v43 = vadd.f32 %v1498_v52, %v1497_v60  ;;  %v1503_v54 = vsel %vm1037_vm0, %v7835_v33, 0.0  ;;  %v8051_v63 = vadd.f32 %v7839_v25, %v7651_v44  ;;  %v8055_v57 = vadd.f32 %v7843_v26, %v7655_v59  ;;  %v13248_v52 = vld [vmem:[#allocation181_spill] sm:$0xff] }
 0x270   :  { %v8047_v6 = vadd.f32 %v1503_v54, %v1502_v56  ;;  %v1507_v50 = vsel %vm1037_vm0, %v7659_v55, 0.0  ;;  %v1508_v5 = vsel %vm1037_vm0, %v7847_v29, 0.0  ;;  %v8063_v3 = vadd.f32 %v7851_v20, %v7663_v1  ;;  %v13241_v29 = vld [vmem:[#allocation130_spill] sm:$0xff] }
 0x271   :  { %v8067_v34 = vadd.f32 %v7855_v22, %v7667_v13  ;;  %v1512_v44 = vsel %vm1037_vm0, %v7671_v51, 0.0  ;;  %v8071_v25 = vadd.f32 %v1508_v5, %v1507_v50  ;;  %v1513_v59 = vsel %vm1037_vm0, %v7859_v31, 0.0  ;;  %v13242_v31 = vld [vmem:[#allocation178_spill] sm:$0xff]  ;;  %v13251_v5 = vld [vmem:[#allocation135_spill] sm:$0xff] }
 0x272   :  { %v8077_v55 = vadd.f32 %v7863_v28, %v7675_v46  ;;  %v8081_v1 = vadd.f32 %v7867_v23, %v7679_v61  ;;  %v8083_v20 = vadd.f32 %v1513_v59, %v1512_v44  ;;  %v1517_v13 = vsel %vm1037_vm0, %v7683_v53, 0.0  ;;  %v13238_v46 = vld [vmem:[#allocation176_spill] sm:$0xff]  ;;  %v13240_v61 = vld [vmem:[#allocation177_spill] sm:$0xff]  ;;  %v13243_v28 = vld [vmem:[#allocation131_spill] sm:$0xff] }
 0x273   :  { %v1518_v51 = vsel %vm1037_vm0, %v13235_v36, 0.0  ;;  %v8091_v41 = vadd.f32 %v13237_v32, %v13236_v8  ;;  %v8097_v33 = vadd.f32 %v13239_v37, %v13238_v46  ;;  %v1522_v26 = vsel %vm1037_vm0, %v13240_v61, 0.0  ;;  %v13249_v56 = vld [vmem:[#allocation134_spill] sm:$0xff]  ;;  %v13252_v59 = vld [vmem:[#allocation183_spill] sm:$0xff]  ;;  %v13254_v32 = vld [vmem:[#allocation184_spill] sm:$0xff] }
 0x274   :  { %v8093_v38 = vadd.f32 %v1518_v51, %v1517_v13  ;;  %v1523_v22 = vsel %vm1037_vm0, %v13241_v29, 0.0  ;;  %v8107_v23 = vadd.f32 %v13243_v28, %v13242_v31  ;;  %v8111_v7 = vadd.f32 %v13245_v47, %v13244_v62  ;;  %v13250_v50 = vld [vmem:[#allocation182_spill] sm:$0xff]  ;;  %v13253_v51 = vld [vmem:[#allocation136_spill] sm:$0xff]  ;;  %v13255_v46 = vld [vmem:[#allocation137_spill] sm:$0xff] }
 0x275   :  { %v8103_v53 = vadd.f32 %v1523_v22, %v1522_v26  ;;  %v1527_v35 = vsel %vm1037_vm0, %v13246_v9, 0.0  ;;  %v1528_v60 = vsel %vm1037_vm0, %v13247_v48, 0.0  ;;  %v8119_v54 = vadd.f32 %v13249_v56, %v13248_v52  ;;  %v13256_v61 = vld [vmem:[#allocation185_spill] sm:$0xff]  ;;  %v13257_v26 = vld [vmem:[#allocation138_spill] sm:$0xff]  ;;  %v13259_v62 = vld [vmem:[#allocation139_spill] sm:$0xff] }
 0x276   :  { %v8123_v44 = vadd.f32 %v13251_v5, %v13250_v50  ;;  %v1532_v13 = vsel %vm1037_vm0, %v13252_v59, 0.0  ;;  %v8127_v36 = vadd.f32 %v1528_v60, %v1527_v35  ;;  %v1533_v8 = vsel %vm1037_vm0, %v13253_v51, 0.0  ;;  %v13258_v31 = vld [vmem:[#allocation186_spill] sm:$0xff]  ;;  %v13260_v9 = vld [vmem:[#allocation187_spill] sm:$0xff]  ;;  %v13261_v35 = vld [vmem:[#allocation140_spill] sm:$0xff] }
 0x277   :  { %v8133_v37 = vadd.f32 %v13255_v46, %v13254_v32  ;;  %v8137_v29 = vadd.f32 %v13257_v26, %v13256_v61  ;;  %v8139_v22 = vadd.f32 %v1533_v8, %v1532_v13  ;;  %v1537_v28 = vsel %vm1037_vm0, %v13258_v31, 0.0  ;;  %v13262_v52 = vld [vmem:[#allocation188_spill] sm:$0xff]  ;;  %v13263_v56 = vld [vmem:[#allocation141_spill] sm:$0xff]  ;;  %v13265_v13 = vld [vmem:[#allocation142_spill] sm:$0xff] }
 0x278   :  { %v1538_v47 = vsel %vm1037_vm0, %v13259_v62, 0.0  ;;  %v8147_v48 = vadd.f32 %v13261_v35, %v13260_v9  ;;  %v8153_v50 = vadd.f32 %v13263_v56, %v13262_v52  ;;  %v13264_v5 = vld [vmem:[#allocation189_spill] sm:$0xff]  ;;  %v1543_v51 = vsel %vm1037_vm0, %v13265_v13, 0.0  ;;  %v13266_v32 = vld [vmem:[#allocation190_spill] sm:$0xff]  ;;  %v13267_v46 = vld [vmem:[#allocation143_spill] sm:$0xff] }
 0x279   :  { %v8149_v60 = vadd.f32 %v1538_v47, %v1537_v28  ;;  %v1542_v59 = vsel %vm1037_vm0, %v13264_v5, 0.0  ;;  %v8163_v61 = vadd.f32 %v13267_v46, %v13266_v32  ;;  %v13268_v26 = vld [vmem:[#allocation191_spill] sm:$0xff]  ;;  %v13269_v31 = vld [vmem:[#allocation144_spill] sm:$0xff]  ;;  %v13271_v9 = vld [vmem:[#allocation145_spill] sm:$0xff]  ;;  %v1553_v46 = vsel %vm1037_vm0, %v7955_v10, 0.0 }
 0x27a   :  { %v8159_v8 = vadd.f32 %v1543_v51, %v1542_v59  ;;  %v8167_v28 = vadd.f32 %v13269_v31, %v13268_v26  ;;  %v13270_v62 = vld [vmem:[#allocation192_spill] sm:$0xff]  ;;  %v1548_v35 = vsel %vm1037_vm0, %v13271_v9, 0.0  ;;  %v13272_v52 = vld [vmem:[#allocation193_spill] sm:$0xff]  ;;  %v13273_v5 = vld [vmem:[#allocation194_spill] sm:$0xff] }
 0x27b   :  { %v1547_v47 = vsel %vm1037_vm0, %v13270_v62, 0.0  ;;  %v8175_v56 = vadd.f32 %v7947_v15, %v13272_v52  ;;  %v8179_v59 = vadd.f32 %v7951_v12, %v13273_v5  ;;  %v13274_v13 = vld [vmem:[#allocation195_spill] sm:$0xff]  ;;  %v13275_v26 = vld [vmem:[#allocation196_spill] sm:$0xff]  ;;  %v13276_v62 = vld [vmem:[#allocation197_spill] sm:$0xff] }
 0x27c   :  { %v1552_v51 = vsel %vm1037_vm0, %v13274_v13, 0.0  ;;  %v8183_v32 = vadd.f32 %v1548_v35, %v1547_v47  ;;  %v8189_v31 = vadd.f32 %v7959_v27, %v13275_v26  ;;  %v8193_v15 = vadd.f32 %v7963_v24, %v13276_v62  ;;  %v13278_v12 = vld [vmem:[#allocation198_spill] sm:$0xff]  ;;  %v13279_v35 = vld [vmem:[#allocation199_spill] sm:$0xff]  ;;  %v13281_v27 = vld [vmem:[#allocation200_spill] sm:$0xff] }
 0x27d   :  { %v8195_v9 = vadd.f32 %v1553_v46, %v1552_v51  ;;  %v1557_v52 = vsel %vm1037_vm0, %v13278_v12, 0.0  ;;  %v1558_v47 = vsel %vm1037_vm0, %v7967_v18, 0.0  ;;  %v13280_v5 = vld [vmem:[#allocation146_spill] sm:$0xff]  ;;  %v8209_v26 = vadd.f32 %v7975_v19, %v13281_v27  ;;  %v13282_v24 = vld [vmem:[#allocation201_spill] sm:$0xff]  ;;  %v13284_v18 = vld [vmem:[#allocation147_spill] sm:$0xff] }
 0x27e   :  { %13277 = vst [vmem:[#allocation149_spill] sm:$0xff] %v8193_v15  ;;  %v8203_v13 = vadd.f32 %v13280_v5, %v13279_v35  ;;  %v8205_v10 = vadd.f32 %v1558_v47, %v1557_v52  ;;  %v1562_v51 = vsel %vm1037_vm0, %v13282_v24, 0.0  ;;  %v1563_v46 = vsel %vm1037_vm0, %v7979_v16, 0.0  ;;  %v13283_v12 = vld [vmem:[#allocation202_spill] sm:$0xff]  ;;  %v13286_v35 = vld [vmem:[#allocation125_spill] sm:$0xff]  ;;  %v13287_v5 = vld [vmem:[#allocation148_spill] sm:$0xff] }
 0x27f   :  { %v8215_v62 = vadd.f32 %v1563_v46, %v1562_v51  ;;  %v8219_v15 = vadd.f32 %v13284_v18, %v13283_v12  ;;  %v8223_v52 = vadd.f32 %v13287_v5, %v13286_v35  ;;  %v13289_v47 = vld [vmem:[#allocation126_spill] sm:$0xff]  ;;  %v1568_v27 = vsel %vm1037_vm0, %v7991_v45, 0.0 }
 0x280   :  { %v1567_v19 = vsel %vm1037_vm0, %v13289_v47, 0.0  ;;  %v1570_v16 = vmul.f32 0.5, %v7994_v21  ;;  %v1571_v51 = vmul.f32 0.5, %v7997_v0  ;;  %v1572_v46 = vmul.f32 0.5, %v8002_v14 }
 0x281   :  { %13285 = vst [vmem:[#allocation150_spill] sm:$0xff] %v8219_v15  ;;  %13288 = vst [vmem:[#allocation151_spill] sm:$0xff] %v8223_v52  ;;  %v8229_v24 = vadd.f32 %v1568_v27, %v1567_v19  ;;  %v1573_v12 = vmul.f32 0.5, %v8005_v42  ;;  %v1574_v18 = vmul.f32 0.5, %v8008_v17  ;;  %v1575_v35 = vmul.f32 0.5, %v8021_v39 }
 0x282   :  { %v1578_v5 = vmul.f32 0.5, %v8030_v30  ;;  %v1576_v47 = vmul.f32 0.5, %v8014_v4  ;;  %v1577_v45 = vmul.f32 0.5, %v8017_v2  ;;  %v1581_v19 = vmul.f32 0.5, %v8038_v43 }
 0x283   :  { %v1624_v27 = vadd.f32 %v1573_v12, %v1570_v16  ;;  %v1641_v21 = vadd.f32 %v1574_v18, %v1571_v51  ;;  %v1658_v0 = vsel %vm1037_vm0, %v1572_v46, 0.0  ;;  %v1659_v14 = vsel %vm1037_vm0, %v1575_v35, 0.0  ;;  %v6459_v35 = vld [vmem:[#allocation8 + $0x80] sm:$0xff]  }
 0x284   :  { %v1579_v42 = vmul.f32 0.5, %v8025_v49  ;;  %v1580_v17 = vmul.f32 0.5, %v8028_v58  ;;  %v1660_v52 = vadd.f32 %v1659_v14, %v1658_v0  ;;  %v1584_v39 = vmul.f32 0.5, %v8047_v6 }
 0x285   :  { %v1625_v30 = vadd.f32 %v1624_v27, %v1576_v47  ;;  %v1642_v15 = vadd.f32 %v1641_v21, %v1577_v45  ;;  %v1661_v4 = vsel %vm1037_vm0, %v1578_v5, 0.0  ;;  %v1582_v2 = vmul.f32 0.5, %v8036_v40  ;;  %v6460_v47 = vld [vmem:[#allocation8] sm:$0xff]  }
 0x286   :  { %v1583_v43 = vmul.f32 0.5, %v8041_v11  ;;  %v1662_v16 = vadd.f32 %v1661_v4, %v1660_v52  ;;  %v1587_v51 = vmul.f32 0.5, %v8071_v25  ;;  %v1663_v49 = vsel %vm1037_vm0, %v1581_v19, 0.0 }
 0x287   :  { %v1626_v46 = vadd.f32 %v1625_v30, %v1579_v42  ;;  %v1643_v12 = vadd.f32 %v1642_v15, %v1580_v17  ;;  %v1585_v58 = vmul.f32 0.5, %v8051_v63  ;;  %v1586_v18 = vmul.f32 0.5, %v8055_v57 }
 0x288   :  { %v1664_v6 = vadd.f32 %v1663_v49, %v1662_v16  ;;  %v1590_v5 = vmul.f32 0.5, %v8083_v20  ;;  %v1665_v11 = vsel %vm1037_vm0, %v1584_v39, 0.0  ;;  %v1588_v52 = vmul.f32 0.5, %v8063_v3  ;;  %v6461_v3 = vld [vmem:[#allocation8 + $0x88] sm:$0xff]   ;;  %v6464_v49 = vld [vmem:[#allocation8 + $0x10] sm:$0xff]  }
 0x289   :  { %v1627_v45 = vadd.f32 %v1626_v46, %v1582_v2  ;;  %v1644_v40 = vadd.f32 %v1643_v12, %v1583_v43  ;;  %v1589_v25 = vmul.f32 0.5, %v8067_v34  ;;  %v1593_v19 = vmul.f32 0.5, %v8093_v38  ;;  %v6462_v34 = vld [vmem:[#allocation8 + $0x8] sm:$0xff]   ;;  %v6463_v12 = vld [vmem:[#allocation8 + $0x90] sm:$0xff]  }
 0x28a   :  { %v1666_v15 = vadd.f32 %v1665_v11, %v1664_v6  ;;  %v1667_v57 = vsel %vm1037_vm0, %v1587_v51, 0.0  ;;  %v12561_v21 = vmov 0   ;;  %v1591_v20 = vmul.f32 0.5, %v8077_v55  ;;  %v6465_v11 = vld [vmem:[#allocation8 + $0x98] sm:$0xff]  }
 0x28b   :  { %v1628_v27 = vadd.f32 %v1627_v45, %v1585_v58  ;;  %v1645_v63 = vadd.f32 %v1644_v40, %v1586_v18  ;;  %6035 = vmatprep.subr.bf16.mxu1 %v12561_v21  ;;  %3345 = vmatprep.subr.bf16.mxu0 %v12561_v21  ;;  %v1592_v0 = vmul.f32 0.5, %v8081_v1  ;;  %v1596_v38 = vmul.f32 0.5, %v8103_v53 }
 0x28c   :  { %v1668_v14 = vadd.f32 %v1667_v57, %v1666_v15  ;;  %6051 = vmatpush1.bf16.msra.mxu1 %v6459_v35  ;;  %3346 = vmatpush1.bf16.msra.mxu0 %v6460_v47  ;;  %v1669_v39 = vsel %vm1037_vm0, %v1590_v5, 0.0  ;;  %v1594_v30 = vmul.f32 0.5, %v8091_v41  ;;  %v1595_v55 = vmul.f32 0.5, %v8097_v33 }
 0x28d   :  { %v1629_v42 = vadd.f32 %v1628_v27, %v1588_v52  ;;  %v1646_v17 = vadd.f32 %v1645_v63, %v1589_v25  ;;  %6036 = vmatprep.subr.bf16.mxu1 %v12561_v21  ;;  %3347 = vmatprep.subr.bf16.mxu0 %v12561_v21  ;;  %v1599_v4 = vmul.f32 0.5, %v8127_v36  ;;  %v1671_v16 = vsel %vm1037_vm0, %v1593_v19, 0.0  ;;  %v6466_v52 = vld [vmem:[#allocation8 + $0x18] sm:$0xff]  }
 0x28e   :  { %v1670_v1 = vadd.f32 %v1669_v39, %v1668_v14  ;;  %v1597_v53 = vmul.f32 0.5, %v8107_v23  ;;  %v1598_v51 = vmul.f32 0.5, %v8111_v7  ;;  %v1602_v41 = vmul.f32 0.5, %v8139_v22  ;;  %v6467_v14 = vld [vmem:[#allocation8 + $0xa0] sm:$0xff]  }
 0x28f   :  { %v1630_v2 = vadd.f32 %v1629_v42, %v1591_v20  ;;  %v1647_v43 = vadd.f32 %v1646_v17, %v1592_v0  ;;  %v1673_v18 = vsel %vm1037_vm0, %v1596_v38, 0.0  ;;  %v1600_v36 = vmul.f32 0.5, %v8119_v54 }
 0x290   :  { %v1672_v46 = vadd.f32 %v1671_v16, %v1670_v1  ;;  %6052 = vmatpush1.bf16.msra.mxu1 %v6461_v3  ;;  %3348 = vmatpush1.bf16.msra.mxu0 %v6462_v34  ;;  %v1601_v23 = vmul.f32 0.5, %v8123_v44  ;;  %v1605_v6 = vmul.f32 0.5, %v8149_v60  ;;  %v1675_v5 = vsel %vm1037_vm0, %v1599_v4, 0.0  ;;  %v6468_v3 = vld [vmem:[#allocation8 + $0x20] sm:$0xff]  }
 0x291   :  { %v1631_v58 = vadd.f32 %v1630_v2, %v1594_v30  ;;  %v1648_v33 = vadd.f32 %v1647_v43, %v1595_v55  ;;  %6037 = vmatprep.subr.bf16.mxu1 %v12561_v21  ;;  %3349 = vmatprep.subr.bf16.mxu0 %v12561_v21  ;;  %v1603_v22 = vmul.f32 0.5, %v8133_v37  ;;  %v1604_v45 = vmul.f32 0.5, %v8137_v29  ;;  %v13290_v55 = vld [vmem:[#allocation149_spill] sm:$0xff] }
 0x292   :  { %v1674_v7 = vadd.f32 %v1673_v18, %v1672_v46  ;;  %v1608_v54 = vmul.f32 0.5, %v8159_v8  ;;  %v1677_v15 = vsel %vm1037_vm0, %v1602_v41, 0.0  ;;  %v1606_v60 = vmul.f32 0.5, %v8147_v48  ;;  %v6469_v2 = vld [vmem:[#allocation8 + $0xa8] sm:$0xff]   ;;  %v6471_v18 = vld [vmem:[#allocation8 + $0xb0] sm:$0xff]  }
 0x293   :  { %v1632_v35 = vadd.f32 %v1631_v58, %v1597_v53  ;;  %v1649_v47 = vadd.f32 %v1648_v33, %v1598_v51  ;;  %v1607_v37 = vmul.f32 0.5, %v8153_v50  ;;  %v1611_v19 = vmul.f32 0.5, %v8183_v32  ;;  %v6470_v43 = vld [vmem:[#allocation8 + $0x28] sm:$0xff]  }
 0x294   :  { %v1676_v40 = vadd.f32 %v1675_v5, %v1674_v7  ;;  %6053 = vmatpush1.bf16.msra.mxu1 %v6463_v12  ;;  %3350 = vmatpush1.bf16.msra.mxu0 %v6464_v49  ;;  %v1679_v57 = vsel %vm1037_vm0, %v1605_v6, 0.0  ;;  %v1609_v8 = vmul.f32 0.5, %v8163_v61  ;;  %v1610_v20 = vmul.f32 0.5, %v8167_v28 }
 0x295   :  { %v1633_v25 = vadd.f32 %v1632_v35, %v1600_v36  ;;  %v1650_v44 = vadd.f32 %v1649_v47, %v1601_v23  ;;  %6038 = vmatprep.subr.bf16.mxu1 %v12561_v21  ;;  %3351 = vmatprep.subr.bf16.mxu0 %v12561_v21  ;;  %v1614_v48 = vmul.f32 0.5, %v8195_v9  ;;  %v1681_v38 = vsel %vm1037_vm0, %v1608_v54, 0.0  ;;  %v6472_v36 = vld [vmem:[#allocation8 + $0x30] sm:$0xff]   ;;  %v13292_v23 = vld [vmem:[#allocation151_spill] sm:$0xff] }
 0x296   :  { %v1678_v29 = vadd.f32 %v1677_v15, %v1676_v40  ;;  %v1612_v32 = vmul.f32 0.5, %v8175_v56  ;;  %v1613_v61 = vmul.f32 0.5, %v8179_v59  ;;  %v1617_v42 = vmul.f32 0.5, %v8205_v10  ;;  %v6474_v40 = vld [vmem:[#allocation8 + $0x38] sm:$0xff]   ;;  %v6475_v15 = vld [vmem:[#allocation8 + $0xc0] sm:$0xff]  }
 0x297   :  { %v1634_v27 = vadd.f32 %v1633_v25, %v1603_v22  ;;  %v1651_v63 = vadd.f32 %v1650_v44, %v1604_v45  ;;  %v1683_v30 = vsel %vm1037_vm0, %v1611_v19, 0.0  ;;  %v1615_v9 = vmul.f32 0.5, %v8189_v31  ;;  %v6473_v45 = vld [vmem:[#allocation8 + $0xb8] sm:$0xff]   ;;  %v6477_v19 = vld [vmem:[#allocation8 + $0xc8] sm:$0xff]  }
 0x298   :  { %v1680_v0 = vadd.f32 %v1679_v57, %v1678_v29  ;;  %6054 = vmatpush1.bf16.msra.mxu1 %v6465_v11  ;;  %3352 = vmatpush1.bf16.msra.mxu0 %v6466_v52  ;;  %v1616_v1 = vmul.f32 0.5, %v13290_v55  ;;  %v1620_v56 = vmul.f32 0.5, %v8215_v62  ;;  %v1685_v53 = vsel %vm1037_vm0, %v1614_v48, 0.0  ;;  %v13291_v62 = vld [vmem:[#allocation150_spill] sm:$0xff]  ;;  %v6482_v48 = vld [vmem:[#allocation8 + $0x58] sm:$0xff]  }
 0x299   :  { %v1635_v34 = vadd.f32 %v1634_v27, %v1606_v60  ;;  %v1652_v50 = vadd.f32 %v1651_v63, %v1607_v37  ;;  %6039 = vmatprep.subr.bf16.mxu1 %v12561_v21  ;;  %3353 = vmatprep.subr.bf16.mxu0 %v12561_v21  ;;  %v1618_v10 = vmul.f32 0.5, %v8203_v13  ;;  %v1619_v31 = vmul.f32 0.5, %v8209_v26  ;;  %v6476_v60 = vld [vmem:[#allocation8 + $0x40] sm:$0xff]   ;;  %v6478_v27 = vld [vmem:[#allocation8 + $0x48] sm:$0xff]   ;;  %v1033_v55 = vld [vmem:[%s12381_s2] sm:$0x1] }
 0x29a   :  { %v1682_v28 = vadd.f32 %v1681_v38, %v1680_v0  ;;  %v1623_v46 = vmul.f32 0.5, %v8229_v24  ;;  %v1687_v41 = vsel %vm1037_vm0, %v1617_v42, 0.0  ;;  %v1621_v58 = vmul.f32 0.5, %v13291_v62  ;;  %v6483_v38 = vld [vmem:[#allocation8 + $0xe0] sm:$0xff]   ;;  %v6485_v42 = vld [vmem:[#allocation8 + $0xe8] sm:$0xff]  }
 0x29b   :  { %v1636_v17 = vadd.f32 %v1635_v34, %v1609_v8  ;;  %v1653_v39 = vadd.f32 %v1652_v50, %v1610_v20  ;;  %v1622_v7 = vmul.f32 0.5, %v13292_v23  ;;  %v1689_v26 = vsel %vm1037_vm0, %v1620_v56, 0.0  ;;  %v6479_v8 = vld [vmem:[#allocation8 + $0xd0] sm:$0xff]   ;;  %v13304_v23 = vld [vmem:[#allocation21_spill] sm:$0xff] }
 0x29c   :  { %v1684_v4 = vadd.f32 %v1683_v30, %v1682_v28  ;;  %6055 = vmatpush1.bf16.msra.mxu1 %v6467_v14  ;;  %3354 = vmatpush1.bf16.msra.mxu0 %v6468_v3  ;;  %v1691_v5 = vsel %vm1037_vm0, %v1623_v46, 0.0  ;;  %v6480_v20 = vld [vmem:[#allocation8 + $0x50] sm:$0xff]   ;;  %v6481_v3 = vld [vmem:[#allocation8 + $0xd8] sm:$0xff]   ;;  %v1712_v28 = vlaneseq }
 0x29d   :  { %v1637_v16 = vadd.f32 %v1636_v17, %v1612_v32  ;;  %v1654_v59 = vadd.f32 %v1653_v39, %v1613_v61  ;;  %6040 = vmatprep.subr.bf16.mxu1 %v12561_v21  ;;  %3355 = vmatprep.subr.bf16.mxu0 %v12561_v21  ;;  %v6484_v32 = vld [vmem:[#allocation8 + $0x60] sm:$0xff]   ;;  %v6486_v17 = vld [vmem:[#allocation8 + $0x68] sm:$0xff]   ;;  %v6487_v30 = vld [vmem:[#allocation8 + $0xf0] sm:$0xff]  }
 0x29e   :  { %v1686_v51 = vadd.f32 %v1685_v53, %v1684_v4  ;;  %v1713_v39 = vshrl.u32 %v1712_v28, 7  ;;  %v6489_v4 = vld [vmem:[#allocation8 + $0xf8] sm:$0xff]   ;;  %v8448_v28 = vld [vmem:[%s12382_s3] sm:$0x1] }
 0x29f   :  { %v1638_v12 = vadd.f32 %v1637_v16, %v1615_v9  ;;  %v1655_v49 = vadd.f32 %v1654_v59, %v1616_v1  ;;  %v6488_v9 = vld [vmem:[#allocation8 + $0x70] sm:$0xff]   ;;  %v13294_v59 = vld [vmem:[#allocation123_spill] sm:$0xff] }
 0x2a0   :  { %v1688_v33 = vadd.f32 %v1687_v41, %v1686_v51  ;;  %6056 = vmatpush1.bf16.msra.mxu1 %v6469_v2  ;;  %3356 = vmatpush1.bf16.msra.mxu0 %v6470_v43  ;;  %v8337_v1 = vsub.s32 0, %v1713_v39  ;;  %v6490_v2 = vld [vmem:[#allocation8 + $0x78] sm:$0xff]   ;;  %v13298_v51 = vld [vmem:[#allocation122_spill] sm:$0xff]  ;;  %v13323_v39 = vld [vmem:[#allocation36_spill] sm:$0xff] }
 0x2a1   :  { %v1639_v6 = vadd.f32 %v1638_v12, %v1618_v10  ;;  %v1656_v13 = vadd.f32 %v1655_v49, %v1619_v31  ;;  %6041 = vmatprep.subr.bf16.mxu1 %v12561_v21  ;;  %3357 = vmatprep.subr.bf16.mxu0 %v12561_v21  ;;  %v13296_v10 = vld [vmem:[#allocation120_spill] sm:$0xff]  ;;  %v13300_v12 = vld [vmem:[#allocation17_spill] sm:$0xff]  ;;  %v13301_v41 = vld [vmem:[#allocation19_spill] sm:$0xff] }
 0x2a2   :  { %v1690_v24 = vadd.f32 %v1689_v26, %v1688_v33  ;;  %13293 = vst [vmem:[#allocation152_spill] sm:$0xff] %v8337_v1  ;;  %v13306_v26 = vld [vmem:[#allocation20_spill] sm:$0xff] }
 0x2a3   :  { %v1640_v35 = vadd.f32 %v1639_v6, %v1621_v58  ;;  %v1657_v47 = vadd.f32 %v1656_v13, %v1622_v7  ;;  %v13302_v58 = vld [vmem:[#allocation16_spill] sm:$0xff]  ;;  %v13305_v6 = vld [vmem:[#allocation23_spill] sm:$0xff] }
 0x2a4   :  { %v1692_v22 = vadd.f32 %v1691_v5, %v1690_v24  ;;  %6057 = vmatpush1.bf16.msra.mxu1 %v6471_v18  ;;  %3358 = vmatpush1.bf16.msra.mxu0 %v6472_v36  ;;  %v13303_v18 = vld [vmem:[#allocation18_spill] sm:$0xff]  ;;  %v13308_v5 = vld [vmem:[#allocation25_spill] sm:$0xff] }
 0x2a5   :  { %v1693_v11 = vmul.f32 0.055555556, %v1640_v35  ;;  %v1694_v52 = vmul.f32 0.055555556, %v1657_v47  ;;  %6042 = vmatprep.subr.bf16.mxu1 %v12561_v21  ;;  %3359 = vmatprep.subr.bf16.mxu0 %v12561_v21  ;;  %v13307_v35 = vld [vmem:[#allocation22_spill] sm:$0xff] }
 0x2a6   :  { %v1695_v54 = vmul.f32 0.055555556, %v1692_v22 }
 0x2a7   :  { %v1696_v25 = vadd.f32 %v1694_v52, %v1693_v11  ;;  %v13310_v11 = vld [vmem:[#allocation24_spill] sm:$0xff] }
 0x2a8   :  { %v1697_v44 = vsel %vm1037_vm0, %v1695_v54, 0.0  ;;  %6058 = vmatpush1.bf16.msra.mxu1 %v6473_v45  ;;  %3360 = vmatpush1.bf16.msra.mxu0 %v6474_v40  ;;  %v13309_v45 = vld [vmem:[#allocation27_spill] sm:$0xff]  ;;  %v13311_v54 = vld [vmem:[#allocation26_spill] sm:$0xff] }
 0x2a9   :  { %v1698_v37 = vadd.f32 %v1697_v44, %v1696_v25  ;;  %6043 = vmatprep.subr.bf16.mxu1 %v12561_v21  ;;  %3361 = vmatprep.subr.bf16.mxu0 %v12561_v21  ;;  %v13312_v44 = vld [vmem:[#allocation29_spill] sm:$0xff] }
 0x2ab   :  { %v1699_v29 = vrot.slane %v1698_v37, 4 }
 0x2ac   :  { %6059 = vmatpush1.bf16.msra.mxu1 %v6475_v15  ;;  %3362 = vmatpush1.bf16.msra.mxu0 %v6476_v60  ;;  %v13313_v60 = vld [vmem:[#allocation31_spill] sm:$0xff] }
 0x2ad   :  { %v1700_v63 = vadd.f32 %v1699_v29, %v1698_v37  ;;  %6044 = vmatprep.subr.bf16.mxu1 %v12561_v21  ;;  %3363 = vmatprep.subr.bf16.mxu0 %v12561_v21  ;;  %v13314_v29 = vld [vmem:[#allocation28_spill] sm:$0xff] }
 0x2af   :  { %v1701_v57 = vrot.slane %v1700_v63, 2 }
 0x2b0   :  { %6060 = vmatpush1.bf16.msra.mxu1 %v6477_v19  ;;  %3364 = vmatpush1.bf16.msra.mxu0 %v6478_v27  ;;  %v13315_v27 = vld [vmem:[#allocation30_spill] sm:$0xff] }
 0x2b1   :  { %v1702_v0 = vadd.f32 %v1701_v57, %v1700_v63  ;;  %6045 = vmatprep.subr.bf16.mxu1 %v12561_v21  ;;  %3365 = vmatprep.subr.bf16.mxu0 %v12561_v21  ;;  %v13316_v57 = vld [vmem:[#allocation124_spill] sm:$0xff] }
 0x2b3   :  { %v1703_v14 = vrot.slane %v1702_v0, 1 }
 0x2b4   :  { %6061 = vmatpush1.bf16.msra.mxu1 %v6479_v8  ;;  %3366 = vmatpush1.bf16.msra.mxu0 %v6480_v20  ;;  %v13317_v20 = vld [vmem:[#allocation33_spill] sm:$0xff] }
 0x2b5   :  { %v1704_v34 = vadd.f32 %v1703_v14, %v1702_v0  ;;  %6046 = vmatprep.subr.bf16.mxu1 %v12561_v21  ;;  %3367 = vmatprep.subr.bf16.mxu0 %v12561_v21  ;;  %v13318_v14 = vld [vmem:[#allocation35_spill] sm:$0xff] }
 0x2b7   :  { %v1705_v50 = vmul.f32 0.055555556, %v1704_v34 }
 0x2b8   :  { %6062 = vmatpush1.bf16.msra.mxu1 %v6481_v3  ;;  %3368 = vmatpush1.bf16.msra.mxu0 %v6482_v48  ;;  %v13319_v48 = vld [vmem:[#allocation32_spill] sm:$0xff] }
 0x2b9   :  { %v1706_v61 = vadd.f32 1e-05, %v1705_v50  ;;  %6047 = vmatprep.subr.bf16.mxu1 %v12561_v21  ;;  %3369 = vmatprep.subr.bf16.mxu0 %v12561_v21  ;;  %v13320_v50 = vld [vmem:[#allocation34_spill] sm:$0xff] }
 0x2bb   :  { %6531 = vrsqrt.f32 %v1706_v61 }
 0x2bc   :  { %6063 = vmatpush1.bf16.msra.mxu1 %v6483_v38  ;;  %3370 = vmatpush1.bf16.msra.mxu0 %v6484_v32  ;;  %v13321_v32 = vld [vmem:[#allocation37_spill] sm:$0xff] }
 0x2bd   :  { %6048 = vmatprep.subr.bf16.mxu1 %v12561_v21  ;;  %3371 = vmatprep.subr.bf16.mxu0 %v12561_v21 }
 0x2c0   :  { %6064 = vmatpush1.bf16.msra.mxu1 %v6485_v42  ;;  %3372 = vmatpush1.bf16.msra.mxu0 %v6486_v17  ;;  %v13322_v42 = vld [vmem:[#allocation39_spill] sm:$0xff] }
 0x2c1   :  { %6049 = vmatprep.subr.bf16.mxu1 %v12561_v21  ;;  %3373 = vmatprep.subr.bf16.mxu0 %v12561_v21 }
 0x2c4   :  { %6065 = vmatpush1.bf16.msra.mxu1 %v6487_v30  ;;  %3374 = vmatpush1.bf16.msra.mxu0 %v6488_v9  ;;  %v13324_v9 = vld [vmem:[#allocation38_spill] sm:$0xff] }
 0x2c5   :  { %v6532_v43 = vpop.eup %6531  ;;  %6050 = vmatprep.subr.bf16.mxu1 %v12561_v21  ;;  %3375 = vmatprep.subr.bf16.mxu0 %v12561_v21 }
 0x2c6   :  { %v1708_v56 = vmul.f32 %v6532_v43, %v1033_v55  ;;  %v13326_v43 = vld [vmem:[#allocation43_spill] sm:$0xff] }
 0x2c8   :  { %v8342_v16 = vrot.slane %v1708_v56, %v8337_v1  ;;  %6066 = vmatpush1.bf16.msra.mxu1 %v6489_v4  ;;  %3376 = vmatpush1.bf16.msra.mxu0 %v6490_v2  ;;  %v8423_v8 = vmul.f32 %v1708_v56, %v13316_v57  ;;  %v13325_v4 = vld [vmem:[#allocation41_spill] sm:$0xff]  ;;  %v13336_v57 = vld [vmem:[#allocation50_spill] sm:$0xff] }
 0x2c9   :  { %3923 = vmatprep.subr.bf16.mxu1 %v12561_v21  ;;  %3634 = vmatprep.subr.bf16.mxu0 %v12561_v21  ;;  %v13355_v21 = vld [vmem:[#allocation64_spill] sm:$0xff] }
 0x2ca   :  { %v8348_v53 = vmul.f32 %v8342_v16, %v13294_v59  ;;  %v8352_v31 = vmul.f32 %v13296_v10, %v8342_v16  ;;  %v8356_v46 = vmul.f32 %v13298_v51, %v8342_v16  ;;  %v8360_v49 = vmul.f32 %v8342_v16, %v13300_v12  ;;  %v13327_v59 = vld [vmem:[#allocation40_spill] sm:$0xff]  ;;  %v13328_v51 = vld [vmem:[#allocation42_spill] sm:$0xff] }
 0x2cb   :  { %v8364_v62 = vmul.f32 %v8342_v16, %v13301_v41  ;;  %v8368_v33 = vmul.f32 %v13302_v58, %v8342_v16  ;;  %v8372_v36 = vmul.f32 %v13303_v18, %v8342_v16  ;;  %v8376_v7 = vmul.f32 %v8342_v16, %v13304_v23  ;;  %v13329_v58 = vld [vmem:[#allocation45_spill] sm:$0xff]  ;;  %v13330_v23 = vld [vmem:[#allocation47_spill] sm:$0xff]  ;;  %v13357_v41 = vld [vmem:[#allocation66_spill] sm:$0xff] }
 0x2cc   :  { %13295 = vst [vmem:[#allocation153_spill] sm:$0xff] %v8348_v53  ;;  %13297 = vst [vmem:[#allocation154_spill] sm:$0xff] %v8352_v31  ;;  %v8380_v13 = vmul.f32 %v8342_v16, %v13305_v6  ;;  %v8384_v24 = vmul.f32 %v13306_v26, %v8342_v16  ;;  %v8388_v47 = vmul.f32 %v13307_v35, %v8342_v16  ;;  %v13331_v26 = vld [vmem:[#allocation44_spill] sm:$0xff]  ;;  %v13361_v31 = vld [vmem:[#allocation71_spill] sm:$0xff] }
 0x2cd   :  { %13299 = vst [vmem:[#allocation155_spill] sm:$0xff] %v8356_v46  ;;  %v8392_v22 = vmul.f32 %v8342_v16, %v13308_v5  ;;  %v8396_v40 = vmul.f32 %v8342_v16, %v13309_v45  ;;  %v8400_v52 = vmul.f32 %v13310_v11, %v8342_v16  ;;  %v8404_v25 = vmul.f32 %v13311_v54, %v8342_v16  ;;  %v13332_v5 = vld [vmem:[#allocation46_spill] sm:$0xff]  ;;  %v13333_v11 = vld [vmem:[#allocation49_spill] sm:$0xff]  ;;  %v13363_v53 = vld [vmem:[#allocation68_spill] sm:$0xff] }
 0x2ce   :  { %v8408_v15 = vmul.f32 %v8342_v16, %v13312_v44  ;;  %v8412_v37 = vmul.f32 %v8342_v16, %v13313_v60  ;;  %v8416_v19 = vmul.f32 %v13314_v29, %v8342_v16  ;;  %v8420_v63 = vmul.f32 %v13315_v27, %v8342_v16  ;;  %v13334_v44 = vld [vmem:[#allocation51_spill] sm:$0xff]  ;;  %v13335_v29 = vld [vmem:[#allocation48_spill] sm:$0xff]  ;;  %v13359_v46 = vld [vmem:[#allocation69_spill] sm:$0xff] }
 0x2cf   :  { %v8427_v0 = vmul.f32 %v8342_v16, %v13317_v20  ;;  %v8431_v3 = vmul.f32 %v8342_v16, %v13318_v14  ;;  %v8435_v34 = vmul.f32 %v13319_v48, %v8342_v16  ;;  %v8439_v38 = vmul.f32 %v13320_v50, %v8342_v16  ;;  %v13337_v14 = vld [vmem:[#allocation53_spill] sm:$0xff]  ;;  %v13338_v50 = vld [vmem:[#allocation55_spill] sm:$0xff] }
 0x2d0   :  { %v8443_v61 = vmul.f32 %v8342_v16, %v13321_v32  ;;  %v8452_v17 = vmul.f32 %v8342_v16, %v13322_v42  ;;  %v8456_v30 = vmul.f32 %v13323_v39, %v8342_v16  ;;  %v8460_v55 = vmul.f32 %v13324_v9, %v8342_v16  ;;  %v13339_v42 = vld [vmem:[#allocation52_spill] sm:$0xff]  ;;  %v13340_v9 = vld [vmem:[#allocation54_spill] sm:$0xff] }
 0x2d1   :  { %v8464_v2 = vmul.f32 %v8342_v16, %v13325_v4  ;;  %v8468_v56 = vmul.f32 %v8342_v16, %v13326_v43  ;;  %v8472_v10 = vmul.f32 %v13327_v59, %v8342_v16  ;;  %v8476_v12 = vmul.f32 %v13328_v51, %v8342_v16  ;;  %v13342_v43 = vld [vmem:[#allocation57_spill] sm:$0xff]  ;;  %v13344_v51 = vld [vmem:[#allocation59_spill] sm:$0xff] }
 0x2d2   :  { %v8482_v18 = vmul.f32 %v8342_v16, %v13329_v58  ;;  %v8486_v6 = vmul.f32 %v8342_v16, %v13330_v23  ;;  %v8490_v35 = vmul.f32 %v13331_v26, %v8342_v16  ;;  %v8494_v45 = vmul.f32 %v13332_v5, %v8342_v16  ;;  %v13345_v23 = vld [vmem:[#allocation56_spill] sm:$0xff]  ;;  %v13347_v5 = vld [vmem:[#allocation58_spill] sm:$0xff] }
 0x2d3   :  { %v8498_v54 = vmul.f32 %v8342_v16, %v13333_v11  ;;  %v8502_v60 = vmul.f32 %v8342_v16, %v13334_v44  ;;  %v8506_v27 = vmul.f32 %v13335_v29, %v8342_v16  ;;  %v8510_v20 = vmul.f32 %v13336_v57, %v8342_v16  ;;  %v13349_v44 = vld [vmem:[#allocation61_spill] sm:$0xff]  ;;  %v13350_v57 = vld [vmem:[#allocation63_spill] sm:$0xff] }
 0x2d4   :  { %v8514_v48 = vmul.f32 %v8342_v16, %v13337_v14  ;;  %v8518_v32 = vmul.f32 %v8342_v16, %v13338_v50  ;;  %v8522_v39 = vmul.f32 %v13339_v42, %v8342_v16  ;;  %v8526_v4 = vmul.f32 %v13340_v9, %v8342_v16  ;;  %v13351_v50 = vld [vmem:[#allocation60_spill] sm:$0xff]  ;;  %v13352_v9 = vld [vmem:[#allocation62_spill] sm:$0xff] }
 0x2d5   :  { %v8530_v59 = vmul.f32 %v8342_v16, %v13342_v43  ;;  %v8534_v58 = vmul.f32 %v8342_v16, %v13344_v51  ;;  %v8538_v26 = vmul.f32 %v13345_v23, %v8342_v16  ;;  %v8542_v11 = vmul.f32 %v13347_v5, %v8342_v16  ;;  %v13353_v51 = vld [vmem:[#allocation65_spill] sm:$0xff]  ;;  %v13354_v5 = vld [vmem:[#allocation67_spill] sm:$0xff] }
 0x2d6   :  { %13341 = vst [vmem:[#allocation156_spill] sm:$0xff] %v8526_v4  ;;  %v8546_v29 = vmul.f32 %v8342_v16, %v13349_v44  ;;  %v8550_v14 = vmul.f32 %v8342_v16, %v13350_v57  ;;  %v8554_v42 = vmul.f32 %v13351_v50, %v8342_v16  ;;  %v8558_v43 = vmul.f32 %v13352_v9, %v8342_v16  ;;  %v13376_v4 = vld [vmem:[#allocation76_spill] sm:$0xff] }
 0x2d7   :  { %13343 = vst [vmem:[#allocation157_spill] sm:$0xff] %v8530_v59  ;;  %13346 = vst [vmem:[#allocation158_spill] sm:$0xff] %v8538_v26  ;;  %v8562_v23 = vmul.f32 %v8342_v16, %v13353_v51  ;;  %v8566_v44 = vmul.f32 %v8342_v16, %v13354_v5  ;;  %v8570_v57 = vmul.f32 %v13355_v21, %v8342_v16  ;;  %v13372_v26 = vld [vmem:[#allocation77_spill] sm:$0xff]  ;;  %v13374_v59 = vld [vmem:[#allocation79_spill] sm:$0xff] }
 0x2d8   :  { %13348 = vst [vmem:[#allocation159_spill] sm:$0xff] %v8542_v11  ;;  %v8574_v50 = vmul.f32 %v13357_v41, %v8342_v16  ;;  %v8578_v9 = vmul.f32 %v8342_v16, %v13359_v46  ;;  %v8582_v51 = vmul.f32 %v8342_v16, %v13361_v31  ;;  %v8586_v5 = vmul.f32 %v13363_v53, %v8342_v16  ;;  %v13364_v11 = vld [vmem:[#allocation70_spill] sm:$0xff] }
 0x2d9   :  { %13356 = vst [vmem:[#allocation160_spill] sm:$0xff] %v8570_v57  ;;  %v8590_v21 = vmul.f32 %v13364_v11, %v8342_v16  ;;  %v13365_v57 = vld [vmem:[#allocation73_spill] sm:$0xff]  ;;  %v8610_v11 = vmul.f32 %v8342_v16, %v13372_v26 }
 0x2da   :  { %13358 = vst [vmem:[#allocation161_spill] sm:$0xff] %v8574_v50  ;;  %13360 = vst [vmem:[#allocation162_spill] sm:$0xff] %v8578_v9  ;;  %v8594_v41 = vmul.f32 %v8342_v16, %v13365_v57  ;;  %v13366_v50 = vld [vmem:[#allocation75_spill] sm:$0xff]  ;;  %v13368_v9 = vld [vmem:[#allocation72_spill] sm:$0xff]  ;;  %v8614_v57 = vmul.f32 %v8342_v16, %v13374_v59 }
 0x2db   :  { %13362 = vst [vmem:[#allocation163_spill] sm:$0xff] %v8582_v51  ;;  %v8598_v46 = vmul.f32 %v8342_v16, %v13366_v50  ;;  %v8602_v31 = vmul.f32 %v13368_v9, %v8342_v16  ;;  %v13370_v51 = vld [vmem:[#allocation74_spill] sm:$0xff]  ;;  %13373 = vst [vmem:[#allocation167_spill] sm:$0xff] %v8610_v11  ;;  %v8618_v50 = vmul.f32 %v13376_v4, %v8342_v16  ;;  %v13384_v11 = vld [vmem:[#allocation80_spill] sm:$0xff] }
 0x2dc   :  { %v8606_v53 = vmul.f32 %v13370_v51, %v8342_v16  ;;  %13375 = vst [vmem:[#allocation168_spill] sm:$0xff] %v8614_v57  ;;  %v8634_v59 = vmul.f32 %v13384_v11, %v8342_v16  ;;  %v13386_v57 = vld [vmem:[#allocation82_spill] sm:$0xff] }
 0x2dd   :  { %13367 = vst [vmem:[#allocation164_spill] sm:$0xff] %v8598_v46  ;;  %13369 = vst [vmem:[#allocation165_spill] sm:$0xff] %v8602_v31  ;;  %v13378_v46 = vld [vmem:[#allocation78_spill] sm:$0xff]  ;;  %v13380_v31 = vld [vmem:[#allocation81_spill] sm:$0xff]  ;;  %v8638_v4 = vmul.f32 %v13386_v57, %v8342_v16 }
 0x2de   :  { %13371 = vst [vmem:[#allocation166_spill] sm:$0xff] %v8606_v53  ;;  %13377 = vst [vmem:[#allocation169_spill] sm:$0xff] %v8618_v50  ;;  %v8622_v9 = vmul.f32 %v13378_v46, %v8342_v16  ;;  %v8626_v51 = vmul.f32 %v8342_v16, %v13380_v31  ;;  %v13382_v53 = vld [vmem:[#allocation83_spill] sm:$0xff]  ;;  %v13388_v50 = vld [vmem:[#allocation85_spill] sm:$0xff] }
 0x2df   :  { %v8630_v26 = vmul.f32 %v8342_v16, %v13382_v53  ;;  %13385 = vst [vmem:[#allocation173_spill] sm:$0xff] %v8634_v59  ;;  %13387 = vst [vmem:[#allocation174_spill] sm:$0xff] %v8638_v4  ;;  %v8642_v46 = vmul.f32 %v8342_v16, %v13388_v50  ;;  %v13396_v59 = vld [vmem:[#allocation89_spill] sm:$0xff]  ;;  %v13398_v4 = vld [vmem:[#allocation91_spill] sm:$0xff] }
 0x2e0   :  { %13379 = vst [vmem:[#allocation170_spill] sm:$0xff] %v8622_v9  ;;  %13381 = vst [vmem:[#allocation171_spill] sm:$0xff] %v8626_v51  ;;  %v13390_v9 = vld [vmem:[#allocation87_spill] sm:$0xff]  ;;  %v13392_v51 = vld [vmem:[#allocation84_spill] sm:$0xff]  ;;  %v8658_v57 = vmul.f32 %v8342_v16, %v13396_v59  ;;  %v8662_v50 = vmul.f32 %v8342_v16, %v13398_v4 }
 0x2e1   :  { %13383 = vst [vmem:[#allocation172_spill] sm:$0xff] %v8630_v26  ;;  %13389 = vst [vmem:[#allocation127_spill] sm:$0xff] %v8642_v46  ;;  %v8646_v31 = vmul.f32 %v8342_v16, %v13390_v9  ;;  %v8650_v53 = vmul.f32 %v13392_v51, %v8342_v16  ;;  %v13394_v26 = vld [vmem:[#allocation86_spill] sm:$0xff]  ;;  %v13400_v46 = vld [vmem:[#allocation88_spill] sm:$0xff] }
 0x2e2   :  { %v8654_v11 = vmul.f32 %v13394_v26, %v8342_v16  ;;  %13397 = vst [vmem:[#allocation129_spill] sm:$0xff] %v8658_v57  ;;  %13399 = vst [vmem:[#allocation177_spill] sm:$0xff] %v8662_v50  ;;  %v8666_v9 = vmul.f32 %v13400_v46, %v8342_v16  ;;  %v13408_v57 = vld [vmem:[#allocation92_spill] sm:$0xff]  ;;  %v13410_v50 = vld [vmem:[#allocation94_spill] sm:$0xff] }
 0x2e3   :  { %13391 = vst [vmem:[#allocation175_spill] sm:$0xff] %v8646_v31  ;;  %13393 = vst [vmem:[#allocation128_spill] sm:$0xff] %v8650_v53  ;;  %v13402_v31 = vld [vmem:[#allocation90_spill] sm:$0xff]  ;;  %v13404_v53 = vld [vmem:[#allocation93_spill] sm:$0xff]  ;;  %v8682_v4 = vmul.f32 %v13408_v57, %v8342_v16  ;;  %v8686_v46 = vmul.f32 %v13410_v50, %v8342_v16 }
 0x2e4   :  { %13395 = vst [vmem:[#allocation176_spill] sm:$0xff] %v8654_v11  ;;  %13401 = vst [vmem:[#allocation130_spill] sm:$0xff] %v8666_v9  ;;  %v8670_v51 = vmul.f32 %v13402_v31, %v8342_v16  ;;  %v8674_v26 = vmul.f32 %v8342_v16, %v13404_v53  ;;  %v13406_v11 = vld [vmem:[#allocation95_spill] sm:$0xff]  ;;  %v13412_v9 = vld [vmem:[#allocation97_spill] sm:$0xff] }
 0x2e5   :  { %v8678_v59 = vmul.f32 %v8342_v16, %v13406_v11  ;;  %13409 = vst [vmem:[#allocation132_spill] sm:$0xff] %v8682_v4  ;;  %13411 = vst [vmem:[#allocation180_spill] sm:$0xff] %v8686_v46  ;;  %v8690_v31 = vmul.f32 %v8342_v16, %v13412_v9  ;;  %v13420_v4 = vld [vmem:[#allocation101_spill] sm:$0xff]  ;;  %v13422_v46 = vld [vmem:[#allocation103_spill] sm:$0xff] }
 0x2e6   :  { %13403 = vst [vmem:[#allocation178_spill] sm:$0xff] %v8670_v51  ;;  %13405 = vst [vmem:[#allocation131_spill] sm:$0xff] %v8674_v26  ;;  %v13414_v51 = vld [vmem:[#allocation99_spill] sm:$0xff]  ;;  %v13416_v26 = vld [vmem:[#allocation96_spill] sm:$0xff]  ;;  %v8706_v50 = vmul.f32 %v8342_v16, %v13420_v4  ;;  %v8710_v9 = vmul.f32 %v8342_v16, %v13422_v46 }
 0x2e7   :  { %13407 = vst [vmem:[#allocation179_spill] sm:$0xff] %v8678_v59  ;;  %13413 = vst [vmem:[#allocation133_spill] sm:$0xff] %v8690_v31  ;;  %v8694_v53 = vmul.f32 %v8342_v16, %v13414_v51  ;;  %v8698_v11 = vmul.f32 %v13416_v26, %v8342_v16  ;;  %v13418_v59 = vld [vmem:[#allocation98_spill] sm:$0xff]  ;;  %v13424_v31 = vld [vmem:[#allocation100_spill] sm:$0xff] }
 0x2e8   :  { %v8702_v57 = vmul.f32 %v13418_v59, %v8342_v16  ;;  %13421 = vst [vmem:[#allocation135_spill] sm:$0xff] %v8706_v50  ;;  %13423 = vst [vmem:[#allocation183_spill] sm:$0xff] %v8710_v9  ;;  %v8714_v51 = vmul.f32 %v13424_v31, %v8342_v16  ;;  %v13432_v50 = vld [vmem:[#allocation104_spill] sm:$0xff]  ;;  %v13434_v9 = vld [vmem:[#allocation106_spill] sm:$0xff] }
 0x2e9   :  { %13415 = vst [vmem:[#allocation181_spill] sm:$0xff] %v8694_v53  ;;  %13417 = vst [vmem:[#allocation134_spill] sm:$0xff] %v8698_v11  ;;  %v13426_v53 = vld [vmem:[#allocation102_spill] sm:$0xff]  ;;  %v13428_v11 = vld [vmem:[#allocation105_spill] sm:$0xff]  ;;  %v8730_v46 = vmul.f32 %v13432_v50, %v8342_v16  ;;  %v8734_v31 = vmul.f32 %v13434_v9, %v8342_v16 }
 0x2ea   :  { %13419 = vst [vmem:[#allocation182_spill] sm:$0xff] %v8702_v57  ;;  %13425 = vst [vmem:[#allocation136_spill] sm:$0xff] %v8714_v51  ;;  %v8718_v26 = vmul.f32 %v13426_v53, %v8342_v16  ;;  %v8722_v59 = vmul.f32 %v8342_v16, %v13428_v11  ;;  %v13430_v57 = vld [vmem:[#allocation107_spill] sm:$0xff]  ;;  %v13436_v51 = vld [vmem:[#allocation109_spill] sm:$0xff] }
 0x2eb   :  { %v8726_v4 = vmul.f32 %v8342_v16, %v13430_v57  ;;  %13433 = vst [vmem:[#allocation138_spill] sm:$0xff] %v8730_v46  ;;  %13435 = vst [vmem:[#allocation186_spill] sm:$0xff] %v8734_v31  ;;  %v8738_v53 = vmul.f32 %v8342_v16, %v13436_v51  ;;  %v13444_v46 = vld [vmem:[#allocation113_spill] sm:$0xff]  ;;  %v13446_v31 = vld [vmem:[#allocation115_spill] sm:$0xff] }
 0x2ec   :  { %13427 = vst [vmem:[#allocation184_spill] sm:$0xff] %v8718_v26  ;;  %13429 = vst [vmem:[#allocation137_spill] sm:$0xff] %v8722_v59  ;;  %v13438_v26 = vld [vmem:[#allocation111_spill] sm:$0xff]  ;;  %v13440_v59 = vld [vmem:[#allocation108_spill] sm:$0xff]  ;;  %v8754_v9 = vmul.f32 %v8342_v16, %v13444_v46  ;;  %v8758_v51 = vmul.f32 %v8342_v16, %v13446_v31 }
 0x2ed   :  { %13431 = vst [vmem:[#allocation185_spill] sm:$0xff] %v8726_v4  ;;  %13437 = vst [vmem:[#allocation139_spill] sm:$0xff] %v8738_v53  ;;  %v8742_v11 = vmul.f32 %v8342_v16, %v13438_v26  ;;  %v8746_v57 = vmul.f32 %v13440_v59, %v8342_v16  ;;  %v13442_v4 = vld [vmem:[#allocation110_spill] sm:$0xff]  ;;  %v13448_v53 = vld [vmem:[#allocation112_spill] sm:$0xff] }
 0x2ee   :  { %v8750_v50 = vmul.f32 %v13442_v4, %v8342_v16  ;;  %13445 = vst [vmem:[#allocation141_spill] sm:$0xff] %v8754_v9  ;;  %13447 = vst [vmem:[#allocation189_spill] sm:$0xff] %v8758_v51  ;;  %v8762_v26 = vmul.f32 %v13448_v53, %v8342_v16  ;;  %v13454_v9 = vld [vmem:[#allocation116_spill] sm:$0xff]  ;;  %v13455_v51 = vld [vmem:[#allocation118_spill] sm:$0xff] }
 0x2ef   :  { %13439 = vst [vmem:[#allocation187_spill] sm:$0xff] %v8742_v11  ;;  %13441 = vst [vmem:[#allocation140_spill] sm:$0xff] %v8746_v57  ;;  %v13450_v11 = vld [vmem:[#allocation114_spill] sm:$0xff]  ;;  %v13451_v57 = vld [vmem:[#allocation117_spill] sm:$0xff]  ;;  %v8778_v31 = vmul.f32 %v13454_v9, %v8342_v16  ;;  %v8782_v53 = vmul.f32 %v13455_v51, %v8342_v16 }
 0x2f0   :  { %13443 = vst [vmem:[#allocation188_spill] sm:$0xff] %v8750_v50  ;;  %13449 = vst [vmem:[#allocation142_spill] sm:$0xff] %v8762_v26  ;;  %v8766_v59 = vmul.f32 %v13450_v11, %v8342_v16  ;;  %v8770_v4 = vmul.f32 %v8342_v16, %v13451_v57  ;;  %v13453_v50 = vld [vmem:[#allocation119_spill] sm:$0xff]  ;;  %v13456_v26 = vld [vmem:[#allocation121_spill] sm:$0xff]  ;;  %v13457_v57 = vsub.f32 %v8448_v28, %v8423_v8 }
 0x2f1   :  { %v8774_v46 = vmul.f32 %v8342_v16, %v13453_v50  ;;  %v8786_v11 = vmul.f32 %v8342_v16, %v13456_v26  ;;  %v13474_v26 = vld [vmem:[#allocation165_spill] sm:$0xff] }
 0x2f2   :  { %13452 = vst [vmem:[#allocation190_spill] sm:$0xff] %v8770_v4  ;;  %v8792_v4 = vrot.slane %v13457_v57, %v8337_v1  ;;  %v13476_v57 = vld [vmem:[#allocation166_spill] sm:$0xff]  ;;  %v13478_v1 = vld [vmem:[#allocation167_spill] sm:$0xff] }
 0x2f4   :  { %13458 = vst [vmem:[#allocation143_spill] sm:$0xff] %v8792_v4  ;;  %v8796_v50 = vadd.f32 %v8792_v4, %v8360_v49  ;;  %v8800_v9 = vadd.f32 %v8792_v4, %v8364_v62  ;;  %v8804_v51 = vadd.f32 %v8792_v4, %v8368_v33  ;;  %v8808_v16 = vadd.f32 %v8792_v4, %v8372_v36 }
 0x2f5   :  { %v8812_v8 = vadd.f32 %v8792_v4, %v8376_v7  ;;  %v8816_v49 = vadd.f32 %v8792_v4, %v8380_v13  ;;  %v8820_v62 = vadd.f32 %v8792_v4, %v8384_v24  ;;  %v8824_v33 = vadd.f32 %v8792_v4, %v8388_v47 }
 0x2f6   :  { %v8828_v36 = vadd.f32 %v8792_v4, %v8392_v22  ;;  %v8832_v7 = vadd.f32 %v8792_v4, %v8396_v40  ;;  %v8836_v13 = vadd.f32 %v8792_v4, %v8400_v52  ;;  %v8840_v24 = vadd.f32 %v8792_v4, %v8404_v25 }
 0x2f7   :  { %13459 = vst [vmem:[#allocation191_spill] sm:$0xff] %v8816_v49  ;;  %v8844_v47 = vadd.f32 %v8792_v4, %v8408_v15  ;;  %v8848_v22 = vadd.f32 %v8792_v4, %v8412_v37  ;;  %v8852_v40 = vadd.f32 %v8792_v4, %v8416_v19  ;;  %v8856_v52 = vadd.f32 %v8792_v4, %v8420_v63 }
 0x2f8   :  { %13460 = vst [vmem:[#allocation144_spill] sm:$0xff] %v8828_v36  ;;  %13461 = vst [vmem:[#allocation192_spill] sm:$0xff] %v8840_v24  ;;  %v8860_v25 = vadd.f32 %v8792_v4, %v8427_v0  ;;  %v8864_v15 = vadd.f32 %v8792_v4, %v8431_v3  ;;  %v8868_v37 = vadd.f32 %v8792_v4, %v8435_v34 }
 0x2f9   :  { %13462 = vst [vmem:[#allocation145_spill] sm:$0xff] %v8852_v40  ;;  %v8872_v19 = vadd.f32 %v8792_v4, %v8439_v38  ;;  %v8876_v63 = vadd.f32 %v8792_v4, %v8443_v61  ;;  %v8880_v0 = vadd.f32 %v8792_v4, %v8452_v17  ;;  %v8884_v3 = vadd.f32 %v8792_v4, %v8456_v30 }
 0x2fa   :  { %13463 = vst [vmem:[#allocation193_spill] sm:$0xff] %v8864_v15  ;;  %v8888_v34 = vadd.f32 %v8792_v4, %v8460_v55  ;;  %v8892_v38 = vadd.f32 %v8792_v4, %v8464_v2  ;;  %v8896_v61 = vadd.f32 %v8792_v4, %v8468_v56  ;;  %v8900_v28 = vadd.f32 %v8792_v4, %v8472_v10 }
 0x2fb   :  { %13464 = vst [vmem:[#allocation194_spill] sm:$0xff] %v8876_v63  ;;  %v8904_v17 = vadd.f32 %v8792_v4, %v8476_v12  ;;  %v8908_v30 = vadd.f32 %v8792_v4, %v8482_v18  ;;  %v8912_v55 = vadd.f32 %v8792_v4, %v8486_v6  ;;  %v8916_v2 = vadd.f32 %v8792_v4, %v8490_v35 }
 0x2fc   :  { %13465 = vst [vmem:[#allocation195_spill] sm:$0xff] %v8888_v34  ;;  %13466 = vst [vmem:[#allocation196_spill] sm:$0xff] %v8900_v28  ;;  %v8920_v56 = vadd.f32 %v8792_v4, %v8494_v45  ;;  %v8924_v10 = vadd.f32 %v8792_v4, %v8498_v54  ;;  %v8928_v12 = vadd.f32 %v8792_v4, %v8502_v60 }
 0x2fd   :  { %13467 = vst [vmem:[#allocation197_spill] sm:$0xff] %v8912_v55  ;;  %v8932_v18 = vadd.f32 %v8792_v4, %v8506_v27  ;;  %v8936_v6 = vadd.f32 %v8792_v4, %v8510_v20  ;;  %v8940_v35 = vadd.f32 %v8792_v4, %v8514_v48  ;;  %v8944_v45 = vadd.f32 %v8792_v4, %v8518_v32 }
 0x2fe   :  { %13468 = vst [vmem:[#allocation198_spill] sm:$0xff] %v8924_v10  ;;  %v8948_v54 = vadd.f32 %v8792_v4, %v8522_v39  ;;  %v8952_v60 = vadd.f32 %v8792_v4, %v8534_v58  ;;  %v8956_v27 = vadd.f32 %v8792_v4, %v8546_v29  ;;  %v8960_v20 = vadd.f32 %v8792_v4, %v8550_v14 }
 0x2ff   :  { %13469 = vst [vmem:[#allocation199_spill] sm:$0xff] %v8936_v6  ;;  %v8964_v48 = vadd.f32 %v8792_v4, %v8554_v42  ;;  %v8968_v32 = vadd.f32 %v8792_v4, %v8558_v43  ;;  %v8972_v39 = vadd.f32 %v8792_v4, %v8562_v23  ;;  %v8976_v58 = vadd.f32 %v8792_v4, %v8566_v44  ;;  %v13472_v43 = vld [vmem:[#allocation164_spill] sm:$0xff] }
 0x300   :  { %v8980_v29 = vadd.f32 %v8792_v4, %v8586_v5  ;;  %v8984_v14 = vadd.f32 %v8792_v4, %v8590_v21  ;;  %v8988_v42 = vadd.f32 %v8792_v4, %v8594_v41  ;;  %v8992_v23 = vadd.f32 %v8792_v4, %v13472_v43 }
 0x301   :  { %v8996_v44 = vadd.f32 %v8792_v4, %v13474_v26  ;;  %v9000_v5 = vadd.f32 %v8792_v4, %v13476_v57  ;;  %v9004_v21 = vadd.f32 %v8792_v4, %v13478_v1 }
 0x302   :  { %13470 = vst [vmem:[#allocation146_spill] sm:$0xff] %v8984_v14  ;;  %13471 = vst [vmem:[#allocation200_spill] sm:$0xff] %v8988_v42  ;;  %v13480_v14 = vld [vmem:[#allocation168_spill] sm:$0xff]  ;;  %v13482_v42 = vld [vmem:[#allocation169_spill] sm:$0xff] }
 0x303   :  { %13473 = vst [vmem:[#allocation201_spill] sm:$0xff] %v8992_v23  ;;  %13475 = vst [vmem:[#allocation202_spill] sm:$0xff] %v8996_v44  ;;  %v9008_v41 = vadd.f32 %v8792_v4, %v13480_v14  ;;  %v9012_v43 = vadd.f32 %v8792_v4, %v13482_v42  ;;  %v13484_v23 = vld [vmem:[#allocation170_spill] sm:$0xff]  ;;  %v13486_v44 = vld [vmem:[#allocation171_spill] sm:$0xff] }
 0x304   :  { %13477 = vst [vmem:[#allocation147_spill] sm:$0xff] %v9000_v5  ;;  %13479 = vst [vmem:[#allocation125_spill] sm:$0xff] %v9004_v21  ;;  %v9016_v26 = vadd.f32 %v8792_v4, %v13484_v23  ;;  %v9020_v57 = vadd.f32 %v8792_v4, %v13486_v44  ;;  %v13488_v5 = vld [vmem:[#allocation172_spill] sm:$0xff]  ;;  %v13490_v21 = vld [vmem:[#allocation173_spill] sm:$0xff] }
 0x305   :  { %13481 = vst [vmem:[#allocation148_spill] sm:$0xff] %v9008_v41  ;;  %13483 = vst [vmem:[#allocation126_spill] sm:$0xff] %v9012_v43  ;;  %v9024_v1 = vadd.f32 %v8792_v4, %v13488_v5  ;;  %v9028_v14 = vadd.f32 %v8792_v4, %v13490_v21  ;;  %v13492_v41 = vld [vmem:[#allocation174_spill] sm:$0xff]  ;;  %v13494_v43 = vld [vmem:[#allocation127_spill] sm:$0xff] }
 0x306   :  { %13485 = vst [vmem:[#allocation149_spill] sm:$0xff] %v9016_v26  ;;  %13487 = vst [vmem:[#allocation150_spill] sm:$0xff] %v9020_v57  ;;  %v9032_v42 = vadd.f32 %v8792_v4, %v13492_v41  ;;  %v9036_v23 = vadd.f32 %v8792_v4, %v13494_v43  ;;  %v13496_v26 = vld [vmem:[#allocation175_spill] sm:$0xff]  ;;  %v13498_v57 = vld [vmem:[#allocation128_spill] sm:$0xff] }
 0x307   :  { %13489 = vst [vmem:[#allocation151_spill] sm:$0xff] %v9024_v1  ;;  %13491 = vst [vmem:[#allocation123_spill] sm:$0xff] %v9028_v14  ;;  %v9040_v44 = vadd.f32 %v8792_v4, %v13496_v26  ;;  %v9044_v5 = vadd.f32 %v8792_v4, %v13498_v57  ;;  %v13500_v1 = vld [vmem:[#allocation176_spill] sm:$0xff]  ;;  %v13502_v14 = vld [vmem:[#allocation129_spill] sm:$0xff] }
 0x308   :  { %13493 = vst [vmem:[#allocation120_spill] sm:$0xff] %v9032_v42  ;;  %13495 = vst [vmem:[#allocation122_spill] sm:$0xff] %v9036_v23  ;;  %v9048_v21 = vadd.f32 %v8792_v4, %v13500_v1  ;;  %v9052_v41 = vadd.f32 %v8792_v4, %v13502_v14  ;;  %v13504_v42 = vld [vmem:[#allocation177_spill] sm:$0xff]  ;;  %v13506_v23 = vld [vmem:[#allocation130_spill] sm:$0xff] }
 0x309   :  { %13497 = vst [vmem:[#allocation17_spill] sm:$0xff] %v9040_v44  ;;  %13499 = vst [vmem:[#allocation19_spill] sm:$0xff] %v9044_v5  ;;  %v9056_v43 = vadd.f32 %v8792_v4, %v13504_v42  ;;  %v9060_v26 = vadd.f32 %v8792_v4, %v13506_v23  ;;  %v13508_v44 = vld [vmem:[#allocation178_spill] sm:$0xff]  ;;  %v13510_v5 = vld [vmem:[#allocation131_spill] sm:$0xff] }
 0x30a   :  { %13501 = vst [vmem:[#allocation16_spill] sm:$0xff] %v9048_v21  ;;  %13503 = vst [vmem:[#allocation18_spill] sm:$0xff] %v9052_v41  ;;  %v9064_v57 = vadd.f32 %v8792_v4, %v13508_v44  ;;  %v9068_v1 = vadd.f32 %v8792_v4, %v13510_v5  ;;  %v13512_v21 = vld [vmem:[#allocation179_spill] sm:$0xff]  ;;  %v13514_v41 = vld [vmem:[#allocation132_spill] sm:$0xff] }
 0x30b   :  { %13505 = vst [vmem:[#allocation21_spill] sm:$0xff] %v9056_v43  ;;  %13507 = vst [vmem:[#allocation23_spill] sm:$0xff] %v9060_v26  ;;  %v9072_v14 = vadd.f32 %v8792_v4, %v13512_v21  ;;  %v9076_v42 = vadd.f32 %v8792_v4, %v13514_v41  ;;  %v13516_v43 = vld [vmem:[#allocation180_spill] sm:$0xff]  ;;  %v13518_v26 = vld [vmem:[#allocation133_spill] sm:$0xff] }
 0x30c   :  { %13509 = vst [vmem:[#allocation20_spill] sm:$0xff] %v9064_v57  ;;  %13511 = vst [vmem:[#allocation22_spill] sm:$0xff] %v9068_v1  ;;  %v9080_v23 = vadd.f32 %v8792_v4, %v13516_v43  ;;  %v9084_v44 = vadd.f32 %v8792_v4, %v13518_v26  ;;  %v13520_v57 = vld [vmem:[#allocation181_spill] sm:$0xff]  ;;  %v13522_v1 = vld [vmem:[#allocation134_spill] sm:$0xff] }
 0x30d   :  { %13513 = vst [vmem:[#allocation25_spill] sm:$0xff] %v9072_v14  ;;  %13515 = vst [vmem:[#allocation27_spill] sm:$0xff] %v9076_v42  ;;  %v9088_v5 = vadd.f32 %v8792_v4, %v13520_v57  ;;  %v9092_v21 = vadd.f32 %v8792_v4, %v13522_v1  ;;  %v13524_v14 = vld [vmem:[#allocation182_spill] sm:$0xff]  ;;  %v13526_v42 = vld [vmem:[#allocation135_spill] sm:$0xff] }
 0x30e   :  { %13517 = vst [vmem:[#allocation24_spill] sm:$0xff] %v9080_v23  ;;  %13519 = vst [vmem:[#allocation26_spill] sm:$0xff] %v9084_v44  ;;  %v9096_v41 = vadd.f32 %v8792_v4, %v13524_v14  ;;  %v9100_v43 = vadd.f32 %v8792_v4, %v13526_v42  ;;  %v13528_v23 = vld [vmem:[#allocation183_spill] sm:$0xff]  ;;  %v13530_v44 = vld [vmem:[#allocation136_spill] sm:$0xff] }
 0x30f   :  { %13521 = vst [vmem:[#allocation29_spill] sm:$0xff] %v9088_v5  ;;  %13523 = vst [vmem:[#allocation31_spill] sm:$0xff] %v9092_v21  ;;  %v9104_v26 = vadd.f32 %v8792_v4, %v13528_v23  ;;  %v9108_v57 = vadd.f32 %v8792_v4, %v13530_v44  ;;  %v13532_v5 = vld [vmem:[#allocation184_spill] sm:$0xff]  ;;  %v13534_v21 = vld [vmem:[#allocation137_spill] sm:$0xff] }
 0x310   :  { %13525 = vst [vmem:[#allocation28_spill] sm:$0xff] %v9096_v41  ;;  %13527 = vst [vmem:[#allocation30_spill] sm:$0xff] %v9100_v43  ;;  %v9112_v1 = vadd.f32 %v8792_v4, %v13532_v5  ;;  %v9116_v14 = vadd.f32 %v8792_v4, %v13534_v21  ;;  %v13536_v41 = vld [vmem:[#allocation185_spill] sm:$0xff]  ;;  %v13538_v43 = vld [vmem:[#allocation138_spill] sm:$0xff] }
 0x311   :  { %13529 = vst [vmem:[#allocation124_spill] sm:$0xff] %v9104_v26  ;;  %13531 = vst [vmem:[#allocation33_spill] sm:$0xff] %v9108_v57  ;;  %v9120_v42 = vadd.f32 %v8792_v4, %v13536_v41  ;;  %v9124_v23 = vadd.f32 %v8792_v4, %v13538_v43  ;;  %v13540_v26 = vld [vmem:[#allocation186_spill] sm:$0xff]  ;;  %v13542_v57 = vld [vmem:[#allocation139_spill] sm:$0xff] }
 0x312   :  { %13533 = vst [vmem:[#allocation35_spill] sm:$0xff] %v9112_v1  ;;  %13535 = vst [vmem:[#allocation32_spill] sm:$0xff] %v9116_v14  ;;  %v9128_v44 = vadd.f32 %v8792_v4, %v13540_v26  ;;  %v9132_v5 = vadd.f32 %v8792_v4, %v13542_v57  ;;  %v13544_v1 = vld [vmem:[#allocation187_spill] sm:$0xff]  ;;  %v13545_v14 = vld [vmem:[#allocation140_spill] sm:$0xff] }
 0x313   :  { %13537 = vst [vmem:[#allocation34_spill] sm:$0xff] %v9120_v42  ;;  %13539 = vst [vmem:[#allocation37_spill] sm:$0xff] %v9124_v23  ;;  %v9136_v21 = vadd.f32 %v8792_v4, %v13544_v1  ;;  %v9140_v41 = vadd.f32 %v8792_v4, %v13545_v14  ;;  %v13547_v42 = vld [vmem:[#allocation188_spill] sm:$0xff]  ;;  %v13548_v23 = vld [vmem:[#allocation141_spill] sm:$0xff]  ;;  %v9160_v14 = vadd.f32 %v8792_v4, %v8766_v59 }
 0x314   :  { %13541 = vst [vmem:[#allocation39_spill] sm:$0xff] %v9128_v44  ;;  %13543 = vst [vmem:[#allocation36_spill] sm:$0xff] %v9132_v5  ;;  %v9144_v43 = vadd.f32 %v8792_v4, %v13547_v42  ;;  %v9148_v26 = vadd.f32 %v8792_v4, %v13548_v23  ;;  %v13549_v44 = vld [vmem:[#allocation189_spill] sm:$0xff]  ;;  %v13550_v5 = vld [vmem:[#allocation142_spill] sm:$0xff]  ;;  %v9168_v23 = vadd.f32 %v8792_v4, %v8774_v46  ;;  %v9207_v46 = vmax.f32 %v8836_v13, 0.0 }
 0x315   :  { %13546 = vst [vmem:[#allocation38_spill] sm:$0xff] %v9140_v41  ;;  %v9152_v57 = vadd.f32 %v8792_v4, %v13549_v44  ;;  %v9156_v1 = vadd.f32 %v8792_v4, %v13550_v5  ;;  %13551 = vst [vmem:[#allocation41_spill] sm:$0xff] %v9160_v14  ;;  %v13552_v41 = vld [vmem:[#allocation190_spill] sm:$0xff]  ;;  %v9172_v44 = vadd.f32 %v8792_v4, %v8778_v31  ;;  %v9183_v14 = vmax.f32 %v8796_v50, 0.0 }
 0x316   :  { %v9164_v42 = vadd.f32 %v8792_v4, %v13552_v41  ;;  %13553 = vst [vmem:[#allocation43_spill] sm:$0xff] %v9168_v23  ;;  %v9176_v5 = vadd.f32 %v8792_v4, %v8782_v53  ;;  %v9180_v59 = vadd.f32 %v8792_v4, %v8786_v11  ;;  %v9186_v41 = vmax.f32 %v8800_v9, 0.0  ;;  %13563 = vst [vmem:[#allocation50_spill] sm:$0xff] %v9207_v46 }
 0x317   :  { %13556 = vst [vmem:[#allocation45_spill] sm:$0xff] %v9183_v14  ;;  %v9190_v23 = vmax.f32 %v8808_v16, 0.0  ;;  %v9193_v31 = vmax.f32 %v8812_v8, 0.0  ;;  %v9200_v11 = vmax.f32 %v8824_v33, 0.0  ;;  %v9204_v9 = vmax.f32 %v8832_v7, 0.0 }
 0x318   :  { %13554 = vst [vmem:[#allocation40_spill] sm:$0xff] %v9176_v5  ;;  %13555 = vst [vmem:[#allocation42_spill] sm:$0xff] %v9180_v59  ;;  %v9197_v5 = vmax.f32 %v8820_v62, 0.0  ;;  %v9211_v8 = vmax.f32 %v8844_v47, 0.0  ;;  %v9214_v53 = vmax.f32 %v8848_v22, 0.0  ;;  %v9218_v33 = vmax.f32 %v8856_v52, 0.0 }
 0x319   :  { %13557 = vst [vmem:[#allocation47_spill] sm:$0xff] %v9186_v41  ;;  %13558 = vst [vmem:[#allocation44_spill] sm:$0xff] %v9190_v23  ;;  %v9221_v50 = vmax.f32 %v8860_v25, 0.0  ;;  %v9225_v13 = vmax.f32 %v8868_v37, 0.0  ;;  %v9228_v16 = vmax.f32 %v8872_v19, 0.0  ;;  %v9232_v22 = vmax.f32 %v8880_v0, 0.0 }
 0x31a   :  { %13559 = vst [vmem:[#allocation46_spill] sm:$0xff] %v9193_v31  ;;  %13560 = vst [vmem:[#allocation49_spill] sm:$0xff] %v9197_v5  ;;  %v9235_v62 = vmax.f32 %v8884_v3, 0.0  ;;  %v9239_v25 = vmax.f32 %v8892_v38, 0.0  ;;  %v9242_v7 = vmax.f32 %v8896_v61, 0.0  ;;  %v9246_v19 = vmax.f32 %v8904_v17, 0.0 }
 0x31b   :  { %13561 = vst [vmem:[#allocation51_spill] sm:$0xff] %v9200_v11  ;;  %13562 = vst [vmem:[#allocation48_spill] sm:$0xff] %v9204_v9  ;;  %v9249_v47 = vmax.f32 %v8908_v30, 0.0  ;;  %v9253_v3 = vmax.f32 %v8916_v2, 0.0  ;;  %v9256_v52 = vmax.f32 %v8920_v56, 0.0  ;;  %v9260_v61 = vmax.f32 %v8928_v12, 0.0 }
 0x31c   :  { %13564 = vst [vmem:[#allocation53_spill] sm:$0xff] %v9211_v8  ;;  %13565 = vst [vmem:[#allocation55_spill] sm:$0xff] %v9214_v53  ;;  %v9263_v37 = vmax.f32 %v8932_v18, 0.0  ;;  %v9267_v30 = vmax.f32 %v8940_v35, 0.0  ;;  %v9270_v0 = vmax.f32 %v8944_v45, 0.0  ;;  %v9276_v12 = vmax.f32 %v8960_v20, 0.0 }
 0x31d   :  { %13566 = vst [vmem:[#allocation52_spill] sm:$0xff] %v9218_v33  ;;  %13567 = vst [vmem:[#allocation54_spill] sm:$0xff] %v9221_v50  ;;  %v9279_v18 = vmax.f32 %v8964_v48, 0.0  ;;  %v9283_v35 = vmax.f32 %v8972_v39, 0.0  ;;  %v9286_v45 = vmax.f32 %v8976_v58, 0.0  ;;  %v9289_v2 = vmax.f32 %v8980_v29, 0.0 }
 0x31e   :  { %13568 = vst [vmem:[#allocation57_spill] sm:$0xff] %v9225_v13  ;;  %13569 = vst [vmem:[#allocation59_spill] sm:$0xff] %v9228_v16  ;;  %v13583_v56 = vld [vmem:[#allocation146_spill] sm:$0xff]  ;;  %v13585_v38 = vld [vmem:[#allocation200_spill] sm:$0xff] }
 0x31f   :  { %13570 = vst [vmem:[#allocation56_spill] sm:$0xff] %v9232_v22  ;;  %13571 = vst [vmem:[#allocation58_spill] sm:$0xff] %v9235_v62  ;;  %v9292_v6 = vmax.f32 %v13583_v56, 0.0  ;;  %v13588_v48 = vld [vmem:[#allocation202_spill] sm:$0xff]  ;;  %v13590_v17 = vld [vmem:[#allocation147_spill] sm:$0xff] }
 0x320   :  { %13572 = vst [vmem:[#allocation61_spill] sm:$0xff] %v9239_v25  ;;  %13573 = vst [vmem:[#allocation63_spill] sm:$0xff] %v9242_v7  ;;  %v9299_v10 = vmax.f32 %v13588_v48, 0.0  ;;  %v13593_v58 = vld [vmem:[#allocation148_spill] sm:$0xff]  ;;  %v13595_v29 = vld [vmem:[#allocation126_spill] sm:$0xff] }
 0x321   :  { %13574 = vst [vmem:[#allocation60_spill] sm:$0xff] %v9246_v19  ;;  %13575 = vst [vmem:[#allocation62_spill] sm:$0xff] %v9249_v47  ;;  %v9306_v55 = vmax.f32 %v13593_v58, 0.0  ;;  %v13596_v56 = vld [vmem:[#allocation149_spill] sm:$0xff]  ;;  %v13598_v20 = vld [vmem:[#allocation150_spill] sm:$0xff] }
 0x322   :  { %13576 = vst [vmem:[#allocation65_spill] sm:$0xff] %v9253_v3  ;;  %13577 = vst [vmem:[#allocation67_spill] sm:$0xff] %v9256_v52  ;;  %v13591_v52 = vld [vmem:[#allocation125_spill] sm:$0xff]  ;;  %v9310_v19 = vmax.f32 %v13596_v56, 0.0  ;;  %v9313_v28 = vmax.f32 %v13598_v20, 0.0  ;;  %v13601_v48 = vld [vmem:[#allocation123_spill] sm:$0xff] }
 0x323   :  { %13578 = vst [vmem:[#allocation64_spill] sm:$0xff] %v9260_v61  ;;  %13579 = vst [vmem:[#allocation66_spill] sm:$0xff] %v9263_v37  ;;  %v13586_v37 = vld [vmem:[#allocation201_spill] sm:$0xff]  ;;  %v9303_v3 = vmax.f32 %v13591_v52, 0.0  ;;  %v9317_v25 = vmax.f32 %v13601_v48, 0.0  ;;  %v13603_v39 = vld [vmem:[#allocation120_spill] sm:$0xff] }
 0x324   :  { %13580 = vst [vmem:[#allocation69_spill] sm:$0xff] %v9283_v35  ;;  %13581 = vst [vmem:[#allocation71_spill] sm:$0xff] %v9286_v45  ;;  %v9296_v61 = vmax.f32 %v13586_v37, 0.0  ;;  %v13600_v37 = vld [vmem:[#allocation151_spill] sm:$0xff]  ;;  %v9320_v34 = vmax.f32 %v13603_v39, 0.0  ;;  %v13605_v52 = vld [vmem:[#allocation122_spill] sm:$0xff] }
 0x325   :  { %13582 = vst [vmem:[#allocation68_spill] sm:$0xff] %v9289_v2  ;;  %13584 = vst [vmem:[#allocation70_spill] sm:$0xff] %v9292_v6  ;;  %v13606_v58 = vld [vmem:[#allocation17_spill] sm:$0xff]  ;;  %v13608_v47 = vld [vmem:[#allocation19_spill] sm:$0xff] }
 0x326   :  { %13587 = vst [vmem:[#allocation73_spill] sm:$0xff] %v9296_v61  ;;  %13589 = vst [vmem:[#allocation75_spill] sm:$0xff] %v9299_v10  ;;  %v9324_v22 = vmax.f32 %v13606_v58, 0.0  ;;  %v9327_v63 = vmax.f32 %v13608_v47, 0.0  ;;  %v13610_v56 = vld [vmem:[#allocation16_spill] sm:$0xff]  ;;  %v13611_v20 = vld [vmem:[#allocation18_spill] sm:$0xff] }
 0x327   :  { %13592 = vst [vmem:[#allocation72_spill] sm:$0xff] %v9303_v3  ;;  %13594 = vst [vmem:[#allocation74_spill] sm:$0xff] %v9306_v55  ;;  %v9331_v13 = vmax.f32 %v13611_v20, 0.0  ;;  %v13613_v7 = vld [vmem:[#allocation21_spill] sm:$0xff]  ;;  %v13615_v48 = vld [vmem:[#allocation23_spill] sm:$0xff] }
 0x328   :  { %13597 = vst [vmem:[#allocation77_spill] sm:$0xff] %v9310_v19  ;;  %13599 = vst [vmem:[#allocation79_spill] sm:$0xff] %v9313_v28  ;;  %v9334_v28 = vmax.f32 %v13613_v7, 0.0  ;;  %v13616_v39 = vld [vmem:[#allocation20_spill] sm:$0xff]  ;;  %v13618_v62 = vld [vmem:[#allocation22_spill] sm:$0xff] }
 0x329   :  { %13602 = vst [vmem:[#allocation76_spill] sm:$0xff] %v9317_v25  ;;  %13604 = vst [vmem:[#allocation78_spill] sm:$0xff] %v9320_v34  ;;  %v2013_v25 = vmax.f32 %v13615_v48, 0.0  ;;  %v9338_v34 = vmax.f32 %v13616_v39, 0.0  ;;  %v9341_v19 = vmax.f32 %v13618_v62, 0.0  ;;  %v13620_v58 = vld [vmem:[#allocation25_spill] sm:$0xff] }
 0x32a   :  { %13607 = vst [vmem:[#allocation81_spill] sm:$0xff] %v9324_v22  ;;  %13609 = vst [vmem:[#allocation83_spill] sm:$0xff] %v9327_v63  ;;  %v2016_v22 = vmax.f32 %v13620_v58, 0.0  ;;  %v13621_v47 = vld [vmem:[#allocation27_spill] sm:$0xff]  ;;  %v13623_v16 = vld [vmem:[#allocation24_spill] sm:$0xff] }
 0x32b   :  { %13612 = vst [vmem:[#allocation80_spill] sm:$0xff] %v9331_v13  ;;  %13614 = vst [vmem:[#allocation82_spill] sm:$0xff] %v9334_v28  ;;  %v9345_v63 = vmax.f32 %v13621_v47, 0.0  ;;  %v9348_v15 = vmax.f32 %v13623_v16, 0.0  ;;  %v13625_v20 = vld [vmem:[#allocation26_spill] sm:$0xff]  ;;  %v13626_v7 = vld [vmem:[#allocation29_spill] sm:$0xff] }
 0x32c   :  { %13617 = vst [vmem:[#allocation85_spill] sm:$0xff] %v9338_v34  ;;  %13619 = vst [vmem:[#allocation87_spill] sm:$0xff] %v9341_v19  ;;  %v2019_v13 = vmax.f32 %v13625_v20, 0.0  ;;  %v9352_v28 = vmax.f32 %v13626_v7, 0.0  ;;  %v13628_v48 = vld [vmem:[#allocation31_spill] sm:$0xff]  ;;  %v13630_v39 = vld [vmem:[#allocation28_spill] sm:$0xff] }
 0x32d   :  { %13622 = vst [vmem:[#allocation84_spill] sm:$0xff] %v9345_v63  ;;  %13624 = vst [vmem:[#allocation86_spill] sm:$0xff] %v9348_v15  ;;  %v9355_v50 = vmax.f32 %v13628_v48, 0.0  ;;  %v2022_v34 = vmax.f32 %v13630_v39, 0.0  ;;  %v13631_v62 = vld [vmem:[#allocation30_spill] sm:$0xff]  ;;  %v13633_v58 = vld [vmem:[#allocation124_spill] sm:$0xff] }
 0x32e   :  { %13627 = vst [vmem:[#allocation89_spill] sm:$0xff] %v9352_v28  ;;  %v9359_v19 = vmax.f32 %v13631_v62, 0.0  ;;  %v9362_v33 = vmax.f32 %v13633_v58, 0.0  ;;  %v13635_v47 = vld [vmem:[#allocation33_spill] sm:$0xff]  ;;  %v13636_v16 = vld [vmem:[#allocation35_spill] sm:$0xff]  ;;  %v13637_v20 = vld [vmem:[#allocation32_spill] sm:$0xff] }
 0x32f   :  { %13629 = vst [vmem:[#allocation91_spill] sm:$0xff] %v9355_v50  ;;  %v2025_v63 = vmax.f32 %v13635_v47, 0.0  ;;  %v9366_v15 = vmax.f32 %v13636_v16, 0.0  ;;  %v9369_v55 = vmax.f32 %v13637_v20, 0.0  ;;  %v13638_v7 = vld [vmem:[#allocation34_spill] sm:$0xff]  ;;  %v13639_v48 = vld [vmem:[#allocation37_spill] sm:$0xff] }
 0x330   :  { %13632 = vst [vmem:[#allocation88_spill] sm:$0xff] %v9359_v19  ;;  %13634 = vst [vmem:[#allocation90_spill] sm:$0xff] %v9362_v33  ;;  %v2028_v28 = vmax.f32 %v13638_v7, 0.0  ;;  %v9373_v50 = vmax.f32 %v13639_v48, 0.0  ;;  %v13640_v39 = vld [vmem:[#allocation39_spill] sm:$0xff]  ;;  %v13642_v62 = vld [vmem:[#allocation36_spill] sm:$0xff] }
 0x331   :  { %v9376_v3 = vmax.f32 %v13640_v39, 0.0  ;;  %v2031_v19 = vmax.f32 %v13642_v62, 0.0  ;;  %v9380_v58 = vmax.f32 %v9136_v21, 0.0  ;;  %v13644_v47 = vld [vmem:[#allocation38_spill] sm:$0xff]  ;;  %v2034_v16 = vmax.f32 %v9144_v43, 0.0  ;;  %v13648_v39 = vld [vmem:[#allocation41_spill] sm:$0xff] }
 0x332   :  { %v9383_v33 = vmax.f32 %v13644_v47, 0.0  ;;  %v9387_v20 = vmax.f32 %v9148_v26, 0.0  ;;  %v9390_v7 = vmax.f32 %v9152_v57, 0.0  ;;  %v2037_v48 = vmax.f32 %v9156_v1, 0.0  ;;  %v13651_v21 = vld [vmem:[#allocation43_spill] sm:$0xff]  ;;  %v13653_v43 = vld [vmem:[#allocation40_spill] sm:$0xff] }
 0x333   :  { %13641 = vst [vmem:[#allocation93_spill] sm:$0xff] %v9376_v3  ;;  %13643 = vst [vmem:[#allocation95_spill] sm:$0xff] %v9380_v58  ;;  %v9394_v3 = vmax.f32 %v13648_v39, 0.0  ;;  %v9397_v62 = vmax.f32 %v9164_v42, 0.0  ;;  %v2040_v58 = vmax.f32 %v13651_v21, 0.0  ;;  %v9401_v47 = vmax.f32 %v9172_v44, 0.0 }
 0x334   :  { %13645 = vst [vmem:[#allocation92_spill] sm:$0xff] %v9383_v33  ;;  %13646 = vst [vmem:[#allocation94_spill] sm:$0xff] %v9387_v20  ;;  %v9404_v33 = vmax.f32 %v13653_v43, 0.0  ;;  %v13655_v57 = vmax.f32 %v8956_v27, 0.0  ;;  %v13656_v1 = vmax.f32 %v8968_v32, 0.0  ;;  %v13657_v42 = vmax.f32 %v13585_v38, 0.0 }
 0x335   :  { %13647 = vst [vmem:[#allocation97_spill] sm:$0xff] %v9390_v7  ;;  %13649 = vst [vmem:[#allocation99_spill] sm:$0xff] %v9394_v3  ;;  %v13659_v44 = vmax.f32 %v13590_v17, 0.0  ;;  %v13661_v43 = vmax.f32 %v13595_v29, 0.0  ;;  %v9439_v3 = vrot.slane %v2013_v25, 1  ;;  %v9524_v20 = vrot.slane %v2040_v58, 2 }
 0x336   :  { %13650 = vst [vmem:[#allocation96_spill] sm:$0xff] %v9397_v62  ;;  %13652 = vst [vmem:[#allocation98_spill] sm:$0xff] %v9401_v47  ;;  %v9409_v7 = vrot.slane %v13655_v57, 1  ;;  %v9413_v39 = vrot.slane %v13656_v1, 1  ;;  %v9417_v62 = vrot.slane %v13657_v42, 1  ;;  %v13663_v57 = vmax.f32 %v13600_v37, 0.0 }
 0x337   :  { %13654 = vst [vmem:[#allocation101_spill] sm:$0xff] %v9404_v33  ;;  %v9421_v21 = vrot.slane %v13659_v44, 1  ;;  %v9425_v26 = vrot.slane %v13661_v43, 1  ;;  %v13665_v1 = vmax.f32 %v13605_v52, 0.0  ;;  %v13667_v42 = vmax.f32 %v13610_v56, 0.0  ;;  %13669 = vst [vmem:[#allocation106_spill] sm:$0xff] %v9439_v3 }
 0x338   :  { %13658 = vst [vmem:[#allocation103_spill] sm:$0xff] %v9417_v62  ;;  %v9429_v59 = vrot.slane %v13663_v57, 1  ;;  %v9441_v44 = vrot.slane %v2016_v22, 1  ;;  %v9445_v43 = vrot.slane %v2022_v34, 1  ;;  %v9449_v57 = vrot.slane %v2028_v28, 1  ;;  %13696 = vst [vmem:[#allocation165_spill] sm:$0xff] %v9524_v20 }
 0x339   :  { %13660 = vst [vmem:[#allocation100_spill] sm:$0xff] %v9421_v21  ;;  %13662 = vst [vmem:[#allocation102_spill] sm:$0xff] %v9425_v26  ;;  %v9433_v33 = vrot.slane %v13665_v1, 1  ;;  %v9437_v47 = vrot.slane %v13667_v42, 1  ;;  %v9443_v21 = vrot.slane %v2019_v13, 1  ;;  %v9447_v26 = vrot.slane %v2025_v63, 1 }
 0x33a   :  { %13664 = vst [vmem:[#allocation105_spill] sm:$0xff] %v9429_v59  ;;  %13670 = vst [vmem:[#allocation109_spill] sm:$0xff] %v9441_v44  ;;  %v9451_v59 = vrot.slane %v2031_v19, 1  ;;  %v9453_v1 = vrot.slane %v2034_v16, 1  ;;  %v9457_v42 = vrot.slane %v2040_v58, 1  ;;  %v13684_v3 = vmax.f32 %v13590_v17, 0.0 }
 0x33b   :  { %13666 = vst [vmem:[#allocation107_spill] sm:$0xff] %v9433_v33  ;;  %13668 = vst [vmem:[#allocation104_spill] sm:$0xff] %v9437_v47  ;;  %v9455_v33 = vrot.slane %v2037_v48, 1  ;;  %v13685_v44 = vmax.f32 %v13595_v29, 0.0  ;;  %v9501_v17 = vrot.slane %v2019_v13, 2  ;;  %v9503_v29 = vrot.slane %v2022_v34, 2 }
 0x33c   :  { %13671 = vst [vmem:[#allocation111_spill] sm:$0xff] %v9443_v21  ;;  %13672 = vst [vmem:[#allocation108_spill] sm:$0xff] %v9445_v43  ;;  %v13679_v21 = vmax.f32 %v8804_v51, 0.0  ;;  %v9517_v13 = vrot.slane %v2034_v16, 2  ;;  %v9519_v34 = vrot.slane %v2037_v48, 2  ;;  %v2430_v16 = vrot.slane %v9270_v0, 2 }
 0x33d   :  { %13673 = vst [vmem:[#allocation110_spill] sm:$0xff] %v9447_v26  ;;  %13674 = vst [vmem:[#allocation113_spill] sm:$0xff] %v9449_v57  ;;  %v13681_v26 = vmax.f32 %v8956_v27, 0.0  ;;  %v13686_v27 = vmax.f32 %v13600_v37, 0.0  ;;  %v9507_v37 = vrot.slane %v2028_v28, 2  ;;  %v13697_v48 = vmax.f32 %v8948_v54, 0.0 }
 0x33e   :  { %13675 = vst [vmem:[#allocation115_spill] sm:$0xff] %v9451_v59  ;;  %13676 = vst [vmem:[#allocation112_spill] sm:$0xff] %v9453_v1  ;;  %v9463_v43 = vrot.slane %v13679_v21, 2  ;;  %v13682_v59 = vmax.f32 %v8968_v32, 0.0  ;;  %v9483_v21 = vrot.slane %v13685_v44, 2  ;;  %v13687_v32 = vmax.f32 %v13605_v52, 0.0 }
 0x33f   :  { %13677 = vst [vmem:[#allocation114_spill] sm:$0xff] %v9455_v33  ;;  %13678 = vst [vmem:[#allocation117_spill] sm:$0xff] %v9457_v42  ;;  %v9467_v47 = vrot.slane %v13681_v26, 2  ;;  %v13683_v33 = vmax.f32 %v13585_v38, 0.0  ;;  %v9479_v42 = vrot.slane %v13684_v3, 2  ;;  %v9487_v26 = vrot.slane %v13686_v27, 2 }
 0x340   :  { %13680 = vst [vmem:[#allocation119_spill] sm:$0xff] %v9463_v43  ;;  %v9471_v57 = vrot.slane %v13682_v59, 2  ;;  %v9491_v59 = vrot.slane %v13687_v32, 2  ;;  %v13688_v38 = vmax.f32 %v13610_v56, 0.0  ;;  %v9497_v43 = vrot.slane %v2013_v25, 2  ;;  %13689 = vst [vmem:[#allocation116_spill] sm:$0xff] %v9507_v37 }
 0x341   :  { %v9475_v1 = vrot.slane %v13683_v33, 2  ;;  %v9499_v3 = vrot.slane %v2016_v22, 2  ;;  %v9505_v44 = vrot.slane %v2025_v63, 2  ;;  %v9509_v27 = vrot.slane %v2031_v19, 2  ;;  %v13691_v52 = vld [vmem:[#allocation156_spill] sm:$0xff]  ;;  %v13692_v56 = vld [vmem:[#allocation157_spill] sm:$0xff] }
 0x342   :  { %v9495_v33 = vrot.slane %v13688_v38, 2  ;;  %v1870_v32 = vadd.f32 %v8792_v4, %v13691_v52  ;;  %v1871_v38 = vadd.f32 %v8792_v4, %v13692_v56  ;;  %v2144_v25 = vrot.slane %v9183_v14, 1  ;;  %13693 = vst [vmem:[#allocation121_spill] sm:$0xff] %v9517_v13  ;;  %13694 = vst [vmem:[#allocation164_spill] sm:$0xff] %v9519_v34  ;;  %v13700_v20 = vld [vmem:[#allocation159_spill] sm:$0xff]  ;;  %v6491_v13 = vld [vmem:[#allocation8 + $0x100] sm:$0xff]  }
 0x343   :  { %13690 = vst [vmem:[#allocation118_spill] sm:$0xff] %v9509_v27  ;;  %v2145_v22 = vrot.slane %v9186_v41, 1  ;;  %v13695_v63 = vmax.f32 %v8804_v51, 0.0  ;;  %v2429_v19 = vrot.slane %v9267_v30, 2  ;;  %v2432_v34 = vrot.slane %v13697_v48, 2 }
 0x344   :  { %v9526_v27 = vmax.f32 %v1870_v32, 0.0  ;;  %v9528_v52 = vmax.f32 %v1871_v38, 0.0  ;;  %v2661_v51 = vpack.c.bf16 %v9186_v41, %v9183_v14  ;;  %v2149_v48 = vrot.slane %v9190_v23, 1 }
 0x345   :  { %v2147_v28 = vrot.slane %v13695_v63, 1  ;;  %v2146_v56 = vsel %vm2143_vm1, %v2144_v25, %v2145_v22  ;;  %v13699_v63 = vld [vmem:[#allocation158_spill] sm:$0xff]  ;;  %v1874_v25 = vadd.f32 %v8792_v4, %v13700_v20  ;;  %v2150_v14 = vrot.slane %v9193_v31, 1 }
 0x346   :  { %v9539_v58 = vpack.c.bf16 %v9528_v52, %v9526_v27  ;;  %v1873_v38 = vadd.f32 %v8792_v4, %v13699_v63  ;;  %v13702_v20 = vmax.f32 %v8816_v49, 0.0  ;;  %v13703_v4 = vmax.f32 %v8952_v60, 0.0 }
 0x347   :  { %v2148_v62 = vsel %vm2143_vm1, %v2145_v22, %v2147_v28  ;;  %v2431_v22 = vsel %vm2368_vm2, %v2429_v19, %v2430_v16  ;;  %v2433_v28 = vsel %vm2368_vm2, %v2430_v16, %v2432_v34  ;;  %v2151_v34 = vsel %vm2143_vm1, %v2149_v48, %v2150_v14 }
 0x348   :  { %13698 = vst [vmem:[#allocation166_spill] sm:$0xff] %v9539_v58  ;;  %v2662_v32 = vpack.c.bf16 %v2148_v62, %v2146_v56  ;;  %3762 = vmatprep.mubr.bf16.mxu1 %v9539_v58  ;;  %v9550_v41 = vpack.c.bf16 %v2433_v28, %v2431_v22  ;;  %v9552_v62 = vmax.f32 %v1873_v38, 0.0  ;;  %v9554_v56 = vmax.f32 %v1874_v25, 0.0 }
 0x349   :  { %v2152_v63 = vrot.slane %v13702_v20, 1  ;;  %v2434_v19 = vrot.slane %v9526_v27, 2  ;;  %v2435_v16 = vrot.slane %v9528_v52, 2  ;;  %v2437_v58 = vrot.slane %v13703_v4, 2  ;;  %v6492_v20 = vld [vmem:[#allocation8 + $0x108] sm:$0xff]  }
 0x34a   :  { %3377 = vmatprep.mubr.bf16.mxu0 %v2662_v32  ;;  %13701 = vst [vmem:[#allocation167_spill] sm:$0xff] %v9550_v41  ;;  %3763 = vmatmul.mubr.bf16.vlgmr.msra.gmra.mrb[0].mxu1 %v9550_v41  ;;  %v9566_v32 = vpack.c.bf16 %v9554_v56, %v9552_v62  ;;  %v9575_v25 = vpack.c.bf16 %v9279_v18, %v9276_v12  ;;  %v2154_v48 = vrot.slane %v9197_v5, 1  ;;  %v6535_v41 = vld [vmem:[#allocation8 + $0x80] sm:$0xff]   ;;  %v2155_v49 = vrot.slane %v9200_v11, 1 }
 0x34b   :  { %3378 = vmatmul.mubr.bf16.vlgmr.msra.gmra.mrb[108].mxu0 %v2661_v51  ;;  %v2153_v38 = vsel %vm2143_vm1, %v2150_v14, %v2152_v63  ;;  %v9571_v51 = vpack.c.bf16 %v9193_v31, %v9190_v23  ;;  %3924 = vmatpush1.bf16.msra.mxu1 %v6491_v13  ;;  %v2436_v4 = vsel %vm2368_vm2, %v2434_v19, %v2435_v16  ;;  %v13709_v63 = vmov 0   ;;  %v6536_v31 = vld [vmem:[#allocation8 + $0x88] sm:$0xff]  }
 0x34c   :  { %13704 = vst [vmem:[#allocation168_spill] sm:$0xff] %v9566_v32  ;;  %13706 = vst [vmem:[#allocation170_spill] sm:$0xff] %v9575_v25  ;;  %v9577_v22 = vpack.c.bf16 %v2153_v38, %v2151_v34  ;;  %v2438_v28 = vsel %vm2368_vm2, %v2435_v16, %v2437_v58  ;;  %3635 = vmatpush1.bf16.msra.mxu0 %v6535_v41  ;;  %3770 = vmatprep.mubr.bf16.mxu1 %v9566_v32  ;;  %v13710_v13 = vmax.f32 %v8828_v36, 0.0 }
 0x34d   :  { %13705 = vst [vmem:[#allocation169_spill] sm:$0xff] %v9571_v51  ;;  %v9583_v14 = vpack.c.bf16 %v2438_v28, %v2436_v4  ;;  %3925 = vmatprep.subr.bf16.mxu1 %v13709_v63  ;;  %v2439_v19 = vrot.slane %v9552_v62, 2  ;;  %v2440_v58 = vrot.slane %v9554_v56, 2  ;;  %v9594_v41 = vpack.c.bf16 %v9200_v11, %v9197_v5  ;;  %3636 = vmatprep.subr.bf16.mxu0 %v13709_v63 }
 0x34e   :  { %13707 = vst [vmem:[#allocation171_spill] sm:$0xff] %v9577_v22  ;;  %v2157_v34 = vrot.slane %v13710_v13, 1  ;;  %3385 = vmatprep.mubr.bf16.mxu0 %v9577_v22  ;;  %v9598_v16 = vpack.c.bf16 %v9286_v45, %v9283_v35  ;;  %v2159_v38 = vrot.slane %v9204_v9, 1  ;;  %v2156_v4 = vsel %vm2143_vm1, %v2154_v48, %v2155_v49  ;;  %v6493_v35 = vld [vmem:[#allocation8 + $0x110] sm:$0xff]  }
 0x34f   :  { %13708 = vst [vmem:[#allocation172_spill] sm:$0xff] %v9583_v14  ;;  %13711 = vst [vmem:[#allocation173_spill] sm:$0xff] %v9594_v41  ;;  %v2160_v13 = vrot.slane %v9207_v46, 1  ;;  %v13713_v22 = vmax.f32 %v8840_v24, 0.0  ;;  %3926 = vmatpush1.bf16.msra.mxu1 %v6492_v20  ;;  %v2441_v11 = vsel %vm2368_vm2, %v2439_v19, %v2440_v58  ;;  %v2443_v45 = vsel %vm2368_vm2, %v2440_v58, %v9467_v47  ;;  %v13732_v24 = vld [vmem:[#allocation79_spill] sm:$0xff] }
 0x350   :  { %13712 = vst [vmem:[#allocation174_spill] sm:$0xff] %v9598_v16  ;;  %v2158_v28 = vsel %vm2143_vm1, %v2155_v49, %v2157_v34  ;;  %v2444_v5 = vrot.slane %v9276_v12, 2  ;;  %3637 = vmatpush1.bf16.msra.mxu0 %v6536_v31  ;;  %v9613_v48 = vpack.c.bf16 %v2443_v45, %v2441_v11  ;;  %3927 = vmatprep.subr.bf16.mxu1 %v13709_v63  ;;  %v2164_v11 = vrot.slane %v9211_v8, 1 }
 0x351   :  { %v2162_v32 = vrot.slane %v13713_v22, 1  ;;  %v9607_v36 = vpack.c.bf16 %v2158_v28, %v2156_v4  ;;  %v2161_v49 = vsel %vm2143_vm1, %v2159_v38, %v2160_v13  ;;  %v2445_v22 = vrot.slane %v9279_v18, 2  ;;  %3638 = vmatprep.subr.bf16.mxu0 %v13709_v63  ;;  %v6494_v28 = vld [vmem:[#allocation8 + $0x118] sm:$0xff]  }
 0x352   :  { %13715 = vst [vmem:[#allocation175_spill] sm:$0xff] %v9613_v48  ;;  %v9625_v20 = vpack.c.bf16 %v9207_v46, %v9204_v9  ;;  %v9629_v31 = vpack.c.bf16 %v9299_v10, %v9296_v61  ;;  %3771 = vmatmul.mubr.bf16.gmra.mrb[4].mxu1 %v9583_v14  ;;  %v2165_v19 = vrot.slane %v9214_v53, 1  ;;  %v13719_v58 = vmax.f32 %v8852_v40, 0.0  ;;  %v6537_v14 = vld [vmem:[#allocation8 + $0x90] sm:$0xff]   ;;  %v13728_v40 = vld [vmem:[#allocation193_spill] sm:$0xff] }
 0x353   :  { %13714 = vst [vmem:[#allocation127_spill] sm:$0xff] %v9607_v36  ;;  %v2163_v34 = vsel %vm2143_vm1, %v2160_v13, %v2162_v32  ;;  %3386 = vmatmul.mubr.bf16.gmra.mrb[112].mxu0 %v9571_v51  ;;  %v2446_v45 = vsel %vm2368_vm2, %v2444_v5, %v2445_v22  ;;  %v2448_v32 = vsel %vm2368_vm2, %v2445_v22, %v9471_v57  ;;  %v2449_v13 = vrot.slane %v9289_v2, 2  ;;  %v13722_v22 = vld [vmem:[#allocation72_spill] sm:$0xff] }
 0x354   :  { %v9621_v47 = vpack.c.bf16 %v2163_v34, %v2161_v49  ;;  %13717 = vst [vmem:[#allocation176_spill] sm:$0xff] %v9625_v20  ;;  %13718 = vst [vmem:[#allocation129_spill] sm:$0xff] %v9629_v31  ;;  %3393 = vmatprep.mubr.bf16.mxu0 %v9607_v36  ;;  %v2167_v38 = vrot.slane %v13719_v58, 1  ;;  %3778 = vmatprep.mubr.bf16.mxu1 %v9575_v25  ;;  %v9641_v4 = vpack.c.bf16 %v2448_v32, %v2446_v45  ;;  %v13723_v58 = vld [vmem:[#allocation74_spill] sm:$0xff]  ;;  %v13725_v45 = vld [vmem:[#allocation52_spill] sm:$0xff] }
 0x355   :  { %3928 = vmatpush1.bf16.msra.mxu1 %v6493_v35  ;;  %v2450_v49 = vrot.slane %v9292_v6, 2  ;;  %v9647_v5 = vpack.c.bf16 %v9214_v53, %v9211_v8  ;;  %v2166_v57 = vsel %vm2143_vm1, %v2164_v11, %v2165_v19  ;;  %v9654_v35 = vpack.c.bf16 %v13723_v58, %v13722_v22  ;;  %3639 = vmatpush1.bf16.msra.mxu0 %v6537_v14  ;;  %v13734_v25 = vld [vmem:[#allocation57_spill] sm:$0xff] }
 0x356   :  { %13716 = vst [vmem:[#allocation128_spill] sm:$0xff] %v9621_v47  ;;  %13720 = vst [vmem:[#allocation177_spill] sm:$0xff] %v9641_v4  ;;  %v2168_v34 = vsel %vm2143_vm1, %v2165_v19, %v2167_v38  ;;  %3929 = vmatprep.subr.bf16.mxu1 %v13709_v63  ;;  %v2169_v32 = vrot.slane %v13725_v45, 1  ;;  %v13727_v19 = vld [vmem:[#allocation54_spill] sm:$0xff]  ;;  %3640 = vmatprep.subr.bf16.mxu0 %v13709_v63  ;;  %v13729_v53 = vmax.f32 %v13728_v40, 0.0  ;;  %v2454_v14 = vrot.slane %v9296_v61, 2 }
 0x357   :  { %13721 = vst [vmem:[#allocation130_spill] sm:$0xff] %v9647_v5  ;;  %13724 = vst [vmem:[#allocation178_spill] sm:$0xff] %v9654_v35  ;;  %v9657_v51 = vpack.c.bf16 %v2168_v34, %v2166_v57  ;;  %v9660_v36 = vsel %vm2368_vm2, %v2449_v13, %v2450_v49  ;;  %v9664_v11 = vsel %vm2368_vm2, %v2450_v49, %v9475_v1  ;;  %v2170_v38 = vrot.slane %v13727_v19, 1  ;;  %v6495_v34 = vld [vmem:[#allocation8 + $0x120] sm:$0xff]   ;;  %v13731_v49 = vld [vmem:[#allocation77_spill] sm:$0xff] }
 0x358   :  { %v2172_v8 = vrot.slane %v13729_v53, 1  ;;  %v2455_v57 = vrot.slane %v9299_v10, 2  ;;  %v9677_v1 = vpack.c.bf16 %v13727_v19, %v13725_v45  ;;  %v9681_v46 = vpack.c.bf16 %v13732_v24, %v13731_v49  ;;  %v6538_v10 = vld [vmem:[#allocation8 + $0x98] sm:$0xff]   ;;  %v13738_v61 = vld [vmem:[#allocation194_spill] sm:$0xff] }
 0x359   :  { %13726 = vst [vmem:[#allocation131_spill] sm:$0xff] %v9657_v51  ;;  %3930 = vmatpush1.bf16.msra.mxu1 %v6494_v28  ;;  %v2171_v13 = vsel %vm2143_vm1, %v2169_v32, %v2170_v38  ;;  %v2174_v9 = vrot.slane %v13734_v25, 1  ;;  %v13735_v32 = vld [vmem:[#allocation59_spill] sm:$0xff]  ;;  %3641 = vmatpush1.bf16.msra.mxu0 %v6538_v10  ;;  %v13739_v37 = vmax.f32 %v13738_v61, 0.0  ;;  %v2460_v10 = vrot.slane %v13723_v58, 2  ;;  %v6496_v58 = vld [vmem:[#allocation8 + $0x128] sm:$0xff]  }
 0x35a   :  { %13730 = vst [vmem:[#allocation179_spill] sm:$0xff] %v9677_v1  ;;  %13733 = vst [vmem:[#allocation132_spill] sm:$0xff] %v9681_v46  ;;  %v2173_v53 = vsel %vm2143_vm1, %v2170_v38, %v2172_v8  ;;  %3931 = vmatprep.subr.bf16.mxu1 %v13709_v63  ;;  %v2456_v40 = vsel %vm2368_vm2, %v2454_v14, %v2455_v57  ;;  %v2458_v28 = vsel %vm2368_vm2, %v2455_v57, %v9479_v42  ;;  %v13742_v57 = vld [vmem:[#allocation78_spill] sm:$0xff] }
 0x35b   :  { %v2175_v23 = vrot.slane %v13735_v32, 1  ;;  %3394 = vmatmul.mubr.bf16.gmra.mrb[116].mxu0 %v9594_v41  ;;  %v9691_v19 = vpack.c.bf16 %v2173_v53, %v2171_v13  ;;  %v9693_v45 = vpack.c.bf16 %v2458_v28, %v2456_v40  ;;  %v2177_v8 = vrot.slane %v13739_v37, 1  ;;  %3642 = vmatprep.subr.bf16.mxu0 %v13709_v63  ;;  %v13741_v40 = vld [vmem:[#allocation76_spill] sm:$0xff] }
 0x35c   :  { %v2459_v38 = vrot.slane %v13722_v22, 2  ;;  %3779 = vmatmul.mubr.bf16.gmra.mrb[8].mxu1 %v9613_v48  ;;  %3401 = vmatprep.mubr.bf16.mxu0 %v9621_v47  ;;  %v9705_v14 = vpack.c.bf16 %v13735_v32, %v13734_v25  ;;  %v9709_v13 = vpack.c.bf16 %v13742_v57, %v13741_v40  ;;  %v13744_v53 = vld [vmem:[#allocation56_spill] sm:$0xff]  ;;  %v13745_v48 = vld [vmem:[#allocation58_spill] sm:$0xff]  ;;  %v2463_v25 = vsel %vm2368_vm2, %v2460_v10, %v9483_v21 }
 0x35d   :  { %13736 = vst [vmem:[#allocation180_spill] sm:$0xff] %v9691_v19  ;;  %13737 = vst [vmem:[#allocation133_spill] sm:$0xff] %v9693_v45  ;;  %v2176_v42 = vsel %vm2143_vm1, %v2174_v9, %v2175_v23  ;;  %3786 = vmatprep.mubr.bf16.mxu1 %v9598_v16  ;;  %3932 = vmatpush1.bf16.msra.mxu1 %v6495_v34  ;;  %v2178_v37 = vsel %vm2143_vm1, %v2175_v23, %v2177_v8  ;;  %v2179_v28 = vrot.slane %v13744_v53, 1  ;;  %v13746_v9 = vld [vmem:[#allocation195_spill] sm:$0xff]  ;;  %v6539_v23 = vld [vmem:[#allocation8 + $0xa0] sm:$0xff]  }
 0x35e   :  { %13740 = vst [vmem:[#allocation181_spill] sm:$0xff] %v9705_v14  ;;  %13743 = vst [vmem:[#allocation134_spill] sm:$0xff] %v9709_v13  ;;  %v2180_v41 = vrot.slane %v13745_v48, 1  ;;  %v13747_v47 = vmax.f32 %v13746_v9, 0.0  ;;  %v9717_v22 = vpack.c.bf16 %v2178_v37, %v2176_v42  ;;  %v2461_v32 = vsel %vm2368_vm2, %v2459_v38, %v2460_v10  ;;  %3933 = vmatprep.subr.bf16.mxu1 %v13709_v63  ;;  %v13752_v10 = vld [vmem:[#allocation81_spill] sm:$0xff]  ;;  %v13753_v37 = vld [vmem:[#allocation83_spill] sm:$0xff] }
 0x35f   :  { %v2464_v34 = vrot.slane %v13731_v49, 2  ;;  %3643 = vmatpush1.bf16.msra.mxu0 %v6539_v23  ;;  %v9724_v8 = vpack.c.bf16 %v2463_v25, %v2461_v32  ;;  %v2465_v42 = vrot.slane %v13732_v24, 2  ;;  %v9734_v21 = vpack.c.bf16 %v13745_v48, %v13744_v53  ;;  %v13755_v25 = vld [vmem:[#allocation61_spill] sm:$0xff]  ;;  %v6497_v49 = vld [vmem:[#allocation8 + $0x130] sm:$0xff]  }
 0x360   :  { %v2182_v61 = vrot.slane %v13747_v47, 1  ;;  %13748 = vst [vmem:[#allocation182_spill] sm:$0xff] %v9717_v22  ;;  %v2181_v16 = vsel %vm2143_vm1, %v2179_v28, %v2180_v41  ;;  %3644 = vmatprep.subr.bf16.mxu0 %v13709_v63  ;;  %v9738_v9 = vpack.c.bf16 %v13753_v37, %v13752_v10  ;;  %v2184_v32 = vrot.slane %v13755_v25, 1 }
 0x361   :  { %13749 = vst [vmem:[#allocation135_spill] sm:$0xff] %v9724_v8  ;;  %13751 = vst [vmem:[#allocation136_spill] sm:$0xff] %v9734_v21  ;;  %3934 = vmatpush1.bf16.msra.mxu1 %v6496_v58  ;;  %v2466_v28 = vsel %vm2368_vm2, %v2464_v34, %v2465_v42  ;;  %v2469_v53 = vrot.slane %v13741_v40, 2  ;;  %v6540_v34 = vld [vmem:[#allocation8 + $0xa8] sm:$0xff]  }
 0x362   :  { %v2183_v47 = vsel %vm2143_vm1, %v2180_v41, %v2182_v61  ;;  %13754 = vst [vmem:[#allocation184_spill] sm:$0xff] %v9738_v9  ;;  %v2468_v61 = vsel %vm2368_vm2, %v2465_v42, %v9487_v26  ;;  %v13756_v41 = vld [vmem:[#allocation63_spill] sm:$0xff]  ;;  %3935 = vmatprep.subr.bf16.mxu1 %v13709_v63  ;;  %v2470_v9 = vrot.slane %v13742_v57, 2 }
 0x363   :  { %v9730_v38 = vpack.c.bf16 %v2183_v47, %v2181_v16  ;;  %v2185_v23 = vrot.slane %v13756_v41, 1  ;;  %v13757_v16 = vld [vmem:[#allocation196_spill] sm:$0xff]  ;;  %v9747_v48 = vpack.c.bf16 %v2468_v61, %v2466_v28  ;;  %v9754_v58 = vpack.c.bf16 %v13756_v41, %v13755_v25  ;;  %3645 = vmatpush1.bf16.msra.mxu0 %v6540_v34  ;;  %v13762_v61 = vld [vmem:[#allocation82_spill] sm:$0xff]  ;;  %v13768_v25 = vld [vmem:[#allocation197_spill] sm:$0xff] }
 0x364   :  { %v13758_v47 = vmax.f32 %v13757_v16, 0.0  ;;  %3402 = vmatmul.mubr.bf16.gmra.mrb[120].mxu0 %v9625_v20  ;;  %v13761_v28 = vld [vmem:[#allocation80_spill] sm:$0xff]  ;;  %3646 = vmatprep.subr.bf16.mxu0 %v13709_v63  ;;  %v2471_v34 = vsel %vm2368_vm2, %v2469_v53, %v2470_v9 }
 0x365   :  { %13750 = vst [vmem:[#allocation183_spill] sm:$0xff] %v9730_v38  ;;  %13759 = vst [vmem:[#allocation137_spill] sm:$0xff] %v9747_v48  ;;  %v2186_v26 = vsel %vm2143_vm1, %v2184_v32, %v2185_v23  ;;  %v13764_v16 = vld [vmem:[#allocation60_spill] sm:$0xff]  ;;  %3787 = vmatmul.mubr.bf16.gmra.mrb[12].mxu1 %v9641_v4  ;;  %3409 = vmatprep.mubr.bf16.mxu0 %v9657_v51  ;;  %v2473_v32 = vsel %vm2368_vm2, %v2470_v9, %v9491_v59  ;;  %v6498_v4 = vld [vmem:[#allocation8 + $0x138] sm:$0xff]   ;;  %v2474_v51 = vrot.slane %v13752_v10, 2 }
 0x366   :  { %v2187_v24 = vrot.slane %v13758_v47, 1  ;;  %13760 = vst [vmem:[#allocation185_spill] sm:$0xff] %v9754_v58  ;;  %v9761_v47 = vpack.c.bf16 %v13762_v61, %v13761_v28  ;;  %v2189_v40 = vrot.slane %v13764_v16, 1  ;;  %3794 = vmatprep.mubr.bf16.mxu1 %v9629_v31  ;;  %3936 = vmatpush1.bf16.msra.mxu1 %v6497_v49  ;;  %v9774_v20 = vpack.c.bf16 %v2473_v32, %v2471_v34  ;;  %v13771_v9 = vld [vmem:[#allocation85_spill] sm:$0xff]  ;;  %v13772_v49 = vld [vmem:[#allocation87_spill] sm:$0xff] }
 0x367   :  { %3937 = vmatprep.subr.bf16.mxu1 %v13709_v63  ;;  %v13774_v34 = vld [vmem:[#allocation65_spill] sm:$0xff] }
 0x368   :  { %v2188_v42 = vsel %vm2143_vm1, %v2185_v23, %v2187_v24  ;;  %13763 = vst [vmem:[#allocation138_spill] sm:$0xff] %v9761_v47  ;;  %v13766_v24 = vld [vmem:[#allocation62_spill] sm:$0xff]  ;;  %13767 = vst [vmem:[#allocation139_spill] sm:$0xff] %v9774_v20  ;;  %v13769_v47 = vmax.f32 %v13768_v25, 0.0  ;;  %v2194_v32 = vrot.slane %v13774_v34, 1  ;;  %v13775_v20 = vld [vmem:[#allocation67_spill] sm:$0xff] }
 0x369   :  { %v9767_v41 = vpack.c.bf16 %v2188_v42, %v2186_v26  ;;  %v2190_v23 = vrot.slane %v13766_v24, 1  ;;  %v2475_v26 = vrot.slane %v13753_v37, 2  ;;  %v9784_v59 = vpack.c.bf16 %v13766_v24, %v13764_v16 }
 0x36a   :  { %v2192_v58 = vrot.slane %v13769_v47, 1  ;;  %v9788_v42 = vpack.c.bf16 %v13772_v49, %v13771_v9  ;;  %v6541_v47 = vld [vmem:[#allocation8 + $0xb0] sm:$0xff]   ;;  %v2195_v37 = vrot.slane %v13775_v20, 1  ;;  %3938 = vmatpush1.bf16.msra.mxu1 %v6498_v4 }
 0x36b   :  { %13765 = vst [vmem:[#allocation186_spill] sm:$0xff] %v9767_v41  ;;  %v2191_v53 = vsel %vm2143_vm1, %v2189_v40, %v2190_v23  ;;  %13770 = vst [vmem:[#allocation187_spill] sm:$0xff] %v9784_v59  ;;  %3647 = vmatpush1.bf16.msra.mxu0 %v6541_v47  ;;  %v2476_v25 = vsel %vm2368_vm2, %v2474_v51, %v2475_v26  ;;  %v2478_v40 = vsel %vm2368_vm2, %v2475_v26, %v9495_v33  ;;  %v13780_v26 = vld [vmem:[#allocation84_spill] sm:$0xff]  ;;  %v13784_v4 = vld [vmem:[#allocation66_spill] sm:$0xff] }
 0x36c   :  { %13773 = vst [vmem:[#allocation140_spill] sm:$0xff] %v9788_v42  ;;  %v2193_v31 = vsel %vm2143_vm1, %v2190_v23, %v2192_v58  ;;  %3648 = vmatprep.subr.bf16.mxu0 %v13709_v63  ;;  %v9799_v16 = vpack.c.bf16 %v2478_v40, %v2476_v25  ;;  %v13778_v42 = vld [vmem:[#allocation198_spill] sm:$0xff]  ;;  %v2479_v47 = vrot.slane %v13761_v28, 2  ;;  %v2196_v58 = vsel %vm2143_vm1, %v2194_v32, %v2195_v37  ;;  %v6499_v23 = vld [vmem:[#allocation8 + $0x140] sm:$0xff]   ;;  %v13785_v32 = vld [vmem:[#allocation199_spill] sm:$0xff] }
 0x36d   :  { %v9797_v24 = vpack.c.bf16 %v2193_v31, %v2191_v53  ;;  %v13779_v59 = vmax.f32 %v13778_v42, 0.0  ;;  %v2480_v51 = vrot.slane %v13762_v61, 2  ;;  %v9808_v33 = vpack.c.bf16 %v13775_v20, %v13774_v34  ;;  %v13781_v31 = vld [vmem:[#allocation86_spill] sm:$0xff]  ;;  %3939 = vmatprep.subr.bf16.mxu1 %v13709_v63  ;;  %v6542_v61 = vld [vmem:[#allocation8 + $0xb8] sm:$0xff]   ;;  %3410 = vmatmul.mubr.bf16.gmra.mrb[124].mxu0 %v9647_v5 }
 0x36e   :  { %13777 = vst [vmem:[#allocation141_spill] sm:$0xff] %v9799_v16  ;;  %v9812_v53 = vpack.c.bf16 %v13781_v31, %v13780_v26  ;;  %v2200_v42 = vrot.slane %v13784_v4, 1  ;;  %v13786_v16 = vmax.f32 %v13785_v32, 0.0  ;;  %3417 = vmatprep.mubr.bf16.mxu0 %v9691_v19  ;;  %3940 = vmatpush1.bf16.msra.mxu1 %v6499_v23  ;;  %v2205_v23 = vrot.slane %v9270_v0, 1 }
 0x36f   :  { %13776 = vst [vmem:[#allocation188_spill] sm:$0xff] %v9797_v24  ;;  %v2197_v10 = vrot.slane %v13779_v59, 1  ;;  %v13783_v59 = vld [vmem:[#allocation64_spill] sm:$0xff]  ;;  %3649 = vmatpush1.bf16.msra.mxu0 %v6542_v61  ;;  %v2481_v34 = vsel %vm2368_vm2, %v2479_v47, %v2480_v51  ;;  %v2485_v47 = vrot.slane %v13772_v49, 2  ;;  %3941 = vmatprep.subr.bf16.mxu1 %v13709_v63  ;;  %v2489_v5 = vrot.slane %v13780_v26, 2 }
 0x370   :  { %13782 = vst [vmem:[#allocation189_spill] sm:$0xff] %v9812_v53  ;;  %v2199_v40 = vrot.slane %v13783_v59, 1  ;;  %v2202_v24 = vrot.slane %v13786_v16, 1  ;;  %3650 = vmatprep.subr.bf16.mxu0 %v13709_v63  ;;  %v13788_v53 = vpack.c.bf16 %v9664_v11, %v9660_v36  ;;  %v13790_v36 = vld [vmem:[#allocation89_spill] sm:$0xff]  ;;  %v13791_v11 = vld [vmem:[#allocation91_spill] sm:$0xff]  ;;  %v2490_v19 = vrot.slane %v13781_v31, 2 }
 0x371   :  { %v2198_v25 = vsel %vm2143_vm1, %v2195_v37, %v2197_v10  ;;  %v2483_v10 = vsel %vm2368_vm2, %v2480_v51, %v9497_v43  ;;  %v2484_v37 = vrot.slane %v13771_v9, 2  ;;  %v9842_v51 = vpack.c.bf16 %v13784_v4, %v13783_v59 }
 0x372   :  { %v9821_v20 = vpack.c.bf16 %v2198_v25, %v2196_v58  ;;  %3795 = vmatmul.mubr.bf16.gmra.mrb[16].mxu1 %v13788_v53  ;;  %v9832_v16 = vpack.c.bf16 %v2483_v10, %v2481_v34  ;;  %v2201_v61 = vsel %vm2143_vm1, %v2199_v40, %v2200_v42  ;;  %v2203_v58 = vsel %vm2143_vm1, %v2200_v42, %v2202_v24  ;;  %v6500_v25 = vld [vmem:[#allocation8 + $0x148] sm:$0xff]  }
 0x373   :  { %3802 = vmatprep.mubr.bf16.mxu1 %v9654_v35  ;;  %v9838_v43 = vpack.c.bf16 %v2203_v58, %v2201_v61  ;;  %v9846_v53 = vpack.c.bf16 %v13791_v11, %v13790_v36  ;;  %v2204_v34 = vrot.slane %v9267_v30, 1  ;;  %v2486_v24 = vsel %vm2368_vm2, %v2484_v37, %v2485_v47  ;;  %v6543_v61 = vld [vmem:[#allocation8 + $0xc0] sm:$0xff]   ;;  %3942 = vmatpush1.bf16.msra.mxu1 %v6500_v25  ;;  %v6544_v25 = vld [vmem:[#allocation8 + $0xc8] sm:$0xff]  }
 0x374   :  { %13787 = vst [vmem:[#allocation142_spill] sm:$0xff] %v9821_v20  ;;  %v2488_v42 = vsel %vm2368_vm2, %v2485_v47, %v9499_v3  ;;  %v13793_v40 = vmax.f32 %v8948_v54, 0.0  ;;  %3651 = vmatpush1.bf16.msra.mxu0 %v6543_v61  ;;  %v9862_v37 = vpack.c.bf16 %v9270_v0, %v9267_v30  ;;  %v13795_v54 = vld [vmem:[#allocation88_spill] sm:$0xff]  ;;  %v2491_v61 = vsel %vm2368_vm2, %v2489_v5, %v2490_v19 }
 0x375   :  { %13789 = vst [vmem:[#allocation190_spill] sm:$0xff] %v9838_v43  ;;  %13792 = vst [vmem:[#allocation146_spill] sm:$0xff] %v9846_v53  ;;  %v9856_v58 = vpack.c.bf16 %v2488_v42, %v2486_v24  ;;  %3652 = vmatprep.subr.bf16.mxu0 %v13709_v63  ;;  %v2206_v3 = vsel %vm2143_vm1, %v2204_v34, %v2205_v23  ;;  %v2209_v24 = vrot.slane %v9526_v27, 1  ;;  %v2210_v30 = vrot.slane %v9528_v52, 1 }
 0x376   :  { %v2207_v10 = vrot.slane %v13793_v40, 1  ;;  %13794 = vst [vmem:[#allocation200_spill] sm:$0xff] %v9862_v37  ;;  %v13796_v40 = vld [vmem:[#allocation90_spill] sm:$0xff]  ;;  %v2493_v0 = vsel %vm2368_vm2, %v2490_v19, %v9501_v17  ;;  %3943 = vmatprep.subr.bf16.mxu1 %v13709_v63  ;;  %v2494_v27 = vrot.slane %v13790_v36, 2  ;;  %3418 = vmatmul.mubr.bf16.gmra.mrb[128].mxu0 %v9677_v1  ;;  %v9889_v52 = vpack.c.bf16 %v9369_v55, %v9366_v15 }
 0x377   :  { %v9869_v35 = vpack.c.bf16 %v13796_v40, %v13795_v54  ;;  %v6501_v37 = vld [vmem:[#allocation8 + $0x150] sm:$0xff]   ;;  %v9878_v34 = vpack.c.bf16 %v2493_v0, %v2491_v61  ;;  %v2211_v17 = vsel %vm2143_vm1, %v2209_v24, %v2210_v30  ;;  %v2214_v5 = vrot.slane %v9552_v62, 1  ;;  %3425 = vmatprep.mubr.bf16.mxu0 %v9717_v22  ;;  %v6504_v22 = vld [vmem:[#allocation8 + $0x168] sm:$0xff]  }
 0x378   :  { %v2208_v47 = vsel %vm2143_vm1, %v2205_v23, %v2207_v10  ;;  %v13799_v23 = vmax.f32 %v8952_v60, 0.0  ;;  %3653 = vmatpush1.bf16.msra.mxu0 %v6544_v25  ;;  %13800 = vst [vmem:[#allocation147_spill] sm:$0xff] %v9889_v52  ;;  %v2215_v60 = vrot.slane %v9554_v56, 1  ;;  %v2499_v61 = vrot.slane %v13795_v54, 2  ;;  %3944 = vmatpush1.bf16.msra.mxu1 %v6501_v37 }
 0x379   :  { %13797 = vst [vmem:[#allocation201_spill] sm:$0xff] %v9869_v35  ;;  %v9872_v42 = vpack.c.bf16 %v2208_v47, %v2206_v3  ;;  %v2495_v3 = vrot.slane %v13791_v11, 2  ;;  %3654 = vmatprep.subr.bf16.mxu0 %v13709_v63  ;;  %v2500_v25 = vrot.slane %v13796_v40, 2  ;;  %3945 = vmatprep.subr.bf16.mxu1 %v13709_v63  ;;  %v2220_v37 = vrot.slane %v9279_v18, 1 }
 0x37a   :  { %v2212_v10 = vrot.slane %v13799_v23, 1  ;;  %3803 = vmatmul.mubr.bf16.gmra.mrb[20].mxu1 %v9693_v45  ;;  %v2216_v0 = vsel %vm2143_vm1, %v2214_v5, %v2215_v60  ;;  %v6502_v23 = vld [vmem:[#allocation8 + $0x158] sm:$0xff]   ;;  %v2505_v18 = vrot.slane %v9369_v55, 2 }
 0x37b   :  { %13798 = vst [vmem:[#allocation202_spill] sm:$0xff] %v9872_v42  ;;  %v2496_v47 = vsel %vm2368_vm2, %v2494_v27, %v2495_v3  ;;  %v2498_v24 = vsel %vm2368_vm2, %v2495_v3, %v9503_v29  ;;  %3810 = vmatprep.mubr.bf16.mxu1 %v9681_v46  ;;  %v13802_v29 = vld [vmem:[#allocation93_spill] sm:$0xff]  ;;  %v2219_v27 = vrot.slane %v9276_v12, 1  ;;  %v6545_v3 = vld [vmem:[#allocation8 + $0xd0] sm:$0xff]   ;;  %v2501_v5 = vsel %vm2368_vm2, %v2499_v61, %v2500_v25  ;;  %v6503_v61 = vld [vmem:[#allocation8 + $0x160] sm:$0xff]  }
 0x37c   :  { %v2213_v19 = vsel %vm2143_vm1, %v2210_v30, %v2212_v10  ;;  %v9904_v56 = vpack.c.bf16 %v2498_v24, %v2496_v47  ;;  %v2218_v30 = vsel %vm2143_vm1, %v2215_v60, %v9409_v7  ;;  %v9913_v10 = vpack.c.bf16 %v13802_v29, %v9373_v50  ;;  %3655 = vmatpush1.bf16.msra.mxu0 %v6545_v3  ;;  %v13811_v45 = vld [vmem:[#allocation103_spill] sm:$0xff] }
 0x37d   :  { %v9902_v62 = vpack.c.bf16 %v2213_v19, %v2211_v17  ;;  %v9917_v17 = vpack.c.bf16 %v2218_v30, %v2216_v0  ;;  %v2503_v19 = vsel %vm2368_vm2, %v2500_v25, %v9505_v44  ;;  %v2504_v7 = vrot.slane %v9366_v15, 2  ;;  %3656 = vmatprep.subr.bf16.mxu0 %v13709_v63  ;;  %3946 = vmatpush1.bf16.msra.mxu1 %v6502_v23  ;;  %v13805_v0 = vld [vmem:[#allocation95_spill] sm:$0xff]  ;;  %v13806_v30 = vld [vmem:[#allocation92_spill] sm:$0xff] }
 0x37e   :  { %13803 = vst [vmem:[#allocation148_spill] sm:$0xff] %v9913_v10  ;;  %v9924_v60 = vpack.c.bf16 %v2503_v19, %v2501_v5  ;;  %v2221_v47 = vsel %vm2143_vm1, %v2219_v27, %v2220_v37  ;;  %v2223_v12 = vsel %vm2143_vm1, %v2220_v37, %v9413_v39  ;;  %v9934_v44 = vpack.c.bf16 %v13806_v30, %v13805_v0  ;;  %v13808_v5 = vld [vmem:[#allocation116_spill] sm:$0xff]  ;;  %v6546_v19 = vld [vmem:[#allocation8 + $0xd8] sm:$0xff]  }
 0x37f   :  { %13801 = vst [vmem:[#allocation125_spill] sm:$0xff] %v9902_v62  ;;  %13804 = vst [vmem:[#allocation126_spill] sm:$0xff] %v9917_v17  ;;  %v9930_v24 = vpack.c.bf16 %v2223_v12, %v2221_v47  ;;  %v2224_v25 = vrot.slane %v9289_v2, 1  ;;  %v2225_v3 = vrot.slane %v9292_v6, 1  ;;  %3947 = vmatprep.subr.bf16.mxu1 %v13709_v63  ;;  %v2506_v27 = vsel %vm2368_vm2, %v2504_v7, %v2505_v18  ;;  %v13817_v7 = vld [vmem:[#allocation97_spill] sm:$0xff]  ;;  %v6547_v6 = vld [vmem:[#allocation8 + $0xe0] sm:$0xff]  }
 0x380   :  { %13807 = vst [vmem:[#allocation149_spill] sm:$0xff] %v9934_v44  ;;  %v2508_v39 = vsel %vm2368_vm2, %v2505_v18, %v13808_v5  ;;  %v2509_v23 = vrot.slane %v9373_v50, 2  ;;  %v2510_v37 = vrot.slane %v13802_v29, 2  ;;  %3657 = vmatpush1.bf16.msra.mxu0 %v6546_v19  ;;  %v13813_v5 = vld [vmem:[#allocation118_spill] sm:$0xff]  ;;  %v2514_v18 = vrot.slane %v13805_v0, 2 }
 0x381   :  { %3426 = vmatmul.mubr.bf16.gmra.mrb[132].mxu0 %v9705_v14  ;;  %v9945_v47 = vpack.c.bf16 %v2508_v39, %v2506_v27  ;;  %v9948_v12 = vsel %vm2143_vm1, %v2224_v25, %v2225_v3  ;;  %v9952_v1 = vsel %vm2143_vm1, %v2225_v3, %v13811_v45  ;;  %v13814_v39 = vld [vmem:[#allocation73_spill] sm:$0xff]  ;;  %3948 = vmatpush1.bf16.msra.mxu1 %v6503_v61  ;;  %v13816_v3 = vld [vmem:[#allocation94_spill] sm:$0xff]  ;;  %v13819_v14 = vld [vmem:[#allocation75_spill] sm:$0xff]  ;;  %v2520_v2 = vrot.slane %v13817_v7, 2 }
 0x382   :  { %13810 = vst [vmem:[#allocation151_spill] sm:$0xff] %v9948_v12  ;;  %13812 = vst [vmem:[#allocation123_spill] sm:$0xff] %v9952_v1  ;;  %3811 = vmatmul.mubr.bf16.gmra.mrb[24].mxu1 %v9724_v8  ;;  %3433 = vmatprep.mubr.bf16.mxu0 %v9730_v38  ;;  %v2511_v27 = vsel %vm2368_vm2, %v2509_v23, %v2510_v37  ;;  %v2513_v25 = vsel %vm2368_vm2, %v2510_v37, %v13813_v5  ;;  %v2229_v19 = vrot.slane %v13814_v39, 1  ;;  %v13820_v37 = vld [vmem:[#allocation99_spill] sm:$0xff]  ;;  %v13821_v5 = vld [vmem:[#allocation96_spill] sm:$0xff] }
 0x383   :  { %13809 = vst [vmem:[#allocation150_spill] sm:$0xff] %v9945_v47  ;;  %3818 = vmatprep.mubr.bf16.mxu1 %v9709_v13  ;;  %v9965_v45 = vpack.c.bf16 %v2513_v25, %v2511_v27  ;;  %v9969_v8 = vpack.c.bf16 %v13817_v7, %v13816_v3  ;;  %v2230_v38 = vrot.slane %v13819_v14, 1  ;;  %3949 = vmatprep.subr.bf16.mxu1 %v13709_v63  ;;  %v2515_v23 = vrot.slane %v13806_v30, 2  ;;  %v13823_v61 = vld [vmem:[#allocation72_spill] sm:$0xff]  ;;  %v13824_v25 = vld [vmem:[#allocation74_spill] sm:$0xff]  ;;  %v13845_v47 = vld [vmem:[#allocation49_spill] sm:$0xff] }
 0x384   :  { %v9977_v39 = vpack.c.bf16 %v13821_v5, %v13820_v37  ;;  %v2234_v27 = vrot.slane %v13823_v61, 1  ;;  %v2235_v13 = vrot.slane %v13824_v25, 1  ;;  %3658 = vmatprep.subr.bf16.mxu0 %v13709_v63  ;;  %v13825_v14 = vld [vmem:[#allocation100_spill] sm:$0xff]  ;;  %v13827_v61 = vld [vmem:[#allocation121_spill] sm:$0xff]  ;;  %v6505_v1 = vld [vmem:[#allocation8 + $0x170] sm:$0xff]  }
 0x385   :  { %13815 = vst [vmem:[#allocation120_spill] sm:$0xff] %v9965_v45  ;;  %13818 = vst [vmem:[#allocation122_spill] sm:$0xff] %v9969_v8  ;;  %v2231_v46 = vsel %vm2143_vm1, %v2229_v19, %v2230_v38  ;;  %v2233_v8 = vsel %vm2143_vm1, %v2230_v38, %v13825_v14  ;;  %v2519_v45 = vrot.slane %v13816_v3, 2  ;;  %3659 = vmatpush1.bf16.msra.mxu0 %v6547_v6  ;;  %3950 = vmatpush1.bf16.msra.mxu1 %v6504_v22  ;;  %v13829_v38 = vld [vmem:[#allocation102_spill] sm:$0xff] }
 0x386   :  { %13822 = vst [vmem:[#allocation17_spill] sm:$0xff] %v9977_v39  ;;  %v9987_v44 = vpack.c.bf16 %v2233_v8, %v2231_v46  ;;  %v2516_v39 = vsel %vm2368_vm2, %v2514_v18, %v2515_v23  ;;  %v2518_v25 = vsel %vm2368_vm2, %v2515_v23, %v13827_v61  ;;  %v2236_v12 = vsel %vm2143_vm1, %v2234_v27, %v2235_v13  ;;  %v13830_v46 = vld [vmem:[#allocation164_spill] sm:$0xff]  ;;  %v13833_v27 = vld [vmem:[#allocation98_spill] sm:$0xff]  ;;  %v13834_v61 = vld [vmem:[#allocation101_spill] sm:$0xff] }
 0x387   :  { %3660 = vmatprep.subr.bf16.mxu0 %v13709_v63  ;;  %v9994_v19 = vpack.c.bf16 %v2518_v25, %v2516_v39  ;;  %v2238_v14 = vsel %vm2143_vm1, %v2235_v13, %v13829_v38  ;;  %v2521_v6 = vsel %vm2368_vm2, %v2519_v45, %v2520_v2  ;;  %v2523_v8 = vsel %vm2368_vm2, %v2520_v2, %v13830_v46  ;;  %v13836_v39 = vld [vmem:[#allocation77_spill] sm:$0xff]  ;;  %v13837_v13 = vld [vmem:[#allocation79_spill] sm:$0xff] }
 0x388   :  { %13826 = vst [vmem:[#allocation19_spill] sm:$0xff] %v9987_v44  ;;  %v10001_v18 = vpack.c.bf16 %v2238_v14, %v2236_v12  ;;  %3951 = vmatprep.subr.bf16.mxu1 %v13709_v63  ;;  %v10004_v23 = vpack.c.bf16 %v2523_v8, %v2521_v6  ;;  %v10008_v22 = vpack.c.bf16 %v13834_v61, %v13833_v27  ;;  %v2239_v25 = vrot.slane %v13836_v39, 1  ;;  %v13838_v12 = vld [vmem:[#allocation44_spill] sm:$0xff]  ;;  %v13839_v6 = vld [vmem:[#allocation46_spill] sm:$0xff]  ;;  %v13840_v8 = vld [vmem:[#allocation191_spill] sm:$0xff] }
 0x389   :  { %13828 = vst [vmem:[#allocation16_spill] sm:$0xff] %v9994_v19  ;;  %3434 = vmatmul.mubr.bf16.gmra.mrb[136].mxu0 %v9734_v21  ;;  %v2240_v38 = vrot.slane %v13837_v13, 1  ;;  %v2524_v45 = vrot.slane %v13820_v37, 2  ;;  %v2525_v2 = vrot.slane %v13821_v5, 2  ;;  %v2374_v14 = vrot.slane %v13838_v12, 2  ;;  %v13842_v39 = vld [vmem:[#allocation76_spill] sm:$0xff]  ;;  %3952 = vmatpush1.bf16.msra.mxu1 %v6505_v1 }
 0x38a   :  { %13831 = vst [vmem:[#allocation18_spill] sm:$0xff] %v10001_v18  ;;  %13832 = vst [vmem:[#allocation21_spill] sm:$0xff] %v10004_v23  ;;  %3819 = vmatmul.mubr.bf16.gmra.mrb[28].mxu1 %v9747_v48  ;;  %3441 = vmatprep.mubr.bf16.mxu0 %v9767_v41  ;;  %v2375_v46 = vrot.slane %v13839_v6, 2  ;;  %v2244_v18 = vrot.slane %v13842_v39, 1  ;;  %v2245_v21 = vrot.slane %v13742_v57, 1  ;;  %v13843_v13 = vld [vmem:[#allocation184_spill] sm:$0xff] }
 0x38b   :  { %13835 = vst [vmem:[#allocation23_spill] sm:$0xff] %v10008_v22  ;;  %v13841_v22 = vmax.f32 %v13840_v8, 0.0  ;;  %3826 = vmatprep.mubr.bf16.mxu1 %v13843_v13  ;;  %v2241_v19 = vsel %vm2143_vm1, %v2239_v25, %v2240_v38  ;;  %v13844_v44 = vld [vmem:[#allocation105_spill] sm:$0xff]  ;;  %v6506_v48 = vld [vmem:[#allocation8 + $0x178] sm:$0xff]   ;;  %v2526_v41 = vsel %vm2368_vm2, %v2524_v45, %v2525_v2  ;;  %v2379_v6 = vrot.slane %v13845_v47, 2  ;;  %3953 = vmatprep.subr.bf16.mxu1 %v13709_v63 }
 0x38c   :  { %v2243_v12 = vsel %vm2143_vm1, %v2240_v38, %v13844_v44  ;;  %v2376_v8 = vsel %vm2368_vm2, %v2374_v14, %v2375_v46  ;;  %v2246_v44 = vsel %vm2143_vm1, %v2244_v18, %v2245_v21  ;;  %v13848_v38 = vld [vmem:[#allocation107_spill] sm:$0xff]  ;;  %v13854_v18 = vld [vmem:[#allocation48_spill] sm:$0xff] }
 0x38d   :  { %v2377_v23 = vrot.slane %v13841_v22, 2  ;;  %v10029_v10 = vpack.c.bf16 %v2243_v12, %v2241_v19  ;;  %v13847_v22 = vld [vmem:[#allocation165_spill] sm:$0xff]  ;;  %v2248_v47 = vsel %vm2143_vm1, %v2245_v21, %v13848_v38  ;;  %v13849_v12 = vld [vmem:[#allocation51_spill] sm:$0xff]  ;;  %3954 = vmatpush1.bf16.msra.mxu1 %v6506_v48 }
 0x38e   :  { %v2528_v57 = vsel %vm2368_vm2, %v2525_v2, %v13847_v22  ;;  %v6548_v19 = vld [vmem:[#allocation8 + $0xe8] sm:$0xff]   ;;  %v10043_v45 = vpack.c.bf16 %v2248_v47, %v2246_v44  ;;  %v2380_v13 = vrot.slane %v13849_v12, 2  ;;  %v13850_v2 = vld [vmem:[#allocation144_spill] sm:$0xff]  ;;  %4212 = vmatprep.subr.bf16.mxu1 %v13709_v63  ;;  %v13858_v12 = vld [vmem:[#allocation82_spill] sm:$0xff] }
 0x38f   :  { %13846 = vst [vmem:[#allocation20_spill] sm:$0xff] %v10029_v10  ;;  %v2378_v1 = vsel %vm2368_vm2, %v2375_v46, %v2377_v23  ;;  %v10036_v25 = vpack.c.bf16 %v2528_v57, %v2526_v41  ;;  %3661 = vmatpush1.bf16.msra.mxu0 %v6548_v19  ;;  %v13851_v22 = vmax.f32 %v13850_v2, 0.0  ;;  %v13852_v10 = vld [vmem:[#allocation81_spill] sm:$0xff]  ;;  %v13853_v41 = vld [vmem:[#allocation83_spill] sm:$0xff]  ;;  %v2384_v57 = vrot.slane %v13854_v18, 2  ;;  %v13861_v18 = vld [vmem:[#allocation104_spill] sm:$0xff] }
 0x390   :  { %v10038_v39 = vpack.c.bf16 %v2378_v1, %v2376_v8  ;;  %v2249_v23 = vrot.slane %v13852_v10, 1  ;;  %3662 = vmatprep.subr.bf16.mxu0 %v13709_v63  ;;  %v2250_v46 = vrot.slane %v13853_v41, 1  ;;  %v13855_v8 = vld [vmem:[#allocation50_spill] sm:$0xff]  ;;  %v13856_v1 = vld [vmem:[#allocation192_spill] sm:$0xff]  ;;  %v2381_v47 = vsel %vm2368_vm2, %v2379_v6, %v2380_v13  ;;  %v13859_v48 = vld [vmem:[#allocation185_spill] sm:$0xff] }
 0x391   :  { %v2382_v14 = vrot.slane %v13851_v22, 2  ;;  %v2385_v21 = vrot.slane %v13855_v8, 2  ;;  %v13857_v38 = vmax.f32 %v13856_v1, 0.0  ;;  %v2254_v10 = vrot.slane %v13761_v28, 1  ;;  %3442 = vmatmul.mubr.bf16.gmra.mrb[140].mxu0 %v13859_v48  ;;  %v13863_v6 = vld [vmem:[#allocation188_spill] sm:$0xff]  ;;  %v13866_v48 = vld [vmem:[#allocation106_spill] sm:$0xff] }
 0x392   :  { %v2255_v2 = vrot.slane %v13858_v12, 1  ;;  %v2251_v41 = vsel %vm2143_vm1, %v2249_v23, %v2250_v46  ;;  %v2253_v8 = vsel %vm2143_vm1, %v2250_v46, %v13861_v18  ;;  %3449 = vmatprep.mubr.bf16.mxu0 %v13863_v6  ;;  %v13864_v12 = vld [vmem:[#allocation53_spill] sm:$0xff] }
 0x393   :  { %v2387_v44 = vrot.slane %v13857_v38, 2  ;;  %v2383_v19 = vsel %vm2368_vm2, %v2380_v13, %v2382_v14  ;;  %v2386_v1 = vsel %vm2368_vm2, %v2384_v57, %v2385_v21  ;;  %v13862_v38 = vld [vmem:[#allocation139_spill] sm:$0xff]  ;;  %v10069_v13 = vpack.c.bf16 %v2253_v8, %v2251_v41  ;;  %v6549_v41 = vld [vmem:[#allocation8 + $0xf0] sm:$0xff]  }
 0x394   :  { %v10061_v22 = vpack.c.bf16 %v2383_v19, %v2381_v47  ;;  %3827 = vmatmul.mubr.bf16.gmra.mrb[32].mxu1 %v13862_v38  ;;  %v2256_v14 = vsel %vm2143_vm1, %v2254_v10, %v2255_v2  ;;  %v2389_v47 = vrot.slane %v13864_v12, 2  ;;  %v13865_v19 = vld [vmem:[#allocation138_spill] sm:$0xff]  ;;  %v2258_v46 = vsel %vm2143_vm1, %v2255_v2, %v13866_v48  ;;  %v13867_v57 = vld [vmem:[#allocation55_spill] sm:$0xff]  ;;  %v13868_v38 = vld [vmem:[#allocation145_spill] sm:$0xff]  ;;  %3663 = vmatpush1.bf16.msra.mxu0 %v6549_v41 }
 0x395   :  { %v2388_v28 = vsel %vm2368_vm2, %v2385_v21, %v2387_v44  ;;  %3834 = vmatprep.mubr.bf16.mxu1 %v13865_v19  ;;  %v2390_v18 = vrot.slane %v13867_v57, 2  ;;  %v10082_v8 = vpack.c.bf16 %v2258_v46, %v2256_v14  ;;  %v2259_v21 = vrot.slane %v13771_v9, 1  ;;  %v13870_v10 = vld [vmem:[#allocation52_spill] sm:$0xff]  ;;  %3664 = vmatprep.subr.bf16.mxu0 %v13709_v63  ;;  %v13871_v48 = vld [vmem:[#allocation54_spill] sm:$0xff]  ;;  %v13875_v9 = vld [vmem:[#allocation109_spill] sm:$0xff] }
 0x396   :  { %13860 = vst [vmem:[#allocation22_spill] sm:$0xff] %v10061_v22  ;;  %v10075_v23 = vpack.c.bf16 %v2388_v28, %v2386_v1  ;;  %v13869_v22 = vmax.f32 %v13868_v38, 0.0  ;;  %v2260_v44 = vrot.slane %v13772_v49, 1  ;;  %v2394_v12 = vrot.slane %v13870_v10, 2  ;;  %v13872_v38 = vld [vmem:[#allocation193_spill] sm:$0xff] }
 0x397   :  { %v2391_v1 = vsel %vm2368_vm2, %v2389_v47, %v2390_v18  ;;  %v2395_v28 = vrot.slane %v13871_v48, 2  ;;  %v2264_v46 = vrot.slane %v13780_v26, 1  ;;  %v6550_v48 = vld [vmem:[#allocation8 + $0xf8] sm:$0xff]  }
 0x398   :  { %v2392_v6 = vrot.slane %v13869_v22, 2  ;;  %v13873_v22 = vmax.f32 %v13872_v38, 0.0  ;;  %v2261_v14 = vsel %vm2143_vm1, %v2259_v21, %v2260_v44  ;;  %v2263_v49 = vsel %vm2143_vm1, %v2260_v44, %v13875_v9  ;;  %3665 = vmatpush1.bf16.msra.mxu0 %v6550_v48  ;;  %v13877_v21 = vld [vmem:[#allocation59_spill] sm:$0xff]  ;;  %v13883_v48 = vld [vmem:[#allocation56_spill] sm:$0xff] }
 0x399   :  { %v10099_v10 = vpack.c.bf16 %v2263_v49, %v2261_v14  ;;  %v2396_v47 = vsel %vm2368_vm2, %v2394_v12, %v2395_v28  ;;  %v13880_v26 = vld [vmem:[#allocation187_spill] sm:$0xff]  ;;  %v13882_v49 = vld [vmem:[#allocation141_spill] sm:$0xff] }
 0x39a   :  { %v2393_v2 = vsel %vm2368_vm2, %v2390_v18, %v2392_v6  ;;  %v2397_v57 = vrot.slane %v13873_v22, 2  ;;  %v2265_v18 = vrot.slane %v13781_v31, 1  ;;  %v2400_v22 = vrot.slane %v13877_v21, 2  ;;  %3450 = vmatmul.mubr.bf16.gmra.mrb[144].mxu0 %v13880_v26  ;;  %v13881_v12 = vld [vmem:[#allocation111_spill] sm:$0xff] }
 0x39b   :  { %v10093_v41 = vpack.c.bf16 %v2393_v2, %v2391_v1  ;;  %v13876_v1 = vld [vmem:[#allocation57_spill] sm:$0xff]  ;;  %v2269_v31 = vrot.slane %v13790_v36, 1  ;;  %3457 = vmatprep.mubr.bf16.mxu0 %v9821_v20  ;;  %v13891_v26 = vld [vmem:[#allocation63_spill] sm:$0xff]  ;;  %v13892_v20 = vld [vmem:[#allocation196_spill] sm:$0xff] }
 0x39c   :  { %v2398_v6 = vsel %vm2368_vm2, %v2395_v28, %v2397_v57  ;;  %v2399_v2 = vrot.slane %v13876_v1, 2  ;;  %v2266_v14 = vsel %vm2143_vm1, %v2264_v46, %v2265_v18  ;;  %v2268_v28 = vsel %vm2143_vm1, %v2265_v18, %v13881_v12  ;;  %3835 = vmatmul.mubr.bf16.gmra.mrb[36].mxu1 %v13882_v49  ;;  %v13884_v46 = vld [vmem:[#allocation140_spill] sm:$0xff] }
 0x39d   :  { %13874 = vst [vmem:[#allocation25_spill] sm:$0xff] %v10093_v41  ;;  %v10104_v38 = vpack.c.bf16 %v2398_v6, %v2396_v47  ;;  %v13878_v41 = vld [vmem:[#allocation194_spill] sm:$0xff]  ;;  %v2270_v57 = vrot.slane %v13791_v11, 1  ;;  %v10118_v47 = vpack.c.bf16 %v2268_v28, %v2266_v14  ;;  %v2404_v1 = vrot.slane %v13883_v48, 2  ;;  %3842 = vmatprep.mubr.bf16.mxu1 %v13884_v46  ;;  %v13886_v18 = vld [vmem:[#allocation108_spill] sm:$0xff]  ;;  %v13888_v14 = vld [vmem:[#allocation195_spill] sm:$0xff] }
 0x39e   :  { %v13879_v44 = vmax.f32 %v13878_v41, 0.0  ;;  %v2401_v41 = vsel %vm2368_vm2, %v2399_v2, %v2400_v22  ;;  %v13889_v28 = vmax.f32 %v13888_v14, 0.0 }
 0x39f   :  { %v2271_v36 = vsel %vm2143_vm1, %v2269_v31, %v2270_v57  ;;  %v2273_v11 = vsel %vm2143_vm1, %v2270_v57, %v13886_v18  ;;  %v2410_v31 = vrot.slane %v13891_v26, 2 }
 0x3a0   :  { %v2402_v9 = vrot.slane %v13879_v44, 2  ;;  %v13887_v44 = vld [vmem:[#allocation58_spill] sm:$0xff]  ;;  %v10130_v49 = vpack.c.bf16 %v2273_v11, %v2271_v36  ;;  %v2407_v2 = vrot.slane %v13889_v28, 2 }
 0x3a1   :  { %v2405_v12 = vrot.slane %v13887_v44, 2  ;;  %v13894_v11 = vld [vmem:[#allocation110_spill] sm:$0xff] }
 0x3a2   :  { %v2403_v6 = vsel %vm2368_vm2, %v2400_v22, %v2402_v9  ;;  %v2274_v22 = vrot.slane %v13795_v54, 1  ;;  %v2275_v9 = vrot.slane %v13796_v40, 1  ;;  %v2279_v54 = vrot.slane %v9366_v15, 1  ;;  %3458 = vmatmul.mubr.bf16.gmra.mrb[148].mxu0 %v9808_v33 }
 0x3a3   :  { %v10124_v21 = vpack.c.bf16 %v2403_v6, %v2401_v41  ;;  %v2406_v48 = vsel %vm2368_vm2, %v2404_v1, %v2405_v12  ;;  %v13890_v41 = vld [vmem:[#allocation61_spill] sm:$0xff]  ;;  %v2408_v18 = vsel %vm2368_vm2, %v2405_v12, %v2407_v2  ;;  %v13896_v2 = vld [vmem:[#allocation62_spill] sm:$0xff]  ;;  %3465 = vmatprep.mubr.bf16.mxu0 %v9838_v43 }
 0x3a4   :  { %v2409_v6 = vrot.slane %v13890_v41, 2  ;;  %v2276_v36 = vsel %vm2143_vm1, %v2274_v22, %v2275_v9  ;;  %v2278_v44 = vsel %vm2143_vm1, %v2275_v9, %v13894_v11  ;;  %v10146_v14 = vpack.c.bf16 %v2408_v18, %v2406_v48  ;;  %v13897_v9 = vld [vmem:[#allocation197_spill] sm:$0xff]  ;;  %3843 = vmatmul.mubr.bf16.gmra.mrb[40].mxu1 %v9832_v16 }
 0x3a5   :  { %13885 = vst [vmem:[#allocation27_spill] sm:$0xff] %v10124_v21  ;;  %v13893_v21 = vmax.f32 %v13892_v20, 0.0  ;;  %v10148_v40 = vpack.c.bf16 %v2278_v44, %v2276_v36  ;;  %v2280_v20 = vrot.slane %v9369_v55, 1  ;;  %v2415_v22 = vrot.slane %v13896_v2, 2  ;;  %v13901_v44 = vld [vmem:[#allocation67_spill] sm:$0xff] }
 0x3a6   :  { %v2411_v1 = vsel %vm2368_vm2, %v2409_v6, %v2410_v31  ;;  %v13898_v15 = vmax.f32 %v13897_v9, 0.0  ;;  %v2284_v41 = vrot.slane %v9373_v50, 1  ;;  %v2285_v18 = vrot.slane %v13802_v29, 1  ;;  %v13899_v6 = vld [vmem:[#allocation65_spill] sm:$0xff]  ;;  %v13903_v2 = vld [vmem:[#allocation115_spill] sm:$0xff] }
 0x3a7   :  { %v2412_v57 = vrot.slane %v13893_v21, 2  ;;  %v13895_v21 = vld [vmem:[#allocation60_spill] sm:$0xff]  ;;  %v2419_v36 = vrot.slane %v13899_v6, 2  ;;  %v2281_v55 = vsel %vm2143_vm1, %v2279_v54, %v2280_v20 }
 0x3a8   :  { %v2414_v12 = vrot.slane %v13895_v21, 2  ;;  %v2417_v48 = vrot.slane %v13898_v15, 2  ;;  %v2286_v21 = vsel %vm2143_vm1, %v2284_v41, %v2285_v18  ;;  %v2288_v9 = vsel %vm2143_vm1, %v2285_v18, %v13903_v2 }
 0x3a9   :  { %v2413_v26 = vsel %vm2368_vm2, %v2410_v31, %v2412_v57  ;;  %v13900_v31 = vld [vmem:[#allocation113_spill] sm:$0xff]  ;;  %v10179_v54 = vpack.c.bf16 %v2288_v9, %v2286_v21  ;;  %v13906_v18 = vmax.f32 %v13785_v32, 0.0 }
 0x3aa   :  { %v10152_v28 = vpack.c.bf16 %v2413_v26, %v2411_v1  ;;  %v2283_v57 = vsel %vm2143_vm1, %v2280_v20, %v13900_v31  ;;  %v2416_v11 = vsel %vm2368_vm2, %v2414_v12, %v2415_v22  ;;  %v2420_v1 = vrot.slane %v13901_v44, 2  ;;  %v13902_v26 = vld [vmem:[#allocation189_spill] sm:$0xff]  ;;  %v13904_v12 = vld [vmem:[#allocation198_spill] sm:$0xff]  ;;  %3466 = vmatmul.mubr.bf16.gmra.mrb[152].mxu0 %v9842_v51 }
 0x3ab   :  { %3850 = vmatprep.mubr.bf16.mxu1 %v13902_v26  ;;  %v10171_v50 = vpack.c.bf16 %v2283_v57, %v2281_v55  ;;  %v2418_v29 = vsel %vm2368_vm2, %v2415_v22, %v2417_v48  ;;  %v13905_v6 = vmax.f32 %v13904_v12, 0.0  ;;  %v2289_v44 = vrot.slane %v13805_v0, 1  ;;  %v13907_v0 = vld [vmem:[#allocation112_spill] sm:$0xff]  ;;  %3473 = vmatprep.mubr.bf16.mxu0 %v9872_v42 }
 0x3ac   :  { %v10177_v15 = vpack.c.bf16 %v2418_v29, %v2416_v11  ;;  %v2421_v20 = vsel %vm2368_vm2, %v2419_v36, %v2420_v1  ;;  %v2290_v55 = vrot.slane %v13806_v30, 1  ;;  %v2424_v22 = vrot.slane %v13783_v59, 2  ;;  %3851 = vmatmul.mubr.bf16.gmra.mrb[44].mxu1 %v9856_v58 }
 0x3ad   :  { %v2422_v31 = vrot.slane %v13905_v6, 2  ;;  %v2425_v48 = vrot.slane %v13784_v4, 2  ;;  %v2427_v57 = vrot.slane %v13906_v18, 2  ;;  %v2294_v11 = vrot.slane %v13816_v3, 1  ;;  %v13909_v6 = vld [vmem:[#allocation47_spill] sm:$0xff]  ;;  %3858 = vmatprep.mubr.bf16.mxu1 %v9846_v53 }
 0x3ae   :  { %v2295_v36 = vrot.slane %v13817_v7, 1  ;;  %v2291_v21 = vsel %vm2143_vm1, %v2289_v44, %v2290_v55  ;;  %v2293_v30 = vsel %vm2143_vm1, %v2290_v55, %v13907_v0  ;;  %v2300_v12 = vrot.slane %v13821_v5, 1  ;;  %v13911_v44 = vld [vmem:[#allocation45_spill] sm:$0xff]  ;;  %v13944_v0 = vld [vmem:[#allocation134_spill] sm:$0xff] }
 0x3af   :  { %v2423_v41 = vsel %vm2368_vm2, %v2420_v1, %v2422_v31  ;;  %v2426_v59 = vsel %vm2368_vm2, %v2424_v22, %v2425_v48  ;;  %v10199_v2 = vpack.c.bf16 %v2293_v30, %v2291_v21  ;;  %v2428_v4 = vsel %vm2368_vm2, %v2425_v48, %v2427_v57  ;;  %v13908_v1 = vld [vmem:[#allocation114_spill] sm:$0xff]  ;;  %v13913_v48 = vld [vmem:[#allocation119_spill] sm:$0xff] }
 0x3b0   :  { %v10193_v29 = vpack.c.bf16 %v2423_v41, %v2421_v20  ;;  %v2296_v32 = vsel %vm2143_vm1, %v2294_v11, %v2295_v36  ;;  %v2298_v3 = vsel %vm2143_vm1, %v2295_v36, %v13908_v1  ;;  %v10206_v7 = vpack.c.bf16 %v2428_v4, %v2426_v59  ;;  %v13917_v36 = vld [vmem:[#allocation117_spill] sm:$0xff] }
 0x3b1   :  { %v10208_v9 = vpack.c.bf16 %v2298_v3, %v2296_v32  ;;  %v2299_v20 = vrot.slane %v13820_v37, 1  ;;  %v13910_v31 = vrot.slane %v13909_v6, 2  ;;  %v13912_v55 = vrot.slane %v13911_v44, 2  ;;  %v13915_v37 = vld [vmem:[#allocation42_spill] sm:$0xff] }
 0x3b2   :  { %v13916_v57 = vmax.f32 %v13915_v37, 0.0  ;;  %v2303_v21 = vsel %vm2143_vm1, %v2300_v12, %v13917_v36  ;;  %v2618_v32 = vrot.slane %v13833_v27, 2  ;;  %v2619_v1 = vrot.slane %v13834_v61, 2  ;;  %v13922_v37 = vld [vmem:[#allocation148_spill] sm:$0xff]  ;;  %v13926_v36 = vld [vmem:[#allocation151_spill] sm:$0xff] }
 0x3b3   :  { %v10219_v22 = vsel %vm2368_vm2, %v13912_v55, %v13910_v31  ;;  %v13914_v41 = vmov %v13910_v31  ;;  %v2301_v11 = vsel %vm2143_vm1, %v2299_v20, %v2300_v12  ;;  %v2604_v3 = vrot.slane %v13833_v27, 1  ;;  %v13920_v27 = vld [vmem:[#allocation166_spill] sm:$0xff] }
 0x3b4   :  { %v10225_v18 = vsel %vm2368_vm2, %v13914_v41, %v13913_v48  ;;  %v2621_v5 = vrot.slane %v13916_v57, 2  ;;  %v13918_v30 = vmov %v13916_v57  ;;  %v10237_v4 = vpack.c.bf16 %v2303_v21, %v2301_v11  ;;  %v13919_v48 = vld [vmem:[#allocation200_spill] sm:$0xff]  ;;  %3859 = vmatmul.mubr.bf16.gmra.mrb[48].mxu1 %v9878_v34  ;;  %v13923_v57 = vld [vmem:[#allocation170_spill] sm:$0xff]  ;;  %v13925_v11 = vld [vmem:[#allocation123_spill] sm:$0xff] }
 0x3b5   :  { %v2607_v59 = vrot.slane %v13918_v30, 1  ;;  %v2605_v6 = vrot.slane %v13834_v61, 1  ;;  %v2620_v20 = vsel %vm2368_vm2, %v2618_v32, %v2619_v1  ;;  %3474 = vmatmul.mubr.bf16.gmra.mrb[156].mxu0 %v13919_v48  ;;  %3866 = vmatprep.mubr.bf16.mxu1 %v9869_v35  ;;  %v13921_v61 = vld [vmem:[#allocation168_spill] sm:$0xff]  ;;  %v13927_v21 = vpack.c.bf16 %v13925_v11, %v13926_v36  ;;  %v13928_v30 = vld [vmem:[#allocation149_spill] sm:$0xff]  ;;  %v13939_v36 = vld [vmem:[#allocation178_spill] sm:$0xff] }
 0x3b6   :  { %v2622_v12 = vsel %vm2368_vm2, %v2619_v1, %v2621_v5  ;;  %3481 = vmatprep.mubr.bf16.mxu0 %v9902_v62  ;;  %v13924_v5 = vld [vmem:[#allocation150_spill] sm:$0xff]  ;;  %v13930_v32 = vld [vmem:[#allocation68_spill] sm:$0xff]  ;;  %v13938_v11 = vld [vmem:[#allocation17_spill] sm:$0xff] }
 0x3b7   :  { %v10245_v31 = vpack.c.bf16 %v2622_v12, %v2620_v20  ;;  %v2606_v44 = vsel %vm2143_vm1, %v2604_v3, %v2605_v6  ;;  %v2608_v55 = vsel %vm2143_vm1, %v2605_v6, %v2607_v59  ;;  %v13929_v59 = vld [vmem:[#allocation70_spill] sm:$0xff]  ;;  %v13932_v3 = vld [vmem:[#allocation120_spill] sm:$0xff]  ;;  %v13933_v6 = vld [vmem:[#allocation19_spill] sm:$0xff] }
 0x3b8   :  { %v10250_v41 = vpack.c.bf16 %v2608_v55, %v2606_v44  ;;  %v13931_v1 = vpack.c.bf16 %v13929_v59, %v13930_v32  ;;  %v13934_v20 = vld [vmem:[#allocation122_spill] sm:$0xff]  ;;  %v13935_v12 = vld [vmem:[#allocation129_spill] sm:$0xff]  ;;  %v13936_v44 = vld [vmem:[#allocation16_spill] sm:$0xff] }
 0x3b9   :  { %v13937_v55 = vld [vmem:[#allocation18_spill] sm:$0xff]  ;;  %v13941_v59 = vld [vmem:[#allocation20_spill] sm:$0xff]  ;;  %v13942_v32 = vld [vmem:[#allocation23_spill] sm:$0xff] }
 0x3bc   :  { %3867 = vmatmul.mubr.bf16.gmra.mrb[52].mxu1 %v9904_v56 }
 0x3bd   :  { %3482 = vmatmul.mubr.bf16.gmra.mrb[160].mxu0 %v13920_v27  ;;  %3874 = vmatprep.mubr.bf16.mxu1 %v9889_v52  ;;  %v13948_v27 = vld [vmem:[#allocation127_spill] sm:$0xff] }
 0x3be   :  { %3489 = vmatprep.mubr.bf16.mxu0 %v9917_v17 }
 0x3c4   :  { %3875 = vmatmul.mubr.bf16.gmra.mrb[56].mxu1 %v9924_v60 }
 0x3c5   :  { %3490 = vmatmul.mubr.bf16.gmra.mrb[164].mxu0 %v13921_v61  ;;  %3882 = vmatprep.mubr.bf16.mxu1 %v13922_v37  ;;  %v6508_v61 = vld [vmem:[#allocation8 + $0x188] sm:$0xff]  }
 0x3c6   :  { %3497 = vmatprep.mubr.bf16.mxu0 %v9930_v24 }
 0x3cc   :  { %3883 = vmatmul.mubr.bf16.gmra.mrb[60].mxu1 %v13924_v5 }
 0x3cd   :  { %3498 = vmatmul.mubr.bf16.gmra.mrb[168].mxu0 %v13923_v57  ;;  %3890 = vmatprep.mubr.bf16.mxu1 %v13928_v30  ;;  %v13945_v57 = vld [vmem:[#allocation171_spill] sm:$0xff] }
 0x3ce   :  { %3505 = vmatprep.mubr.bf16.mxu0 %v13927_v21  ;;  %v13940_v21 = vld [vmem:[#allocation21_spill] sm:$0xff] }
 0x3d4   :  { %3891 = vmatmul.mubr.bf16.gmra.mrb[64].mxu1 %v13932_v3 }
 0x3d5   :  { %3506 = vmatmul.mubr.bf16.gmra.mrb[172].mxu0 %v13931_v1  ;;  %3898 = vmatprep.mubr.bf16.mxu1 %v13934_v20  ;;  %v13943_v1 = vld [vmem:[#allocation132_spill] sm:$0xff] }
 0x3d6   :  { %3513 = vmatprep.mubr.bf16.mxu0 %v13933_v6 }
 0x3dc   :  { %3899 = vmatmul.mubr.bf16.gmra.mrb[68].mxu1 %v13936_v44 }
 0x3dd   :  { %3514 = vmatmul.mubr.bf16.gmra.mrb[176].mxu0 %v13935_v12  ;;  %3906 = vmatprep.mubr.bf16.mxu1 %v13938_v11  ;;  %v6507_v12 = vld [vmem:[#allocation8 + $0x180] sm:$0xff]  }
 0x3de   :  { %3521 = vmatprep.mubr.bf16.mxu0 %v13937_v55 }
 0x3e4   :  { %3907 = vmatmul.mubr.bf16.gmra.mrb[72].mxu1 %v13940_v21 }
 0x3e5   :  { %3522 = vmatmul.mubr.bf16.gmra.mrb[180].mxu0 %v13939_v36  ;;  %3914 = vmatprep.mubr.bf16.mxu1 %v13942_v32  ;;  %v13946_v36 = vld [vmem:[#allocation22_spill] sm:$0xff] }
 0x3e6   :  { %3529 = vmatprep.mubr.bf16.mxu0 %v13941_v59  ;;  %v6509_v32 = vld [vmem:[#allocation8 + $0x190] sm:$0xff]  }
 0x3ec   :  { %3915 = vmatmul.mubr.bf16.gmra.mrb[76].mxu1 %v10036_v25 }
 0x3ed   :  { %3530 = vmatmul.mubr.bf16.gmra.mrb[184].mxu0 %v13943_v1  ;;  %3955 = vmatprep.mubr.bf16.mxu1 %v10038_v39  ;;  %v13947_v1 = vld [vmem:[#allocation184_spill] sm:$0xff] }
 0x3ee   :  { %3537 = vmatprep.mubr.bf16.mxu0 %v10043_v45 }
 0x3f4   :  { %3956 = vmatmul.mubr.bf16.vlgmr.msra.gmra.mrb[80].mxu1 %v13945_v57  ;;  %v6510_v57 = vld [vmem:[#allocation8 + $0x198] sm:$0xff]  }
 0x3f5   :  { %3538 = vmatmul.mubr.bf16.gmra.mrb[188].mxu0 %v13944_v0  ;;  %4213 = vmatpush1.bf16.msra.mxu1 %v6507_v12  ;;  %v6511_v12 = vld [vmem:[#allocation8 + $0x1a0] sm:$0xff]   ;;  %v6512_v0 = vld [vmem:[#allocation8 + $0x1a8] sm:$0xff]  }
 0x3f6   :  { %3545 = vmatprep.mubr.bf16.mxu0 %v10069_v13  ;;  %3963 = vmatprep.mubr.bf16.mxu1 %v13946_v36 }
 0x3f7   :  { %4214 = vmatprep.subr.bf16.mxu1 %v13709_v63 }
 0x3f9   :  { %4215 = vmatpush1.bf16.msra.mxu1 %v6508_v61  ;;  %v13949_v61 = vld [vmem:[#allocation128_spill] sm:$0xff] }
 0x3fa   :  { %4216 = vmatprep.subr.bf16.mxu1 %v13709_v63 }
 0x3fc   :  { %3964 = vmatmul.mubr.bf16.gmra.mrb[84].mxu1 %v13948_v27 }
 0x3fd   :  { %3546 = vmatmul.mubr.bf16.gmra.mrb[192].mxu0 %v13947_v1  ;;  %3971 = vmatprep.mubr.bf16.mxu1 %v10075_v23  ;;  %v13950_v1 = vld [vmem:[#allocation25_spill] sm:$0xff] }
 0x3fe   :  { %3553 = vmatprep.mubr.bf16.mxu0 %v10082_v8  ;;  %4217 = vmatpush1.bf16.msra.mxu1 %v6509_v32  ;;  %v6513_v32 = vld [vmem:[#allocation8 + $0x1b0] sm:$0xff]  }
 0x3ff   :  { %4218 = vmatprep.subr.bf16.mxu1 %v13709_v63 }
 0x402   :  { %4219 = vmatpush1.bf16.msra.mxu1 %v6510_v57  ;;  %v13951_v57 = vld [vmem:[#allocation131_spill] sm:$0xff] }
 0x403   :  { %4220 = vmatprep.subr.bf16.mxu1 %v13709_v63 }
 0x404   :  { %3972 = vmatmul.mubr.bf16.gmra.mrb[88].mxu1 %v13949_v61  ;;  %v6518_v61 = vld [vmem:[#allocation8 + $0x200] sm:$0xff]  }
 0x405   :  { %3554 = vmatmul.mubr.bf16.gmra.mrb[196].mxu0 %v13865_v19  ;;  %3979 = vmatprep.mubr.bf16.mxu1 %v13950_v1  ;;  %v6514_v19 = vld [vmem:[#allocation8 + $0x1b8] sm:$0xff]  }
 0x406   :  { %3561 = vmatprep.mubr.bf16.mxu0 %v10099_v10  ;;  %4221 = vmatpush1.bf16.msra.mxu1 %v6511_v12  ;;  %v6515_v12 = vld [vmem:[#allocation8 + $0x1c0] sm:$0xff]  }
 0x407   :  { %4222 = vmatprep.subr.bf16.mxu1 %v13709_v63  ;;  %5955 = vmatprep.subr.bf16.mxu0 %v6518_v61 }
 0x40a   :  { %4223 = vmatpush1.bf16.msra.mxu1 %v6512_v0  ;;  %v13952_v0 = vld [vmem:[#allocation180_spill] sm:$0xff] }
 0x40b   :  { %4224 = vmatprep.subr.bf16.mxu1 %v13709_v63 }
 0x40c   :  { %3980 = vmatmul.mubr.bf16.gmra.mrb[92].mxu1 %v13951_v57  ;;  %v6516_v57 = vld [vmem:[#allocation8 + $0x1c8] sm:$0xff]  }
 0x40d   :  { %3562 = vmatmul.mubr.bf16.gmra.mrb[200].mxu0 %v13884_v46  ;;  %3987 = vmatprep.mubr.bf16.mxu1 %v10104_v38  ;;  %v13953_v46 = vld [vmem:[#allocation27_spill] sm:$0xff] }
 0x40e   :  { %3569 = vmatprep.mubr.bf16.mxu0 %v10118_v47  ;;  %4225 = vmatpush1.bf16.msra.mxu1 %v6513_v32  ;;  %v6517_v32 = vld [vmem:[#allocation8 + $0x1d0] sm:$0xff]  }
 0x40f   :  { %4226 = vmatprep.subr.bf16.mxu1 %v13709_v63 }
 0x412   :  { %4227 = vmatpush1.bf16.msra.mxu1 %v6514_v19  ;;  %v13954_v19 = vld [vmem:[#allocation182_spill] sm:$0xff] }
 0x413   :  { %4228 = vmatprep.subr.bf16.mxu1 %v13709_v63 }
 0x414   :  { %3988 = vmatmul.mubr.bf16.gmra.mrb[96].mxu1 %v13952_v0 }
 0x415   :  { %3570 = vmatmul.mubr.bf16.gmra.mrb[204].mxu0 %v13902_v26  ;;  %3995 = vmatprep.mubr.bf16.mxu1 %v13953_v46  ;;  %v6519_v26 = vld [vmem:[#allocation8 + $0x208] sm:$0xff]  }
 0x416   :  { %3577 = vmatprep.mubr.bf16.mxu0 %v10130_v49  ;;  %4229 = vmatpush1.bf16.msra.mxu1 %v6515_v12  ;;  %v13955_v12 = vld [vmem:[#allocation183_spill] sm:$0xff] }
 0x417   :  { %4230 = vmatprep.subr.bf16.mxu1 %v13709_v63 }
 0x41a   :  { %4231 = vmatpush1.bf16.msra.mxu1 %v6516_v57  ;;  %v6522_v57 = vld [vmem:[#allocation8 + $0x1d8] sm:$0xff]  }
 0x41b   :  { %4232 = vmatprep.subr.bf16.mxu1 %v13709_v63 }
 0x41c   :  { %3996 = vmatmul.mubr.bf16.gmra.mrb[100].mxu1 %v13954_v19  ;;  %v13970_v19 = vld [vmem:[#allocation177_spill] sm:$0xff] }
 0x41d   :  { %3578 = vmatmul.mubr.bf16.gmra.mrb[208].mxu0 %v9846_v53  ;;  %4003 = vmatprep.mubr.bf16.mxu1 %v10146_v14  ;;  %v13956_v53 = vld [vmem:[#allocation186_spill] sm:$0xff] }
 0x41e   :  { %3585 = vmatprep.mubr.bf16.mxu0 %v10148_v40  ;;  %4233 = vmatpush1.bf16.msra.mxu1 %v6517_v32  ;;  %v13957_v32 = vld [vmem:[#allocation188_spill] sm:$0xff] }
 0x41f   :  { %4234 = vmatprep.subr.bf16.mxu1 %v13709_v63 }
 0x422   :  { %4235 = vmatpush1.bf16.msra.mxu1 %v6522_v57  ;;  %v13958_v57 = vld [vmem:[#allocation142_spill] sm:$0xff] }
 0x423   :  { %4236 = vmatprep.subr.bf16.mxu1 %v13709_v63 }
 0x424   :  { %4004 = vmatmul.mubr.bf16.gmra.mrb[104].mxu1 %v13955_v12  ;;  %v13969_v12 = vld [vmem:[#allocation71_spill] sm:$0xff] }
 0x425   :  { %3586 = vmatmul.mubr.bf16.gmra.mrb[212].mxu0 %v9869_v35  ;;  %4011 = vmatprep.mubr.bf16.mxu1 %v10152_v28  ;;  %v6527_v35 = vld [vmem:[#allocation8 + $0x1e0] sm:$0xff]  }
 0x426   :  { %3593 = vmatprep.mubr.bf16.mxu0 %v10171_v50  ;;  %4237 = vmatpush1.bf16.msra.mxu1 %v6527_v35  ;;  %v13960_v35 = vld [vmem:[#allocation169_spill] sm:$0xff] }
 0x427   :  { %4238 = vmatprep.subr.bf16.mxu1 %v13709_v63 }
 0x42c   :  { %4012 = vmatmul.mubr.bf16.gmra.mrb[108].mxu1 %v13956_v53  ;;  %v6529_v53 = vld [vmem:[#allocation8 + $0x1f0] sm:$0xff]  }
 0x42d   :  { %3594 = vmatmul.mubr.bf16.gmra.mrb[216].mxu0 %v9889_v52  ;;  %4019 = vmatprep.mubr.bf16.mxu1 %v10177_v15  ;;  %v13959_v52 = vld [vmem:[#allocation167_spill] sm:$0xff] }
 0x42e   :  { %3601 = vmatprep.mubr.bf16.mxu0 %v10179_v54 }
 0x434   :  { %4020 = vmatmul.mubr.bf16.gmra.mrb[112].mxu1 %v13957_v32 }
 0x435   :  { %3602 = vmatmul.mubr.bf16.gmra.mrb[220].mxu0 %v13922_v37  ;;  %4027 = vmatprep.mubr.bf16.mxu1 %v10193_v29  ;;  %v6528_v37 = vld [vmem:[#allocation8 + $0x1e8] sm:$0xff]  }
 0x436   :  { %3609 = vmatprep.mubr.bf16.mxu0 %v10199_v2  ;;  %4239 = vmatpush1.bf16.msra.mxu1 %v6528_v37  ;;  %v13965_v37 = vld [vmem:[#allocation173_spill] sm:$0xff] }
 0x437   :  { %4240 = vmatprep.subr.bf16.mxu1 %v13709_v63 }
 0x43a   :  { %4241 = vmatpush1.bf16.msra.mxu1 %v6529_v53 }
 0x43b   :  { %4242 = vmatprep.subr.bf16.mxu1 %v13709_v63  ;;  %v6523_v63 = vld [vmem:[#allocation8 + $0x220] sm:$0xff]  }
 0x43c   :  { %4028 = vmatmul.mubr.bf16.gmra.mrb[116].mxu1 %v13958_v57  ;;  %v13964_v57 = vld [vmem:[#allocation143_spill] sm:$0xff] }
 0x43d   :  { %3610 = vmatmul.mubr.bf16.gmra.mrb[224].mxu0 %v13928_v30  ;;  %4035 = vmatprep.mubr.bf16.mxu1 %v10206_v7  ;;  %v13961_v30 = vld [vmem:[#allocation172_spill] sm:$0xff] }
 0x43e   :  { %3617 = vmatprep.mubr.bf16.mxu0 %v10208_v9 }
 0x444   :  { %4036 = vmatmul.mubr.bf16.gmra.mrb[120].mxu1 %v9838_v43  ;;  %v13963_v43 = vld [vmem:[#allocation160_spill] sm:$0xff] }
 0x445   :  { %3618 = vmatmul.mubr.bf16.gmra.mrb[228].mxu0 %v13934_v20  ;;  %4043 = vmatprep.mubr.bf16.mxu1 %v13959_v52  ;;  %v13962_v20 = vpack.c.bf16 %v10225_v18, %v10219_v22  ;;  %v1881_v32 = vadd.f32 %v13964_v57, %v13963_v43  ;;  %v6521_v22 = vld [vmem:[#allocation8 + $0x218] sm:$0xff]   ;;  %v13967_v18 = vld [vmem:[#allocation176_spill] sm:$0xff] }
 0x446   :  { %3625 = vmatprep.mubr.bf16.mxu0 %v10237_v4 }
 0x44c   :  { %4044 = vmatmul.mubr.bf16.gmra.mrb[124].mxu1 %v9872_v42  ;;  %v1989_v42 = vmax.f32 %v1881_v32, 0.0 }
 0x44d   :  { %3626 = vmatmul.mubr.bf16.gmra.mrb[232].mxu0 %v13938_v11  ;;  %4051 = vmatprep.mubr.bf16.mxu1 %v13961_v30  ;;  %v13966_v11 = vld [vmem:[#allocation175_spill] sm:$0xff] }
 0x44e   :  { %3666 = vmatprep.mubr.bf16.mxu0 %v13960_v35  ;;  %v6520_v35 = vld [vmem:[#allocation8 + $0x210] sm:$0xff]   ;;  %v2616_v43 = vrot.slane %v1989_v42, 2  ;;  %v2602_v32 = vrot.slane %v1989_v42, 1 }
 0x454   :  { %4052 = vmatmul.mubr.bf16.gmra.mrb[0].mxu1 %v9902_v62 }
 0x455   :  { %3667 = vmatmul.mubr.bf16.vlgmr.msra.gmra.mrb[108].mxu0 %v13962_v20  ;;  %4059 = vmatprep.mubr.bf16.mxu1 %v13966_v11  ;;  %v13968_v20 = vld [vmem:[#allocation69_spill] sm:$0xff] }
 0x456   :  { %3674 = vmatprep.mubr.bf16.mxu0 %v13965_v37  ;;  %5956 = vmatpush3.bf16.msra.mxu0 %v6518_v61  ;;  %v2613_v62 = vrot.slane %v13968_v20, 2  ;;  %v2614_v61 = vrot.slane %v13969_v12, 2  ;;  %v2599_v0 = vrot.slane %v13968_v20, 1  ;;  %v6530_v37 = vld [vmem:[#allocation8 + $0x1f8] sm:$0xff]  }
 0x457   :  { %5957 = vmatprep.subr.bf16.mxu0 %v6519_v26  ;;  %4243 = vmatpush1.bf16.msra.mxu1 %v6530_v37  ;;  %v13972_v20 = vld [vmem:[#allocation179_spill] sm:$0xff] }
 0x458   :  { %v2615_v53 = vsel %vm2368_vm2, %v2613_v62, %v2614_v61  ;;  %v6525_v62 = vld [vmem:[#allocation8 + $0x230] sm:$0xff]   ;;  %v13975_v37 = vld [vmem:[#allocation135_spill] sm:$0xff] }
 0x45a   :  { %5958 = vmatpush3.bf16.msra.mxu0 %v6519_v26  ;;  %v2617_v26 = vsel %vm2368_vm2, %v2614_v61, %v2616_v43  ;;  %v13973_v61 = vld [vmem:[#allocation133_spill] sm:$0xff] }
 0x45b   :  { %5959 = vmatprep.subr.bf16.mxu0 %v6520_v35 }
 0x45c   :  { %4060 = vmatmul.mubr.bf16.gmra.mrb[4].mxu1 %v9917_v17  ;;  %v10367_v17 = vpack.c.bf16 %v2617_v26, %v2615_v53  ;;  %v13978_v53 = vld [vmem:[#allocation185_spill] sm:$0xff]  ;;  %v13979_v26 = vld [vmem:[#allocation139_spill] sm:$0xff] }
 0x45d   :  { %3675 = vmatmul.mubr.bf16.gmra.mrb[112].mxu0 %v10038_v39  ;;  %4067 = vmatprep.mubr.bf16.mxu1 %v13970_v19  ;;  %v6524_v39 = vld [vmem:[#allocation8 + $0x228] sm:$0xff]  }
 0x45e   :  { %3682 = vmatprep.mubr.bf16.mxu0 %v13967_v18  ;;  %5960 = vmatpush3.bf16.msra.mxu0 %v6520_v35  ;;  %v2600_v18 = vrot.slane %v13969_v12, 1  ;;  %v13971_v35 = vld [vmem:[#allocation130_spill] sm:$0xff]  ;;  %v6526_v12 = vld [vmem:[#allocation8 + $0x238] sm:$0xff]  }
 0x45f   :  { %5961 = vmatprep.subr.bf16.mxu0 %v6521_v22 }
 0x460   :  { %v2601_v42 = vsel %vm2143_vm1, %v2599_v0, %v2600_v18  ;;  %v13974_v0 = vld [vmem:[#allocation181_spill] sm:$0xff] }
 0x462   :  { %5962 = vmatpush3.bf16.msra.mxu0 %v6521_v22  ;;  %v2603_v22 = vsel %vm2143_vm1, %v2600_v18, %v2602_v32  ;;  %v13976_v18 = vld [vmem:[#allocation136_spill] sm:$0xff] }
 0x463   :  { %5963 = vmatprep.subr.bf16.mxu0 %v6523_v63  ;;  %v10376_v43 = vpack.c.bf16 %v2603_v22, %v2601_v42  ;;  %v13982_v42 = vld [vmem:[#allocation187_spill] sm:$0xff]  ;;  %v13983_v22 = vld [vmem:[#allocation141_spill] sm:$0xff] }
 0x464   :  { %4068 = vmatmul.mubr.bf16.gmra.mrb[8].mxu1 %v9930_v24 }
 0x465   :  { %3683 = vmatmul.mubr.bf16.gmra.mrb[116].mxu0 %v13946_v36  ;;  %4075 = vmatprep.mubr.bf16.mxu1 %v10367_v17 }
 0x466   :  { %3690 = vmatprep.mubr.bf16.mxu0 %v13971_v35  ;;  %5964 = vmatpush3.bf16.msra.mxu0 %v6523_v63  ;;  %v13977_v63 = vld [vmem:[#allocation137_spill] sm:$0xff] }
 0x467   :  { %5965 = vmatprep.subr.bf16.mxu0 %v6524_v39 }
 0x46a   :  { %5966 = vmatpush3.bf16.msra.mxu0 %v6524_v39 }
 0x46b   :  { %5967 = vmatprep.subr.bf16.mxu0 %v6525_v62 }
 0x46c   :  { %4076 = vmatmul.mubr.bf16.gmra.mrb[12].mxu1 %v10376_v43 }
 0x46d   :  { %3691 = vmatmul.mubr.bf16.gmra.mrb[120].mxu0 %v10075_v23  ;;  %4083 = vmatprep.mubr.bf16.mxu1 %v13973_v61 }
 0x46e   :  { %3698 = vmatprep.mubr.bf16.mxu0 %v13972_v20  ;;  %5968 = vmatpush3.bf16.msra.mxu0 %v6525_v62 }
 0x46f   :  { %5969 = vmatprep.subr.bf16.mxu0 %v6526_v12 }
 0x472   :  { %5970 = vmatpush3.bf16.msra.mxu0 %v6526_v12 }
 0x474   :  { %4084 = vmatmul.mubr.bf16.gmra.mrb[16].mxu1 %v13933_v6 }
 0x475   :  { %3699 = vmatmul.mubr.bf16.gmra.mrb[124].mxu0 %v13950_v1  ;;  %4091 = vmatprep.mubr.bf16.mxu1 %v13975_v37 }
 0x476   :  { %3706 = vmatprep.mubr.bf16.mxu0 %v13974_v0 }
 0x47c   :  { %4092 = vmatmul.mubr.bf16.gmra.mrb[20].mxu1 %v13937_v55 }
 0x47d   :  { %3707 = vmatmul.mubr.bf16.gmra.mrb[128].mxu0 %v10104_v38  ;;  %4099 = vmatprep.mubr.bf16.mxu1 %v13977_v63 }
 0x47e   :  { %3714 = vmatprep.mubr.bf16.mxu0 %v13976_v18 }
 0x484   :  { %4100 = vmatmul.mubr.bf16.gmra.mrb[24].mxu1 %v13941_v59 }
 0x485   :  { %3715 = vmatmul.mubr.bf16.gmra.mrb[132].mxu0 %v13953_v46  ;;  %4107 = vmatprep.mubr.bf16.mxu1 %v13979_v26 }
 0x486   :  { %3722 = vmatprep.mubr.bf16.mxu0 %v13978_v53 }
 0x488   :  { %v10394_v6 = vpop.f32.mrb[156].mxu0 }
 0x489   :  { %13980 = vst [vmem:[#allocation24_spill] sm:$0xff] %v10394_v6  ;;  %v3477_v39 = vpop.f32.mrb[157].mxu0 }
 0x48a   :  { %v10396_v32 = vpop.f32.mrb[158].mxu0 }
 0x48b   :  { %13981 = vst [vmem:[#allocation26_spill] sm:$0xff] %v10396_v32  ;;  %v3480_v62 = vpop.f32.mrb[159].mxu0 }
 0x48c   :  { %4108 = vmatmul.mubr.bf16.gmra.mrb[28].mxu1 %v10043_v45 }
 0x48d   :  { %3723 = vmatmul.mubr.bf16.gmra.mrb[136].mxu0 %v10146_v14  ;;  %4115 = vmatprep.mubr.bf16.mxu1 %v13983_v22 }
 0x48e   :  { %3730 = vmatprep.mubr.bf16.mxu0 %v13982_v42 }
 0x490   :  { %v10402_v12 = vpop.f32.mrb[160].mxu0 }
 0x491   :  { %13984 = vst [vmem:[#allocation29_spill] sm:$0xff] %v10402_v12  ;;  %v3485_v61 = vpop.f32.mrb[161].mxu0 }
 0x492   :  { %v10404_v59 = vpop.f32.mrb[162].mxu0 }
 0x493   :  { %13985 = vst [vmem:[#allocation31_spill] sm:$0xff] %v10404_v59  ;;  %v3488_v55 = vpop.f32.mrb[163].mxu0 }
 0x494   :  { %4116 = vmatmul.mubr.bf16.gmra.mrb[32].mxu1 %v10069_v13 }
 0x495   :  { %3731 = vmatmul.mubr.bf16.gmra.mrb[140].mxu0 %v10152_v28  ;;  %4123 = vmatprep.mubr.bf16.mxu1 %v9832_v16 }
 0x496   :  { %3738 = vmatprep.mubr.bf16.mxu0 %v9808_v33 }
 0x498   :  { %v10410_v39 = vpop.f32.mrb[164].mxu0 }
 0x499   :  { %13986 = vst [vmem:[#allocation28_spill] sm:$0xff] %v10410_v39  ;;  %v3493_v62 = vpop.f32.mrb[165].mxu0 }
 0x49a   :  { %v10412_v32 = vpop.f32.mrb[166].mxu0 }
 0x49b   :  { %13987 = vst [vmem:[#allocation30_spill] sm:$0xff] %v10412_v32  ;;  %v3496_v6 = vpop.f32.mrb[167].mxu0 }
 0x49c   :  { %4124 = vmatmul.mubr.bf16.gmra.mrb[36].mxu1 %v10082_v8 }
 0x49d   :  { %3739 = vmatmul.mubr.bf16.gmra.mrb[144].mxu0 %v10177_v15  ;;  %4131 = vmatprep.mubr.bf16.mxu1 %v9856_v58 }
 0x49e   :  { %3746 = vmatprep.mubr.bf16.mxu0 %v9842_v51 }
 0x4a0   :  { %v10418_v55 = vpop.f32.mrb[168].mxu0 }
 0x4a1   :  { %13988 = vst [vmem:[#allocation124_spill] sm:$0xff] %v10418_v55  ;;  %v3501_v61 = vpop.f32.mrb[169].mxu0 }
 0x4a2   :  { %v10420_v59 = vpop.f32.mrb[170].mxu0 }
 0x4a3   :  { %13989 = vst [vmem:[#allocation33_spill] sm:$0xff] %v10420_v59  ;;  %v3504_v12 = vpop.f32.mrb[171].mxu0 }
 0x4a4   :  { %4132 = vmatmul.mubr.bf16.gmra.mrb[40].mxu1 %v10099_v10 }
 0x4a5   :  { %3747 = vmatmul.mubr.bf16.gmra.mrb[148].mxu0 %v10193_v29  ;;  %4139 = vmatprep.mubr.bf16.mxu1 %v9878_v34 }
 0x4a6   :  { %3754 = vmatprep.mubr.bf16.mxu0 %v13919_v48 }
 0x4a8   :  { %v10426_v6 = vpop.f32.mrb[172].mxu0 }
 0x4a9   :  { %13990 = vst [vmem:[#allocation35_spill] sm:$0xff] %v10426_v6  ;;  %v3509_v62 = vpop.f32.mrb[173].mxu0 }
 0x4aa   :  { %v10428_v32 = vpop.f32.mrb[174].mxu0 }
 0x4ab   :  { %13991 = vst [vmem:[#allocation32_spill] sm:$0xff] %v10428_v32  ;;  %v3512_v39 = vpop.f32.mrb[175].mxu0 }
 0x4ac   :  { %4140 = vmatmul.mubr.bf16.gmra.mrb[44].mxu1 %v10118_v47 }
 0x4ad   :  { %3755 = vmatmul.mubr.bf16.gmra.mrb[152].mxu0 %v10206_v7  ;;  %4147 = vmatprep.mubr.bf16.mxu1 %v9904_v56 }
 0x4ae   :  { %5971 = vmatprep.mubr.bf16.mxu0 %v13946_v36 }
 0x4b0   :  { %v10434_v12 = vpop.f32.mrb[176].mxu0 }
 0x4b1   :  { %13992 = vst [vmem:[#allocation34_spill] sm:$0xff] %v10434_v12  ;;  %v3517_v61 = vpop.f32.mrb[177].mxu0 }
 0x4b2   :  { %v10436_v59 = vpop.f32.mrb[178].mxu0 }
 0x4b3   :  { %13993 = vst [vmem:[#allocation37_spill] sm:$0xff] %v10436_v59  ;;  %v3520_v55 = vpop.f32.mrb[179].mxu0 }
 0x4b4   :  { %4148 = vmatmul.mubr.bf16.gmra.mrb[48].mxu1 %v10130_v49 }
 0x4b5   :  { %5972 = vmatmul.mubr.bf16.vlgmr.msra.gmra.mrb[236].mxu0 %v10075_v23  ;;  %4155 = vmatprep.mubr.bf16.mxu1 %v9924_v60 }
 0x4b6   :  { %5975 = vmatprep.mubr.bf16.mxu0 %v13950_v1 }
 0x4b8   :  { %v10442_v39 = vpop.f32.mrb[180].mxu0 }
 0x4b9   :  { %13994 = vst [vmem:[#allocation39_spill] sm:$0xff] %v10442_v39  ;;  %v3525_v62 = vpop.f32.mrb[181].mxu0 }
 0x4ba   :  { %v10444_v36 = vpop.f32.mrb[182].mxu0 }
 0x4bb   :  { %13995 = vst [vmem:[#allocation36_spill] sm:$0xff] %v10444_v36  ;;  %v3528_v32 = vpop.f32.mrb[183].mxu0 }
 0x4bc   :  { %4156 = vmatmul.mubr.bf16.gmra.mrb[52].mxu1 %v10148_v40 }
 0x4bd   :  { %5976 = vmatmul.mubr.bf16.gmra.mrb[240].mxu0 %v10104_v38  ;;  %4163 = vmatprep.mubr.bf16.mxu1 %v13924_v5 }
 0x4be   :  { %5979 = vmatprep.mubr.bf16.mxu0 %v13953_v46 }
 0x4c0   :  { %v10450_v23 = vpop.f32.mrb[184].mxu0 }
 0x4c1   :  { %13996 = vst [vmem:[#allocation38_spill] sm:$0xff] %v10450_v23  ;;  %v3533_v55 = vpop.f32.mrb[185].mxu0 }
 0x4c2   :  { %v10452_v1 = vpop.f32.mrb[186].mxu0 }
 0x4c3   :  { %13997 = vst [vmem:[#allocation41_spill] sm:$0xff] %v10452_v1  ;;  %v3536_v61 = vpop.f32.mrb[187].mxu0 }
 0x4c4   :  { %4164 = vmatmul.mubr.bf16.gmra.mrb[56].mxu1 %v10171_v50 }
 0x4c5   :  { %5980 = vmatmul.mubr.bf16.gmra.mrb[244].mxu0 %v10146_v14  ;;  %4171 = vmatprep.mubr.bf16.mxu1 %v13932_v3 }
 0x4c6   :  { %5983 = vmatprep.mubr.bf16.mxu0 %v10152_v28 }
 0x4c8   :  { %v10458_v38 = vpop.f32.mrb[188].mxu0 }
 0x4c9   :  { %13998 = vst [vmem:[#allocation43_spill] sm:$0xff] %v10458_v38  ;;  %v3541_v32 = vpop.f32.mrb[189].mxu0 }
 0x4ca   :  { %v10460_v46 = vpop.f32.mrb[190].mxu0 }
 0x4cb   :  { %13999 = vst [vmem:[#allocation40_spill] sm:$0xff] %v10460_v46  ;;  %v3544_v62 = vpop.f32.mrb[191].mxu0  ;;  %v14004_v46 = vld [vmem:[#allocation161_spill] sm:$0xff] }
 0x4cc   :  { %4172 = vmatmul.mubr.bf16.gmra.mrb[60].mxu1 %v10179_v54 }
 0x4cd   :  { %5984 = vmatmul.mubr.bf16.gmra.mrb[248].mxu0 %v10177_v15  ;;  %4179 = vmatprep.mubr.bf16.mxu1 %v13936_v44 }
 0x4ce   :  { %5987 = vmatprep.mubr.bf16.mxu0 %v10193_v29 }
 0x4d0   :  { %v10466_v14 = vpop.f32.mrb[192].mxu0 }
 0x4d1   :  { %14000 = vst [vmem:[#allocation156_spill] sm:$0xff] %v10466_v14  ;;  %v3549_v55 = vpop.f32.mrb[193].mxu0  ;;  %v14005_v14 = vld [vmem:[#allocation162_spill] sm:$0xff] }
 0x4d2   :  { %v10468_v28 = vpop.f32.mrb[194].mxu0  ;;  %v1882_v55 = vadd.f32 %v13964_v57, %v14004_v46 }
 0x4d3   :  { %14001 = vst [vmem:[#allocation157_spill] sm:$0xff] %v10468_v28  ;;  %v3552_v61 = vpop.f32.mrb[195].mxu0  ;;  %v14006_v28 = vld [vmem:[#allocation163_spill] sm:$0xff] }
 0x4d4   :  { %4180 = vmatmul.mubr.bf16.gmra.mrb[64].mxu1 %v10199_v2  ;;  %v1883_v61 = vadd.f32 %v13964_v57, %v14005_v14 }
 0x4d5   :  { %5988 = vmatmul.mubr.bf16.gmra.mrb[252].mxu0 %v10206_v7  ;;  %4187 = vmatprep.mubr.bf16.mxu1 %v13940_v21  ;;  %v10484_v7 = vadd.f32 %v13964_v57, %v14006_v28 }
 0x4d6   :  { %5991 = vmatprep.mubr.bf16.mxu0 %v13959_v52  ;;  %v10490_v52 = vmax.f32 %v1882_v55, 0.0 }
 0x4d7   :  { %v12774_v46 = vmax.f32 %v10484_v7, 0.0 }
 0x4d8   :  { %v10474_v15 = vpop.f32.mrb[196].mxu0 }
 0x4d9   :  { %14002 = vst [vmem:[#allocation158_spill] sm:$0xff] %v10474_v15  ;;  %v3557_v32 = vpop.f32.mrb[197].mxu0 }
 0x4da   :  { %v10476_v29 = vpop.f32.mrb[198].mxu0  ;;  %v10492_v32 = vmax.f32 %v1883_v61, 0.0 }
 0x4db   :  { %14003 = vst [vmem:[#allocation159_spill] sm:$0xff] %v10476_v29  ;;  %v3560_v62 = vpop.f32.mrb[199].mxu0 }
 0x4dc   :  { %4188 = vmatmul.mubr.bf16.gmra.mrb[68].mxu1 %v10208_v9  ;;  %v2648_v15 = vrot.slane %v10492_v32, 2 }
 0x4dd   :  { %5992 = vmatmul.mubr.bf16.gmra.mrb[0].mxu0 %v13961_v30  ;;  %4195 = vmatprep.mubr.bf16.mxu1 %v10036_v25  ;;  %v2647_v30 = vrot.slane %v10490_v52, 2 }
 0x4de   :  { %5995 = vmatprep.mubr.bf16.mxu0 %v13966_v11  ;;  %v2650_v11 = vrot.slane %v12774_v46, 2 }
 0x4df   :  { %v2649_v55 = vsel %vm2368_vm2, %v2647_v30, %v2648_v15 }
 0x4e0   :  { %v10495_v62 = vpop.f32.mrb[200].mxu0  ;;  %v2651_v61 = vsel %vm2368_vm2, %v2648_v15, %v2650_v11  ;;  %v14013_v11 = vld [vmem:[#allocation173_spill] sm:$0xff] }
 0x4e1   :  { %14007 = vst [vmem:[#allocation78_spill] sm:$0xff] %v10495_v62  ;;  %v3565_v14 = vpop.f32.mrb[201].mxu0  ;;  %v2714_v62 = vpack.c.bf16 %v2651_v61, %v2649_v55  ;;  %v14017_v61 = vld [vmem:[#allocation176_spill] sm:$0xff] }
 0x4e2   :  { %v10497_v29 = vpop.f32.mrb[202].mxu0 }
 0x4e3   :  { %14008 = vst [vmem:[#allocation80_spill] sm:$0xff] %v10497_v29  ;;  %v3568_v28 = vpop.f32.mrb[203].mxu0 }
 0x4e4   :  { %4196 = vmatmul.mubr.bf16.gmra.mrb[72].mxu1 %v10237_v4 }
 0x4e5   :  { %5996 = vmatmul.mubr.bf16.gmra.mrb[4].mxu0 %v13970_v19  ;;  %4203 = vmatprep.mubr.bf16.mxu1 %v10245_v31 }
 0x4e6   :  { %5999 = vmatprep.mubr.bf16.mxu0 %v10367_v17 }
 0x4e8   :  { %v10509_v14 = vpop.f32.mrb[204].mxu0 }
 0x4e9   :  { %14009 = vst [vmem:[#allocation85_spill] sm:$0xff] %v10509_v14  ;;  %v3573_v28 = vpop.f32.mrb[205].mxu0 }
 0x4ea   :  { %v10511_v29 = vpop.f32.mrb[206].mxu0  ;;  %v14018_v28 = vld [vmem:[#allocation131_spill] sm:$0xff] }
 0x4eb   :  { %14010 = vst [vmem:[#allocation87_spill] sm:$0xff] %v10511_v29  ;;  %v3576_v38 = vpop.f32.mrb[207].mxu0 }
 0x4ec   :  { %4204 = vmatmul.mubr.bf16.gmra.mrb[76].mxu1 %v10250_v41  ;;  %v14014_v38 = vld [vmem:[#allocation128_spill] sm:$0xff] }
 0x4ed   :  { %6000 = vmatmul.mubr.bf16.gmra.mrb[8].mxu0 %v2714_v62  ;;  %4244 = vmatprep.mubr.bf16.mxu1 %v13948_v27 }
 0x4ee   :  { %6003 = vmatprep.mubr.bf16.mxu0 %v13975_v37 }
 0x4f0   :  { %v10516_v17 = vpop.f32.mrb[208].mxu0 }
 0x4f1   :  { %14011 = vst [vmem:[#allocation84_spill] sm:$0xff] %v10516_v17  ;;  %v3581_v19 = vpop.f32.mrb[209].mxu0 }
 0x4f2   :  { %v10518_v30 = vpop.f32.mrb[210].mxu0 }
 0x4f3   :  { %14012 = vst [vmem:[#allocation86_spill] sm:$0xff] %v10518_v30  ;;  %v3584_v15 = vpop.f32.mrb[211].mxu0 }
 0x4f4   :  { %4245 = vmatmul.mubr.bf16.vlgmr.msra.gmra.mrb[80].mxu1 %v14013_v11  ;;  %v14021_v11 = vld [vmem:[#allocation180_spill] sm:$0xff] }
 0x4f5   :  { %6004 = vmatmul.mubr.bf16.gmra.mrb[12].mxu0 %v13977_v63  ;;  %4252 = vmatprep.mubr.bf16.mxu1 %v14014_v38 }
 0x4f6   :  { %6007 = vmatprep.mubr.bf16.mxu0 %v13979_v26 }
 0x4f8   :  { %v10524_v62 = vpop.f32.mrb[212].mxu0 }
 0x4f9   :  { %14015 = vst [vmem:[#allocation64_spill] sm:$0xff] %v10524_v62  ;;  %v3589_v55 = vpop.f32.mrb[213].mxu0 }
 0x4fa   :  { %v10526_v37 = vpop.f32.mrb[214].mxu0 }
 0x4fb   :  { %14016 = vst [vmem:[#allocation66_spill] sm:$0xff] %v10526_v37  ;;  %v3592_v27 = vpop.f32.mrb[215].mxu0 }
 0x4fc   :  { %4253 = vmatmul.mubr.bf16.gmra.mrb[84].mxu1 %v14017_v61  ;;  %v14024_v27 = vld [vmem:[#allocation182_spill] sm:$0xff] }
 0x4fd   :  { %6008 = vmatmul.mubr.bf16.gmra.mrb[16].mxu0 %v13983_v22  ;;  %4260 = vmatprep.mubr.bf16.mxu1 %v14018_v28  ;;  %v14027_v28 = vld [vmem:[#allocation183_spill] sm:$0xff] }
 0x4fe   :  { %6011 = vmatprep.mubr.bf16.mxu0 %v9832_v16 }
 0x500   :  { %v10532_v63 = vpop.f32.mrb[216].mxu0 }
 0x501   :  { %14019 = vst [vmem:[#allocation199_spill] sm:$0xff] %v10532_v63  ;;  %v3597_v19 = vpop.f32.mrb[217].mxu0 }
 0x502   :  { %v10534_v26 = vpop.f32.mrb[218].mxu0 }
 0x503   :  { %14020 = vst [vmem:[#allocation89_spill] sm:$0xff] %v10534_v26  ;;  %v3600_v15 = vpop.f32.mrb[219].mxu0 }
 0x504   :  { %4261 = vmatmul.mubr.bf16.gmra.mrb[88].mxu1 %v13971_v35  ;;  %v14030_v15 = vld [vmem:[#allocation153_spill] sm:$0xff] }
 0x505   :  { %6012 = vmatmul.mubr.bf16.gmra.mrb[20].mxu0 %v9856_v58  ;;  %4268 = vmatprep.mubr.bf16.mxu1 %v14021_v11  ;;  %v1936_v11 = vadd.f32 %v13964_v57, %v14030_v15  ;;  %v14036_v15 = vld [vmem:[#allocation188_spill] sm:$0xff] }
 0x506   :  { %6015 = vmatprep.mubr.bf16.mxu0 %v9878_v34 }
 0x508   :  { %v10540_v22 = vpop.f32.mrb[220].mxu0 }
 0x509   :  { %14022 = vst [vmem:[#allocation91_spill] sm:$0xff] %v10540_v22  ;;  %v3605_v38 = vpop.f32.mrb[221].mxu0  ;;  %v14053_v22 = vld [vmem:[#allocation184_spill] sm:$0xff] }
 0x50a   :  { %v10542_v16 = vpop.f32.mrb[222].mxu0  ;;  %v14031_v38 = vld [vmem:[#allocation154_spill] sm:$0xff] }
 0x50b   :  { %14023 = vst [vmem:[#allocation88_spill] sm:$0xff] %v10542_v16  ;;  %v3608_v55 = vpop.f32.mrb[223].mxu0  ;;  %v14047_v16 = vld [vmem:[#allocation18_spill] sm:$0xff] }
 0x50c   :  { %4269 = vmatmul.mubr.bf16.gmra.mrb[92].mxu1 %v13972_v20  ;;  %v1937_v55 = vadd.f32 %v13964_v57, %v14031_v38 }
 0x50d   :  { %6016 = vmatmul.mubr.bf16.gmra.mrb[24].mxu0 %v9904_v56  ;;  %4276 = vmatprep.mubr.bf16.mxu1 %v14024_v27  ;;  %v14032_v27 = vld [vmem:[#allocation155_spill] sm:$0xff] }
 0x50e   :  { %6019 = vmatprep.mubr.bf16.mxu0 %v9924_v60 }
 0x510   :  { %v10548_v58 = vpop.f32.mrb[224].mxu0 }
 0x511   :  { %14025 = vst [vmem:[#allocation90_spill] sm:$0xff] %v10548_v58  ;;  %v3613_v35 = vpop.f32.mrb[225].mxu0 }
 0x512   :  { %v10550_v34 = vpop.f32.mrb[226].mxu0  ;;  %v10574_v35 = vmax.f32 %v1937_v55, 0.0 }
 0x513   :  { %14026 = vst [vmem:[#allocation93_spill] sm:$0xff] %v10550_v34  ;;  %v3616_v61 = vpop.f32.mrb[227].mxu0 }
 0x514   :  { %4277 = vmatmul.mubr.bf16.gmra.mrb[96].mxu1 %v13974_v0  ;;  %v10572_v0 = vmax.f32 %v1936_v11, 0.0 }
 0x515   :  { %6020 = vmatmul.mubr.bf16.gmra.mrb[28].mxu0 %v13924_v5  ;;  %4284 = vmatprep.mubr.bf16.mxu1 %v14027_v28  ;;  %v10566_v5 = vadd.f32 %v13964_v57, %v14032_v27 }
 0x516   :  { %6023 = vmatprep.mubr.bf16.mxu0 %v13932_v3  ;;  %v14033_v3 = vld [vmem:[#allocation186_spill] sm:$0xff] }
 0x517   :  { %v12773_v61 = vmax.f32 %v10566_v5, 0.0 }
 0x518   :  { %v10556_v56 = vpop.f32.mrb[228].mxu0 }
 0x519   :  { %14028 = vst [vmem:[#allocation95_spill] sm:$0xff] %v10556_v56  ;;  %v3621_v20 = vpop.f32.mrb[229].mxu0 }
 0x51a   :  { %v10558_v60 = vpop.f32.mrb[230].mxu0 }
 0x51b   :  { %14029 = vst [vmem:[#allocation92_spill] sm:$0xff] %v10558_v60  ;;  %v3624_v19 = vpop.f32.mrb[231].mxu0  ;;  %v2634_v60 = vrot.slane %v10492_v32, 1 }
 0x51c   :  { %4285 = vmatmul.mubr.bf16.gmra.mrb[100].mxu1 %v13976_v18  ;;  %v2653_v18 = vrot.slane %v10574_v35, 2 }
 0x51d   :  { %6024 = vmatmul.mubr.bf16.gmra.mrb[32].mxu0 %v13936_v44  ;;  %4292 = vmatprep.mubr.bf16.mxu1 %v14033_v3  ;;  %v2652_v44 = vrot.slane %v10572_v0, 2 }
 0x51e   :  { %6027 = vmatprep.mubr.bf16.mxu0 %v13940_v21  ;;  %v2655_v21 = vrot.slane %v12773_v61, 2  ;;  %v14041_v61 = vld [vmem:[#allocation166_spill] sm:$0xff] }
 0x51f   :  { %v2654_v11 = vsel %vm2368_vm2, %v2652_v44, %v2653_v18 }
 0x520   :  { %v10577_v28 = vpop.f32.mrb[232].mxu0  ;;  %v2656_v38 = vsel %vm2368_vm2, %v2653_v18, %v2655_v21  ;;  %v14038_v18 = vld [vmem:[#allocation190_spill] sm:$0xff] }
 0x521   :  { %14034 = vst [vmem:[#allocation116_spill] sm:$0xff] %v10577_v28  ;;  %v3629_v20 = vpop.f32.mrb[233].mxu0 }
 0x522   :  { %v10579_v19 = vpop.f32.mrb[234].mxu0  ;;  %v2768_v20 = vpack.c.bf16 %v2656_v38, %v2654_v11 }
 0x523   :  { %14035 = vst [vmem:[#allocation103_spill] sm:$0xff] %v10579_v19  ;;  %v3632_v57 = vpop.f32.mrb[235].mxu0  ;;  %v14043_v19 = vld [vmem:[#allocation168_spill] sm:$0xff] }
 0x524   :  { %4293 = vmatmul.mubr.bf16.gmra.mrb[104].mxu1 %v13978_v53 }
 0x525   :  { %6028 = vmatmul.mubr.bf16.gmra.mrb[36].mxu0 %v10036_v25  ;;  %4300 = vmatprep.mubr.bf16.mxu1 %v14036_v15  ;;  %v14037_v25 = vld [vmem:[#allocation142_spill] sm:$0xff] }
 0x526   :  { %6031 = vmatprep.mubr.bf16.mxu0 %v10245_v31 }
 0x528   :  { %v10591_v55 = vpop.f32.mrb[108].mxu0 }
 0x529   :  { %v3670_v27 = vpop.f32.mrb[109].mxu0 }
 0x52a   :  { %v10593_v3 = vpop.f32.mrb[110].mxu0 }
 0x52b   :  { %v3673_v57 = vpop.f32.mrb[111].mxu0 }
 0x52c   :  { %4301 = vmatmul.mubr.bf16.gmra.mrb[108].mxu1 %v13982_v42  ;;  %v14039_v42 = vld [vmem:[#allocation202_spill] sm:$0xff] }
 0x52d   :  { %6032 = vmatmul.mubr.bf16.gmra.mrb[40].mxu0 %v2768_v20  ;;  %4308 = vmatprep.mubr.bf16.mxu1 %v14037_v25 }
 0x530   :  { %v10597_v53 = vpop.f32.mrb[112].mxu0 }
 0x531   :  { %v3678_v31 = vpop.f32.mrb[113].mxu0 }
 0x532   :  { %v10599_v15 = vpop.f32.mrb[114].mxu0 }
 0x533   :  { %v3681_v44 = vpop.f32.mrb[115].mxu0 }
 0x534   :  { %4309 = vmatmul.mubr.bf16.gmra.mrb[112].mxu1 %v9808_v33  ;;  %v14040_v33 = vld [vmem:[#allocation125_spill] sm:$0xff] }
 0x535   :  { %4316 = vmatprep.mubr.bf16.mxu1 %v14038_v18 }
 0x538   :  { %v10603_v21 = vpop.f32.mrb[116].mxu0 }
 0x539   :  { %v3686_v27 = vpop.f32.mrb[117].mxu0 }
 0x53a   :  { %v10605_v11 = vpop.f32.mrb[118].mxu0 }
 0x53b   :  { %v3689_v38 = vpop.f32.mrb[119].mxu0 }
 0x53c   :  { %4317 = vmatmul.mubr.bf16.gmra.mrb[116].mxu1 %v9842_v51  ;;  %v14042_v51 = vld [vmem:[#allocation126_spill] sm:$0xff] }
 0x53d   :  { %4324 = vmatprep.mubr.bf16.mxu1 %v14039_v42 }
 0x540   :  { %v10609_v20 = vpop.f32.mrb[120].mxu0 }
 0x541   :  { %v3694_v57 = vpop.f32.mrb[121].mxu0 }
 0x542   :  { %v10611_v25 = vpop.f32.mrb[122].mxu0 }
 0x543   :  { %v3697_v31 = vpop.f32.mrb[123].mxu0 }
 0x544   :  { %4325 = vmatmul.mubr.bf16.gmra.mrb[120].mxu1 %v13919_v48 }
 0x545   :  { %4332 = vmatprep.mubr.bf16.mxu1 %v14040_v33 }
 0x548   :  { %v10615_v44 = vpop.f32.mrb[124].mxu0 }
 0x549   :  { %v3702_v18 = vpop.f32.mrb[125].mxu0 }
 0x54a   :  { %v10617_v27 = vpop.f32.mrb[126].mxu0 }
 0x54b   :  { %v3705_v38 = vpop.f32.mrb[127].mxu0 }
 0x54c   :  { %4333 = vmatmul.mubr.bf16.gmra.mrb[124].mxu1 %v14041_v61  ;;  %v14044_v61 = vmax.f32 %v10484_v7, 0.0 }
 0x54d   :  { %4340 = vmatprep.mubr.bf16.mxu1 %v14042_v51  ;;  %v14045_v51 = vld [vmem:[#allocation170_spill] sm:$0xff] }
 0x54e   :  { %v2636_v28 = vrot.slane %v14044_v61, 1  ;;  %v14046_v61 = vld [vmem:[#allocation174_spill] sm:$0xff] }
 0x550   :  { %v10621_v42 = vpop.f32.mrb[128].mxu0 }
 0x551   :  { %v3710_v57 = vpop.f32.mrb[129].mxu0 }
 0x552   :  { %v10623_v46 = vpop.f32.mrb[130].mxu0  ;;  %v2633_v57 = vrot.slane %v10490_v52, 1 }
 0x553   :  { %v3713_v31 = vpop.f32.mrb[131].mxu0 }
 0x554   :  { %4341 = vmatmul.mubr.bf16.gmra.mrb[0].mxu1 %v14043_v19 }
 0x555   :  { %4348 = vmatprep.mubr.bf16.mxu1 %v9930_v24 }
 0x558   :  { %v10627_v48 = vpop.f32.mrb[132].mxu0 }
 0x559   :  { %v3718_v33 = vpop.f32.mrb[133].mxu0 }
 0x55a   :  { %v10629_v18 = vpop.f32.mrb[134].mxu0  ;;  %v2635_v33 = vsel %vm2143_vm1, %v2633_v57, %v2634_v60 }
 0x55b   :  { %v3721_v38 = vpop.f32.mrb[135].mxu0 }
 0x55c   :  { %4349 = vmatmul.mubr.bf16.gmra.mrb[4].mxu1 %v14045_v51  ;;  %v2637_v38 = vsel %vm2143_vm1, %v2634_v60, %v2636_v28 }
 0x55d   :  { %4356 = vmatprep.mubr.bf16.mxu1 %v10376_v43  ;;  %v2713_v7 = vpack.c.bf16 %v2637_v38, %v2635_v33  ;;  %v14048_v33 = vld [vmem:[#allocation178_spill] sm:$0xff]  ;;  %v14049_v38 = vld [vmem:[#allocation20_spill] sm:$0xff] }
 0x560   :  { %v10637_v19 = vpop.f32.mrb[136].mxu0 }
 0x561   :  { %v3726_v24 = vpop.f32.mrb[137].mxu0 }
 0x562   :  { %v10639_v31 = vpop.f32.mrb[138].mxu0  ;;  %v2712_v24 = vpack.c.bf16 %v10492_v32, %v10490_v52  ;;  %v14050_v52 = vld [vmem:[#allocation132_spill] sm:$0xff] }
 0x563   :  { %v3729_v56 = vpop.f32.mrb[139].mxu0 }
 0x564   :  { %4357 = vmatmul.mubr.bf16.gmra.mrb[8].mxu1 %v14046_v61 }
 0x565   :  { %4364 = vmatprep.mubr.bf16.mxu1 %v2713_v7 }
 0x568   :  { %v10644_v51 = vpop.f32.mrb[140].mxu0 }
 0x569   :  { %v3734_v34 = vpop.f32.mrb[141].mxu0 }
 0x56a   :  { %v10646_v58 = vpop.f32.mrb[142].mxu0 }
 0x56b   :  { %v3737_v43 = vpop.f32.mrb[143].mxu0 }
 0x56c   :  { %4365 = vmatmul.mubr.bf16.gmra.mrb[12].mxu1 %v2712_v24 }
 0x56d   :  { %4372 = vmatprep.mubr.bf16.mxu1 %v14047_v16 }
 0x570   :  { %v10651_v57 = vpop.f32.mrb[144].mxu0 }
 0x571   :  { %v3742_v60 = vpop.f32.mrb[145].mxu0 }
 0x572   :  { %v10653_v56 = vpop.f32.mrb[146].mxu0 }
 0x573   :  { %v3745_v28 = vpop.f32.mrb[147].mxu0 }
 0x574   :  { %4373 = vmatmul.mubr.bf16.gmra.mrb[16].mxu1 %v14048_v33  ;;  %v14052_v28 = vld [vmem:[#allocation134_spill] sm:$0xff] }
 0x575   :  { %4380 = vmatprep.mubr.bf16.mxu1 %v14049_v38 }
 0x578   :  { %v10657_v34 = vpop.f32.mrb[148].mxu0 }
 0x579   :  { %v3750_v7 = vpop.f32.mrb[149].mxu0 }
 0x57a   :  { %v10659_v61 = vpop.f32.mrb[150].mxu0 }
 0x57b   :  { %v3753_v43 = vpop.f32.mrb[151].mxu0 }
 0x57c   :  { %4381 = vmatmul.mubr.bf16.gmra.mrb[20].mxu1 %v14050_v52 }
 0x57d   :  { %4388 = vmatprep.mubr.bf16.mxu1 %v10043_v45 }
 0x580   :  { %v10663_v32 = vpop.f32.mrb[152].mxu0 }
 0x581   :  { %v3758_v16 = vpop.f32.mrb[153].mxu0 }
 0x582   :  { %v10665_v24 = vpop.f32.mrb[154].mxu0 }
 0x583   :  { %14051 = vst [vmem:[#allocation118_spill] sm:$0xff] %v10665_v24  ;;  %v3761_v60 = vpop.f32.mrb[155].mxu0 }
 0x584   :  { %4389 = vmatmul.mubr.bf16.gmra.mrb[24].mxu1 %v14052_v28  ;;  %v14054_v28 = vld [vmem:[#allocation138_spill] sm:$0xff] }
 0x585   :  { %4396 = vmatprep.mubr.bf16.mxu1 %v10069_v13 }
 0x588   :  { %v10669_v33 = vpop.f32.mrb[236].mxu0 }
 0x589   :  { %v4535_v38 = vpop.f32.mrb[237].mxu0 }
 0x58a   :  { %v10671_v7 = vpop.f32.mrb[238].mxu0 }
 0x58b   :  { %v4538_v43 = vpop.f32.mrb[239].mxu0 }
 0x58c   :  { %4397 = vmatmul.mubr.bf16.gmra.mrb[28].mxu1 %v14053_v22 }
 0x58d   :  { %4404 = vmatprep.mubr.bf16.mxu1 %v10082_v8  ;;  %v14055_v8 = vld [vmem:[#allocation140_spill] sm:$0xff] }
 0x590   :  { %v10675_v45 = vpop.f32.mrb[240].mxu0 }
 0x591   :  { %v10677_v52 = vpop.f32.mrb[241].mxu0 }
 0x592   :  { %v10679_v16 = vpop.f32.mrb[242].mxu0 }
 0x593   :  { %v10681_v60 = vpop.f32.mrb[243].mxu0 }
 0x594   :  { %4405 = vmatmul.mubr.bf16.gmra.mrb[32].mxu1 %v14054_v28 }
 0x595   :  { %4412 = vmatprep.mubr.bf16.mxu1 %v10099_v10  ;;  %v14056_v10 = vld [vmem:[#allocation189_spill] sm:$0xff] }
 0x598   :  { %v10685_v13 = vpop.f32.mrb[244].mxu0 }
 0x599   :  { %v10687_v26 = vpop.f32.mrb[245].mxu0 }
 0x59a   :  { %v10689_v63 = vpop.f32.mrb[246].mxu0 }
 0x59b   :  { %v10691_v22 = vpop.f32.mrb[247].mxu0 }
 0x59c   :  { %4413 = vmatmul.mubr.bf16.gmra.mrb[36].mxu1 %v14055_v8 }
 0x59d   :  { %4420 = vmatprep.mubr.bf16.mxu1 %v10118_v47  ;;  %v14057_v47 = vld [vmem:[#allocation146_spill] sm:$0xff] }
 0x5a0   :  { %v10695_v37 = vpop.f32.mrb[248].mxu0 }
 0x5a1   :  { %v10697_v62 = vpop.f32.mrb[249].mxu0 }
 0x5a2   :  { %v10699_v30 = vpop.f32.mrb[250].mxu0 }
 0x5a3   :  { %v10701_v28 = vpop.f32.mrb[251].mxu0 }
 0x5a4   :  { %4421 = vmatmul.mubr.bf16.gmra.mrb[40].mxu1 %v14056_v10 }
 0x5a5   :  { %4428 = vmatprep.mubr.bf16.mxu1 %v10130_v49  ;;  %v14060_v49 = vld [vmem:[#allocation201_spill] sm:$0xff] }
 0x5a8   :  { %v10705_v17 = vpop.f32.mrb[252].mxu0 }
 0x5a9   :  { %v10707_v29 = vpop.f32.mrb[253].mxu0 }
 0x5aa   :  { %v10709_v14 = vpop.f32.mrb[254].mxu0 }
 0x5ab   :  { %v10711_v8 = vpop.f32.mrb[255].mxu0 }
 0x5ac   :  { %4429 = vmatmul.mubr.bf16.gmra.mrb[44].mxu1 %v14057_v47 }
 0x5ad   :  { %4436 = vmatprep.mubr.bf16.mxu1 %v10148_v40  ;;  %v14065_v40 = vld [vmem:[#allocation147_spill] sm:$0xff] }
 0x5b0   :  { %v10715_v1 = vpop.f32.mrb[0].mxu0 }
 0x5b1   :  { %14058 = vst [vmem:[#allocation73_spill] sm:$0xff] %v10715_v1  ;;  %v10717_v23 = vpop.f32.mrb[1].mxu0 }
 0x5b2   :  { %v10719_v36 = vpop.f32.mrb[2].mxu0 }
 0x5b3   :  { %14059 = vst [vmem:[#allocation94_spill] sm:$0xff] %v10719_v36  ;;  %v10721_v10 = vpop.f32.mrb[3].mxu0 }
 0x5b4   :  { %4437 = vmatmul.mubr.bf16.gmra.mrb[48].mxu1 %v14060_v49 }
 0x5b5   :  { %4444 = vmatprep.mubr.bf16.mxu1 %v10171_v50  ;;  %v14070_v50 = vld [vmem:[#allocation148_spill] sm:$0xff] }
 0x5b8   :  { %v10725_v39 = vpop.f32.mrb[4].mxu0 }
 0x5b9   :  { %14061 = vst [vmem:[#allocation97_spill] sm:$0xff] %v10725_v39  ;;  %v10727_v59 = vpop.f32.mrb[5].mxu0 }
 0x5ba   :  { %14062 = vst [vmem:[#allocation75_spill] sm:$0xff] %v10727_v59  ;;  %v10729_v12 = vpop.f32.mrb[6].mxu0 }
 0x5bb   :  { %14063 = vst [vmem:[#allocation99_spill] sm:$0xff] %v10729_v12  ;;  %v10731_v47 = vpop.f32.mrb[7].mxu0 }
 0x5bc   :  { %14064 = vst [vmem:[#allocation96_spill] sm:$0xff] %v10731_v47  ;;  %4445 = vmatmul.mubr.bf16.gmra.mrb[52].mxu1 %v14065_v40 }
 0x5bd   :  { %4452 = vmatprep.mubr.bf16.mxu1 %v10179_v54 }
 0x5c0   :  { %v10735_v6 = vpop.f32.mrb[8].mxu0 }
 0x5c1   :  { %14066 = vst [vmem:[#allocation72_spill] sm:$0xff] %v10735_v6  ;;  %v10737_v36 = vpop.f32.mrb[9].mxu0 }
 0x5c2   :  { %14067 = vst [vmem:[#allocation74_spill] sm:$0xff] %v10737_v36  ;;  %v10739_v24 = vpop.f32.mrb[10].mxu0 }
 0x5c3   :  { %14068 = vst [vmem:[#allocation100_spill] sm:$0xff] %v10739_v24  ;;  %v10741_v49 = vpop.f32.mrb[11].mxu0 }
 0x5c4   :  { %14069 = vst [vmem:[#allocation121_spill] sm:$0xff] %v10741_v49  ;;  %4453 = vmatmul.mubr.bf16.gmra.mrb[56].mxu1 %v14070_v50 }
 0x5c5   :  { %4460 = vmatprep.mubr.bf16.mxu1 %v10199_v2  ;;  %v14076_v2 = vld [vmem:[#allocation149_spill] sm:$0xff] }
 0x5c7   :  { %v4246_v12 = vpop.f32.mrb[80].mxu1 }
 0x5c8   :  { %v10745_v39 = vpop.f32.mrb[12].mxu0  ;;  %v6067_v40 = vadd.f32 %v4246_v12, %v10591_v55  ;;  %v4248_v54 = vpop.f32.mrb[81].mxu1 }
 0x5c9   :  { %14071 = vst [vmem:[#allocation102_spill] sm:$0xff] %v10745_v39  ;;  %v10747_v47 = vpop.f32.mrb[13].mxu0  ;;  %v4249_v6 = vpop.f32.mrb[82].mxu1 }
 0x5ca   :  { %v10750_v59 = vpop.f32.mrb[14].mxu0  ;;  %v10754_v24 = vadd.f32 %v6067_v40, %v4535_v38  ;;  %v6068_v49 = vadd.f32 %v4249_v6, %v10593_v3  ;;  %v4251_v50 = vpop.f32.mrb[83].mxu1 }
 0x5cb   :  { %14072 = vst [vmem:[#allocation164_spill] sm:$0xff] %v10750_v59  ;;  %v10752_v36 = vpop.f32.mrb[15].mxu0 }
 0x5cc   :  { %14073 = vst [vmem:[#allocation98_spill] sm:$0xff] %v10752_v36  ;;  %14074 = vst [vmem:[#allocation101_spill] sm:$0xff] %v10754_v24  ;;  %v10757_v1 = vadd.f32 %v6068_v49, %v4538_v43  ;;  %4461 = vmatmul.mubr.bf16.gmra.mrb[60].mxu1 %v14076_v2  ;;  %v14079_v49 = vld [vmem:[#allocation122_spill] sm:$0xff] }
 0x5cd   :  { %4468 = vmatprep.mubr.bf16.mxu1 %v10208_v9 }
 0x5ce   :  { %14075 = vst [vmem:[#allocation77_spill] sm:$0xff] %v10757_v1  ;;  %v14083_v1 = vld [vmem:[#allocation17_spill] sm:$0xff] }
 0x5cf   :  { %v4254_v12 = vpop.f32.mrb[84].mxu1 }
 0x5d0   :  { %v10761_v39 = vpop.f32.mrb[16].mxu0  ;;  %v6069_v54 = vadd.f32 %v4254_v12, %v10597_v53  ;;  %v4256_v59 = vpop.f32.mrb[85].mxu1 }
 0x5d1   :  { %v10763_v55 = vpop.f32.mrb[17].mxu0  ;;  %v4257_v38 = vpop.f32.mrb[86].mxu1 }
 0x5d2   :  { %v10766_v36 = vpop.f32.mrb[18].mxu0  ;;  %v10771_v6 = vadd.f32 %v6069_v54, %v10669_v33  ;;  %v6070_v3 = vadd.f32 %v4257_v38, %v10599_v15  ;;  %v4259_v43 = vpop.f32.mrb[87].mxu1 }
 0x5d3   :  { %v10768_v40 = vpop.f32.mrb[19].mxu0 }
 0x5d4   :  { %14077 = vst [vmem:[#allocation79_spill] sm:$0xff] %v10771_v6  ;;  %v10775_v9 = vadd.f32 %v6070_v3, %v10671_v7  ;;  %4469 = vmatmul.mubr.bf16.gmra.mrb[64].mxu1 %v14079_v49 }
 0x5d5   :  { %4476 = vmatprep.mubr.bf16.mxu1 %v10237_v4  ;;  %v14081_v4 = vmax.f32 %v10566_v5, 0.0 }
 0x5d6   :  { %14078 = vst [vmem:[#allocation44_spill] sm:$0xff] %v10775_v9 }
 0x5d7   :  { %v4262_v59 = vpop.f32.mrb[88].mxu1  ;;  %v2641_v43 = vrot.slane %v14081_v4, 1 }
 0x5d8   :  { %v10779_v53 = vpop.f32.mrb[20].mxu0  ;;  %v6071_v2 = vadd.f32 %v4262_v59, %v10603_v21  ;;  %v4264_v12 = vpop.f32.mrb[89].mxu1  ;;  %v2638_v21 = vrot.slane %v10572_v0, 1  ;;  %v2639_v59 = vrot.slane %v10574_v35, 1 }
 0x5d9   :  { %v10781_v50 = vpop.f32.mrb[21].mxu0  ;;  %v4265_v54 = vpop.f32.mrb[90].mxu1 }
 0x5da   :  { %v10784_v33 = vpop.f32.mrb[22].mxu0  ;;  %v10789_v7 = vadd.f32 %v6071_v2, %v10677_v52  ;;  %v6072_v38 = vadd.f32 %v4265_v54, %v10605_v11  ;;  %v4267_v3 = vpop.f32.mrb[91].mxu1 }
 0x5db   :  { %v10786_v15 = vpop.f32.mrb[23].mxu0 }
 0x5dc   :  { %14080 = vst [vmem:[#allocation46_spill] sm:$0xff] %v10789_v7  ;;  %v10795_v49 = vadd.f32 %v6072_v38, %v10681_v60  ;;  %4477 = vmatmul.mubr.bf16.gmra.mrb[68].mxu1 %v14083_v1  ;;  %v2640_v60 = vsel %vm2143_vm1, %v2638_v21, %v2639_v59  ;;  %v2642_v1 = vsel %vm2143_vm1, %v2639_v59, %v2641_v43 }
 0x5dd   :  { %4484 = vmatprep.mubr.bf16.mxu1 %v10250_v41  ;;  %v2767_v7 = vpack.c.bf16 %v2642_v1, %v2640_v60 }
 0x5de   :  { %14082 = vst [vmem:[#allocation191_spill] sm:$0xff] %v10795_v49 }
 0x5df   :  { %v4270_v52 = vpop.f32.mrb[92].mxu1 }
 0x5e0   :  { %v10801_v12 = vpop.f32.mrb[24].mxu0  ;;  %v6073_v11 = vadd.f32 %v4270_v52, %v10609_v20  ;;  %v4272_v5 = vpop.f32.mrb[93].mxu1  ;;  %v14086_v20 = vld [vmem:[#allocation23_spill] sm:$0xff] }
 0x5e1   :  { %v10803_v2 = vpop.f32.mrb[25].mxu0  ;;  %v4273_v38 = vpop.f32.mrb[94].mxu1 }
 0x5e2   :  { %v10806_v54 = vpop.f32.mrb[26].mxu0  ;;  %v10813_v4 = vadd.f32 %v6073_v11, %v10675_v45  ;;  %v6074_v41 = vadd.f32 %v4273_v38, %v10611_v25  ;;  %v4275_v49 = vpop.f32.mrb[95].mxu1 }
 0x5e3   :  { %v10810_v3 = vpop.f32.mrb[27].mxu0 }
 0x5e4   :  { %14084 = vst [vmem:[#allocation76_spill] sm:$0xff] %v10813_v4  ;;  %v10817_v9 = vadd.f32 %v6074_v41, %v10679_v16  ;;  %4485 = vmatmul.mubr.bf16.gmra.mrb[72].mxu1 %v14086_v20 }
 0x5e5   :  { %4492 = vmatprep.mubr.bf16.mxu1 %v2767_v7  ;;  %v2766_v7 = vpack.c.bf16 %v10574_v35, %v10572_v0 }
 0x5e6   :  { %14085 = vst [vmem:[#allocation105_spill] sm:$0xff] %v10817_v9 }
 0x5e7   :  { %v4278_v21 = vpop.f32.mrb[96].mxu1 }
 0x5e8   :  { %v10820_v52 = vpop.f32.mrb[28].mxu0  ;;  %v6075_v59 = vadd.f32 %v4278_v21, %v10615_v44  ;;  %v4280_v5 = vpop.f32.mrb[97].mxu1 }
 0x5e9   :  { %v10822_v43 = vpop.f32.mrb[29].mxu0  ;;  %v4281_v11 = vpop.f32.mrb[98].mxu1 }
 0x5ea   :  { %v10825_v45 = vpop.f32.mrb[30].mxu0  ;;  %v10830_v49 = vadd.f32 %v6075_v59, %v10687_v26  ;;  %v6076_v16 = vadd.f32 %v4281_v11, %v10617_v27  ;;  %v4283_v60 = vpop.f32.mrb[99].mxu1 }
 0x5eb   :  { %v10827_v25 = vpop.f32.mrb[31].mxu0 }
 0x5ec   :  { %14087 = vst [vmem:[#allocation49_spill] sm:$0xff] %v10830_v49  ;;  %v10836_v1 = vadd.f32 %v6076_v16, %v10691_v22  ;;  %4493 = vmatmul.mubr.bf16.gmra.mrb[76].mxu1 %v2766_v7 }
 0x5ee   :  { %14088 = vst [vmem:[#allocation165_spill] sm:$0xff] %v10836_v1 }
 0x5ef   :  { %v4286_v38 = vpop.f32.mrb[100].mxu1 }
 0x5f0   :  { %v10838_v44 = vpop.f32.mrb[32].mxu0  ;;  %v6077_v20 = vadd.f32 %v4286_v38, %v10621_v42  ;;  %v4288_v21 = vpop.f32.mrb[101].mxu1 }
 0x5f1   :  { %v10840_v41 = vpop.f32.mrb[33].mxu0  ;;  %v4289_v59 = vpop.f32.mrb[102].mxu1 }
 0x5f2   :  { %v10843_v26 = vpop.f32.mrb[34].mxu0  ;;  %v10848_v5 = vadd.f32 %v6077_v20, %v10685_v13  ;;  %v6078_v0 = vadd.f32 %v4289_v59, %v10623_v46  ;;  %v4291_v35 = vpop.f32.mrb[103].mxu1 }
 0x5f3   :  { %v10845_v27 = vpop.f32.mrb[35].mxu0 }
 0x5f4   :  { %14089 = vst [vmem:[#allocation107_spill] sm:$0xff] %v10848_v5  ;;  %v10852_v22 = vadd.f32 %v6078_v0, %v10689_v63 }
 0x5f6   :  { %14090 = vst [vmem:[#allocation51_spill] sm:$0xff] %v10852_v22 }
 0x5f7   :  { %v4294_v16 = vpop.f32.mrb[104].mxu1 }
 0x5f8   :  { %v10854_v11 = vpop.f32.mrb[36].mxu0  ;;  %v6079_v42 = vadd.f32 %v4294_v16, %v10627_v48  ;;  %v4296_v7 = vpop.f32.mrb[105].mxu1 }
 0x5f9   :  { %14091 = vst [vmem:[#allocation144_spill] sm:$0xff] %v10854_v11  ;;  %v10856_v60 = vpop.f32.mrb[37].mxu0  ;;  %v4297_v21 = vpop.f32.mrb[106].mxu1 }
 0x5fa   :  { %v10859_v38 = vpop.f32.mrb[38].mxu0  ;;  %v10864_v13 = vadd.f32 %v6079_v42, %v10697_v62  ;;  %v6080_v46 = vadd.f32 %v4297_v21, %v10629_v18  ;;  %v4299_v63 = vpop.f32.mrb[107].mxu1 }
 0x5fb   :  { %14092 = vst [vmem:[#allocation81_spill] sm:$0xff] %v10859_v38  ;;  %v10861_v1 = vpop.f32.mrb[39].mxu0 }
 0x5fc   :  { %14093 = vst [vmem:[#allocation83_spill] sm:$0xff] %v10864_v13  ;;  %v10868_v20 = vadd.f32 %v6080_v46, %v10701_v28 }
 0x5fe   :  { %14094 = vst [vmem:[#allocation48_spill] sm:$0xff] %v10868_v20 }
 0x5ff   :  { %v4302_v0 = vpop.f32.mrb[108].mxu1 }
 0x600   :  { %v10870_v59 = vpop.f32.mrb[40].mxu0  ;;  %v6081_v48 = vadd.f32 %v4302_v0, %v10637_v19  ;;  %v4304_v16 = vpop.f32.mrb[109].mxu1 }
 0x601   :  { %14095 = vst [vmem:[#allocation50_spill] sm:$0xff] %v10870_v59  ;;  %v10872_v35 = vpop.f32.mrb[41].mxu0  ;;  %v4305_v38 = vpop.f32.mrb[110].mxu1  ;;  %v14121_v59 = vld [vmem:[#allocation99_spill] sm:$0xff] }
 0x602   :  { %v10875_v7 = vpop.f32.mrb[42].mxu0  ;;  %v10880_v62 = vadd.f32 %v6081_v48, %v10695_v37  ;;  %v6082_v18 = vadd.f32 %v4305_v38, %v10639_v31  ;;  %v4307_v28 = vpop.f32.mrb[111].mxu1 }
 0x603   :  { %14096 = vst [vmem:[#allocation192_spill] sm:$0xff] %v10875_v7  ;;  %v10877_v11 = vpop.f32.mrb[43].mxu0 }
 0x604   :  { %14097 = vst [vmem:[#allocation82_spill] sm:$0xff] %v10877_v11  ;;  %14098 = vst [vmem:[#allocation104_spill] sm:$0xff] %v10880_v62  ;;  %v10884_v42 = vadd.f32 %v6082_v18, %v10699_v30 }
 0x606   :  { %14099 = vst [vmem:[#allocation53_spill] sm:$0xff] %v10884_v42 }
 0x607   :  { %v4310_v21 = vpop.f32.mrb[112].mxu1 }
 0x608   :  { %v6083_v46 = vadd.f32 %v4310_v21, %v10644_v51  ;;  %v4312_v63 = vpop.f32.mrb[113].mxu1 }
 0x609   :  { %v4313_v19 = vpop.f32.mrb[114].mxu1 }
 0x60a   :  { %v10888_v0 = vadd.f32 %v6083_v46, %v10707_v29  ;;  %v6084_v16 = vadd.f32 %v4313_v19, %v10646_v58  ;;  %v4315_v7 = vpop.f32.mrb[115].mxu1 }
 0x60c   :  { %14100 = vst [vmem:[#allocation106_spill] sm:$0xff] %v10888_v0  ;;  %v10892_v37 = vadd.f32 %v6084_v16, %v10711_v8 }
 0x60e   :  { %14101 = vst [vmem:[#allocation55_spill] sm:$0xff] %v10892_v37 }
 0x60f   :  { %v4318_v48 = vpop.f32.mrb[116].mxu1 }
 0x610   :  { %v6085_v31 = vadd.f32 %v4318_v48, %v10651_v57  ;;  %v4320_v38 = vpop.f32.mrb[117].mxu1  ;;  %v14106_v48 = vld [vmem:[#allocation73_spill] sm:$0xff] }
 0x611   :  { %v4321_v30 = vpop.f32.mrb[118].mxu1 }
 0x612   :  { %v10896_v18 = vadd.f32 %v6085_v31, %v10705_v17  ;;  %v6086_v51 = vadd.f32 %v4321_v30, %v10653_v56  ;;  %v4323_v28 = vpop.f32.mrb[119].mxu1 }
 0x614   :  { %14102 = vst [vmem:[#allocation145_spill] sm:$0xff] %v10896_v18  ;;  %v10900_v29 = vadd.f32 %v6086_v51, %v10709_v14  ;;  %v14109_v51 = vld [vmem:[#allocation94_spill] sm:$0xff] }
 0x616   :  { %14103 = vst [vmem:[#allocation52_spill] sm:$0xff] %v10900_v29 }
 0x617   :  { %v4326_v21 = vpop.f32.mrb[120].mxu1 }
 0x618   :  { %v6087_v58 = vadd.f32 %v4326_v21, %v10657_v34  ;;  %v4328_v7 = vpop.f32.mrb[121].mxu1  ;;  %v14108_v34 = vld [vmem:[#allocation118_spill] sm:$0xff] }
 0x619   :  { %v4329_v8 = vpop.f32.mrb[122].mxu1  ;;  %v14112_v7 = vld [vmem:[#allocation75_spill] sm:$0xff] }
 0x61a   :  { %v10904_v46 = vadd.f32 %v6087_v58, %v10717_v23  ;;  %v6088_v57 = vadd.f32 %v4329_v8, %v10659_v61  ;;  %v4331_v63 = vpop.f32.mrb[123].mxu1  ;;  %v14111_v61 = vld [vmem:[#allocation24_spill] sm:$0xff] }
 0x61c   :  { %14104 = vst [vmem:[#allocation54_spill] sm:$0xff] %v10904_v46  ;;  %v10908_v17 = vadd.f32 %v6088_v57, %v10721_v10 }
 0x61e   :  { %14105 = vst [vmem:[#allocation193_spill] sm:$0xff] %v10908_v17 }
 0x61f   :  { %v4334_v19 = vpop.f32.mrb[124].mxu1 }
 0x620   :  { %v6089_v56 = vadd.f32 %v4334_v19, %v10663_v32  ;;  %v4336_v16 = vpop.f32.mrb[125].mxu1  ;;  %v14114_v32 = vld [vmem:[#allocation26_spill] sm:$0xff]  ;;  %v14115_v19 = vld [vmem:[#allocation96_spill] sm:$0xff] }
 0x621   :  { %v4337_v14 = vpop.f32.mrb[126].mxu1 }
 0x622   :  { %v10912_v31 = vadd.f32 %v6089_v56, %v14106_v48  ;;  %v6090_v38 = vadd.f32 %v4337_v14, %v14108_v34  ;;  %v4339_v30 = vpop.f32.mrb[127].mxu1  ;;  %v14117_v14 = vld [vmem:[#allocation29_spill] sm:$0xff] }
 0x623   :  { %v14118_v30 = vld [vmem:[#allocation97_spill] sm:$0xff] }
 0x624   :  { %14107 = vst [vmem:[#allocation109_spill] sm:$0xff] %v10912_v31  ;;  %v10916_v23 = vadd.f32 %v6090_v38, %v14109_v51 }
 0x626   :  { %14110 = vst [vmem:[#allocation57_spill] sm:$0xff] %v10916_v23 }
 0x627   :  { %v4342_v28 = vpop.f32.mrb[0].mxu1 }
 0x628   :  { %v6091_v21 = vadd.f32 %v4342_v28, %v14111_v61  ;;  %v4344_v58 = vpop.f32.mrb[1].mxu1  ;;  %v14120_v28 = vld [vmem:[#allocation31_spill] sm:$0xff] }
 0x629   :  { %v4345_v10 = vpop.f32.mrb[2].mxu1 }
 0x62a   :  { %v10920_v8 = vadd.f32 %v6091_v21, %v14112_v7  ;;  %v6092_v57 = vadd.f32 %v4345_v10, %v14114_v32  ;;  %v4347_v63 = vpop.f32.mrb[3].mxu1  ;;  %v14123_v10 = vld [vmem:[#allocation28_spill] sm:$0xff] }
 0x62c   :  { %14113 = vst [vmem:[#allocation59_spill] sm:$0xff] %v10920_v8  ;;  %v10924_v56 = vadd.f32 %v6092_v57, %v14115_v19  ;;  %v14124_v19 = vld [vmem:[#allocation74_spill] sm:$0xff] }
 0x62e   :  { %14116 = vst [vmem:[#allocation194_spill] sm:$0xff] %v10924_v56  ;;  %v14127_v56 = vld [vmem:[#allocation121_spill] sm:$0xff] }
 0x62f   :  { %v4350_v16 = vpop.f32.mrb[4].mxu1 }
 0x630   :  { %v6093_v48 = vadd.f32 %v4350_v16, %v14117_v14  ;;  %v4352_v34 = vpop.f32.mrb[5].mxu1  ;;  %v14126_v16 = vld [vmem:[#allocation30_spill] sm:$0xff] }
 0x631   :  { %v4353_v38 = vpop.f32.mrb[6].mxu1 }
 0x632   :  { %v10928_v51 = vadd.f32 %v6093_v48, %v14118_v30  ;;  %v6094_v61 = vadd.f32 %v4353_v38, %v14120_v28  ;;  %v4355_v58 = vpop.f32.mrb[7].mxu1  ;;  %v14129_v38 = vld [vmem:[#allocation124_spill] sm:$0xff] }
 0x634   :  { %14119 = vst [vmem:[#allocation111_spill] sm:$0xff] %v10928_v51  ;;  %v10932_v21 = vadd.f32 %v6094_v61, %v14121_v59  ;;  %v14130_v61 = vld [vmem:[#allocation72_spill] sm:$0xff] }
 0x635   :  { %v14133_v51 = vld [vmem:[#allocation100_spill] sm:$0xff] }
 0x636   :  { %14122 = vst [vmem:[#allocation56_spill] sm:$0xff] %v10932_v21 }
 0x637   :  { %v4358_v7 = vpop.f32.mrb[8].mxu1 }
 0x638   :  { %v6095_v32 = vadd.f32 %v4358_v7, %v14123_v10  ;;  %v4360_v63 = vpop.f32.mrb[9].mxu1  ;;  %v14132_v7 = vld [vmem:[#allocation33_spill] sm:$0xff] }
 0x639   :  { %v4361_v57 = vpop.f32.mrb[10].mxu1 }
 0x63a   :  { %v10936_v11 = vadd.f32 %v6095_v32, %v14124_v19  ;;  %v6096_v14 = vadd.f32 %v4361_v57, %v14126_v16  ;;  %v4363_v34 = vpop.f32.mrb[11].mxu1  ;;  %v14135_v57 = vld [vmem:[#allocation35_spill] sm:$0xff] }
 0x63c   :  { %14125 = vst [vmem:[#allocation108_spill] sm:$0xff] %v10936_v11  ;;  %v10940_v48 = vadd.f32 %v6096_v14, %v14127_v56 }
 0x63e   :  { %14128 = vst [vmem:[#allocation58_spill] sm:$0xff] %v10940_v48  ;;  %v14138_v48 = vld [vmem:[#allocation98_spill] sm:$0xff] }
 0x63f   :  { %v4366_v30 = vpop.f32.mrb[12].mxu1 }
 0x640   :  { %v6097_v28 = vadd.f32 %v4366_v30, %v14129_v38  ;;  %v4368_v58 = vpop.f32.mrb[13].mxu1  ;;  %v14137_v30 = vld [vmem:[#allocation32_spill] sm:$0xff] }
 0x641   :  { %v4369_v59 = vpop.f32.mrb[14].mxu1 }
 0x642   :  { %v10944_v21 = vadd.f32 %v6097_v28, %v14130_v61  ;;  %v6098_v10 = vadd.f32 %v4369_v59, %v14132_v7  ;;  %v4371_v63 = vpop.f32.mrb[15].mxu1  ;;  %v14140_v59 = vld [vmem:[#allocation34_spill] sm:$0xff] }
 0x644   :  { %14131 = vst [vmem:[#allocation195_spill] sm:$0xff] %v10944_v21  ;;  %v10948_v32 = vadd.f32 %v6098_v10, %v14133_v51  ;;  %v14141_v10 = vld [vmem:[#allocation102_spill] sm:$0xff]  ;;  %v14144_v21 = vld [vmem:[#allocation164_spill] sm:$0xff] }
 0x646   :  { %14134 = vst [vmem:[#allocation61_spill] sm:$0xff] %v10948_v32 }
 0x647   :  { %v4374_v19 = vpop.f32.mrb[16].mxu1 }
 0x648   :  { %v6099_v16 = vadd.f32 %v4374_v19, %v14135_v57  ;;  %v4376_v34 = vpop.f32.mrb[17].mxu1  ;;  %v14143_v19 = vld [vmem:[#allocation37_spill] sm:$0xff] }
 0x649   :  { %v4377_v56 = vpop.f32.mrb[18].mxu1 }
 0x64a   :  { %v10952_v14 = vadd.f32 %v6099_v16, %v10747_v47  ;;  %v6100_v38 = vadd.f32 %v4377_v56, %v14137_v30  ;;  %v4379_v58 = vpop.f32.mrb[19].mxu1  ;;  %v14146_v56 = vld [vmem:[#allocation39_spill] sm:$0xff] }
 0x64c   :  { %14136 = vst [vmem:[#allocation63_spill] sm:$0xff] %v10952_v14  ;;  %v10956_v28 = vadd.f32 %v6100_v38, %v14138_v48 }
 0x64e   :  { %14139 = vst [vmem:[#allocation196_spill] sm:$0xff] %v10956_v28 }
 0x64f   :  { %v4382_v61 = vpop.f32.mrb[20].mxu1 }
 0x650   :  { %v6101_v7 = vadd.f32 %v4382_v61, %v14140_v59  ;;  %v4384_v63 = vpop.f32.mrb[21].mxu1  ;;  %v14148_v61 = vld [vmem:[#allocation36_spill] sm:$0xff] }
 0x651   :  { %v4385_v51 = vpop.f32.mrb[22].mxu1 }
 0x652   :  { %v10960_v32 = vadd.f32 %v6101_v7, %v14141_v10  ;;  %v6102_v57 = vadd.f32 %v4385_v51, %v14143_v19  ;;  %v4387_v34 = vpop.f32.mrb[23].mxu1  ;;  %v14150_v51 = vld [vmem:[#allocation38_spill] sm:$0xff] }
 0x654   :  { %14142 = vst [vmem:[#allocation110_spill] sm:$0xff] %v10960_v32  ;;  %v10964_v47 = vadd.f32 %v6102_v57, %v14144_v21 }
 0x656   :  { %14145 = vst [vmem:[#allocation60_spill] sm:$0xff] %v10964_v47 }
 0x657   :  { %v4390_v16 = vpop.f32.mrb[24].mxu1 }
 0x658   :  { %v6103_v30 = vadd.f32 %v4390_v16, %v14146_v56  ;;  %v4392_v58 = vpop.f32.mrb[25].mxu1  ;;  %v14152_v16 = vld [vmem:[#allocation41_spill] sm:$0xff] }
 0x659   :  { %v4393_v48 = vpop.f32.mrb[26].mxu1 }
 0x65a   :  { %v10968_v38 = vadd.f32 %v6103_v30, %v10763_v55  ;;  %v6104_v59 = vadd.f32 %v4393_v48, %v14148_v61  ;;  %v4395_v63 = vpop.f32.mrb[27].mxu1  ;;  %v14154_v48 = vld [vmem:[#allocation43_spill] sm:$0xff] }
 0x65c   :  { %14147 = vst [vmem:[#allocation62_spill] sm:$0xff] %v10968_v38  ;;  %v10972_v7 = vadd.f32 %v6104_v59, %v10768_v40 }
 0x65e   :  { %14149 = vst [vmem:[#allocation197_spill] sm:$0xff] %v10972_v7 }
 0x65f   :  { %v4398_v10 = vpop.f32.mrb[28].mxu1 }
 0x660   :  { %v6105_v19 = vadd.f32 %v4398_v10, %v14150_v51  ;;  %v4400_v34 = vpop.f32.mrb[29].mxu1  ;;  %v14156_v10 = vld [vmem:[#allocation40_spill] sm:$0xff] }
 0x661   :  { %v4401_v21 = vpop.f32.mrb[30].mxu1 }
 0x662   :  { %v10976_v57 = vadd.f32 %v6105_v19, %v10761_v39  ;;  %v6106_v56 = vadd.f32 %v4401_v21, %v14152_v16  ;;  %v4403_v58 = vpop.f32.mrb[31].mxu1  ;;  %v14158_v21 = vld [vmem:[#allocation156_spill] sm:$0xff] }
 0x664   :  { %14151 = vst [vmem:[#allocation65_spill] sm:$0xff] %v10976_v57  ;;  %v10980_v55 = vadd.f32 %v6106_v56, %v10766_v36 }
 0x666   :  { %14153 = vst [vmem:[#allocation113_spill] sm:$0xff] %v10980_v55 }
 0x667   :  { %v4406_v30 = vpop.f32.mrb[32].mxu1 }
 0x668   :  { %v6107_v61 = vadd.f32 %v4406_v30, %v14154_v48  ;;  %v4408_v63 = vpop.f32.mrb[33].mxu1  ;;  %v14160_v30 = vld [vmem:[#allocation157_spill] sm:$0xff] }
 0x669   :  { %v4409_v40 = vpop.f32.mrb[34].mxu1 }
 0x66a   :  { %v10984_v59 = vadd.f32 %v6107_v61, %v10781_v50  ;;  %v6108_v51 = vadd.f32 %v4409_v40, %v14156_v10  ;;  %v4411_v34 = vpop.f32.mrb[35].mxu1  ;;  %v14162_v40 = vld [vmem:[#allocation158_spill] sm:$0xff] }
 0x66c   :  { %14155 = vst [vmem:[#allocation67_spill] sm:$0xff] %v10984_v59  ;;  %v10988_v39 = vadd.f32 %v6108_v51, %v10786_v15 }
 0x66e   :  { %14157 = vst [vmem:[#allocation115_spill] sm:$0xff] %v10988_v39 }
 0x66f   :  { %v4414_v19 = vpop.f32.mrb[36].mxu1 }
 0x670   :  { %v6109_v16 = vadd.f32 %v4414_v19, %v14158_v21  ;;  %v4416_v58 = vpop.f32.mrb[37].mxu1  ;;  %v14164_v19 = vld [vmem:[#allocation159_spill] sm:$0xff] }
 0x671   :  { %v4417_v36 = vpop.f32.mrb[38].mxu1 }
 0x672   :  { %v10992_v56 = vadd.f32 %v6109_v16, %v10779_v53  ;;  %v6110_v48 = vadd.f32 %v4417_v36, %v14160_v30  ;;  %v4419_v63 = vpop.f32.mrb[39].mxu1  ;;  %v14166_v36 = vld [vmem:[#allocation78_spill] sm:$0xff] }
 0x674   :  { %14159 = vst [vmem:[#allocation198_spill] sm:$0xff] %v10992_v56  ;;  %v10996_v50 = vadd.f32 %v6110_v48, %v10784_v33 }
 0x676   :  { %14161 = vst [vmem:[#allocation112_spill] sm:$0xff] %v10996_v50 }
 0x677   :  { %v4422_v61 = vpop.f32.mrb[40].mxu1 }
 0x678   :  { %v6111_v10 = vadd.f32 %v4422_v61, %v14162_v40  ;;  %v4424_v34 = vpop.f32.mrb[41].mxu1  ;;  %v14168_v61 = vld [vmem:[#allocation80_spill] sm:$0xff] }
 0x679   :  { %v4425_v15 = vpop.f32.mrb[42].mxu1 }
 0x67a   :  { %v11000_v51 = vadd.f32 %v6111_v10, %v10803_v2  ;;  %v6112_v21 = vadd.f32 %v4425_v15, %v14164_v19  ;;  %v4427_v58 = vpop.f32.mrb[43].mxu1  ;;  %v14170_v15 = vld [vmem:[#allocation85_spill] sm:$0xff] }
 0x67c   :  { %14163 = vst [vmem:[#allocation114_spill] sm:$0xff] %v11000_v51  ;;  %v11004_v53 = vadd.f32 %v6112_v21, %v10810_v3 }
 0x67e   :  { %14165 = vst [vmem:[#allocation47_spill] sm:$0xff] %v11004_v53 }
 0x67f   :  { %v4430_v16 = vpop.f32.mrb[44].mxu1 }
 0x680   :  { %v6113_v30 = vadd.f32 %v4430_v16, %v14166_v36  ;;  %v4432_v63 = vpop.f32.mrb[45].mxu1  ;;  %v14172_v16 = vld [vmem:[#allocation87_spill] sm:$0xff] }
 0x681   :  { %v4433_v33 = vpop.f32.mrb[46].mxu1 }
 0x682   :  { %v11008_v48 = vadd.f32 %v6113_v30, %v10801_v12  ;;  %v6114_v40 = vadd.f32 %v4433_v33, %v14168_v61  ;;  %v4435_v34 = vpop.f32.mrb[47].mxu1  ;;  %v14174_v33 = vld [vmem:[#allocation84_spill] sm:$0xff] }
 0x684   :  { %14167 = vst [vmem:[#allocation45_spill] sm:$0xff] %v11008_v48  ;;  %v11012_v2 = vadd.f32 %v6114_v40, %v10806_v54 }
 0x686   :  { %14169 = vst [vmem:[#allocation119_spill] sm:$0xff] %v11012_v2 }
 0x687   :  { %v4438_v10 = vpop.f32.mrb[48].mxu1 }
 0x688   :  { %v6115_v19 = vadd.f32 %v4438_v10, %v14170_v15  ;;  %v4440_v58 = vpop.f32.mrb[49].mxu1  ;;  %v14176_v10 = vld [vmem:[#allocation86_spill] sm:$0xff] }
 0x689   :  { %v4441_v3 = vpop.f32.mrb[50].mxu1 }
 0x68a   :  { %v11016_v21 = vadd.f32 %v6115_v19, %v10822_v43  ;;  %v6116_v36 = vadd.f32 %v4441_v3, %v14172_v16  ;;  %v4443_v63 = vpop.f32.mrb[51].mxu1  ;;  %v14178_v3 = vld [vmem:[#allocation64_spill] sm:$0xff] }
 0x68c   :  { %14171 = vst [vmem:[#allocation42_spill] sm:$0xff] %v11016_v21  ;;  %v11020_v12 = vadd.f32 %v6116_v36, %v10827_v25 }
 0x68e   :  { %14173 = vst [vmem:[#allocation117_spill] sm:$0xff] %v11020_v12 }
 0x68f   :  { %v4446_v30 = vpop.f32.mrb[52].mxu1 }
 0x690   :  { %v6117_v61 = vadd.f32 %v4446_v30, %v14174_v33  ;;  %v4448_v34 = vpop.f32.mrb[53].mxu1  ;;  %v14180_v30 = vld [vmem:[#allocation66_spill] sm:$0xff] }
 0x691   :  { %v4449_v54 = vpop.f32.mrb[54].mxu1 }
 0x692   :  { %v11024_v40 = vadd.f32 %v6117_v61, %v10820_v52  ;;  %v6118_v15 = vadd.f32 %v4449_v54, %v14176_v10  ;;  %v4451_v58 = vpop.f32.mrb[55].mxu1  ;;  %v14182_v54 = vld [vmem:[#allocation199_spill] sm:$0xff] }
 0x694   :  { %14175 = vst [vmem:[#allocation200_spill] sm:$0xff] %v11024_v40  ;;  %v11028_v43 = vadd.f32 %v6118_v15, %v10825_v45 }
 0x696   :  { %14177 = vst [vmem:[#allocation150_spill] sm:$0xff] %v11028_v43 }
 0x697   :  { %v4454_v19 = vpop.f32.mrb[56].mxu1 }
 0x698   :  { %v6119_v16 = vadd.f32 %v4454_v19, %v14178_v3  ;;  %v4456_v63 = vpop.f32.mrb[57].mxu1  ;;  %v14184_v19 = vld [vmem:[#allocation89_spill] sm:$0xff] }
 0x699   :  { %v4457_v25 = vpop.f32.mrb[58].mxu1 }
 0x69a   :  { %v11032_v36 = vadd.f32 %v6119_v16, %v10840_v41  ;;  %v6120_v33 = vadd.f32 %v4457_v25, %v14180_v30  ;;  %v4459_v34 = vpop.f32.mrb[59].mxu1  ;;  %v4794_v41 = vadd.f32 %v10960_v32, %v10771_v6  ;;  %v14186_v25 = vld [vmem:[#allocation44_spill] sm:$0xff] }
 0x69b   :  { %v4795_v30 = vadd.f32 %v10964_v47, %v14186_v25  ;;  %v4799_v47 = vadd.f32 %v10980_v55, %v10817_v9 }
 0x69c   :  { %14179 = vst [vmem:[#allocation123_spill] sm:$0xff] %v11032_v36  ;;  %v11036_v52 = vadd.f32 %v6120_v33, %v10845_v27  ;;  %v4792_v27 = vadd.f32 %v10952_v14, %v10754_v24  ;;  %v14187_v33 = vld [vmem:[#allocation46_spill] sm:$0xff] }
 0x69d   :  { %v4796_v34 = vadd.f32 %v10968_v38, %v14187_v33  ;;  %v4827_v14 = vmul.f32 0.5, %v4795_v30  ;;  %v4831_v55 = vmul.f32 0.5, %v4799_v47 }
 0x69e   :  { %14181 = vst [vmem:[#allocation151_spill] sm:$0xff] %v11036_v52  ;;  %v4824_v32 = vmul.f32 0.5, %v4792_v27 }
 0x69f   :  { %v4462_v61 = vpop.f32.mrb[60].mxu1  ;;  %v4828_v33 = vmul.f32 0.5, %v4796_v34 }
 0x6a0   :  { %v6121_v10 = vadd.f32 %v4462_v61, %v14182_v54  ;;  %v4464_v58 = vpop.f32.mrb[61].mxu1  ;;  %v14189_v54 = vld [vmem:[#allocation191_spill] sm:$0xff] }
 0x6a1   :  { %v4465_v45 = vpop.f32.mrb[62].mxu1 }
 0x6a2   :  { %v11040_v15 = vadd.f32 %v6121_v10, %v10838_v44  ;;  %v6122_v3 = vadd.f32 %v4465_v45, %v14184_v19  ;;  %v4467_v63 = vpop.f32.mrb[63].mxu1  ;;  %v14188_v44 = vld [vmem:[#allocation77_spill] sm:$0xff]  ;;  %v4797_v10 = vadd.f32 %v10972_v7, %v14189_v54  ;;  %v4826_v45 = vmul.f32 0.5, %v4794_v41  ;;  %v14190_v19 = vld [vmem:[#allocation91_spill] sm:$0xff]  ;;  %v14192_v41 = vld [vmem:[#allocation88_spill] sm:$0xff] }
 0x6a3   :  { %v4793_v61 = vadd.f32 %v10956_v28, %v14188_v44  ;;  %v4800_v28 = vadd.f32 %v10984_v59, %v10830_v49 }
 0x6a4   :  { %14183 = vst [vmem:[#allocation70_spill] sm:$0xff] %v11040_v15  ;;  %v11046_v16 = vadd.f32 %v6122_v3, %v10843_v26  ;;  %v4798_v26 = vadd.f32 %v10976_v57, %v10813_v4  ;;  %v4829_v4 = vmul.f32 0.5, %v4797_v10  ;;  %v4856_v30 = vadd.f32 %v4826_v45, %v4824_v32 }
 0x6a5   :  { %v4825_v57 = vmul.f32 0.5, %v4793_v61  ;;  %v4805_v32 = vadd.f32 %v11004_v53, %v10868_v20  ;;  %v14198_v53 = vld [vmem:[#allocation93_spill] sm:$0xff] }
 0x6a6   :  { %14185 = vst [vmem:[#allocation68_spill] sm:$0xff] %v11046_v16 }
 0x6a7   :  { %v4470_v58 = vpop.f32.mrb[64].mxu1  ;;  %v4871_v59 = vadd.f32 %v4827_v14, %v4825_v57 }
 0x6a8   :  { %v6123_v3 = vadd.f32 %v4470_v58, %v14190_v19  ;;  %v4472_v63 = vpop.f32.mrb[65].mxu1  ;;  %v14193_v58 = vld [vmem:[#allocation165_spill] sm:$0xff]  ;;  %v4830_v19 = vmul.f32 0.5, %v4798_v26 }
 0x6a9   :  { %v4473_v38 = vpop.f32.mrb[66].mxu1  ;;  %v4801_v27 = vadd.f32 %v10988_v39, %v14193_v58  ;;  %v4802_v63 = vadd.f32 %v10992_v56, %v10848_v5  ;;  %v4872_v61 = vadd.f32 %v4871_v59, %v4829_v4  ;;  %v4807_v4 = vadd.f32 %v11012_v2, %v10884_v42 }
 0x6aa   :  { %v11066_v7 = vadd.f32 %v6123_v3, %v10856_v60  ;;  %v6124_v54 = vadd.f32 %v4473_v38, %v14192_v41  ;;  %v4475_v25 = vpop.f32.mrb[67].mxu1  ;;  %v4803_v60 = vadd.f32 %v10996_v50, %v10852_v22  ;;  %v4857_v38 = vadd.f32 %v4856_v30, %v4828_v33 }
 0x6ab   :  { %v4832_v25 = vmul.f32 0.5, %v4800_v28  ;;  %v4833_v10 = vmul.f32 0.5, %v4801_v27  ;;  %v4804_v3 = vadd.f32 %v11000_v51, %v10864_v13  ;;  %v4834_v41 = vmul.f32 0.5, %v4802_v63  ;;  %v14196_v27 = vld [vmem:[#allocation144_spill] sm:$0xff] }
 0x6ac   :  { %14191 = vst [vmem:[#allocation120_spill] sm:$0xff] %v11066_v7  ;;  %v11074_v34 = vadd.f32 %v6124_v54, %v10861_v1  ;;  %v4858_v26 = vadd.f32 %v4857_v38, %v4830_v19  ;;  %v14195_v1 = vld [vmem:[#allocation90_spill] sm:$0xff]  ;;  %v4873_v47 = vadd.f32 %v4872_v61, %v4831_v55  ;;  %v4835_v57 = vmul.f32 0.5, %v4803_v60 }
 0x6ad   :  { %v4806_v33 = vadd.f32 %v11008_v48, %v10880_v62  ;;  %v4836_v38 = vmul.f32 0.5, %v4804_v3  ;;  %v4808_v55 = vadd.f32 %v11016_v21, %v10888_v0  ;;  %v4809_v61 = vadd.f32 %v11020_v12, %v10892_v37 }
 0x6ae   :  { %14194 = vst [vmem:[#allocation19_spill] sm:$0xff] %v11074_v34  ;;  %v4859_v59 = vadd.f32 %v4858_v26, %v4832_v25  ;;  %v4874_v63 = vadd.f32 %v4873_v47, %v4833_v10  ;;  %v4811_v10 = vadd.f32 %v11028_v43, %v10900_v29  ;;  %v14214_v43 = vld [vmem:[#allocation195_spill] sm:$0xff] }
 0x6af   :  { %v4478_v45 = vpop.f32.mrb[68].mxu1  ;;  %v4838_v26 = vmul.f32 0.5, %v4806_v33  ;;  %v4840_v47 = vmul.f32 0.5, %v4808_v55  ;;  %v4815_v55 = vadd.f32 %v11046_v16, %v10916_v23 }
 0x6b0   :  { %v6125_v54 = vadd.f32 %v4478_v45, %v14195_v1  ;;  %v4480_v14 = vpop.f32.mrb[69].mxu1  ;;  %v4837_v45 = vmul.f32 0.5, %v4805_v32  ;;  %v4860_v60 = vadd.f32 %v4859_v59, %v4834_v41  ;;  %v14199_v1 = vld [vmem:[#allocation81_spill] sm:$0xff]  ;;  %v4875_v25 = vadd.f32 %v4874_v63, %v4835_v57  ;;  %v14201_v57 = vld [vmem:[#allocation95_spill] sm:$0xff] }
 0x6b1   :  { %v4481_v28 = vpop.f32.mrb[70].mxu1  ;;  %v4812_v41 = vadd.f32 %v11032_v36, %v10904_v46  ;;  %v4841_v59 = vmul.f32 0.5, %v4809_v61  ;;  %v14203_v61 = vld [vmem:[#allocation92_spill] sm:$0xff] }
 0x6b2   :  { %v11088_v30 = vadd.f32 %v6125_v54, %v14196_v27  ;;  %v6126_v51 = vadd.f32 %v4481_v28, %v14198_v53  ;;  %v4483_v19 = vpop.f32.mrb[71].mxu1  ;;  %v4839_v54 = vmul.f32 0.5, %v4807_v4  ;;  %v4810_v53 = vadd.f32 %v11024_v40, %v10896_v18 }
 0x6b3   :  { %v4861_v3 = vadd.f32 %v4860_v60, %v4836_v38  ;;  %v4876_v32 = vadd.f32 %v4875_v25, %v4837_v45  ;;  %v4843_v45 = vmul.f32 0.5, %v4811_v10  ;;  %v14205_v10 = vld [vmem:[#allocation82_spill] sm:$0xff] }
 0x6b4   :  { %14197 = vst [vmem:[#allocation129_spill] sm:$0xff] %v11088_v30  ;;  %v11096_v14 = vadd.f32 %v6126_v51, %v14199_v1  ;;  %v4813_v51 = vadd.f32 %v11036_v52, %v10908_v17  ;;  %v4842_v63 = vmul.f32 0.5, %v4810_v53  ;;  %v4814_v1 = vadd.f32 %v11040_v15, %v10912_v31 }
 0x6b5   :  { %v4862_v27 = vadd.f32 %v4861_v3, %v4838_v26  ;;  %v4877_v19 = vadd.f32 %v4876_v32, %v4839_v54  ;;  %v4816_v26 = vadd.f32 %v11066_v7, %v10920_v8  ;;  %v14204_v3 = vld [vmem:[#allocation194_spill] sm:$0xff] }
 0x6b6   :  { %14200 = vst [vmem:[#allocation16_spill] sm:$0xff] %v11096_v14  ;;  %v4845_v53 = vmul.f32 0.5, %v4813_v51  ;;  %v4817_v32 = vadd.f32 %v11074_v34, %v14204_v3  ;;  %v4846_v16 = vmul.f32 0.5, %v4814_v1 }
 0x6b7   :  { %v4486_v28 = vpop.f32.mrb[72].mxu1  ;;  %v4863_v36 = vadd.f32 %v4862_v27, %v4840_v47  ;;  %v4878_v54 = vadd.f32 %v4877_v19, %v4841_v59  ;;  %v14208_v47 = vld [vmem:[#allocation56_spill] sm:$0xff] }
 0x6b8   :  { %v6127_v33 = vadd.f32 %v4486_v28, %v14201_v57  ;;  %v4488_v4 = vpop.f32.mrb[73].mxu1  ;;  %v4844_v28 = vmul.f32 0.5, %v4812_v41  ;;  %v4819_v41 = vadd.f32 %v11096_v14, %v14208_v47  ;;  %v4849_v34 = vmul.f32 0.5, %v4817_v32  ;;  %v14211_v14 = vld [vmem:[#allocation50_spill] sm:$0xff] }
 0x6b9   :  { %v4489_v38 = vpop.f32.mrb[74].mxu1  ;;  %v4864_v4 = vadd.f32 %v4863_v36, %v4842_v63  ;;  %v14210_v63 = vld [vmem:[#allocation116_spill] sm:$0xff] }
 0x6ba   :  { %v11112_v60 = vadd.f32 %v6127_v33, %v10872_v35  ;;  %v6128_v25 = vadd.f32 %v4489_v38, %v14203_v61  ;;  %v4491_v52 = vpop.f32.mrb[75].mxu1  ;;  %v14207_v35 = vld [vmem:[#allocation111_spill] sm:$0xff]  ;;  %v4879_v38 = vadd.f32 %v4878_v54, %v4843_v45  ;;  %v4848_v61 = vmul.f32 0.5, %v4816_v26 }
 0x6bb   :  { %v4818_v33 = vadd.f32 %v11088_v30, %v14207_v35  ;;  %v4847_v52 = vmul.f32 0.5, %v4815_v55  ;;  %v4865_v27 = vadd.f32 %v4864_v4, %v4844_v28  ;;  %v4851_v7 = vmul.f32 0.5, %v4819_v41  ;;  %v14213_v26 = vld [vmem:[#allocation103_spill] sm:$0xff]  ;;  %v14217_v41 = vld [vmem:[#allocation61_spill] sm:$0xff] }
 0x6bc   :  { %14202 = vst [vmem:[#allocation21_spill] sm:$0xff] %v11112_v60  ;;  %v11120_v57 = vadd.f32 %v6128_v25, %v14205_v10  ;;  %v4820_v59 = vadd.f32 %v11112_v60, %v10936_v11  ;;  %v4880_v19 = vadd.f32 %v4879_v38, %v4845_v53  ;;  %v14209_v25 = vld [vmem:[#allocation58_spill] sm:$0xff] }
 0x6bd   :  { %v4866_v30 = vadd.f32 %v4865_v27, %v4846_v16  ;;  %v4850_v45 = vmul.f32 0.5, %v4818_v33 }
 0x6be   :  { %14206 = vst [vmem:[#allocation171_spill] sm:$0xff] %v11120_v57  ;;  %v4821_v36 = vadd.f32 %v11120_v57, %v14209_v25  ;;  %v4881_v54 = vadd.f32 %v4880_v19, %v4847_v52  ;;  %v4852_v53 = vmul.f32 0.5, %v4820_v59 }
 0x6bf   :  { %v4494_v51 = vpop.f32.mrb[76].mxu1  ;;  %v4867_v15 = vadd.f32 %v4866_v30, %v4848_v61 }
 0x6c0   :  { %v6129_v1 = vadd.f32 %v4494_v51, %v14210_v63  ;;  %v4496_v10 = vpop.f32.mrb[77].mxu1  ;;  %v4882_v32 = vadd.f32 %v4881_v54, %v4849_v34  ;;  %v4853_v38 = vmul.f32 0.5, %v4821_v36  ;;  %v14215_v51 = vld [vmem:[#allocation192_spill] sm:$0xff] }
 0x6c1   :  { %v4497_v55 = vpop.f32.mrb[78].mxu1  ;;  %v4868_v16 = vadd.f32 %v4867_v15, %v4850_v45 }
 0x6c2   :  { %v11132_v28 = vadd.f32 %v6129_v1, %v14211_v14  ;;  %v6130_v4 = vadd.f32 %v4497_v55, %v14213_v26  ;;  %v4499_v60 = vpop.f32.mrb[79].mxu1  ;;  %v4883_v33 = vadd.f32 %v4882_v32, %v4851_v7 }
 0x6c3   :  { %v4869_v27 = vadd.f32 %v4868_v16, %v4852_v53  ;;  %v14219_v53 = vld [vmem:[#allocation44_spill] sm:$0xff]  ;;  %v14221_v16 = vld [vmem:[#allocation191_spill] sm:$0xff] }
 0x6c4   :  { %14212 = vst [vmem:[#allocation22_spill] sm:$0xff] %v11132_v28  ;;  %v4822_v57 = vadd.f32 %v11132_v28, %v14214_v43  ;;  %v11138_v63 = vadd.f32 %v6130_v4, %v14215_v51  ;;  %v4884_v19 = vadd.f32 %v4883_v33, %v4853_v38  ;;  %v14220_v38 = vld [vmem:[#allocation46_spill] sm:$0xff] }
 0x6c6   :  { %14216 = vst [vmem:[#allocation127_spill] sm:$0xff] %v11138_v63  ;;  %v4854_v52 = vmul.f32 0.5, %v4822_v57  ;;  %v4823_v14 = vadd.f32 %v11138_v63, %v14217_v41 }
 0x6c8   :  { %v4855_v1 = vmul.f32 0.5, %v4823_v14  ;;  %v4870_v60 = vadd.f32 %v4869_v27, %v4854_v52  ;;  %v14222_v52 = vld [vmem:[#allocation76_spill] sm:$0xff] }
 0x6ca   :  { %v4885_v30 = vadd.f32 %v4884_v19, %v4855_v1  ;;  %v4887_v34 = vmul.f32 0.0625, %v4870_v60 }
 0x6cc   :  { %v4888_v61 = vmul.f32 0.0625, %v4885_v30 }
 0x6ce   :  { %v4889_v59 = vadd.f32 %v4888_v61, %v4887_v34 }
 0x6d0   :  { %v4890_v36 = vrot.slane %v4889_v59, 4 }
 0x6d2   :  { %v4891_v10 = vadd.f32 %v4890_v36, %v4889_v59 }
 0x6d4   :  { %v4892_v55 = vrot.slane %v4891_v10, 2 }
 0x6d6   :  { %v4893_v54 = vadd.f32 %v4892_v55, %v4891_v10 }
 0x6d8   :  { %v4894_v26 = vrot.slane %v4893_v54, 1 }
 0x6da   :  { %v4895_v4 = vadd.f32 %v4894_v26, %v4893_v54 }
 0x6dc   :  { %v11142_v15 = vmul.f32 0.0625, %v4895_v4 }
 0x6de   :  { %14218 = vst [vmem:[#allocation25_spill] sm:$0xff] %v11142_v15  ;;  %v11146_v7 = vsub.f32 %v10754_v24, %v11142_v15  ;;  %v11150_v57 = vsub.f32 %v14188_v44, %v11142_v15  ;;  %v11154_v45 = vsub.f32 %v10771_v6, %v11142_v15  ;;  %v11158_v32 = vsub.f32 %v14219_v53, %v11142_v15  ;;  %v14237_v53 = vld [vmem:[#allocation123_spill] sm:$0xff]  ;;  %v14241_v44 = vld [vmem:[#allocation70_spill] sm:$0xff]  ;;  %v14243_v24 = vld [vmem:[#allocation68_spill] sm:$0xff] }
 0x6df   :  { %v11162_v51 = vsub.f32 %v14220_v38, %v11142_v15  ;;  %v11166_v33 = vsub.f32 %v14221_v16, %v11142_v15  ;;  %v11170_v14 = vsub.f32 %v14222_v52, %v11142_v15  ;;  %v11174_v27 = vsub.f32 %v10817_v9, %v11142_v15  ;;  %v14233_v16 = vld [vmem:[#allocation47_spill] sm:$0xff]  ;;  %v14235_v38 = vld [vmem:[#allocation150_spill] sm:$0xff] }
 0x6e0   :  { %v11178_v19 = vsub.f32 %v10830_v49, %v11142_v15  ;;  %v11182_v1 = vsub.f32 %v14193_v58, %v11142_v15  ;;  %v11186_v60 = vsub.f32 %v10848_v5, %v11142_v15  ;;  %v11190_v30 = vsub.f32 %v10852_v22, %v11142_v15  ;;  %v14227_v5 = vld [vmem:[#allocation62_spill] sm:$0xff]  ;;  %v14228_v58 = vld [vmem:[#allocation197_spill] sm:$0xff]  ;;  %v14239_v6 = vld [vmem:[#allocation151_spill] sm:$0xff] }
 0x6e1   :  { %v11194_v61 = vsub.f32 %v10864_v13, %v11142_v15  ;;  %v11198_v34 = vsub.f32 %v10868_v20, %v11142_v15  ;;  %v11202_v59 = vsub.f32 %v10880_v62, %v11142_v15  ;;  %v11206_v36 = vsub.f32 %v10884_v42, %v11142_v15  ;;  %v14223_v42 = vld [vmem:[#allocation63_spill] sm:$0xff]  ;;  %v14224_v62 = vld [vmem:[#allocation196_spill] sm:$0xff] }
 0x6e2   :  { %v11210_v10 = vsub.f32 %v10888_v0, %v11142_v15  ;;  %v11214_v55 = vsub.f32 %v10892_v37, %v11142_v15  ;;  %v11218_v54 = vsub.f32 %v10896_v18, %v11142_v15  ;;  %v11222_v26 = vsub.f32 %v10900_v29, %v11142_v15 }
 0x6e3   :  { %v11226_v4 = vsub.f32 %v10904_v46, %v11142_v15  ;;  %v11230_v0 = vsub.f32 %v10908_v17, %v11142_v15  ;;  %v11234_v37 = vsub.f32 %v10912_v31, %v11142_v15  ;;  %v11238_v18 = vsub.f32 %v10916_v23, %v11142_v15 }
 0x6e4   :  { %v11242_v29 = vsub.f32 %v10920_v8, %v11142_v15  ;;  %v11246_v46 = vsub.f32 %v14204_v3, %v11142_v15  ;;  %v11250_v17 = vsub.f32 %v14207_v35, %v11142_v15  ;;  %v11254_v31 = vsub.f32 %v14208_v47, %v11142_v15 }
 0x6e5   :  { %v11258_v23 = vsub.f32 %v10936_v11, %v11142_v15  ;;  %v11262_v8 = vsub.f32 %v14209_v25, %v11142_v15  ;;  %v11266_v3 = vsub.f32 %v14214_v43, %v11142_v15  ;;  %v11270_v35 = vsub.f32 %v14217_v41, %v11142_v15  ;;  %v14225_v11 = vld [vmem:[#allocation110_spill] sm:$0xff]  ;;  %v14226_v25 = vld [vmem:[#allocation60_spill] sm:$0xff]  ;;  %v14229_v41 = vld [vmem:[#allocation65_spill] sm:$0xff] }
 0x6e6   :  { %v4929_v47 = vsub.f32 %v14223_v42, %v11142_v15  ;;  %v4930_v20 = vsub.f32 %v14224_v62, %v11142_v15  ;;  %v4931_v13 = vsub.f32 %v14225_v11, %v11142_v15  ;;  %v4932_v22 = vsub.f32 %v14226_v25, %v11142_v15  ;;  %v14230_v42 = vld [vmem:[#allocation113_spill] sm:$0xff]  ;;  %v14231_v62 = vld [vmem:[#allocation67_spill] sm:$0xff] }
 0x6e7   :  { %v4933_v43 = vsub.f32 %v14227_v5, %v11142_v15  ;;  %v4934_v49 = vsub.f32 %v14228_v58, %v11142_v15  ;;  %v11286_v9 = vsub.f32 %v14229_v41, %v11142_v15  ;;  %v11290_v52 = vsub.f32 %v14230_v42, %v11142_v15  ;;  %v14232_v58 = vld [vmem:[#allocation114_spill] sm:$0xff] }
 0x6e8   :  { %v11294_v11 = vsub.f32 %v14231_v62, %v11142_v15  ;;  %v11298_v25 = vsub.f32 %v10988_v39, %v11142_v15  ;;  %v11302_v5 = vsub.f32 %v10992_v56, %v11142_v15  ;;  %v11306_v41 = vsub.f32 %v10996_v50, %v11142_v15 }
 0x6e9   :  { %v11310_v42 = vsub.f32 %v14232_v58, %v11142_v15  ;;  %v11314_v62 = vsub.f32 %v14233_v16, %v11142_v15  ;;  %v11318_v39 = vsub.f32 %v11008_v48, %v11142_v15  ;;  %v11322_v56 = vsub.f32 %v11012_v2, %v11142_v15 }
 0x6ea   :  { %v11326_v50 = vsub.f32 %v11016_v21, %v11142_v15  ;;  %v11330_v58 = vsub.f32 %v11020_v12, %v11142_v15  ;;  %v11334_v16 = vsub.f32 %v11024_v40, %v11142_v15  ;;  %v11338_v48 = vsub.f32 %v14235_v38, %v11142_v15 }
 0x6eb   :  { %v11342_v2 = vsub.f32 %v14237_v53, %v11142_v15  ;;  %v11346_v21 = vsub.f32 %v14239_v6, %v11142_v15  ;;  %v11350_v12 = vsub.f32 %v14241_v44, %v11142_v15  ;;  %v11354_v40 = vsub.f32 %v14243_v24, %v11142_v15 }
 0x6ec   :  { %14234 = vst [vmem:[#allocation27_spill] sm:$0xff] %v11334_v16  ;;  %14236 = vst [vmem:[#allocation167_spill] sm:$0xff] %v11338_v48  ;;  %v14245_v16 = vld [vmem:[#allocation120_spill] sm:$0xff]  ;;  %v14246_v48 = vld [vmem:[#allocation19_spill] sm:$0xff] }
 0x6ed   :  { %14238 = vst [vmem:[#allocation169_spill] sm:$0xff] %v11342_v2  ;;  %14240 = vst [vmem:[#allocation172_spill] sm:$0xff] %v11346_v21  ;;  %v11358_v38 = vsub.f32 %v14245_v16, %v11142_v15  ;;  %v11362_v53 = vsub.f32 %v14246_v48, %v11142_v15  ;;  %v14247_v2 = vld [vmem:[#allocation129_spill] sm:$0xff]  ;;  %v14248_v21 = vld [vmem:[#allocation16_spill] sm:$0xff]  ;;  %v11382_v48 = vsub.f32 %v11132_v28, %v11142_v15 }
 0x6ee   :  { %14242 = vst [vmem:[#allocation160_spill] sm:$0xff] %v11350_v12  ;;  %14244 = vst [vmem:[#allocation143_spill] sm:$0xff] %v11354_v40  ;;  %v11366_v6 = vsub.f32 %v14247_v2, %v11142_v15  ;;  %v11370_v44 = vsub.f32 %v14248_v21, %v11142_v15  ;;  %v14250_v12 = vld [vmem:[#allocation21_spill] sm:$0xff]  ;;  %v14251_v40 = vld [vmem:[#allocation171_spill] sm:$0xff]  ;;  %v11386_v2 = vsub.f32 %v11138_v63, %v11142_v15 }
 0x6ef   :  { %v11374_v24 = vsub.f32 %v14250_v12, %v11142_v15  ;;  %v11378_v16 = vsub.f32 %v14251_v40, %v11142_v15  ;;  %14253 = vst [vmem:[#allocation71_spill] sm:$0xff] %v11382_v48  ;;  %v4961_v21 = vmul.f32 %v11146_v7, %v11146_v7  ;;  %v4963_v12 = vmul.f32 %v11154_v45, %v11154_v45 }
 0x6f0   :  { %14249 = vst [vmem:[#allocation175_spill] sm:$0xff] %v11370_v44  ;;  %14254 = vst [vmem:[#allocation177_spill] sm:$0xff] %v11386_v2  ;;  %v4962_v44 = vmul.f32 %v11150_v57, %v11150_v57  ;;  %v4964_v40 = vmul.f32 %v11158_v32, %v11158_v32  ;;  %v4965_v28 = vmul.f32 %v11162_v51, %v11162_v51 }
 0x6f1   :  { %14252 = vst [vmem:[#allocation69_spill] sm:$0xff] %v11378_v16  ;;  %v4966_v48 = vmul.f32 %v11166_v33, %v11166_v33  ;;  %v4967_v63 = vmul.f32 %v11170_v14, %v11170_v14  ;;  %v4968_v7 = vmul.f32 %v11174_v27, %v11174_v27  ;;  %v4969_v57 = vmul.f32 %v11178_v19, %v11178_v19 }
 0x6f2   :  { %v4970_v45 = vmul.f32 %v11182_v1, %v11182_v1  ;;  %v4971_v32 = vmul.f32 %v11186_v60, %v11186_v60  ;;  %v4972_v51 = vmul.f32 %v11190_v30, %v11190_v30  ;;  %v4993_v15 = vmul.f32 %v4929_v47, %v4929_v47 }
 0x6f3   :  { %v4994_v33 = vmul.f32 %v4930_v20, %v4930_v20  ;;  %v4995_v2 = vmul.f32 %v4931_v13, %v4931_v13  ;;  %v4996_v16 = vmul.f32 %v4932_v22, %v4932_v22  ;;  %v4973_v14 = vmul.f32 %v11194_v61, %v11194_v61 }
 0x6f4   :  { %v4974_v27 = vmul.f32 %v11198_v34, %v11198_v34  ;;  %v11418_v19 = vmul.f32 %v11202_v59, %v11202_v59  ;;  %v11422_v1 = vmul.f32 %v11206_v36, %v11206_v36  ;;  %v11426_v47 = vmul.f32 %v11210_v10, %v11210_v10 }
 0x6f5   :  { %v11430_v22 = vmul.f32 %v11214_v55, %v11214_v55  ;;  %v11434_v13 = vmul.f32 %v11218_v54, %v11218_v54  ;;  %v11438_v20 = vmul.f32 %v11222_v26, %v11222_v26  ;;  %v11442_v60 = vmul.f32 %v11226_v4, %v11226_v4 }
 0x6f6   :  { %v11446_v30 = vmul.f32 %v11230_v0, %v11230_v0  ;;  %v4997_v61 = vmul.f32 %v4933_v43, %v4933_v43  ;;  %v4998_v34 = vmul.f32 %v4934_v49, %v4934_v49  ;;  %v5025_v59 = vadd.f32 %v4993_v15, %v4961_v21 }
 0x6f7   :  { %v5026_v36 = vadd.f32 %v4994_v33, %v4962_v44  ;;  %v5027_v10 = vadd.f32 %v4995_v2, %v4963_v12  ;;  %v5028_v55 = vadd.f32 %v4996_v16, %v4964_v40  ;;  %v11450_v54 = vmul.f32 %v11234_v37, %v11234_v37 }
 0x6f8   :  { %v11454_v26 = vmul.f32 %v11238_v18, %v11238_v18  ;;  %v11458_v4 = vmul.f32 %v11242_v29, %v11242_v29  ;;  %v11462_v0 = vmul.f32 %v11246_v46, %v11246_v46  ;;  %v11466_v49 = vmul.f32 %v11250_v17, %v11250_v17 }
 0x6f9   :  { %v11470_v37 = vmul.f32 %v11254_v31, %v11254_v31  ;;  %v4999_v18 = vmul.f32 %v11286_v9, %v11286_v9  ;;  %v5000_v2 = vmul.f32 %v11290_v52, %v11290_v52  ;;  %v5001_v29 = vmul.f32 %v11294_v11, %v11294_v11 }
 0x6fa   :  { %v5002_v46 = vmul.f32 %v11298_v25, %v11298_v25  ;;  %v5029_v21 = vadd.f32 %v4997_v61, %v4965_v28  ;;  %v5030_v12 = vadd.f32 %v4998_v34, %v4966_v48  ;;  %v5057_v17 = vmul.f32 0.5, %v5025_v59 }
 0x6fb   :  { %v5058_v40 = vmul.f32 0.5, %v5026_v36  ;;  %v5059_v43 = vmul.f32 0.5, %v5027_v10  ;;  %v5060_v44 = vmul.f32 0.5, %v5028_v55  ;;  %v11482_v31 = vmul.f32 %v11258_v23, %v11258_v23 }
 0x6fc   :  { %v11486_v9 = vmul.f32 %v11262_v8, %v11262_v8  ;;  %v5003_v11 = vmul.f32 %v11302_v5, %v11302_v5  ;;  %v5004_v25 = vmul.f32 %v11306_v41, %v11306_v41  ;;  %v11494_v48 = vmul.f32 %v11266_v3, %v11266_v3 }
 0x6fd   :  { %v11498_v28 = vmul.f32 %v11270_v35, %v11270_v35  ;;  %v5031_v23 = vadd.f32 %v4999_v18, %v4967_v63  ;;  %v5032_v15 = vadd.f32 %v5000_v2, %v4968_v7  ;;  %v5005_v8 = vmul.f32 %v11310_v42, %v11310_v42 }
 0x6fe   :  { %v5006_v16 = vmul.f32 %v11314_v62, %v11314_v62  ;;  %v5033_v5 = vadd.f32 %v5001_v29, %v4969_v57  ;;  %v5034_v52 = vadd.f32 %v5002_v46, %v4970_v45  ;;  %v5061_v33 = vmul.f32 0.5, %v5029_v21  ;;  %v14255_v46 = vld [vmem:[#allocation27_spill] sm:$0xff] }
 0x6ff   :  { %v5062_v41 = vmul.f32 0.5, %v5030_v12  ;;  %v5089_v61 = vadd.f32 %v5059_v43, %v5057_v17  ;;  %v5104_v34 = vadd.f32 %v5060_v44, %v5058_v40  ;;  %v5007_v3 = vmul.f32 %v11318_v39, %v11318_v39  ;;  %v14258_v43 = vld [vmem:[#allocation172_spill] sm:$0xff] }
 0x700   :  { %v5008_v35 = vmul.f32 %v11322_v56, %v11322_v56  ;;  %v5035_v63 = vadd.f32 %v5003_v11, %v4971_v32  ;;  %v5036_v7 = vadd.f32 %v5004_v25, %v4972_v51  ;;  %v5063_v59 = vmul.f32 0.5, %v5031_v23  ;;  %v14256_v32 = vld [vmem:[#allocation167_spill] sm:$0xff] }
 0x701   :  { %v5064_v36 = vmul.f32 0.5, %v5032_v15  ;;  %v5090_v42 = vadd.f32 %v5089_v61, %v5061_v33  ;;  %v5105_v10 = vadd.f32 %v5104_v34, %v5062_v41  ;;  %v5009_v62 = vmul.f32 %v11326_v50, %v11326_v50 }
 0x702   :  { %v5010_v57 = vmul.f32 %v11330_v58, %v11330_v58  ;;  %v5037_v45 = vadd.f32 %v5005_v8, %v4973_v14  ;;  %v5038_v55 = vadd.f32 %v5006_v16, %v4974_v27  ;;  %v5065_v18 = vmul.f32 0.5, %v5033_v5  ;;  %v14257_v14 = vld [vmem:[#allocation169_spill] sm:$0xff]  ;;  %v14259_v16 = vld [vmem:[#allocation160_spill] sm:$0xff]  ;;  %v14260_v5 = vld [vmem:[#allocation143_spill] sm:$0xff] }
 0x703   :  { %v5066_v2 = vmul.f32 0.5, %v5034_v52  ;;  %v5091_v39 = vadd.f32 %v5090_v42, %v5063_v59  ;;  %v5106_v29 = vadd.f32 %v5105_v10, %v5064_v36  ;;  %v5011_v56 = vmul.f32 %v14255_v46, %v14255_v46  ;;  %v14261_v10 = vld [vmem:[#allocation175_spill] sm:$0xff] }
 0x704   :  { %v5012_v51 = vmul.f32 %v14256_v32, %v14256_v32  ;;  %v5039_v21 = vadd.f32 %v5007_v3, %v11418_v19  ;;  %v5040_v12 = vadd.f32 %v5008_v35, %v11422_v1  ;;  %v5067_v50 = vmul.f32 0.5, %v5035_v63  ;;  %v14263_v32 = vld [vmem:[#allocation71_spill] sm:$0xff] }
 0x705   :  { %v5068_v17 = vmul.f32 0.5, %v5036_v7  ;;  %v5092_v40 = vadd.f32 %v5091_v39, %v5065_v18  ;;  %v5107_v58 = vadd.f32 %v5106_v29, %v5066_v2  ;;  %v5013_v27 = vmul.f32 %v14257_v14, %v14257_v14  ;;  %v14262_v18 = vld [vmem:[#allocation69_spill] sm:$0xff] }
 0x706   :  { %v5014_v44 = vmul.f32 %v14258_v43, %v14258_v43  ;;  %v5041_v11 = vadd.f32 %v5009_v62, %v11426_v47  ;;  %v5042_v25 = vadd.f32 %v5010_v57, %v11430_v22  ;;  %v5069_v23 = vmul.f32 0.5, %v5037_v45 }
 0x707   :  { %v5070_v15 = vmul.f32 0.5, %v5038_v55  ;;  %v5093_v8 = vadd.f32 %v5092_v40, %v5067_v50  ;;  %v5108_v19 = vadd.f32 %v5107_v58, %v5068_v17  ;;  %v5015_v1 = vmul.f32 %v14259_v16, %v14259_v16 }
 0x708   :  { %v5016_v52 = vmul.f32 %v14260_v5, %v14260_v5  ;;  %v5043_v33 = vadd.f32 %v5011_v56, %v11434_v13  ;;  %v5044_v41 = vadd.f32 %v5012_v51, %v11438_v20  ;;  %v5071_v61 = vmul.f32 0.5, %v5039_v21  ;;  %v14264_v51 = vld [vmem:[#allocation177_spill] sm:$0xff] }
 0x709   :  { %v5072_v34 = vmul.f32 0.5, %v5040_v12  ;;  %v5094_v3 = vadd.f32 %v5093_v8, %v5069_v23  ;;  %v5109_v47 = vadd.f32 %v5108_v19, %v5070_v15  ;;  %v5017_v22 = vmul.f32 %v11358_v38, %v11358_v38 }
 0x70a   :  { %v5018_v35 = vmul.f32 %v11362_v53, %v11362_v53  ;;  %v5045_v63 = vadd.f32 %v5013_v27, %v11442_v60  ;;  %v5046_v7 = vadd.f32 %v5014_v44, %v11446_v30  ;;  %v5073_v59 = vmul.f32 0.5, %v5041_v11 }
 0x70b   :  { %v5074_v36 = vmul.f32 0.5, %v5042_v25  ;;  %v5095_v42 = vadd.f32 %v5094_v3, %v5071_v61  ;;  %v5110_v13 = vadd.f32 %v5109_v47, %v5072_v34  ;;  %v5019_v20 = vmul.f32 %v11366_v6, %v11366_v6 }
 0x70c   :  { %v5020_v62 = vmul.f32 %v14261_v10, %v14261_v10  ;;  %v5047_v57 = vadd.f32 %v5015_v1, %v11450_v54  ;;  %v5048_v38 = vadd.f32 %v5016_v52, %v11454_v26  ;;  %v5075_v45 = vmul.f32 0.5, %v5043_v33  ;;  %v14265_v10 = vld [vmem:[#allocation25_spill] sm:$0xff] }
 0x70d   :  { %v5076_v53 = vmul.f32 0.5, %v5044_v41  ;;  %v5096_v55 = vadd.f32 %v5095_v42, %v5073_v59  ;;  %v5111_v60 = vadd.f32 %v5110_v13, %v5074_v36  ;;  %v5021_v30 = vmul.f32 %v11374_v24, %v11374_v24  ;;  %v4790_v36 = vld [vmem:[%s12384_s5] sm:$0x1]  ;;  %s6675_s5 = smov [#allocation9]  }
 0x70e   :  { %v5022_v2 = vmul.f32 %v14262_v18, %v14262_v18  ;;  %v5049_v39 = vadd.f32 %v5017_v22, %v11458_v4  ;;  %v5050_v6 = vadd.f32 %v5018_v35, %v11462_v0  ;;  %v5077_v29 = vmul.f32 0.5, %v5045_v63  ;;  %v14269_v18 = vld [vmem:[#allocation22_spill] sm:$0xff] }
 0x70f   :  { %v5078_v46 = vmul.f32 0.5, %v5046_v7  ;;  %v5097_v56 = vadd.f32 %v5096_v55, %v5075_v45  ;;  %v5112_v54 = vadd.f32 %v5111_v60, %v5076_v53  ;;  %v5023_v26 = vmul.f32 %v14263_v32, %v14263_v32  ;;  %v14267_v53 = vld [vmem:[#allocation21_spill] sm:$0xff]  ;;  %v14268_v60 = vld [vmem:[#allocation171_spill] sm:$0xff] }
 0x710   :  { %v5024_v21 = vmul.f32 %v14264_v51, %v14264_v51  ;;  %v5051_v12 = vadd.f32 %v5019_v20, %v11466_v49  ;;  %v5052_v24 = vadd.f32 %v5020_v62, %v11470_v37  ;;  %v5079_v50 = vmul.f32 0.5, %v5047_v57  ;;  %v4791_v20 = vld [vmem:[%s12385_s6] sm:$0x1]  ;;  %v14266_v57 = vld [vmem:[#allocation152_spill] sm:$0xff]  ;;  %v14273_v32 = vld [vmem:[#allocation79_spill] sm:$0xff]  ;;  %s5566_s6 = sshll.u32 %s6675_s5, 4  ;;  %s12221_s6 = int_to_ptr.vmem [resolvable:$true] %s5566_s6 }
 0x711   :  { %v5080_v17 = vmul.f32 0.5, %v5048_v38  ;;  %v5098_v40 = vadd.f32 %v5097_v56, %v5077_v29  ;;  %v5113_v4 = vadd.f32 %v5112_v54, %v5078_v46  ;;  %v5053_v0 = vadd.f32 %v5021_v30, %v11482_v31  ;;  %v14271_v29 = vld [vmem:[#allocation101_spill] sm:$0xff]  ;;  %s6617_s24 = scalar_lea.vmem %s12221_s6, 8192  ;;  %p6622_p11 = scmp.lt.s32.totalorder %s12221_s6, %s12221_s6 }
 0x712   :  { %v5054_v58 = vadd.f32 %v5022_v2, %v11486_v9  ;;  %v5081_v14 = vmul.f32 0.5, %v5049_v39  ;;  %v5082_v27 = vmul.f32 0.5, %v5050_v6  ;;  %v5055_v11 = vadd.f32 %v5023_v26, %v11494_v48  ;;  %v14270_v39 = vld [vmem:[#allocation127_spill] sm:$0xff]  ;;  %v14272_v56 = vld [vmem:[#allocation77_spill] sm:$0xff]  ;;  %p6618_p10 = scmp.ne.s32.totalorder %s12221_s6, %s6617_s24  ;;  %p6623_p12 = scmp.lt.s32.totalorder %s6617_s24, %s6617_s24 }
 0x713   :  { %v5099_v43 = vadd.f32 %v5098_v40, %v5079_v50  ;;  %v5114_v44 = vadd.f32 %v5113_v4, %v5080_v17  ;;  %v5056_v25 = vadd.f32 %v5024_v21, %v11498_v28  ;;  %v5083_v23 = vmul.f32 0.5, %v5051_v12  ;;  %v14274_v21 = vld [vmem:[#allocation44_spill] sm:$0xff]  ;;  %v14276_v17 = vld [vmem:[#allocation191_spill] sm:$0xff] }
 0x714   :  { %v5084_v49 = vmul.f32 0.5, %v5052_v24  ;;  %v5085_v8 = vmul.f32 0.5, %v5053_v0  ;;  %v5086_v19 = vmul.f32 0.5, %v5054_v58  ;;  %v5087_v5 = vmul.f32 0.5, %v5055_v11  ;;  %v14275_v24 = vld [vmem:[#allocation46_spill] sm:$0xff]  ;;  %v14277_v4 = vld [vmem:[#allocation76_spill] sm:$0xff]  ;;  %p6624_p13 = por %p6623_p12, %p6622_p11 }
 0x715   :  { %v5100_v15 = vadd.f32 %v5099_v43, %v5081_v14  ;;  %v5115_v37 = vadd.f32 %v5114_v44, %v5082_v27  ;;  %v5088_v31 = vmul.f32 0.5, %v5056_v25  ;;  %v14278_v58 = vld [vmem:[#allocation105_spill] sm:$0xff] }
 0x716   :  { %v14279_v27 = vld [vmem:[#allocation49_spill] sm:$0xff]  ;;  %p6625_p0 = pnand %p6624_p13, %p6618_p10 }
 0x717   :  { %v5101_v16 = vadd.f32 %v5100_v15, %v5083_v23  ;;  %v5116_v1 = vadd.f32 %v5115_v37, %v5084_v49  ;;  %v14280_v44 = vld [vmem:[#allocation165_spill] sm:$0xff]  ;;  %v14281_v37 = vld [vmem:[#allocation107_spill] sm:$0xff] }
 0x719   :  { %v5102_v52 = vadd.f32 %v5101_v16, %v5085_v8  ;;  %v5117_v9 = vadd.f32 %v5116_v1, %v5086_v19  ;;  %v14282_v19 = vld [vmem:[#allocation51_spill] sm:$0xff] }
 0x71a   :  { %v14283_v1 = vld [vmem:[#allocation83_spill] sm:$0xff] }
 0x71b   :  { %v5103_v33 = vadd.f32 %v5102_v52, %v5087_v5  ;;  %v5118_v41 = vadd.f32 %v5117_v9, %v5088_v31  ;;  %v14284_v31 = vld [vmem:[#allocation48_spill] sm:$0xff] }
 0x71d   :  { %v5119_v61 = vmul.f32 0.0625, %v5103_v33  ;;  %v5120_v34 = vmul.f32 0.0625, %v5118_v41 }
 0x71f   :  { %v5121_v3 = vadd.f32 %v5120_v34, %v5119_v61  ;;  %v14285_v34 = vld [vmem:[#allocation104_spill] sm:$0xff] }
 0x721   :  { %v5122_v48 = vrot.slane %v5121_v3, 4 }
 0x723   :  { %v5123_v47 = vadd.f32 %v5122_v48, %v5121_v3  ;;  %v14286_v48 = vld [vmem:[#allocation53_spill] sm:$0xff] }
 0x725   :  { %v5124_v28 = vrot.slane %v5123_v47, 2 }
 0x727   :  { %v5125_v22 = vadd.f32 %v5124_v28, %v5123_v47  ;;  %v14287_v28 = vld [vmem:[#allocation106_spill] sm:$0xff] }
 0x729   :  { %v5126_v35 = vrot.slane %v5125_v22, 1 }
 0x72b   :  { %v5127_v63 = vadd.f32 %v5126_v35, %v5125_v22  ;;  %v14288_v35 = vld [vmem:[#allocation55_spill] sm:$0xff] }
 0x72d   :  { %v5128_v7 = vmul.f32 0.0625, %v5127_v63 }
 0x72f   :  { %v5129_v59 = vadd.f32 1e-05, %v5128_v7 }
 0x731   :  { %6533 = vrsqrt.f32 %v5129_v59 }
 0x73b   :  { %v6534_v42 = vpop.eup %6533 }
 0x73c   :  { %v5131_v13 = vmul.f32 %v6534_v42, %v4790_v36  ;;  %v14289_v36 = vld [vmem:[#allocation145_spill] sm:$0xff] }
 0x73e   :  { %v5132_v62 = vmul.f32 %v5131_v13, %v14265_v10  ;;  %v11566_v38 = vrot.slane %v5131_v13, %v14266_v57  ;;  %v14290_v13 = vld [vmem:[#allocation52_spill] sm:$0xff]  ;;  %v14291_v10 = vld [vmem:[#allocation54_spill] sm:$0xff] }
 0x740   :  { %v5133_v45 = vsub.f32 %v4791_v20, %v5132_v62  ;;  %v5200_v55 = vmul.f32 %v11566_v38, %v14267_v53  ;;  %v5201_v30 = vmul.f32 %v11566_v38, %v14268_v60  ;;  %v5202_v2 = vmul.f32 %v11566_v38, %v14269_v18  ;;  %v14293_v53 = vld [vmem:[#allocation109_spill] sm:$0xff]  ;;  %v14295_v18 = vld [vmem:[#allocation59_spill] sm:$0xff] }
 0x741   :  { %v5203_v6 = vmul.f32 %v11566_v38, %v14270_v39  ;;  %v11578_v46 = vmul.f32 %v11566_v38, %v14271_v29  ;;  %v11582_v54 = vmul.f32 %v11566_v38, %v14272_v56  ;;  %v11586_v26 = vmul.f32 %v11566_v38, %v14273_v32  ;;  %v14294_v60 = vld [vmem:[#allocation57_spill] sm:$0xff]  ;;  %v14296_v39 = vld [vmem:[#allocation194_spill] sm:$0xff]  ;;  %v14297_v29 = vld [vmem:[#allocation111_spill] sm:$0xff] }
 0x742   :  { %v11589_v51 = vrot.slane %v5133_v45, %v14266_v57  ;;  %v11593_v12 = vmul.f32 %v11566_v38, %v14274_v21  ;;  %v11597_v50 = vmul.f32 %v11566_v38, %v14275_v24  ;;  %v11601_v40 = vmul.f32 %v11566_v38, %v14276_v17  ;;  %v14292_v57 = vld [vmem:[#allocation193_spill] sm:$0xff]  ;;  %v14298_v32 = vld [vmem:[#allocation56_spill] sm:$0xff] }
 0x743   :  { %v11605_v0 = vmul.f32 %v11566_v38, %v14277_v4  ;;  %v11609_v14 = vmul.f32 %v11566_v38, %v14278_v58  ;;  %v11613_v43 = vmul.f32 %v11566_v38, %v14279_v27  ;;  %v11617_v11 = vmul.f32 %v11566_v38, %v14280_v44  ;;  %v14299_v24 = vld [vmem:[#allocation108_spill] sm:$0xff]  ;;  %v14300_v4 = vld [vmem:[#allocation58_spill] sm:$0xff]  ;;  %v14301_v27 = vld [vmem:[#allocation195_spill] sm:$0xff] }
 0x744   :  { %v5270_v25 = vadd.f32 %v11589_v51, %v5200_v55  ;;  %v5271_v23 = vadd.f32 %v11589_v51, %v5201_v30  ;;  %v5272_v49 = vadd.f32 %v11589_v51, %v5202_v2  ;;  %v5273_v15 = vadd.f32 %v11589_v51, %v5203_v6 }
 0x745   :  { %v11625_v8 = vmul.f32 %v11566_v38, %v14281_v37  ;;  %v11629_v16 = vmul.f32 %v11566_v38, %v14282_v19  ;;  %v11633_v5 = vmul.f32 %v11566_v38, %v14283_v1  ;;  %v11637_v52 = vmul.f32 %v11566_v38, %v14284_v31  ;;  %v14304_v37 = vld [vmem:[#allocation196_spill] sm:$0xff]  ;;  %v14305_v1 = vld [vmem:[#allocation110_spill] sm:$0xff] }
 0x746   :  { %v5334_v9 = vmax.f32 %v5270_v25, 0.0  ;;  %v5335_v33 = vmax.f32 %v5271_v23, 0.0  ;;  %v5336_v41 = vmax.f32 %v5272_v49, 0.0  ;;  %v5337_v61 = vmax.f32 %v5273_v15, 0.0  ;;  %v14302_v25 = vld [vmem:[#allocation61_spill] sm:$0xff]  ;;  %v14303_v49 = vld [vmem:[#allocation63_spill] sm:$0xff] }
 0x747   :  { %v11641_v3 = vmul.f32 %v11566_v38, %v14285_v34  ;;  %v11645_v47 = vmul.f32 %v11566_v38, %v14286_v48  ;;  %v11649_v22 = vmul.f32 %v11566_v38, %v14287_v28  ;;  %v11653_v63 = vmul.f32 %v11566_v38, %v14288_v35  ;;  %v14308_v34 = vld [vmem:[#allocation197_spill] sm:$0xff] }
 0x748   :  { %5401 = vst [vmem:[#allocation9 + $0x1f8] sm:$0xff] %v5337_v61  ;;  %v5432_v7 = vmax.f32 %v5334_v9, %v5336_v41  ;;  %v5433_v59 = vmax.f32 %v5335_v33, %v5337_v61  ;;  %v11657_v42 = vmul.f32 %v11566_v38, %v14289_v36  ;;  %v11661_v20 = vmul.f32 %v11566_v38, %v14290_v13  ;;  %v14309_v28 = vld [vmem:[#allocation65_spill] sm:$0xff]  ;;  %v14311_v36 = vld [vmem:[#allocation67_spill] sm:$0xff] }
 0x749   :  { %5398 = vst [vmem:[#allocation9 + $0x1e0] sm:$0xff] %v5334_v9  ;;  %5399 = vst [vmem:[#allocation9 + $0x1e8] sm:$0xff] %v5335_v33  ;;  %v11665_v62 = vmul.f32 %v11566_v38, %v14291_v10  ;;  %v11669_v45 = vmul.f32 %v11566_v38, %v14292_v57  ;;  %v11673_v55 = vmul.f32 %v11566_v38, %v14293_v53  ;;  %v14306_v9 = vld [vmem:[#allocation60_spill] sm:$0xff]  ;;  %v14312_v10 = vld [vmem:[#allocation115_spill] sm:$0xff] }
 0x74a   :  { %5400 = vst [vmem:[#allocation9 + $0x1f0] sm:$0xff] %v5336_v41  ;;  %v11677_v30 = vmul.f32 %v11566_v38, %v14294_v60  ;;  %5464 = vst [vmem:[#allocation2 + $0xf0] sm:$0xff] %v5432_v7  ;;  %v11681_v2 = vmul.f32 %v11566_v38, %v14295_v18  ;;  %v11685_v6 = vmul.f32 %v11566_v38, %v14296_v39  ;;  %v14307_v41 = vld [vmem:[#allocation62_spill] sm:$0xff]  ;;  %v14310_v7 = vld [vmem:[#allocation113_spill] sm:$0xff] }
 0x74b   :  { %5465 = vst [vmem:[#allocation2 + $0xf8] sm:$0xff] %v5433_v59  ;;  %v11689_v56 = vmul.f32 %v11566_v38, %v14297_v29  ;;  %v11693_v21 = vmul.f32 %v11566_v38, %v14298_v32  ;;  %v11697_v17 = vmul.f32 %v11566_v38, %v14299_v24  ;;  %v11701_v58 = vmul.f32 %v11566_v38, %v14300_v4  ;;  %v14313_v53 = vld [vmem:[#allocation198_spill] sm:$0xff]  ;;  %v14314_v18 = vld [vmem:[#allocation112_spill] sm:$0xff]  ;;  %v14317_v24 = vld [vmem:[#allocation47_spill] sm:$0xff] }
 0x74c   :  { %v11705_v44 = vmul.f32 %v11566_v38, %v14301_v27  ;;  %v11709_v23 = vmul.f32 %v11566_v38, %v14302_v25  ;;  %v11713_v15 = vmul.f32 %v11566_v38, %v14303_v49  ;;  %v11717_v19 = vmul.f32 %v11566_v38, %v14304_v37  ;;  %v14315_v29 = vld [vmem:[#allocation114_spill] sm:$0xff]  ;;  %v14319_v27 = vld [vmem:[#allocation45_spill] sm:$0xff]  ;;  %v14321_v49 = vld [vmem:[#allocation119_spill] sm:$0xff] }
 0x74d   :  { %v11721_v31 = vmul.f32 %v11566_v38, %v14305_v1  ;;  %v11725_v33 = vmul.f32 %v11566_v38, %v14306_v9  ;;  %v11729_v61 = vmul.f32 %v11566_v38, %v14307_v41  ;;  %v11733_v48 = vmul.f32 %v11566_v38, %v14308_v34  ;;  %v14323_v1 = vld [vmem:[#allocation42_spill] sm:$0xff]  ;;  %v14325_v41 = vld [vmem:[#allocation117_spill] sm:$0xff] }
 0x74e   :  { %v11737_v35 = vmul.f32 %v11566_v38, %v14309_v28  ;;  %v11741_v59 = vmul.f32 %v11566_v38, %v14310_v7  ;;  %v11745_v13 = vmul.f32 %v11566_v38, %v14311_v36  ;;  %v11749_v57 = vmul.f32 %v11566_v38, %v14312_v10  ;;  %v14327_v28 = vld [vmem:[#allocation200_spill] sm:$0xff]  ;;  %v14329_v36 = vld [vmem:[#allocation150_spill] sm:$0xff] }
 0x74f   :  { %v11753_v60 = vmul.f32 %v11566_v38, %v14313_v53  ;;  %v11757_v39 = vmul.f32 %v11566_v38, %v14314_v18  ;;  %v11761_v32 = vmul.f32 %v11566_v38, %v14315_v29  ;;  %v11765_v4 = vmul.f32 %v11566_v38, %v14317_v24  ;;  %v14331_v29 = vld [vmem:[#allocation123_spill] sm:$0xff] }
 0x750   :  { %v11769_v25 = vmul.f32 %v11566_v38, %v14319_v27  ;;  %v11773_v37 = vmul.f32 %v11566_v38, %v14321_v49  ;;  %v11777_v9 = vmul.f32 %v11566_v38, %v14323_v1  ;;  %v11781_v34 = vmul.f32 %v11566_v38, %v14325_v41  ;;  %v14332_v27 = vld [vmem:[#allocation151_spill] sm:$0xff]  ;;  %v14333_v1 = vld [vmem:[#allocation70_spill] sm:$0xff] }
 0x751   :  { %14316 = vst [vmem:[#allocation130_spill] sm:$0xff] %v11761_v32  ;;  %14318 = vst [vmem:[#allocation179_spill] sm:$0xff] %v11765_v4  ;;  %v11785_v7 = vmul.f32 %v11566_v38, %v14327_v28  ;;  %v11789_v10 = vmul.f32 %v11566_v38, %v14329_v36  ;;  %v5192_v24 = vmul.f32 %v11566_v38, %v14331_v29  ;;  %v14336_v36 = vld [vmem:[#allocation19_spill] sm:$0xff]  ;;  %v14338_v29 = vld [vmem:[#allocation16_spill] sm:$0xff] }
 0x752   :  { %14320 = vst [vmem:[#allocation133_spill] sm:$0xff] %v11769_v25  ;;  %14322 = vst [vmem:[#allocation181_spill] sm:$0xff] %v11773_v37  ;;  %v5496_v53 = vld [vmem:[#allocation2 + $0xf0] ss:$2 sm:$0xff]  ;;  %v5528_v18 = vld [vmem:[#allocation2 + $0xf1] ss:$2 sm:$0xff]  ;;  %v5193_v49 = vmul.f32 %v11566_v38, %v14332_v27  ;;  %v5194_v41 = vmul.f32 %v11566_v38, %v14333_v1  ;;  %v5199_v32 = vmul.f32 %v11566_v38, %v14338_v29 }
 0x753   :  { %14324 = vst [vmem:[#allocation135_spill] sm:$0xff] %v11777_v9  ;;  %14326 = vst [vmem:[#allocation136_spill] sm:$0xff] %v11781_v34  ;;  %v14334_v34 = vld [vmem:[#allocation68_spill] sm:$0xff]  ;;  %v5544_v28 = vmax.f32 %v5496_v53, %v5528_v18  ;;  %v14337_v25 = vld [vmem:[#allocation129_spill] sm:$0xff]  ;;  %v11809_v27 = vadd.f32 %v11589_v51, %v11578_v46  ;;  %v11821_v53 = vadd.f32 %v11589_v51, %v11593_v12 }
 0x754   :  { %14328 = vst [vmem:[#allocation137_spill] sm:$0xff] %v11785_v7  ;;  %14330 = vst [vmem:[#allocation185_spill] sm:$0xff] %v11789_v10  ;;  %v5195_v9 = vmul.f32 %v11566_v38, %v14334_v34  ;;  %v14335_v7 = vld [vmem:[#allocation120_spill] sm:$0xff]  ;;  %v5197_v10 = vmul.f32 %v11566_v38, %v14336_v36  ;;  %v5198_v4 = vmul.f32 %v11566_v38, %v14337_v25 }
 0x755   :  { %v5196_v37 = vmul.f32 %v11566_v38, %v14335_v7  ;;  %v11813_v34 = vadd.f32 %v11589_v51, %v11582_v54  ;;  %v11817_v7 = vadd.f32 %v11589_v51, %v11586_v26  ;;  %5560 = vst [vmem:[#allocation10 + $0x78] sm:$0xff] %v5544_v28  ;;  %v11825_v38 = vadd.f32 %v11589_v51, %v11597_v50 }
 0x756   :  { %v11829_v46 = vadd.f32 %v11589_v51, %v11601_v40  ;;  %v11833_v54 = vadd.f32 %v11589_v51, %v11605_v0  ;;  %v11837_v26 = vadd.f32 %v11589_v51, %v11609_v14  ;;  %v11841_v12 = vadd.f32 %v11589_v51, %v11613_v43 }
 0x757   :  { %v11845_v50 = vadd.f32 %v11589_v51, %v11617_v11  ;;  %v11849_v40 = vadd.f32 %v11589_v51, %v11625_v8  ;;  %v11853_v0 = vadd.f32 %v11589_v51, %v11629_v16  ;;  %v11857_v14 = vadd.f32 %v11589_v51, %v11633_v5 }
 0x758   :  { %v11861_v43 = vadd.f32 %v11589_v51, %v11637_v52  ;;  %v11865_v11 = vadd.f32 %v11589_v51, %v11641_v3  ;;  %v11869_v8 = vadd.f32 %v11589_v51, %v11645_v47  ;;  %v11873_v16 = vadd.f32 %v11589_v51, %v11649_v22  ;;  %v14344_v25 = vld [vmem:[#allocation130_spill] sm:$0xff]  ;;  %v14346_v18 = vld [vmem:[#allocation179_spill] sm:$0xff] }
 0x759   :  { %v11877_v5 = vadd.f32 %v11589_v51, %v11653_v63  ;;  %v11881_v52 = vadd.f32 %v11589_v51, %v11657_v42  ;;  %v11885_v3 = vadd.f32 %v11589_v51, %v11661_v20  ;;  %v11889_v47 = vadd.f32 %v11589_v51, %v11665_v62  ;;  %v14348_v1 = vld [vmem:[#allocation133_spill] sm:$0xff] }
 0x75a   :  { %v11893_v22 = vadd.f32 %v11589_v51, %v11669_v45  ;;  %v11897_v63 = vadd.f32 %v11589_v51, %v11673_v55  ;;  %v11901_v42 = vadd.f32 %v11589_v51, %v11677_v30  ;;  %v11905_v20 = vadd.f32 %v11589_v51, %v11681_v2  ;;  %v14350_v28 = vld [vmem:[#allocation181_spill] sm:$0xff]  ;;  %v14351_v36 = vld [vmem:[#allocation135_spill] sm:$0xff]  ;;  %v14352_v29 = vld [vmem:[#allocation136_spill] sm:$0xff] }
 0x75b   :  { %v11909_v62 = vadd.f32 %v11589_v51, %v11685_v6  ;;  %v11913_v45 = vadd.f32 %v11589_v51, %v11689_v56  ;;  %v11917_v55 = vadd.f32 %v11589_v51, %v11693_v21  ;;  %v11921_v30 = vadd.f32 %v11589_v51, %v11697_v17 }
 0x75c   :  { %v11925_v2 = vadd.f32 %v11589_v51, %v11701_v58  ;;  %v11929_v6 = vadd.f32 %v11589_v51, %v11705_v44  ;;  %v11933_v56 = vadd.f32 %v11589_v51, %v11709_v23  ;;  %v11937_v21 = vadd.f32 %v11589_v51, %v11713_v15 }
 0x75d   :  { %v11941_v17 = vadd.f32 %v11589_v51, %v11717_v19  ;;  %v11945_v58 = vadd.f32 %v11589_v51, %v11721_v31  ;;  %v11949_v44 = vadd.f32 %v11589_v51, %v11725_v33  ;;  %v11953_v23 = vadd.f32 %v11589_v51, %v11729_v61 }
 0x75e   :  { %14339 = vst [vmem:[#allocation139_spill] sm:$0xff] %v11925_v2  ;;  %v11957_v15 = vadd.f32 %v11589_v51, %v11733_v48  ;;  %v11961_v19 = vadd.f32 %v11589_v51, %v11737_v35  ;;  %v11965_v31 = vadd.f32 %v11589_v51, %v11741_v59  ;;  %v11969_v33 = vadd.f32 %v11589_v51, %v11745_v13 }
 0x75f   :  { %14340 = vst [vmem:[#allocation187_spill] sm:$0xff] %v11941_v17  ;;  %v11973_v61 = vadd.f32 %v11589_v51, %v11749_v57  ;;  %v11977_v48 = vadd.f32 %v11589_v51, %v11753_v60  ;;  %v11981_v35 = vadd.f32 %v11589_v51, %v11757_v39  ;;  %v11985_v59 = vadd.f32 %v11589_v51, %v14344_v25 }
 0x760   :  { %14341 = vst [vmem:[#allocation141_spill] sm:$0xff] %v11969_v33  ;;  %v11989_v13 = vadd.f32 %v11589_v51, %v14346_v18  ;;  %v11993_v57 = vadd.f32 %v11589_v51, %v14348_v1  ;;  %v11997_v60 = vadd.f32 %v11589_v51, %v14350_v28  ;;  %v12001_v39 = vadd.f32 %v11589_v51, %v14351_v36 }
 0x761   :  { %14342 = vst [vmem:[#allocation161_spill] sm:$0xff] %v11973_v61  ;;  %14343 = vst [vmem:[#allocation162_spill] sm:$0xff] %v11981_v35  ;;  %v12005_v25 = vadd.f32 %v11589_v51, %v14352_v29  ;;  %v12019_v28 = vadd.f32 %v11589_v51, %v5193_v49  ;;  %v12022_v36 = vadd.f32 %v11589_v51, %v5194_v41  ;;  %v12878_v49 = vmax.f32 %v11809_v27, 0.0 }
 0x762   :  { %14345 = vst [vmem:[#allocation163_spill] sm:$0xff] %v11985_v59  ;;  %14347 = vst [vmem:[#allocation173_spill] sm:$0xff] %v11989_v13  ;;  %v14354_v59 = vld [vmem:[#allocation137_spill] sm:$0xff]  ;;  %v12025_v29 = vadd.f32 %v11589_v51, %v5195_v9  ;;  %v12879_v41 = vmax.f32 %v11813_v34, 0.0  ;;  %v12881_v9 = vmax.f32 %v11821_v53, 0.0 }
 0x763   :  { %14349 = vst [vmem:[#allocation128_spill] sm:$0xff] %v11993_v57  ;;  %14353 = vst [vmem:[#allocation176_spill] sm:$0xff] %v12005_v25  ;;  %v12009_v18 = vadd.f32 %v11589_v51, %v14354_v59  ;;  %v14355_v13 = vld [vmem:[#allocation185_spill] sm:$0xff]  ;;  %v12016_v57 = vadd.f32 %v11589_v51, %v5192_v24  ;;  %v12028_v25 = vadd.f32 %v11589_v51, %v5196_v37  ;;  %v12882_v37 = vmax.f32 %v11825_v38, 0.0 }
 0x764   :  { %v12013_v1 = vadd.f32 %v11589_v51, %v14355_v13  ;;  %14357 = vst [vmem:[#allocation180_spill] sm:$0xff] %v12022_v36  ;;  %v12031_v59 = vadd.f32 %v11589_v51, %v5197_v10  ;;  %v12034_v13 = vadd.f32 %v11589_v51, %v5198_v4  ;;  %v12037_v24 = vadd.f32 %v11589_v51, %v5199_v32 }
 0x765   :  { %14356 = vst [vmem:[#allocation131_spill] sm:$0xff] %v12016_v57  ;;  %14358 = vst [vmem:[#allocation182_spill] sm:$0xff] %v12028_v25  ;;  %v12880_v36 = vmax.f32 %v11817_v7, 0.0  ;;  %v12883_v51 = vmax.f32 %v11845_v50, 0.0  ;;  %v12884_v32 = vmax.f32 %v11849_v40, 0.0  ;;  %v12886_v10 = vmax.f32 %v11873_v16, 0.0 }
 0x766   :  { %14359 = vst [vmem:[#allocation183_spill] sm:$0xff] %v12034_v13  ;;  %5338 = vst [vmem:[#allocation9] sm:$0xff] %v12878_v49  ;;  %v14360_v49 = vmax.f32 %v11829_v46, 0.0  ;;  %v14362_v25 = vmax.f32 %v11837_v26, 0.0  ;;  %v14364_v4 = vmax.f32 %v11853_v0, 0.0 }
 0x767   :  { %5339 = vst [vmem:[#allocation9 + $0x8] sm:$0xff] %v12879_v41  ;;  %5340 = vst [vmem:[#allocation9 + $0x10] sm:$0xff] %v12880_v36  ;;  %v14361_v41 = vmax.f32 %v11833_v54, 0.0  ;;  %v12885_v36 = vmax.f32 %v11869_v8, 0.0 }
 0x768   :  { %5341 = vst [vmem:[#allocation9 + $0x18] sm:$0xff] %v12881_v9  ;;  %5342 = vst [vmem:[#allocation9 + $0x20] sm:$0xff] %v12882_v37  ;;  %v14363_v9 = vmax.f32 %v11841_v12, 0.0  ;;  %v14403_v37 = vmax.f32 %v12013_v1, 0.0 }
 0x769   :  { %5343 = vst [vmem:[#allocation9 + $0x28] sm:$0xff] %v14360_v49  ;;  %5344 = vst [vmem:[#allocation9 + $0x30] sm:$0xff] %v14361_v41  ;;  %v12887_v49 = vmax.f32 %v11885_v3, 0.0  ;;  %v12889_v41 = vmax.f32 %v11905_v20, 0.0 }
 0x76a   :  { %5345 = vst [vmem:[#allocation9 + $0x38] sm:$0xff] %v14362_v25  ;;  %5346 = vst [vmem:[#allocation9 + $0x40] sm:$0xff] %v14363_v9  ;;  %v14365_v25 = vmax.f32 %v11857_v14, 0.0  ;;  %v14366_v9 = vmax.f32 %v11861_v43, 0.0 }
 0x76b   :  { %5347 = vst [vmem:[#allocation9 + $0x48] sm:$0xff] %v12883_v51  ;;  %5348 = vst [vmem:[#allocation9 + $0x50] sm:$0xff] %v12884_v32  ;;  %v14367_v51 = vmax.f32 %v11865_v11, 0.0  ;;  %v12888_v32 = vmax.f32 %v11901_v42, 0.0 }
 0x76c   :  { %5349 = vst [vmem:[#allocation9 + $0x58] sm:$0xff] %v14364_v4  ;;  %5350 = vst [vmem:[#allocation9 + $0x60] sm:$0xff] %v14365_v25  ;;  %v14368_v4 = vmax.f32 %v11877_v5, 0.0  ;;  %v14369_v25 = vmax.f32 %v11881_v52, 0.0 }
 0x76d   :  { %5351 = vst [vmem:[#allocation9 + $0x68] sm:$0xff] %v14366_v9  ;;  %5352 = vst [vmem:[#allocation9 + $0x70] sm:$0xff] %v14367_v51  ;;  %v12890_v51 = vmax.f32 %v11917_v55, 0.0  ;;  %v12893_v9 = vmax.f32 %v11937_v21, 0.0 }
 0x76e   :  { %5353 = vst [vmem:[#allocation9 + $0x78] sm:$0xff] %v12885_v36  ;;  %5354 = vst [vmem:[#allocation9 + $0x80] sm:$0xff] %v12886_v10  ;;  %v14370_v36 = vmax.f32 %v11889_v47, 0.0  ;;  %v14371_v10 = vmax.f32 %v11893_v22, 0.0 }
 0x76f   :  { %5355 = vst [vmem:[#allocation9 + $0x88] sm:$0xff] %v14368_v4  ;;  %5356 = vst [vmem:[#allocation9 + $0x90] sm:$0xff] %v14369_v25  ;;  %v14372_v4 = vmax.f32 %v11897_v63, 0.0  ;;  %v12892_v25 = vmax.f32 %v11933_v56, 0.0 }
 0x770   :  { %5357 = vst [vmem:[#allocation9 + $0x98] sm:$0xff] %v12887_v49  ;;  %5358 = vst [vmem:[#allocation9 + $0xa0] sm:$0xff] %v14370_v36  ;;  %v14373_v36 = vmax.f32 %v11909_v62, 0.0  ;;  %v14392_v49 = vld [vmem:[#allocation180_spill] sm:$0xff] }
 0x771   :  { %5359 = vst [vmem:[#allocation9 + $0xa8] sm:$0xff] %v14371_v10  ;;  %5360 = vst [vmem:[#allocation9 + $0xb0] sm:$0xff] %v14372_v4  ;;  %v14374_v10 = vmax.f32 %v11913_v45, 0.0  ;;  %v14382_v4 = vld [vmem:[#allocation128_spill] sm:$0xff] }
 0x772   :  { %5361 = vst [vmem:[#allocation9 + $0xb8] sm:$0xff] %v12888_v32  ;;  %5362 = vst [vmem:[#allocation9 + $0xc0] sm:$0xff] %v12889_v41  ;;  %v14375_v32 = vmax.f32 %v11921_v30, 0.0  ;;  %v14376_v41 = vmax.f32 %v11925_v2, 0.0  ;;  %v14383_v2 = vmax.f32 %v11949_v44, 0.0 }
 0x773   :  { %5363 = vst [vmem:[#allocation9 + $0xc8] sm:$0xff] %v14373_v36  ;;  %5364 = vst [vmem:[#allocation9 + $0xd0] sm:$0xff] %v14374_v10  ;;  %v14377_v36 = vmax.f32 %v11929_v6, 0.0  ;;  %v14381_v10 = vld [vmem:[#allocation173_spill] sm:$0xff] }
 0x774   :  { %5365 = vst [vmem:[#allocation9 + $0xd8] sm:$0xff] %v12890_v51  ;;  %5366 = vst [vmem:[#allocation9 + $0xe0] sm:$0xff] %v14375_v32  ;;  %v14378_v32 = vmax.f32 %v11941_v17, 0.0  ;;  %v14380_v51 = vld [vmem:[#allocation163_spill] sm:$0xff]  ;;  %v14388_v17 = vmax.f32 %v11965_v31, 0.0 }
 0x775   :  { %5367 = vst [vmem:[#allocation9 + $0xe8] sm:$0xff] %v14376_v41  ;;  %5368 = vst [vmem:[#allocation9 + $0xf0] sm:$0xff] %v14377_v36  ;;  %v14379_v41 = vmax.f32 %v11945_v58, 0.0  ;;  %v14387_v36 = vld [vmem:[#allocation176_spill] sm:$0xff] }
 0x776   :  { %5369 = vst [vmem:[#allocation9 + $0xf8] sm:$0xff] %v12892_v25  ;;  %5370 = vst [vmem:[#allocation9 + $0x100] sm:$0xff] %v12893_v9  ;;  %v14384_v25 = vmax.f32 %v11953_v23, 0.0  ;;  %v14385_v9 = vmax.f32 %v11957_v15, 0.0 }
 0x777   :  { %5371 = vst [vmem:[#allocation9 + $0x108] sm:$0xff] %v14378_v32  ;;  %5372 = vst [vmem:[#allocation9 + $0x110] sm:$0xff] %v14379_v41  ;;  %v14386_v32 = vmax.f32 %v11961_v19, 0.0  ;;  %v14405_v41 = vmax.f32 %v12019_v28, 0.0 }
 0x778   :  { %5373 = vst [vmem:[#allocation9 + $0x118] sm:$0xff] %v14383_v2  ;;  %5374 = vst [vmem:[#allocation9 + $0x120] sm:$0xff] %v14384_v25  ;;  %v14389_v2 = vmax.f32 %v11969_v33, 0.0  ;;  %v14390_v25 = vmax.f32 %v11973_v61, 0.0  ;;  %v14397_v61 = vld [vmem:[#allocation182_spill] sm:$0xff]  ;;  %v14398_v33 = vmov %v12034_v13  ;;  %v14404_v13 = vmax.f32 %v12016_v57, 0.0 }
 0x779   :  { %5375 = vst [vmem:[#allocation9 + $0x128] sm:$0xff] %v14385_v9  ;;  %5376 = vst [vmem:[#allocation9 + $0x130] sm:$0xff] %v14386_v32  ;;  %v14391_v9 = vmax.f32 %v11977_v48, 0.0 }
 0x77a   :  { %5377 = vst [vmem:[#allocation9 + $0x138] sm:$0xff] %v14388_v17  ;;  %5378 = vst [vmem:[#allocation9 + $0x140] sm:$0xff] %v14389_v2  ;;  %v14393_v17 = vmax.f32 %v11981_v35, 0.0  ;;  %v14394_v2 = vmax.f32 %v14380_v51, 0.0  ;;  %v14399_v35 = vmax.f32 %v11997_v60, 0.0 }
 0x77b   :  { %5379 = vst [vmem:[#allocation9 + $0x148] sm:$0xff] %v14390_v25  ;;  %5380 = vst [vmem:[#allocation9 + $0x150] sm:$0xff] %v14391_v9  ;;  %v14395_v25 = vmax.f32 %v14381_v10, 0.0  ;;  %v14396_v9 = vmax.f32 %v14382_v4, 0.0 }
 0x77c   :  { %5381 = vst [vmem:[#allocation9 + $0x158] sm:$0xff] %v14393_v17  ;;  %5382 = vst [vmem:[#allocation9 + $0x160] sm:$0xff] %v14394_v2  ;;  %v14400_v17 = vmax.f32 %v12001_v39, 0.0  ;;  %v14401_v2 = vmax.f32 %v14387_v36, 0.0 }
 0x77d   :  { %5383 = vst [vmem:[#allocation9 + $0x168] sm:$0xff] %v14395_v25  ;;  %5384 = vst [vmem:[#allocation9 + $0x170] sm:$0xff] %v14396_v9  ;;  %v14402_v25 = vmax.f32 %v12009_v18, 0.0  ;;  %v14410_v9 = vmax.f32 %v11813_v34, 0.0  ;;  %v14417_v34 = vmax.f32 %v11837_v26, 0.0  ;;  %v14425_v26 = vmax.f32 %v12037_v24, 0.0 }
 0x77e   :  { %5385 = vst [vmem:[#allocation9 + $0x178] sm:$0xff] %v14399_v35  ;;  %5386 = vst [vmem:[#allocation9 + $0x180] sm:$0xff] %v14400_v17  ;;  %v14406_v35 = vmax.f32 %v14392_v49, 0.0  ;;  %v14407_v17 = vmax.f32 %v11817_v7, 0.0  ;;  %v14414_v7 = vmax.f32 %v14397_v61, 0.0 }
 0x77f   :  { %5387 = vst [vmem:[#allocation9 + $0x188] sm:$0xff] %v14401_v2  ;;  %5388 = vst [vmem:[#allocation9 + $0x190] sm:$0xff] %v14402_v25  ;;  %v14408_v2 = vmax.f32 %v11809_v27, 0.0  ;;  %v14409_v25 = vmax.f32 %v11821_v53, 0.0  ;;  %v14415_v27 = vmax.f32 %v12031_v59, 0.0  ;;  %v14416_v53 = vmax.f32 %v14398_v33, 0.0 }
 0x780   :  { %5389 = vst [vmem:[#allocation9 + $0x198] sm:$0xff] %v14403_v37  ;;  %5390 = vst [vmem:[#allocation9 + $0x1a0] sm:$0xff] %v14404_v13  ;;  %v14411_v37 = vmax.f32 %v11833_v54, 0.0  ;;  %v14412_v13 = vmax.f32 %v11825_v38, 0.0  ;;  %v14418_v54 = vmax.f32 %v11829_v46, 0.0  ;;  %v14426_v46 = vmax.f32 %v11869_v8, 0.0 }
 0x781   :  { %5391 = vst [vmem:[#allocation9 + $0x1a8] sm:$0xff] %v14405_v41  ;;  %5392 = vst [vmem:[#allocation9 + $0x1b0] sm:$0xff] %v14406_v35  ;;  %v5402_v32 = vmax.f32 %v14408_v2, %v14407_v17  ;;  %v5403_v36 = vmax.f32 %v14410_v9, %v14409_v25  ;;  %v14413_v41 = vmax.f32 %v12025_v29, 0.0  ;;  %v14419_v9 = vmax.f32 %v11849_v40, 0.0 }
 0x782   :  { %v5404_v57 = vmax.f32 %v14412_v13, %v14411_v37  ;;  %5394 = vst [vmem:[#allocation9 + $0x1c0] sm:$0xff] %v14414_v7  ;;  %5395 = vst [vmem:[#allocation9 + $0x1c8] sm:$0xff] %v14415_v27  ;;  %v5405_v38 = vmax.f32 %v14418_v54, %v14417_v34  ;;  %v14420_v35 = vmax.f32 %v11841_v12, 0.0  ;;  %v14421_v2 = vmax.f32 %v11853_v0, 0.0 }
 0x783   :  { %5393 = vst [vmem:[#allocation9 + $0x1b8] sm:$0xff] %v14413_v41  ;;  %5396 = vst [vmem:[#allocation9 + $0x1d0] sm:$0xff] %v14416_v53  ;;  %v14422_v25 = vmax.f32 %v11845_v50, 0.0  ;;  %v14423_v13 = vmax.f32 %v11865_v11, 0.0  ;;  %v14424_v41 = vmax.f32 %v11857_v14, 0.0  ;;  %v14427_v40 = vmax.f32 %v11861_v43, 0.0 }
 0x784   :  { %v5406_v17 = vmax.f32 %v14420_v35, %v14419_v9  ;;  %5397 = vst [vmem:[#allocation9 + $0x1d8] sm:$0xff] %v14425_v26  ;;  %v14428_v27 = vmax.f32 %v11881_v52, 0.0  ;;  %v14429_v0 = vmax.f32 %v11873_v16, 0.0  ;;  %v14430_v11 = vmax.f32 %v11885_v3, 0.0  ;;  %5434 = vst [vmem:[#allocation2] sm:$0xff] %v5402_v32 }
 0x785   :  { %v5407_v37 = vmax.f32 %v14422_v25, %v14421_v2  ;;  %v5408_v7 = vmax.f32 %v14424_v41, %v14423_v13  ;;  %v5409_v12 = vmax.f32 %v14427_v40, %v14426_v46  ;;  %v14431_v14 = vmax.f32 %v11877_v5, 0.0  ;;  %5435 = vst [vmem:[#allocation2 + $0x8] sm:$0xff] %v5403_v36  ;;  %5436 = vst [vmem:[#allocation2 + $0x10] sm:$0xff] %v5404_v57 }
 0x786   :  { %v5410_v50 = vmax.f32 %v14429_v0, %v14428_v27  ;;  %v14432_v34 = vmax.f32 %v11897_v63, 0.0  ;;  %v14433_v8 = vmax.f32 %v11889_v47, 0.0  ;;  %v14434_v43 = vmax.f32 %v11901_v42, 0.0  ;;  %5437 = vst [vmem:[#allocation2 + $0x18] sm:$0xff] %v5405_v38  ;;  %5438 = vst [vmem:[#allocation2 + $0x20] sm:$0xff] %v5406_v17 }
 0x787   :  { %v5411_v53 = vmax.f32 %v14431_v14, %v14430_v11  ;;  %v14435_v16 = vmax.f32 %v11893_v22, 0.0  ;;  %v14436_v9 = vmax.f32 %v11913_v45, 0.0  ;;  %v14437_v3 = vmax.f32 %v11905_v20, 0.0  ;;  %5439 = vst [vmem:[#allocation2 + $0x28] sm:$0xff] %v5407_v37  ;;  %5440 = vst [vmem:[#allocation2 + $0x30] sm:$0xff] %v5408_v7 }
 0x788   :  { %v5412_v54 = vmax.f32 %v14433_v8, %v14432_v34  ;;  %v14438_v35 = vmax.f32 %v11917_v55, 0.0  ;;  %v14439_v63 = vmax.f32 %v11909_v62, 0.0  ;;  %v14440_v47 = vmax.f32 %v11929_v6, 0.0 }
 0x789   :  { %v5413_v52 = vmax.f32 %v14435_v16, %v14434_v43  ;;  %v5414_v5 = vmax.f32 %v14437_v3, %v14436_v9  ;;  %v14441_v36 = vmax.f32 %v11921_v30, 0.0 }
 0x78a   :  { %v5415_v2 = vmax.f32 %v14439_v63, %v14438_v35 }
 0x78b   :  { %v5416_v57 = vmax.f32 %v14441_v36, %v14440_v47 }
 0x78c   :  { %6628 = shalt.err (!%p6625_p0)
}
 0x78d   :  { %s6629_s27 = scalar_lea.hbm %s12386_s7, 8192 }
 0x78e   :  { %p6630_p1 = scmp.ne.s32.totalorder %s12386_s7, %s6629_s27  ;;  %p6633_p2 = scmp.lt.u32.totalorder %s6629_s27, %s12386_s7 }
 0x790   :  { %p6635_p3 = pnand %p6633_p2, %p6630_p1 }
 0x792   :  { %6638 = shalt.err (!%p6635_p3)
}
 0x793   :  { %s6676_s10 = smov 128   ;;  %s6677_s11 = smov 8   ;;  %v14442_v22 = vmax.f32 %v11933_v56, 0.0  ;;  %v14443_v42 = vld [vmem:[#allocation139_spill] sm:$0xff]  ;;  %v14445_v45 = vmax.f32 %v11945_v58, 0.0  ;;  %v14446_v55 = vmax.f32 %v11937_v21, 0.0 }
 0x794   :  { %5572 = dma.vmem_to_hbm [thread:$0]  %s12221_s6, 8192, %s12386_s7, [#allocation5], %s6676_s10, %s6676_s10, %s6677_s11   ;;  %v14444_v20 = vmax.f32 %v14443_v42, 0.0  ;;  %v14447_v6 = vmax.f32 %v11949_v44, 0.0  ;;  %v14448_v32 = vld [vmem:[#allocation187_spill] sm:$0xff]  ;;  %v14450_v25 = vmax.f32 %v11961_v19, 0.0 }
 0x795   :  { %v5418_v30 = vmax.f32 %v14446_v55, %v14445_v45  ;;  %v14449_v38 = vmax.f32 %v14448_v32, 0.0  ;;  %v14451_v37 = vmax.f32 %v11953_v23, 0.0  ;;  %5441 = vst [vmem:[#allocation2 + $0x38] sm:$0xff] %v5409_v12  ;;  %5442 = vst [vmem:[#allocation2 + $0x40] sm:$0xff] %v5410_v50  ;;  %v14452_v56 = vmax.f32 %v11965_v31, 0.0  ;;  %v14455_v44 = vld [vmem:[#allocation141_spill] sm:$0xff] }
 0x796   :  { %v5417_v62 = vmax.f32 %v14444_v20, %v14442_v22  ;;  %5443 = vst [vmem:[#allocation2 + $0x48] sm:$0xff] %v5411_v53  ;;  %5444 = vst [vmem:[#allocation2 + $0x50] sm:$0xff] %v5412_v54  ;;  %v14453_v58 = vmax.f32 %v11957_v15, 0.0  ;;  %v14454_v41 = vmax.f32 %v11977_v48, 0.0  ;;  %v14456_v7 = vmax.f32 %v14455_v44, 0.0  ;;  %v14457_v46 = vld [vmem:[#allocation162_spill] sm:$0xff] }
 0x797   :  { %v5419_v17 = vmax.f32 %v14449_v38, %v14447_v6  ;;  %v5420_v13 = vmax.f32 %v14451_v37, %v14450_v25  ;;  %v14458_v40 = vmax.f32 %v14457_v46, 0.0  ;;  %v14459_v19 = vld [vmem:[#allocation161_spill] sm:$0xff]  ;;  %v14461_v12 = vmax.f32 %v14382_v4, 0.0  ;;  %5445 = vst [vmem:[#allocation2 + $0x58] sm:$0xff] %v5413_v52  ;;  %5446 = vst [vmem:[#allocation2 + $0x60] sm:$0xff] %v5414_v5  ;;  %v14468_v4 = vld [vmem:[#allocation176_spill] sm:$0xff] }
 0x798   :  { %v5421_v21 = vmax.f32 %v14453_v58, %v14452_v56  ;;  %v5422_v26 = vmax.f32 %v14456_v7, %v14454_v41  ;;  %v14460_v27 = vmax.f32 %v14459_v19, 0.0  ;;  %v14462_v0 = vmax.f32 %v14380_v51, 0.0  ;;  %5447 = vst [vmem:[#allocation2 + $0x68] sm:$0xff] %v5415_v2  ;;  %5448 = vst [vmem:[#allocation2 + $0x70] sm:$0xff] %v5416_v57  ;;  %v14471_v43 = vld [vmem:[#allocation131_spill] sm:$0xff]  ;;  %s6678_s7 = smov [#allocation10]  }
 0x799   :  { %v14463_v15 = vmax.f32 %v11997_v60, 0.0  ;;  %v14464_v31 = vmax.f32 %v14381_v10, 0.0  ;;  %v14465_v11 = vmax.f32 %v12009_v18, 0.0  ;;  %v14466_v14 = vmax.f32 %v12001_v39, 0.0  ;;  %5449 = vst [vmem:[#allocation2 + $0x78] sm:$0xff] %v5417_v62  ;;  %5450 = vst [vmem:[#allocation2 + $0x80] sm:$0xff] %v5418_v30 }
 0x79a   :  { %v5423_v23 = vmax.f32 %v14460_v27, %v14458_v40  ;;  %v5424_v50 = vmax.f32 %v14462_v0, %v14461_v12  ;;  %v14467_v34 = vmax.f32 %v12013_v1, 0.0  ;;  %v14469_v8 = vmax.f32 %v14468_v4, 0.0  ;;  %5451 = vst [vmem:[#allocation2 + $0x88] sm:$0xff] %v5419_v17  ;;  %5452 = vst [vmem:[#allocation2 + $0x90] sm:$0xff] %v5420_v13  ;;  %s12361_s14 = sshll.u32 %s6678_s7, 4  ;;  %s5579_s14 = int_to_ptr.vmem [resolvable:$true] %s12361_s14 }
 0x79b   :  { %v5425_v48 = vmax.f32 %v14464_v31, %v14463_v15  ;;  %v5426_v53 = vmax.f32 %v14466_v14, %v14465_v11  ;;  %v14470_v54 = vmax.f32 %v14392_v49, 0.0  ;;  %v14472_v16 = vmax.f32 %v14471_v43, 0.0  ;;  %5453 = vst [vmem:[#allocation2 + $0x98] sm:$0xff] %v5421_v21  ;;  %5454 = vst [vmem:[#allocation2 + $0xa0] sm:$0xff] %v5422_v26  ;;  %v5502_v2 = vld [vmem:[#allocation2 + $0x21] ss:$2 sm:$0xff]  ;;  %p6644_p5 = scmp.lt.s32.totalorder %s5579_s14, %s5579_s14 }
 0x79c   :  { %v5427_v51 = vmax.f32 %v14469_v8, %v14467_v34  ;;  %v14473_v60 = vmax.f32 %v12025_v29, 0.0  ;;  %v14474_v18 = vmax.f32 %v12019_v28, 0.0  ;;  %v14475_v10 = vmax.f32 %v14398_v33, 0.0  ;;  %5455 = vst [vmem:[#allocation2 + $0xa8] sm:$0xff] %v5423_v23  ;;  %5456 = vst [vmem:[#allocation2 + $0xb0] sm:$0xff] %v5424_v50  ;;  %s6639_s15 = scalar_lea.vmem %s5579_s14, 2048 }
 0x79d   :  { %v5428_v52 = vmax.f32 %v14472_v16, %v14470_v54  ;;  %v14476_v1 = vmax.f32 %v14397_v61, 0.0  ;;  %v14477_v3 = vmax.f32 %v12037_v24, 0.0  ;;  %v14478_v49 = vmax.f32 %v12031_v59, 0.0  ;;  %5457 = vst [vmem:[#allocation2 + $0xb8] sm:$0xff] %v5425_v48  ;;  %5458 = vst [vmem:[#allocation2 + $0xc0] sm:$0xff] %v5426_v53  ;;  %p6640_p4 = scmp.ne.s32.totalorder %s5579_s14, %s6639_s15  ;;  %p6645_p6 = scmp.lt.s32.totalorder %s6639_s15, %s6639_s15 }
 0x79e   :  { %v5429_v39 = vmax.f32 %v14474_v18, %v14473_v60  ;;  %5459 = vst [vmem:[#allocation2 + $0xc8] sm:$0xff] %v5427_v51  ;;  %v5466_v33 = vld [vmem:[#allocation2] ss:$2 sm:$0xff]  ;;  %v5498_v28 = vld [vmem:[#allocation2 + $0x1] ss:$2 sm:$0xff] }
 0x79f   :  { %v5430_v9 = vmax.f32 %v14476_v1, %v14475_v10  ;;  %v5431_v5 = vmax.f32 %v14478_v49, %v14477_v3  ;;  %5460 = vst [vmem:[#allocation2 + $0xd0] sm:$0xff] %v5428_v52  ;;  %v5468_v61 = vld [vmem:[#allocation2 + $0x10] ss:$2 sm:$0xff]  ;;  %v5470_v29 = vld [vmem:[#allocation2 + $0x20] ss:$2 sm:$0xff]  ;;  %v5529_v24 = vmax.f32 %v5466_v33, %v5498_v28  ;;  %p6646_p7 = por %p6645_p6, %p6644_p5 }
 0x7a0   :  { %5461 = vst [vmem:[#allocation2 + $0xd8] sm:$0xff] %v5429_v39  ;;  %v5500_v59 = vld [vmem:[#allocation2 + $0x11] ss:$2 sm:$0xff]  ;;  %v5472_v35 = vld [vmem:[#allocation2 + $0x30] ss:$2 sm:$0xff]  ;;  %v5531_v42 = vmax.f32 %v5470_v29, %v5502_v2 }
 0x7a1   :  { %5462 = vst [vmem:[#allocation2 + $0xe0] sm:$0xff] %v5430_v9  ;;  %5463 = vst [vmem:[#allocation2 + $0xe8] sm:$0xff] %v5431_v5  ;;  %v5474_v63 = vld [vmem:[#allocation2 + $0x40] ss:$2 sm:$0xff]  ;;  %v5530_v47 = vmax.f32 %v5468_v61, %v5500_v59  ;;  %v5476_v36 = vld [vmem:[#allocation2 + $0x50] ss:$2 sm:$0xff]  ;;  %p6647_p8 = pnand %p6646_p7, %p6640_p4 }
 0x7a2   :  { %v5478_v57 = vld [vmem:[#allocation2 + $0x60] ss:$2 sm:$0xff]  ;;  %v5504_v22 = vld [vmem:[#allocation2 + $0x31] ss:$2 sm:$0xff]  ;;  %5545 = vst [vmem:[#allocation10] sm:$0xff] %v5529_v24  ;;  %5547 = vst [vmem:[#allocation10 + $0x10] sm:$0xff] %v5531_v42 }
 0x7a3   :  { %v5480_v20 = vld [vmem:[#allocation2 + $0x70] ss:$2 sm:$0xff]  ;;  %v5482_v62 = vld [vmem:[#allocation2 + $0x80] ss:$2 sm:$0xff]  ;;  %v5506_v45 = vld [vmem:[#allocation2 + $0x41] ss:$2 sm:$0xff]  ;;  %v5532_v55 = vmax.f32 %v5472_v35, %v5504_v22 }
 0x7a4   :  { %5546 = vst [vmem:[#allocation10 + $0x8] sm:$0xff] %v5530_v47  ;;  %v5484_v30 = vld [vmem:[#allocation2 + $0x90] ss:$2 sm:$0xff]  ;;  %v5486_v6 = vld [vmem:[#allocation2 + $0xa0] ss:$2 sm:$0xff]  ;;  %v5533_v38 = vmax.f32 %v5474_v63, %v5506_v45 }
 0x7a5   :  { %v5508_v32 = vld [vmem:[#allocation2 + $0x51] ss:$2 sm:$0xff]  ;;  %v5488_v17 = vld [vmem:[#allocation2 + $0xb0] ss:$2 sm:$0xff]  ;;  %v5490_v25 = vld [vmem:[#allocation2 + $0xc0] ss:$2 sm:$0xff] }
 0x7a6   :  { %v5510_v37 = vld [vmem:[#allocation2 + $0x61] ss:$2 sm:$0xff]  ;;  %v5534_v13 = vmax.f32 %v5476_v36, %v5508_v32  ;;  %5548 = vst [vmem:[#allocation10 + $0x18] sm:$0xff] %v5532_v55  ;;  %v5512_v21 = vld [vmem:[#allocation2 + $0x71] ss:$2 sm:$0xff]  ;;  %5549 = vst [vmem:[#allocation10 + $0x20] sm:$0xff] %v5533_v38 }
 0x7a7   :  { %v5492_v56 = vld [vmem:[#allocation2 + $0xd0] ss:$2 sm:$0xff]  ;;  %v5535_v41 = vmax.f32 %v5478_v57, %v5510_v37  ;;  %v5514_v44 = vld [vmem:[#allocation2 + $0x81] ss:$2 sm:$0xff]  ;;  %v5516_v7 = vld [vmem:[#allocation2 + $0x91] ss:$2 sm:$0xff]  ;;  %v5536_v46 = vmax.f32 %v5480_v20, %v5512_v21 }
 0x7a8   :  { %v5494_v58 = vld [vmem:[#allocation2 + $0xe0] ss:$2 sm:$0xff]  ;;  %v5518_v26 = vld [vmem:[#allocation2 + $0xa1] ss:$2 sm:$0xff]  ;;  %5550 = vst [vmem:[#allocation10 + $0x28] sm:$0xff] %v5534_v13  ;;  %v5537_v23 = vmax.f32 %v5482_v62, %v5514_v44  ;;  %v5538_v12 = vmax.f32 %v5484_v30, %v5516_v7 }
 0x7a9   :  { %v5520_v40 = vld [vmem:[#allocation2 + $0xb1] ss:$2 sm:$0xff]  ;;  %v5522_v19 = vld [vmem:[#allocation2 + $0xc1] ss:$2 sm:$0xff]  ;;  %v5539_v0 = vmax.f32 %v5486_v6, %v5518_v26  ;;  %5551 = vst [vmem:[#allocation10 + $0x30] sm:$0xff] %v5535_v41  ;;  %5552 = vst [vmem:[#allocation10 + $0x38] sm:$0xff] %v5536_v46 }
 0x7aa   :  { %v5524_v27 = vld [vmem:[#allocation2 + $0xd1] ss:$2 sm:$0xff]  ;;  %v5526_v50 = vld [vmem:[#allocation2 + $0xe1] ss:$2 sm:$0xff]  ;;  %v5540_v15 = vmax.f32 %v5488_v17, %v5520_v40  ;;  %v5541_v31 = vmax.f32 %v5490_v25, %v5522_v19  ;;  %5553 = vst [vmem:[#allocation10 + $0x40] sm:$0xff] %v5537_v23  ;;  %5554 = vst [vmem:[#allocation10 + $0x48] sm:$0xff] %v5538_v12 }
 0x7ab   :  { %v5542_v48 = vmax.f32 %v5492_v56, %v5524_v27  ;;  %v5543_v11 = vmax.f32 %v5494_v58, %v5526_v50  ;;  %5555 = vst [vmem:[#allocation10 + $0x50] sm:$0xff] %v5539_v0 }
 0x7ac   :  { %5556 = vst [vmem:[#allocation10 + $0x58] sm:$0xff] %v5540_v15  ;;  %5557 = vst [vmem:[#allocation10 + $0x60] sm:$0xff] %v5541_v31 }
 0x7ad   :  { %5558 = vst [vmem:[#allocation10 + $0x68] sm:$0xff] %v5542_v48  ;;  %5559 = vst [vmem:[#allocation10 + $0x70] sm:$0xff] %v5543_v11 }
 0x7ae   :  { %6650 = shalt.err (!%p6647_p8)
}
 0x7af   :  { %s6651_s20 = scalar_lea.hbm %s12387_s8, 2048 }
 0x7b0   :  { %p6652_p9 = scmp.ne.s32.totalorder %s12387_s8, %s6651_s20  ;;  %p6655_p10 = scmp.lt.u32.totalorder %s6651_s20, %s12387_s8 }
 0x7b2   :  { %p6657_p11 = pnand %p6655_p10, %p6652_p9 }
 0x7b4   :  { %6660 = shalt.err (!%p6657_p11)
}
 0x7b5   :  { %5584 = dma.vmem_to_hbm [thread:$0]  %s5579_s14, 2048, %s12387_s8, [#allocation11], %s6676_s10, %s6676_s10, %s6677_s11  }
 0x7b6   :  { %6665 = dma.done.wait [#allocation5], 8192  }
 0x7b7   :  { %6666 = vsyncadd [#allocation5], 4294959104 }
 0x7b8   :  { %6667 = dma.done.wait [#allocation11], 2048  }
 0x7b9   :  { %6668 = vsyncadd [#allocation11], 4294965248 }
 0x7ba   :  { %5591 = vsyncpa [#allocation4], 1 }
 0x7bb   :  { %5592 = vsyncpa [#allocation7], 1 }
 0x7bc   :  { %5593 = vsyncpa [#allocation5], 1 }
 0x7bd   :  { %5594 = vsyncpa [#allocation11], 1 }

</bundles_post_ra>
